<compile_context>
chip_gen: v5e
topology: v5e:2x2
jax: 0.10.0
libtpu: 0.0.40
codegen_flags: <defaults>
</compile_context>

<pallas_src>
import jax
import jax.numpy as jnp
from jax.experimental import pallas as pl
from jax.experimental.pallas import tpu as pltpu

# ---- model dimensions (module hard-codes 2048 / SEMANTIC_EMBED=512) ----
Y_DIM = 32            # opt.y_dim (small, chosen for the demo)
HID = 2048            # gconv1/gconv2 width (fixed by the module)
SEMANTIC_EMBED = 512  # gconv3 output / hash & label input (fixed by the module)
BIT = 32              # opt.bit
LABEL_DIM = 16        # opt.label_dim
HEAD_PAD = 128        # fused (hash ++ label) head, padded to a lane-dense width
ALPHA = 1.0
BN_EPS = 1e-5
KT = 4                # K-chunks of the gconv2 weight streamed through the grid
TK = HID // KT        # 512 rows per chunk -> 2 MiB bf16 per chunk (double-buffered)


def _batchnorm_relu(h, gamma, beta):
    """One-pass training-mode BatchNorm1d (biased batch variance) + ReLU."""
    m = jnp.mean(h, axis=0, keepdims=True)
    ms = jnp.mean(h * h, axis=0, keepdims=True)
    var = jnp.maximum(ms - m * m, 0.0)
    h = (h - m) * jax.lax.rsqrt(var + BN_EPS) * gamma + beta
    return jnp.maximum(h, 0.0)


def textnet_kernel(x_ref, ain_ref, aout_ref,
                   w1_ref, b1_ref, g1_ref, be1_ref,
                   w2_ref, b2_ref, g2_ref, be2_ref,
                   w3_ref, b3_ref, wh_ref, bh_ref,
                   out_ref, heads_ref,
                   h1_scr, acc_scr):
    k = pl.program_id(0)

    # ---- first grid step: gconv1 + in_affnty.mm + BN1 + ReLU ----
    @pl.when(k == 0)
    def _():
        h = jnp.dot(x_ref[...], w1_ref[...],
                    preferred_element_type=jnp.float32) + b1_ref[...]
        h = jnp.dot(ain_ref[...], h, preferred_element_type=jnp.float32)
        h = _batchnorm_relu(h, g1_ref[...], be1_ref[...])
        hb = h.astype(jnp.bfloat16)
        for j in range(KT):                     # static K-chunking of gconv1 output
            h1_scr[j] = hb[:, j * TK:(j + 1) * TK]
        acc_scr[...] = jnp.zeros_like(acc_scr)

    # ---- gconv2: accumulate one K-chunk of the (2048, 2048) weight ----
    acc_scr[...] += jnp.dot(h1_scr[k], w2_ref[...],
                            preferred_element_type=jnp.float32)

    # ---- last grid step: out_affnty.mm + BN2/ReLU + gconv3 + fused heads ----
    @pl.when(k == pl.num_programs(0) - 1)
    def _():
        h = acc_scr[...] + b2_ref[...]
        h = jnp.dot(aout_ref[...], h, preferred_element_type=jnp.float32)
        h = _batchnorm_relu(h, g2_ref[...], be2_ref[...])

        o = jnp.dot(h.astype(jnp.bfloat16), w3_ref[...],
                    preferred_element_type=jnp.float32) + b3_ref[...]
        o = jnp.tanh(ALPHA * o)
        out_ref[...] = o

        # fused hash/label heads: single lane-dense (512, 128) matmul + store
        heads = jnp.dot(o.astype(jnp.bfloat16), wh_ref[...],
                        preferred_element_type=jnp.float32) + bh_ref[...]
        lane = jax.lax.broadcasted_iota(jnp.int32, heads.shape, 1)
        heads_ref[...] = jnp.where(lane < BIT,
                                   jnp.tanh(heads),
                                   jax.nn.sigmoid(heads))


def init_params(key):
    """Module-style f32 parameters (normal std=0.01 weights/biases, BN gamma=1, beta=0)."""
    ks = jax.random.split(key, 10)
    std = 0.01
    return {
        "w1": jax.random.normal(ks[0], (Y_DIM, HID), jnp.float32) * std,
        "b1": jax.random.normal(ks[1], (HID,), jnp.float32) * std,
        "w2": jax.random.normal(ks[2], (HID, HID), jnp.float32) * std,
        "b2": jax.random.normal(ks[3], (HID,), jnp.float32) * std,
        "w3": jax.random.normal(ks[4], (HID, SEMANTIC_EMBED), jnp.float32) * std,
        "b3": jax.random.normal(ks[5], (SEMANTIC_EMBED,), jnp.float32) * std,
        "wh": jax.random.normal(ks[6], (SEMANTIC_EMBED, BIT), jnp.float32) * std,
        "bh": jax.random.normal(ks[7], (BIT,), jnp.float32) * std,
        "wl": jax.random.normal(ks[8], (SEMANTIC_EMBED, LABEL_DIM), jnp.float32) * std,
        "bl": jax.random.normal(ks[9], (LABEL_DIM,), jnp.float32) * std,
        "g1": jnp.ones((HID,), jnp.float32), "be1": jnp.zeros((HID,), jnp.float32),
        "g2": jnp.ones((HID,), jnp.float32), "be2": jnp.zeros((HID,), jnp.float32),
    }


def prepare_params(p):
    """One-time conversion to kernel-ready layout: bf16 storage for the large
    weights (halves HBM weight DMA), fused + 128-lane-padded hash/label head,
    (1, F)-shaped biases/affine params."""
    wheads = jnp.zeros((SEMANTIC_EMBED, HEAD_PAD), jnp.float32)
    wheads = wheads.at[:, :BIT].set(p["wh"])
    wheads = wheads.at[:, BIT:BIT + LABEL_DIM].set(p["wl"])
    bheads = jnp.zeros((HEAD_PAD,), jnp.float32)
    bheads = bheads.at[:BIT].set(p["bh"])
    bheads = bheads.at[BIT:BIT + LABEL_DIM].set(p["bl"])
    r = lambda v: v.reshape(1, -1)
    return {
        "w1": p["w1"],                        # small (256 KiB), keep f32
        "b1": r(p["b1"]), "g1": r(p["g1"]), "be1": r(p["be1"]),
        "w2": p["w2"].astype(jnp.bfloat16),   # 2048x2048: bf16 halves the dominant DMA
        "b2": r(p["b2"]), "g2": r(p["g2"]), "be2": r(p["be2"]),
        "w3": p["w3"].astype(jnp.bfloat16),
        "b3": r(p["b3"]),
        "wheads": wheads.astype(jnp.bfloat16),
        "bheads": r(bheads),
    }


@jax.jit
def textnet_forward(inputs, in_affnty, out_affnty, params):
    # glue: torch.squeeze(inputs) — but never squeeze the batch axis (N==1 safe)
    sq_axes = tuple(i for i in range(1, inputs.ndim) if inputs.shape[i] == 1)
    x = jnp.squeeze(inputs, axis=sq_axes) if sq_axes else inputs
    n = x.shape[0]

    args = (x, in_affnty, out_affnty,
            params["w1"], params["b1"], params["g1"], params["be1"],
            params["w2"], params["b2"], params["g2"], params["be2"],
            params["w3"], params["b3"], params["wheads"], params["bheads"])

    const2d = lambda shape: pl.BlockSpec(shape, lambda k: (0, 0))
    in_specs = [
        const2d((n, Y_DIM)),                                  # x
        const2d((n, n)),                                      # in_affnty
        const2d((n, n)),                                      # out_affnty
        const2d((Y_DIM, HID)), const2d((1, HID)),             # w1, b1
        const2d((1, HID)), const2d((1, HID)),                 # g1, be1
        pl.BlockSpec((TK, HID), lambda k: (k, 0)),            # w2: K-chunk streamed
        const2d((1, HID)), const2d((1, HID)), const2d((1, HID)),  # b2, g2, be2
        const2d((HID, SEMANTIC_EMBED)), const2d((1, SEMANTIC_EMBED)),  # w3, b3
        const2d((SEMANTIC_EMBED, HEAD_PAD)), const2d((1, HEAD_PAD)),   # fused heads
    ]
    out_specs = (
        pl.BlockSpec((n, SEMANTIC_EMBED), lambda k: (0, 0)),
        pl.BlockSpec((n, HEAD_PAD), lambda k: (0, 0)),
    )

    out, heads = pl.pallas_call(
        textnet_kernel,
        out_shape=(
            jax.ShapeDtypeStruct((n, SEMANTIC_EMBED), jnp.float32),
            jax.ShapeDtypeStruct((n, HEAD_PAD), jnp.float32),
        ),
        grid_spec=pltpu.PrefetchScalarGridSpec(
            num_scalar_prefetch=0,
            grid=(KT,),
            in_specs=in_specs,
            out_specs=out_specs,
            scratch_shapes=[
                pltpu.VMEM((KT, n, TK), jnp.bfloat16),   # gconv1 output, K-chunked
                pltpu.VMEM((n, HID), jnp.float32),       # gconv2 accumulator
            ]),
        compiler_params=pltpu.CompilerParams(
            dimension_semantics=("arbitrary",),          # sequential reduction over K
            vmem_limit_bytes=32 * 1024 * 1024),          # fits v7x (64 MiB) with room
    )(*args)

    hash_gcn = heads[:, :BIT]
    label = heads[:, BIT:BIT + LABEL_DIM]

    # glue: torch.squeeze on the outputs (no-op for these shapes)
    return jnp.squeeze(out), jnp.squeeze(hash_gcn), jnp.squeeze(label)


if __name__ == "__main__":
    key = jax.random.PRNGKey(0)
    k_in, k_a1, k_a2, k_p = jax.random.split(key, 4)

    N = 8
    inputs = jax.random.normal(k_in, (N, 1, Y_DIM), jnp.float32)   # squeezed to (N, Y_DIM)
    in_affnty = jax.random.normal(k_a1, (N, N), jnp.float32) * 0.1
    out_affnty = jax.random.normal(k_a2, (N, N), jnp.float32) * 0.1
    params = prepare_params(init_params(k_p))

    out, hash_gcn, label = textnet_forward(inputs, in_affnty, out_affnty, params)
    jax.block_until_ready((out, hash_gcn, label))

    assert out.shape == (N, SEMANTIC_EMBED)
    assert hash_gcn.shape == (N, BIT)
    assert label.shape == (N, LABEL_DIM)
    assert bool(jnp.all(jnp.isfinite(out)))
    assert bool(jnp.all(jnp.isfinite(hash_gcn)))
    assert bool(jnp.all(jnp.isfinite(label)))
    print("KERNEL_OK")
</pallas_src>

<mosaic_0001>
module attributes {stable_mosaic.version = 11 : i64} {
  func.func @textnet_kernel(%arg0: i32, %arg1: memref<8x32xf32, #tpu.memory_space<vmem>>, %arg2: memref<8x8xf32, #tpu.memory_space<vmem>>, %arg3: memref<8x8xf32, #tpu.memory_space<vmem>>, %arg4: memref<32x2048xf32, #tpu.memory_space<vmem>>, %arg5: memref<1x2048xf32, #tpu.memory_space<vmem>>, %arg6: memref<1x2048xf32, #tpu.memory_space<vmem>>, %arg7: memref<1x2048xf32, #tpu.memory_space<vmem>>, %arg8: memref<512x2048xbf16, #tpu.memory_space<vmem>>, %arg9: memref<1x2048xf32, #tpu.memory_space<vmem>>, %arg10: memref<1x2048xf32, #tpu.memory_space<vmem>>, %arg11: memref<1x2048xf32, #tpu.memory_space<vmem>>, %arg12: memref<2048x512xbf16, #tpu.memory_space<vmem>>, %arg13: memref<1x512xf32, #tpu.memory_space<vmem>>, %arg14: memref<512x128xbf16, #tpu.memory_space<vmem>>, %arg15: memref<1x128xf32, #tpu.memory_space<vmem>>, %arg16: memref<8x512xf32, #tpu.memory_space<vmem>>, %arg17: memref<8x128xf32, #tpu.memory_space<vmem>>, %arg18: memref<4x8x512xbf16, #tpu.memory_space<vmem>>, %arg19: memref<8x2048xf32, #tpu.memory_space<vmem>>) attributes {dimension_semantics = [#tpu.dimension_semantics<arbitrary>], iteration_bounds = array<i64: 4>, scalar_prefetch = 0 : i64, scratch_operands = 2 : i64, tpu.core_type = #tpu.core_type<tc>, window_params = [{pipeline_mode = #tpu.pipeline_mode<synchronous>, transform_indices = @transform_0, window_bounds = array<i64: 8, 32>}, {pipeline_mode = #tpu.pipeline_mode<synchronous>, transform_indices = @transform_1, window_bounds = array<i64: 8, 8>}, {pipeline_mode = #tpu.pipeline_mode<synchronous>, transform_indices = @transform_2, window_bounds = array<i64: 8, 8>}, {pipeline_mode = #tpu.pipeline_mode<synchronous>, transform_indices = @transform_3, window_bounds = array<i64: 32, 2048>}, {pipeline_mode = #tpu.pipeline_mode<synchronous>, transform_indices = @transform_4, window_bounds = array<i64: 1, 2048>}, {pipeline_mode = #tpu.pipeline_mode<synchronous>, transform_indices = @transform_5, window_bounds = array<i64: 1, 2048>}, {pipeline_mode = #tpu.pipeline_mode<synchronous>, transform_indices = @transform_6, window_bounds = array<i64: 1, 2048>}, {transform_indices = @transform_7, window_bounds = array<i64: 512, 2048>}, {pipeline_mode = #tpu.pipeline_mode<synchronous>, transform_indices = @transform_8, window_bounds = array<i64: 1, 2048>}, {pipeline_mode = #tpu.pipeline_mode<synchronous>, transform_indices = @transform_9, window_bounds = array<i64: 1, 2048>}, {pipeline_mode = #tpu.pipeline_mode<synchronous>, transform_indices = @transform_10, window_bounds = array<i64: 1, 2048>}, {pipeline_mode = #tpu.pipeline_mode<synchronous>, transform_indices = @transform_11, window_bounds = array<i64: 2048, 512>}, {pipeline_mode = #tpu.pipeline_mode<synchronous>, transform_indices = @transform_12, window_bounds = array<i64: 1, 512>}, {pipeline_mode = #tpu.pipeline_mode<synchronous>, transform_indices = @transform_13, window_bounds = array<i64: 512, 128>}, {pipeline_mode = #tpu.pipeline_mode<synchronous>, transform_indices = @transform_14, window_bounds = array<i64: 1, 128>}, {pipeline_mode = #tpu.pipeline_mode<synchronous>, transform_indices = @transform_15, window_bounds = array<i64: 8, 512>}, {pipeline_mode = #tpu.pipeline_mode<synchronous>, transform_indices = @transform_16, window_bounds = array<i64: 8, 128>}]} {
    %c0_i32 = arith.constant 0 : i32
    %0 = arith.cmpi eq, %arg0, %c0_i32 : i32
    %1 = arith.extui %0 : i1 to i32
    %c0_i32_0 = arith.constant 0 : i32
    %2 = arith.cmpi ne, %1, %c0_i32_0 : i32
    scf.if %2 {
      %c0_9 = arith.constant 0 : index
      %c0_10 = arith.constant 0 : index
      %14 = vector.load %arg1[%c0_9, %c0_10] : memref<8x32xf32, #tpu.memory_space<vmem>>, vector<8x32xf32>
      %c0_11 = arith.constant 0 : index
      %c0_12 = arith.constant 0 : index
      %15 = vector.load %arg4[%c0_11, %c0_12] : memref<32x2048xf32, #tpu.memory_space<vmem>>, vector<32x2048xf32>
      %cst_13 = arith.constant dense<0.000000e+00> : vector<8x2048xf32>
      %16 = tpu.matmul %14, %15, %cst_13 {dimension_numbers = #tpu.dot_dimension_numbers<[1], [0], [0], [1], [0, 0, 1, 1], [], []>} : vector<8x32xf32>, vector<32x2048xf32>, vector<8x2048xf32> -> vector<8x2048xf32>
      %c0_14 = arith.constant 0 : index
      %c0_15 = arith.constant 0 : index
      %17 = vector.load %arg5[%c0_14, %c0_15] : memref<1x2048xf32, #tpu.memory_space<vmem>>, vector<1x2048xf32>
      %18 = vector.broadcast %17 : vector<1x2048xf32> to vector<8x2048xf32>
      %19 = arith.addf %16, %18 : vector<8x2048xf32>
      %c0_16 = arith.constant 0 : index
      %c0_17 = arith.constant 0 : index
      %20 = vector.load %arg2[%c0_16, %c0_17] : memref<8x8xf32, #tpu.memory_space<vmem>>, vector<8x8xf32>
      %cst_18 = arith.constant dense<0.000000e+00> : vector<8x2048xf32>
      %21 = tpu.matmul %20, %19, %cst_18 {dimension_numbers = #tpu.dot_dimension_numbers<[1], [0], [0], [1], [0, 0, 1, 1], [], []>} : vector<8x8xf32>, vector<8x2048xf32>, vector<8x2048xf32> -> vector<8x2048xf32>
      %c0_19 = arith.constant 0 : index
      %c0_20 = arith.constant 0 : index
      %22 = vector.load %arg6[%c0_19, %c0_20] : memref<1x2048xf32, #tpu.memory_space<vmem>>, vector<1x2048xf32>
      %c0_21 = arith.constant 0 : index
      %c0_22 = arith.constant 0 : index
      %23 = vector.load %arg7[%c0_21, %c0_22] : memref<1x2048xf32, #tpu.memory_space<vmem>>, vector<1x2048xf32>
      %cst_23 = arith.constant dense<0.000000e+00> : vector<2048xf32>
      %24 = vector.multi_reduction <add>, %21, %cst_23 [0] : vector<8x2048xf32> to vector<2048xf32>
      %25 = vector.shape_cast %24 : vector<2048xf32> to vector<1x2048xf32>
      %cst_24 = arith.constant 8.000000e+00 : f32
      %26 = vector.broadcast %cst_24 : f32 to vector<1x2048xf32>
      %27 = arith.divf %25, %26 : vector<1x2048xf32>
      %28 = arith.mulf %21, %21 : vector<8x2048xf32>
      %cst_25 = arith.constant dense<0.000000e+00> : vector<2048xf32>
      %29 = vector.multi_reduction <add>, %28, %cst_25 [0] : vector<8x2048xf32> to vector<2048xf32>
      %30 = vector.shape_cast %29 : vector<2048xf32> to vector<1x2048xf32>
      %cst_26 = arith.constant 8.000000e+00 : f32
      %31 = vector.broadcast %cst_26 : f32 to vector<1x2048xf32>
      %32 = arith.divf %30, %31 : vector<1x2048xf32>
      %33 = arith.mulf %27, %27 : vector<1x2048xf32>
      %34 = arith.subf %32, %33 : vector<1x2048xf32>
      %cst_27 = arith.constant 0.000000e+00 : f32
      %35 = vector.broadcast %cst_27 : f32 to vector<1x2048xf32>
      %36 = arith.maximumf %34, %35 : vector<1x2048xf32>
      %37 = vector.broadcast %27 : vector<1x2048xf32> to vector<8x2048xf32>
      %38 = arith.subf %21, %37 : vector<8x2048xf32>
      %cst_28 = arith.constant 9.99999974E-6 : f32
      %39 = vector.broadcast %cst_28 : f32 to vector<1x2048xf32>
      %40 = arith.addf %36, %39 : vector<1x2048xf32>
      %41 = math.rsqrt %40 : vector<1x2048xf32>
      %42 = vector.broadcast %41 : vector<1x2048xf32> to vector<8x2048xf32>
      %43 = arith.mulf %38, %42 : vector<8x2048xf32>
      %44 = vector.broadcast %22 : vector<1x2048xf32> to vector<8x2048xf32>
      %45 = arith.mulf %43, %44 : vector<8x2048xf32>
      %46 = vector.broadcast %23 : vector<1x2048xf32> to vector<8x2048xf32>
      %47 = arith.addf %45, %46 : vector<8x2048xf32>
      %cst_29 = arith.constant 0.000000e+00 : f32
      %48 = vector.broadcast %cst_29 : f32 to vector<8x2048xf32>
      %49 = arith.maximumf %47, %48 : vector<8x2048xf32>
      %50 = arith.truncf %49 : vector<8x2048xf32> to vector<8x2048xbf16>
      %51 = vector.extract_strided_slice %50 {offsets = [0, 0], sizes = [8, 512], strides = [1, 1]} : vector<8x2048xbf16> to vector<8x512xbf16>
      %c0_30 = arith.constant 0 : index
      %c0_31 = arith.constant 0 : index
      %c0_32 = arith.constant 0 : index
      %52 = vector.load %arg18[%c0_30, %c0_31, %c0_32] : memref<4x8x512xbf16, #tpu.memory_space<vmem>>, vector<1x8x512xbf16>
      %53 = vector.shape_cast %52 : vector<1x8x512xbf16> to vector<8x512xbf16>
      %54 = vector.shape_cast %51 : vector<8x512xbf16> to vector<1x8x512xbf16>
      tpu.vector_store %arg18[%c0_30, %c0_31, %c0_32], %54 {strides = array<i32>} : memref<4x8x512xbf16, #tpu.memory_space<vmem>>, vector<1x8x512xbf16>,
      %55 = vector.extract_strided_slice %50 {offsets = [0, 512], sizes = [8, 512], strides = [1, 1]} : vector<8x2048xbf16> to vector<8x512xbf16>
      %c1 = arith.constant 1 : index
      %c0_33 = arith.constant 0 : index
      %c0_34 = arith.constant 0 : index
      %56 = vector.load %arg18[%c1, %c0_33, %c0_34] : memref<4x8x512xbf16, #tpu.memory_space<vmem>>, vector<1x8x512xbf16>
      %57 = vector.shape_cast %56 : vector<1x8x512xbf16> to vector<8x512xbf16>
      %58 = vector.shape_cast %55 : vector<8x512xbf16> to vector<1x8x512xbf16>
      tpu.vector_store %arg18[%c1, %c0_33, %c0_34], %58 {strides = array<i32>} : memref<4x8x512xbf16, #tpu.memory_space<vmem>>, vector<1x8x512xbf16>,
      %59 = vector.extract_strided_slice %50 {offsets = [0, 1024], sizes = [8, 512], strides = [1, 1]} : vector<8x2048xbf16> to vector<8x512xbf16>
      %c2 = arith.constant 2 : index
      %c0_35 = arith.constant 0 : index
      %c0_36 = arith.constant 0 : index
      %60 = vector.load %arg18[%c2, %c0_35, %c0_36] : memref<4x8x512xbf16, #tpu.memory_space<vmem>>, vector<1x8x512xbf16>
      %61 = vector.shape_cast %60 : vector<1x8x512xbf16> to vector<8x512xbf16>
      %62 = vector.shape_cast %59 : vector<8x512xbf16> to vector<1x8x512xbf16>
      tpu.vector_store %arg18[%c2, %c0_35, %c0_36], %62 {strides = array<i32>} : memref<4x8x512xbf16, #tpu.memory_space<vmem>>, vector<1x8x512xbf16>,
      %63 = vector.extract_strided_slice %50 {offsets = [0, 1536], sizes = [8, 512], strides = [1, 1]} : vector<8x2048xbf16> to vector<8x512xbf16>
      %c3 = arith.constant 3 : index
      %c0_37 = arith.constant 0 : index
      %c0_38 = arith.constant 0 : index
      %64 = vector.load %arg18[%c3, %c0_37, %c0_38] : memref<4x8x512xbf16, #tpu.memory_space<vmem>>, vector<1x8x512xbf16>
      %65 = vector.shape_cast %64 : vector<1x8x512xbf16> to vector<8x512xbf16>
      %66 = vector.shape_cast %63 : vector<8x512xbf16> to vector<1x8x512xbf16>
      tpu.vector_store %arg18[%c3, %c0_37, %c0_38], %66 {strides = array<i32>} : memref<4x8x512xbf16, #tpu.memory_space<vmem>>, vector<1x8x512xbf16>,
      %cst_39 = arith.constant 0.000000e+00 : f32
      %67 = vector.broadcast %cst_39 : f32 to vector<8x2048xf32>
      %c0_40 = arith.constant 0 : index
      %c0_41 = arith.constant 0 : index
      %68 = vector.load %arg19[%c0_40, %c0_41] : memref<8x2048xf32, #tpu.memory_space<vmem>>, vector<8x2048xf32>
      tpu.vector_store %arg19[%c0_40, %c0_41], %67 {strides = array<i32>} : memref<8x2048xf32, #tpu.memory_space<vmem>>, vector<8x2048xf32>,
    } else {
    }
    %c0 = arith.constant 0 : index
    %c0_1 = arith.constant 0 : index
    %3 = vector.load %arg19[%c0, %c0_1] : memref<8x2048xf32, #tpu.memory_space<vmem>>, vector<8x2048xf32>
    %4 = arith.index_cast %arg0 : i32 to index
    %c0_2 = arith.constant 0 : index
    %c0_3 = arith.constant 0 : index
    %5 = vector.load %arg18[%4, %c0_2, %c0_3] : memref<4x8x512xbf16, #tpu.memory_space<vmem>>, vector<1x8x512xbf16>
    %6 = vector.shape_cast %5 : vector<1x8x512xbf16> to vector<8x512xbf16>
    %c0_4 = arith.constant 0 : index
    %c0_5 = arith.constant 0 : index
    %7 = vector.load %arg8[%c0_4, %c0_5] : memref<512x2048xbf16, #tpu.memory_space<vmem>>, vector<512x2048xbf16>
    %cst = arith.constant dense<0.000000e+00> : vector<8x2048xf32>
    %8 = tpu.matmul %6, %7, %cst {dimension_numbers = #tpu.dot_dimension_numbers<[1], [0], [0], [1], [0, 0, 1, 1], [], []>} : vector<8x512xbf16>, vector<512x2048xbf16>, vector<8x2048xf32> -> vector<8x2048xf32>
    %9 = arith.addf %3, %8 : vector<8x2048xf32>
    %c0_6 = arith.constant 0 : index
    %c0_7 = arith.constant 0 : index
    %10 = vector.load %arg19[%c0_6, %c0_7] : memref<8x2048xf32, #tpu.memory_space<vmem>>, vector<8x2048xf32>
    tpu.vector_store %arg19[%c0_6, %c0_7], %9 {strides = array<i32>} : memref<8x2048xf32, #tpu.memory_space<vmem>>, vector<8x2048xf32>,
    %c3_i32 = arith.constant 3 : i32
    %11 = arith.cmpi eq, %arg0, %c3_i32 : i32
    %12 = arith.extui %11 : i1 to i32
    %c0_i32_8 = arith.constant 0 : i32
    %13 = arith.cmpi ne, %12, %c0_i32_8 : i32
    scf.if %13 {
      %c0_9 = arith.constant 0 : index
      %c0_10 = arith.constant 0 : index
      %14 = vector.load %arg19[%c0_9, %c0_10] : memref<8x2048xf32, #tpu.memory_space<vmem>>, vector<8x2048xf32>
      %c0_11 = arith.constant 0 : index
      %c0_12 = arith.constant 0 : index
      %15 = vector.load %arg9[%c0_11, %c0_12] : memref<1x2048xf32, #tpu.memory_space<vmem>>, vector<1x2048xf32>
      %16 = vector.broadcast %15 : vector<1x2048xf32> to vector<8x2048xf32>
      %17 = arith.addf %14, %16 : vector<8x2048xf32>
      %c0_13 = arith.constant 0 : index
      %c0_14 = arith.constant 0 : index
      %18 = vector.load %arg3[%c0_13, %c0_14] : memref<8x8xf32, #tpu.memory_space<vmem>>, vector<8x8xf32>
      %cst_15 = arith.constant dense<0.000000e+00> : vector<8x2048xf32>
      %19 = tpu.matmul %18, %17, %cst_15 {dimension_numbers = #tpu.dot_dimension_numbers<[1], [0], [0], [1], [0, 0, 1, 1], [], []>} : vector<8x8xf32>, vector<8x2048xf32>, vector<8x2048xf32> -> vector<8x2048xf32>
      %c0_16 = arith.constant 0 : index
      %c0_17 = arith.constant 0 : index
      %20 = vector.load %arg10[%c0_16, %c0_17] : memref<1x2048xf32, #tpu.memory_space<vmem>>, vector<1x2048xf32>
      %c0_18 = arith.constant 0 : index
      %c0_19 = arith.constant 0 : index
      %21 = vector.load %arg11[%c0_18, %c0_19] : memref<1x2048xf32, #tpu.memory_space<vmem>>, vector<1x2048xf32>
      %cst_20 = arith.constant dense<0.000000e+00> : vector<2048xf32>
      %22 = vector.multi_reduction <add>, %19, %cst_20 [0] : vector<8x2048xf32> to vector<2048xf32>
      %23 = vector.shape_cast %22 : vector<2048xf32> to vector<1x2048xf32>
      %cst_21 = arith.constant 8.000000e+00 : f32
      %24 = vector.broadcast %cst_21 : f32 to vector<1x2048xf32>
      %25 = arith.divf %23, %24 : vector<1x2048xf32>
      %26 = arith.mulf %19, %19 : vector<8x2048xf32>
      %cst_22 = arith.constant dense<0.000000e+00> : vector<2048xf32>
      %27 = vector.multi_reduction <add>, %26, %cst_22 [0] : vector<8x2048xf32> to vector<2048xf32>
      %28 = vector.shape_cast %27 : vector<2048xf32> to vector<1x2048xf32>
      %cst_23 = arith.constant 8.000000e+00 : f32
      %29 = vector.broadcast %cst_23 : f32 to vector<1x2048xf32>
      %30 = arith.divf %28, %29 : vector<1x2048xf32>
      %31 = arith.mulf %25, %25 : vector<1x2048xf32>
      %32 = arith.subf %30, %31 : vector<1x2048xf32>
      %cst_24 = arith.constant 0.000000e+00 : f32
      %33 = vector.broadcast %cst_24 : f32 to vector<1x2048xf32>
      %34 = arith.maximumf %32, %33 : vector<1x2048xf32>
      %35 = vector.broadcast %25 : vector<1x2048xf32> to vector<8x2048xf32>
      %36 = arith.subf %19, %35 : vector<8x2048xf32>
      %cst_25 = arith.constant 9.99999974E-6 : f32
      %37 = vector.broadcast %cst_25 : f32 to vector<1x2048xf32>
      %38 = arith.addf %34, %37 : vector<1x2048xf32>
      %39 = math.rsqrt %38 : vector<1x2048xf32>
      %40 = vector.broadcast %39 : vector<1x2048xf32> to vector<8x2048xf32>
      %41 = arith.mulf %36, %40 : vector<8x2048xf32>
      %42 = vector.broadcast %20 : vector<1x2048xf32> to vector<8x2048xf32>
      %43 = arith.mulf %41, %42 : vector<8x2048xf32>
      %44 = vector.broadcast %21 : vector<1x2048xf32> to vector<8x2048xf32>
      %45 = arith.addf %43, %44 : vector<8x2048xf32>
      %cst_26 = arith.constant 0.000000e+00 : f32
      %46 = vector.broadcast %cst_26 : f32 to vector<8x2048xf32>
      %47 = arith.maximumf %45, %46 : vector<8x2048xf32>
      %48 = arith.truncf %47 : vector<8x2048xf32> to vector<8x2048xbf16>
      %c0_27 = arith.constant 0 : index
      %c0_28 = arith.constant 0 : index
      %49 = vector.load %arg12[%c0_27, %c0_28] : memref<2048x512xbf16, #tpu.memory_space<vmem>>, vector<2048x512xbf16>
      %cst_29 = arith.constant dense<0.000000e+00> : vector<8x512xf32>
      %50 = tpu.matmul %48, %49, %cst_29 {dimension_numbers = #tpu.dot_dimension_numbers<[1], [0], [0], [1], [0, 0, 1, 1], [], []>} : vector<8x2048xbf16>, vector<2048x512xbf16>, vector<8x512xf32> -> vector<8x512xf32>
      %c0_30 = arith.constant 0 : index
      %c0_31 = arith.constant 0 : index
      %51 = vector.load %arg13[%c0_30, %c0_31] : memref<1x512xf32, #tpu.memory_space<vmem>>, vector<1x512xf32>
      %52 = vector.broadcast %51 : vector<1x512xf32> to vector<8x512xf32>
      %53 = arith.addf %50, %52 : vector<8x512xf32>
      %cst_32 = arith.constant 1.000000e+00 : f32
      %54 = vector.broadcast %cst_32 : f32 to vector<8x512xf32>
      %55 = arith.mulf %54, %53 : vector<8x512xf32>
      %56 = math.tanh %55 : vector<8x512xf32>
      %c0_33 = arith.constant 0 : index
      %c0_34 = arith.constant 0 : index
      %57 = vector.load %arg16[%c0_33, %c0_34] : memref<8x512xf32, #tpu.memory_space<vmem>>, vector<8x512xf32>
      tpu.vector_store %arg16[%c0_33, %c0_34], %56 {strides = array<i32>} : memref<8x512xf32, #tpu.memory_space<vmem>>, vector<8x512xf32>,
      %58 = arith.truncf %56 : vector<8x512xf32> to vector<8x512xbf16>
      %c0_35 = arith.constant 0 : index
      %c0_36 = arith.constant 0 : index
      %59 = vector.load %arg14[%c0_35, %c0_36] : memref<512x128xbf16, #tpu.memory_space<vmem>>, vector<512x128xbf16>
      %cst_37 = arith.constant dense<0.000000e+00> : vector<8x128xf32>
      %60 = tpu.matmul %58, %59, %cst_37 {dimension_numbers = #tpu.dot_dimension_numbers<[1], [0], [0], [1], [0, 0, 1, 1], [], []>} : vector<8x512xbf16>, vector<512x128xbf16>, vector<8x128xf32> -> vector<8x128xf32>
      %c0_38 = arith.constant 0 : index
      %c0_39 = arith.constant 0 : index
      %61 = vector.load %arg15[%c0_38, %c0_39] : memref<1x128xf32, #tpu.memory_space<vmem>>, vector<1x128xf32>
      %62 = vector.broadcast %61 : vector<1x128xf32> to vector<8x128xf32>
      %63 = arith.addf %60, %62 : vector<8x128xf32>
      %64 = tpu.iota {dimensions = array<i32: 1>} : vector<8x128xi32>
      %c32_i32 = arith.constant 32 : i32
      %65 = vector.broadcast %c32_i32 : i32 to vector<8x128xi32>
      %66 = arith.cmpi slt, %64, %65 : vector<8x128xi32>
      %67 = math.tanh %63 : vector<8x128xf32>
      %68 = arith.negf %63 : vector<8x128xf32>
      %69 = math.exp %68 : vector<8x128xf32>
      %cst_40 = arith.constant 1.000000e+00 : f32
      %70 = vector.broadcast %cst_40 : f32 to vector<8x128xf32>
      %71 = arith.addf %70, %69 : vector<8x128xf32>
      %72 = arith.divf %70, %71 : vector<8x128xf32>
      %73 = arith.select %66, %67, %72 : vector<8x128xi1>, vector<8x128xf32>
      %c0_41 = arith.constant 0 : index
      %c0_42 = arith.constant 0 : index
      %74 = vector.load %arg17[%c0_41, %c0_42] : memref<8x128xf32, #tpu.memory_space<vmem>>, vector<8x128xf32>
      tpu.vector_store %arg17[%c0_41, %c0_42], %73 {strides = array<i32>} : memref<8x128xf32, #tpu.memory_space<vmem>>, vector<8x128xf32>,
    } else {
    }
    return
  }
  func.func @transform_0(%arg0: i32) -> (i32, i32) {
    %c0_i32 = arith.constant 0 : i32
    %c0_i32_0 = arith.constant 0 : i32
    %c0_i32_1 = arith.constant 0 : i32
    return %c0_i32, %c0_i32_0 : i32, i32
  }
  func.func @transform_1(%arg0: i32) -> (i32, i32) {
    %c0_i32 = arith.constant 0 : i32
    %c0_i32_0 = arith.constant 0 : i32
    %c0_i32_1 = arith.constant 0 : i32
    return %c0_i32, %c0_i32_0 : i32, i32
  }
  func.func @transform_2(%arg0: i32) -> (i32, i32) {
    %c0_i32 = arith.constant 0 : i32
    %c0_i32_0 = arith.constant 0 : i32
    %c0_i32_1 = arith.constant 0 : i32
    return %c0_i32, %c0_i32_0 : i32, i32
  }
  func.func @transform_3(%arg0: i32) -> (i32, i32) {
    %c0_i32 = arith.constant 0 : i32
    %c0_i32_0 = arith.constant 0 : i32
    %c0_i32_1 = arith.constant 0 : i32
    return %c0_i32, %c0_i32_0 : i32, i32
  }
  func.func @transform_4(%arg0: i32) -> (i32, i32) {
    %c0_i32 = arith.constant 0 : i32
    %c0_i32_0 = arith.constant 0 : i32
    %c0_i32_1 = arith.constant 0 : i32
    return %c0_i32, %c0_i32_0 : i32, i32
  }
  func.func @transform_5(%arg0: i32) -> (i32, i32) {
    %c0_i32 = arith.constant 0 : i32
    %c0_i32_0 = arith.constant 0 : i32
    %c0_i32_1 = arith.constant 0 : i32
    return %c0_i32, %c0_i32_0 : i32, i32
  }
  func.func @transform_6(%arg0: i32) -> (i32, i32) {
    %c0_i32 = arith.constant 0 : i32
    %c0_i32_0 = arith.constant 0 : i32
    %c0_i32_1 = arith.constant 0 : i32
    return %c0_i32, %c0_i32_0 : i32, i32
  }
  func.func @transform_7(%arg0: i32) -> (i32, i32) {
    %c0_i32 = arith.constant 0 : i32
    %c0_i32_0 = arith.constant 0 : i32
    return %arg0, %c0_i32 : i32, i32
  }
  func.func @transform_8(%arg0: i32) -> (i32, i32) {
    %c0_i32 = arith.constant 0 : i32
    %c0_i32_0 = arith.constant 0 : i32
    %c0_i32_1 = arith.constant 0 : i32
    return %c0_i32, %c0_i32_0 : i32, i32
  }
  func.func @transform_9(%arg0: i32) -> (i32, i32) {
    %c0_i32 = arith.constant 0 : i32
    %c0_i32_0 = arith.constant 0 : i32
    %c0_i32_1 = arith.constant 0 : i32
    return %c0_i32, %c0_i32_0 : i32, i32
  }
  func.func @transform_10(%arg0: i32) -> (i32, i32) {
    %c0_i32 = arith.constant 0 : i32
    %c0_i32_0 = arith.constant 0 : i32
    %c0_i32_1 = arith.constant 0 : i32
    return %c0_i32, %c0_i32_0 : i32, i32
  }
  func.func @transform_11(%arg0: i32) -> (i32, i32) {
    %c0_i32 = arith.constant 0 : i32
    %c0_i32_0 = arith.constant 0 : i32
    %c0_i32_1 = arith.constant 0 : i32
    return %c0_i32, %c0_i32_0 : i32, i32
  }
  func.func @transform_12(%arg0: i32) -> (i32, i32) {
    %c0_i32 = arith.constant 0 : i32
    %c0_i32_0 = arith.constant 0 : i32
    %c0_i32_1 = arith.constant 0 : i32
    return %c0_i32, %c0_i32_0 : i32, i32
  }
  func.func @transform_13(%arg0: i32) -> (i32, i32) {
    %c0_i32 = arith.constant 0 : i32
    %c0_i32_0 = arith.constant 0 : i32
    %c0_i32_1 = arith.constant 0 : i32
    return %c0_i32, %c0_i32_0 : i32, i32
  }
  func.func @transform_14(%arg0: i32) -> (i32, i32) {
    %c0_i32 = arith.constant 0 : i32
    %c0_i32_0 = arith.constant 0 : i32
    %c0_i32_1 = arith.constant 0 : i32
    return %c0_i32, %c0_i32_0 : i32, i32
  }
  func.func @transform_15(%arg0: i32) -> (i32, i32) {
    %c0_i32 = arith.constant 0 : i32
    %c0_i32_0 = arith.constant 0 : i32
    %c0_i32_1 = arith.constant 0 : i32
    return %c0_i32, %c0_i32_0 : i32, i32
  }
  func.func @transform_16(%arg0: i32) -> (i32, i32) {
    %c0_i32 = arith.constant 0 : i32
    %c0_i32_0 = arith.constant 0 : i32
    %c0_i32_1 = arith.constant 0 : i32
    return %c0_i32, %c0_i32_0 : i32, i32
  }
}

</mosaic_0001>

<bundles_post_ra>
// kernel: textnet_forward.1
= control target key start
LH: loop header
LB: loop body
LE: loop exit
PB: predicated region body
PF: predicated region fallthrough
CT: control target
= control target key end

     0   :  { %s20702_s0 = inlined_call_operand.hbm [shape: f32[8,32], index: 0, kind: input, shape index: {}]   ;;  %s20703_s1 = inlined_call_operand.hbm [shape: f32[8,8], index: 1, kind: input, shape index: {}]   ;;  %s20704_s2 = inlined_call_operand.hbm [shape: f32[8,8], index: 2, kind: input, shape index: {}]   ;;  %s20705_s3 = inlined_call_operand.hbm [shape: f32[32,2048], index: 3, kind: input, shape index: {}]   ;;  %s20706_s4 = inlined_call_operand.hbm [shape: f32[1,2048], index: 4, kind: input, shape index: {}]   ;;  %s20707_s5 = inlined_call_operand.hbm [shape: f32[1,2048], index: 5, kind: input, shape index: {}]   ;;  %s20708_s6 = inlined_call_operand.hbm [shape: f32[1,2048], index: 6, kind: input, shape index: {}]   ;;  %s20709_s7 = inlined_call_operand.hbm [shape: bf16[2048,2048], index: 7, kind: input, shape index: {}]   ;;  %s20710_s8 = inlined_call_operand.hbm [shape: f32[1,2048], index: 8, kind: input, shape index: {}]   ;;  %s20711_s9 = inlined_call_operand.hbm [shape: f32[1,2048], index: 9, kind: input, shape index: {}]   ;;  %s20712_s10 = inlined_call_operand.hbm [shape: f32[1,2048], index: 10, kind: input, shape index: {}]   ;;  %s20713_s11 = inlined_call_operand.hbm [shape: bf16[2048,512], index: 11, kind: input, shape index: {}]   ;;  %s20714_s12 = inlined_call_operand.hbm [shape: f32[1,512], index: 12, kind: input, shape index: {}]   ;;  %s20715_s13 = inlined_call_operand.hbm [shape: bf16[512,128], index: 13, kind: input, shape index: {}]   ;;  %s20716_s14 = inlined_call_operand.hbm [shape: f32[1,128], index: 14, kind: input, shape index: {}]   ;;  %s20717_s15 = inlined_call_operand.hbm [shape: f32[8,512], index: 15, kind: output, shape index: {0}]   ;;  %s20718_s16 = inlined_call_operand.vmem [shape: f32[8,128], index: 16, kind: output, shape index: {1}]  }
   0x1   :  { %20738 = sst [smem:[#allocation51_spill]] %s20702_s0 }
   0x2   :  { %20739 = sst [smem:[#allocation52_spill]] %s20703_s1 }
   0x3   :  { %20740 = sst [smem:[#allocation53_spill]] %s20704_s2 }
   0x4   :  { %20741 = sst [smem:[#allocation54_spill]] %s20705_s3 }
   0x5   :  { %20742 = sst [smem:[#allocation55_spill]] %s20709_s7 }
   0x6   :  { %20743 = sst [smem:[#allocation56_spill]] %s20717_s15 }
   0x7   :  { %20744 = sst [smem:[#allocation57_spill]] %s20718_s16 }
   0x8   :  { %22 = vsyncpa [#allocation5], 0 }
   0x9   :  { %23 = vsyncpa [#allocation8], 0 }
   0xa   :  { %24 = vsyncpa [#allocation11], 0 }
   0xb   :  { %25 = vsyncpa [#allocation14], 0 }
   0xc   :  { %26 = vsyncpa [#allocation17], 0 }
   0xd   :  { %28 = vsyncpa [#allocation17 + $0x1], 0 }
   0xe   :  { %29 = vsyncpa [#allocation20], 0 }
   0xf   :  { %30 = vsyncpa [#allocation23], 0 }
  0x10   :  { %31 = vsyncpa [#allocation26], 0 }
  0x11   :  { %32 = vsyncpa [#allocation6], 0  ;;  %s17945_s21 = smov 0   ;;  %s17947_s22 = smov 0  }
  0x12   :  { %s17949_s23 = smov 0   ;;  %s17951_s24 = smov 0  }
  0x13 LB: > { %s20745_s1 = sld [smem:[#allocation52_spill]]  ;;  %s17969_s28 = sadd.s32 4294967295, %s17833_s24   ;;  %s17833_s24 = sphi %s17951_s24, %s20836_s24   ;;  %s17829_s23 = sphi %s17949_s23, %s20835_s23   ;;  %s17825_s22 = sphi %s17947_s22, %s20834_s22   ;;  %s17821_s21 = sphi %s17945_s21, %s20833_s21  }
  0x14   : > { %20746 = sst [smem:[#allocation39_spill]] %s17969_s28  ;;  %p11624_p0 = scmp.ge.s32.totalorder %s17833_s24, 1 }
  0x15   : > { %p206_p1 = scmp.eq.s32.totalorder %s17969_s28, 0  ;;  %p405_p2 = scmp.lt.s32.totalorder %s17833_s24, 5 }
  0x16   : > { %p11625_p3 = scmp.ne.s32.totalorder %s17969_s28, 0  ;;  %s17835_s30 = smov [#allocation7]  }
  0x17   : > { %p17975_p4 = pnand %p11624_p0, %p405_p2  ;;  %s431_s0 = sshll.u32 %s17835_s30, 4  ;;  %s432_s0 = int_to_ptr.vmem [resolvable:$true] %s431_s0 }
  0x18   : > { %s20749_s3 = sld [smem:[#allocation54_spill]]  ;;  %s17836_s25 = smov [#allocation10]  }
  0x19   : > { %s429_s27 = sshll.u32 %s20745_s1, 4  ;;  %p17062_p5 = pneg %p17975_p4  ;;  %s430_s27 = int_to_ptr.hbm [resolvable:$true] %s429_s27 }
  0x1a   : > { %s20747_s29 = scalar_select %p17975_p4, 1, 0 }
  0x1b   : > { %p17986_p6 = pnand %p17062_p5, %p206_p1  ;;  %s454_s26 = sshll.u32 %s17836_s25, 4  ;;  %s455_s26 = int_to_ptr.vmem [resolvable:$true] %s454_s26 }
  0x1c   : > { %20748 = sst [smem:[#allocation40_spill]] %s20747_s29  ;;  %s17837_s30 = smov 2048  }
  0x1d   : > { %17068 = dma.hbm_to_vmem [thread:$0]  (!%p17986_p6), %s430_s27, 128, %s432_s0, [#allocation8]  }
  0x1e   : > { %s452_s19 = sshll.u32 %s20749_s3, 4  ;;  %s17838_s1 = smov 128   ;;  %s453_s19 = int_to_ptr.hbm [resolvable:$true] %s452_s19 }
  0x1f   : > { %17074 = dma.hbm_to_vmem [thread:$0]  (!%p17986_p6), %s453_s19, 8192, %s455_s26, [#allocation11], %s17837_s30, %s17837_s30, %s17838_s1  }
  0x20   : > { %s479_s3 = sshll.u32 %s20707_s5, 4  ;;  %s17839_s15 = smov [#allocation13]   ;;  %s480_s3 = int_to_ptr.hbm [resolvable:$true] %s479_s3 }
  0x21   : > { %s481_s16 = sshll.u32 %s17839_s15, 4  ;;  %s503_s25 = sshll.u32 %s20710_s8, 4  ;;  %s482_s16 = int_to_ptr.vmem [resolvable:$true] %s481_s16  ;;  %s504_s25 = int_to_ptr.hbm [resolvable:$true] %s503_s25 }
  0x22   : > { %17080 = dma.hbm_to_vmem [thread:$0]  (!%p17986_p6), %s480_s3, 256, %s482_s16, [#allocation14]  }
  0x23   : > { %s17840_s27 = smov [#allocation18]   ;;  %s515_s19 = sshll.u32 %s20711_s9, 4  ;;  %s516_s19 = int_to_ptr.hbm [resolvable:$true] %s515_s19 }
  0x24   : > { %s505_s0 = sshll.u32 %s17840_s27, 4  ;;  %s538_s30 = sshll.u32 %s20713_s11, 4  ;;  %s506_s0 = int_to_ptr.vmem [resolvable:$true] %s505_s0  ;;  %s539_s30 = int_to_ptr.hbm [resolvable:$true] %s538_s30 }
  0x25   : > { %17086 = dma.hbm_to_vmem [thread:$0]  (!%p17986_p6), %s504_s25, 256, %s506_s0, [#allocation17]  }
  0x26   : > { %s17841_s7 = smov [#allocation19]   ;;  %s17842_s3 = smov [#allocation22]  }
  0x27   : > { %s517_s29 = sshll.u32 %s17841_s7, 4  ;;  %s540_s16 = sshll.u32 %s17842_s3, 4  ;;  %s518_s29 = int_to_ptr.vmem [resolvable:$true] %s517_s29  ;;  %s541_s16 = int_to_ptr.vmem [resolvable:$true] %s540_s16 }
  0x28   : > { %17089 = dma.hbm_to_vmem [thread:$0]  (!%p17986_p6), %s516_s19, 256, %s518_s29, [#allocation20]  }
  0x29   : > { %s17843_s28 = smov 256   ;;  %s17844_s17 = smov 16  }
  0x2a   : > { %17095 = dma.hbm_to_vmem [thread:$0]  (!%p17986_p6), %s539_s30, 65536, %s541_s16, [#allocation23], %s17843_s28, %s17843_s28, %s17844_s17  }
  0x2b   : > { %s564_s27 = sshll.u32 %s20715_s13, 4  ;;  %s17845_s0 = smov [#allocation25]   ;;  %s565_s27 = int_to_ptr.hbm [resolvable:$true] %s564_s27 }
  0x2c   : > { %s566_s1 = sshll.u32 %s17845_s0, 4  ;;  %s20751_s7 = sld [smem:[#allocation51_spill]]  ;;  %s567_s1 = int_to_ptr.vmem [resolvable:$true] %s566_s1 }
  0x2d   : > { %s20724_s29 = smov 64   ;;  %s17847_s3 = smov 4  }
  0x2e   : > { %17101 = dma.hbm_to_vmem [thread:$0]  (!%p17986_p6), %s565_s27, 4096, %s567_s1, [#allocation26], %s20724_s29, %s20724_s29, %s17847_s3  }
  0x2f   : > { %s17848_s30 = smov [#allocation4]   ;;  %s20752_s2 = sld [smem:[#allocation53_spill]] }
  0x30   : > { %s419_s16 = sshll.u32 %s17848_s30, 4  ;;  %s467_s15 = sshll.u32 %s20706_s4, 4  ;;  %s420_s16 = int_to_ptr.vmem [resolvable:$true] %s419_s16  ;;  %s468_s15 = int_to_ptr.hbm [resolvable:$true] %s467_s15 }
  0x31   : > { %s17849_s26 = smov [#allocation9]   ;;  %s17850_s27 = smov [#allocation12]  }
  0x32   : > { %s417_s19 = sshll.u32 %s20751_s7, 4  ;;  %s443_s7 = sshll.u32 %s17849_s26, 4  ;;  %s418_s19 = int_to_ptr.hbm [resolvable:$true] %s417_s19  ;;  %s444_s7 = int_to_ptr.vmem [resolvable:$true] %s443_s7 }
  0x33   : > { %17065 = dma.hbm_to_vmem [thread:$0]  (!%p17986_p6), %s418_s19, 128, %s420_s16, [#allocation5]  }
  0x34   : > { %s469_s1 = sshll.u32 %s17850_s27, 4  ;;  %s491_s28 = sshll.u32 %s20708_s6, 4  ;;  %s470_s1 = int_to_ptr.vmem [resolvable:$true] %s469_s1  ;;  %s492_s28 = int_to_ptr.hbm [resolvable:$true] %s491_s28 }
  0x35   : > { %s441_s18 = sshll.u32 %s20752_s2, 4  ;;  %s527_s17 = sshll.u32 %s20712_s10, 4  ;;  %s442_s18 = int_to_ptr.hbm [resolvable:$true] %s441_s18  ;;  %s528_s17 = int_to_ptr.hbm [resolvable:$true] %s527_s17 }
  0x36   : > { %17071 = dma.hbm_to_vmem [thread:$0]  (!%p17986_p6), %s442_s18, 128, %s444_s7, [#allocation8]  }
  0x37   : > { %17077 = dma.hbm_to_vmem [thread:$0]  (!%p17986_p6), %s468_s15, 256, %s470_s1, [#allocation11]  }
  0x38   : > { %s17851_s25 = smov [#allocation15]   ;;  %s17852_s18 = smov [#allocation21]  }
  0x39   : > { %s493_s0 = sshll.u32 %s17851_s25, 4  ;;  %s529_s26 = sshll.u32 %s17852_s18, 4  ;;  %s494_s0 = int_to_ptr.vmem [resolvable:$true] %s493_s0  ;;  %s530_s26 = int_to_ptr.vmem [resolvable:$true] %s529_s26 }
  0x3a   : > { %17083 = dma.hbm_to_vmem [thread:$0]  (!%p17986_p6), %s492_s28, 256, %s494_s0, [#allocation14]  }
  0x3b   : > { %s553_s15 = sshll.u32 %s20714_s12, 4  ;;  %s579_s30 = sshll.u32 %s20716_s14, 4  ;;  %s554_s15 = int_to_ptr.hbm [resolvable:$true] %s553_s15  ;;  %s580_s30 = int_to_ptr.hbm [resolvable:$true] %s579_s30 }
  0x3c   : > { %17092 = dma.hbm_to_vmem [thread:$0]  (!%p17986_p6), %s528_s17, 256, %s530_s26, [#allocation20]  }
  0x3d   : > { %s17853_s28 = smov [#allocation24]   ;;  %s17854_s25 = smov [#allocation27]  }
  0x3e   : > { %s555_s19 = sshll.u32 %s17853_s28, 4  ;;  %s581_s17 = sshll.u32 %s17854_s25, 4  ;;  %s556_s19 = int_to_ptr.vmem [resolvable:$true] %s555_s19  ;;  %s582_s17 = int_to_ptr.vmem [resolvable:$true] %s581_s17 }
  0x3f   : > { %17098 = dma.hbm_to_vmem [thread:$0]  (!%p17986_p6), %s554_s15, 64, %s556_s19, [#allocation23]  }
  0x40   : > { %17104 = dma.hbm_to_vmem [thread:$0]  (!%p17986_p6), %s580_s30, 16, %s582_s17, [#allocation26]  }
  0x41   : > { %s18057_s0 = sadd.s32 1, %s17833_s24   ;;  %s192_s18 = sadd.s32 1, %s17829_s23 }
  0x42   : > { %s189_s26 = ssub.s32 %s17833_s24, %s18057_s0  ;;  %p199_p7 = scmp.ne.s32.totalorder %s17829_s23, %s17825_s22 }
  0x43   : > { %p190_p8 = scmp.eq.s32.totalorder %s189_s26, 0  ;;  %p200_p9 = scmp.eq.s32.totalorder %s17833_s24, 0 }
  0x44   : > { %p205_p10 = scmp.ne.s32.totalorder %s17825_s22, %s17821_s21  ;;  %p17123_p11 = scmp.lt.s32.totalorder %s17833_s24, 4 }
  0x45   : > { %s18069_s7 = scalar_select %p190_p8, %s17829_s23, %s192_s18  }
  0x46   : > { %p201_p12 = por %p200_p9, %p199_p7  ;;  %p18073_p13 = por %p206_p1, %p205_p10 }
  0x47   : > { %s592_s20 = sand.u32 1, %s17833_s24   ;;  %s594_s15 = sand.u32 1, %s17829_s23  }
  0x48   : > { %s11640_s1 = sshll.u32 %s594_s15, 12  ;;  %s15942_s3 = sshll.u32 %s17833_s24, 12 }
  0x49   : > { %s20755_s19 = sld [smem:[#allocation55_spill]]  ;;  %s596_s17 = scalar_lea.vmem [#allocation16], %s11640_s1 }
  0x4a   : > { %s605_s26 = sshll.u32 %s596_s17, 4  ;;  %p18085_p0 = pnand %p17123_p11, %p201_p12  ;;  %s606_s26 = int_to_ptr.vmem [resolvable:$true] %s605_s26 }
  0x4b   : > { %s593_s18 = scalar_lea.sflag [#allocation17], %s592_s20 }
  0x4c   : > { %p17709_p5 = pneg %p18085_p0 }
  0x4f   : > { %s602_s25 = scalar_lea.hbm %s20755_s19, %s15942_s3  ;;  %s17712_s30 = scalar_lea.hbm %s20755_s19, 16384 }
  0x50   : > { %s603_s21 = sshll.u32 %s602_s25, 4  ;;  %s604_s21 = int_to_ptr.hbm [resolvable:$true] %s603_s21 }
  0x51   : > { %s17705_s29 = sshra.s32 %s604_s21, 4  ;;  %s17706_s29 = int_to_ptr.hbm [resolvable:$true] %s17705_s29 }
  0x52   : > { %s17707_s15 = scalar_lea.hbm %s17706_s29, 4096  ;;  %p17713_p8 = scmp.lt.s32.totalorder %s17706_s29, %s20755_s19 }
  0x53   : > { %p17708_p2 = scmp.ne.s32.totalorder %s17706_s29, %s17707_s15  ;;  %p17714_p9 = scmp.lt.s32.totalorder %s17712_s30, %s17707_s15 }
  0x55   : > { %p17710_p6 = pnand %p17709_p5, %p17708_p2  ;;  %p17715_p10 = por %p17714_p9, %p17713_p8 }
  0x57   : > { %p17711_p7 = pneg %p17710_p6 }
  0x59   : > { %p17716_p11 = pnand %p17715_p10, %p17711_p7 }
  0x5b   : > { %17719 = shalt.err (!%p17716_p11)
}
  0x5c   : > { %s17855_s20 = smov 1024   ;;  %s20757_s25 = smov 64  }
  0x5d   : > { %17108 = dma.hbm_to_vmem [thread:$0]  (!%p18085_p0), %s604_s21, 65536, %s606_s26, %s593_s18, %s17855_s20, %s17855_s20, %s20757_s25  }
  0x5e   : > { %617 = sbr.rel (%p17975_p4) target bundleno = 2280 (0x8e8), region = 80  ;;  %s20759_s2 = sld [smem:[#allocation39_spill]] (!%p17975_p4) }
  0x63   : > { %17780 = dma.done.wait (%p206_p1), [#allocation5], 128  }
  0x64   : > { %17782 = vsyncadd (%p206_p1), [#allocation5], 4294967168 }
  0x65   : > { %17784 = dma.done.wait (%p206_p1), [#allocation8], 256  }
  0x66   : > { %17786 = vsyncadd (%p206_p1), [#allocation8], 4294967040 }
  0x67   : > { %17788 = dma.done.wait (%p206_p1), [#allocation11], 8448  }
  0x68   : > { %17790 = vsyncadd (%p206_p1), [#allocation11], 4294958848 }
  0x69   : > { %17792 = dma.done.wait (%p206_p1), [#allocation14], 512  }
  0x6a   : > { %17794 = vsyncadd (%p206_p1), [#allocation14], 4294966784  ;;  %s654_s29 = sand.u32 1, %s20759_s2   ;;  %s656_s26 = sand.u32 1, %s17825_s22  }
  0x6b   : > { %s11652_s21 = sshll.u32 %s656_s26, 12  ;;  %s655_s16 = scalar_lea.sflag [#allocation17], %s654_s29 }
  0x6c   : > { %s18120_s18 = scalar_lea.vmem [#allocation16], %s11652_s21 }
  0x6d   : > { %17796 = dma.done.wait (%p18073_p13), %s655_s16, 65536  }
  0x6e   : > { %17798 = vsyncadd (%p18073_p13), %s655_s16, 4294901760 }
  0x6f   : > { %17800 = dma.done.wait (%p206_p1), [#allocation17], 256  }
  0x70   : > { %17802 = vsyncadd (%p206_p1), [#allocation17], 4294967040 }
  0x71   : > { %17804 = dma.done.wait (%p206_p1), [#allocation20], 512  }
  0x72   : > { %17806 = vsyncadd (%p206_p1), [#allocation20], 4294966784 }
  0x73   : > { %17808 = dma.done.wait (%p206_p1), [#allocation23], 65600  }
  0x74   : > { %17810 = vsyncadd (%p206_p1), [#allocation23], 4294901696 }
  0x75   : > { %17812 = dma.done.wait (%p206_p1), [#allocation26], 4112  }
  0x76   : > { %17814 = vsyncadd (%p206_p1), [#allocation26], 4294963184  ;;  %742 = sbr.rel (%p11625_p3) target bundleno = 554 (0x22a), region = 144 }
  0x7b   : > { %v792_v0 = vld [vmem:[#allocation10 + $0x180] sm:$0xff]  ;;  %v793_v1 = vld [vmem:[#allocation10 + $0x188] sm:$0xff]  ;;  %v794_v2 = vld [vmem:[#allocation10 + $0x190] sm:$0xff]  ;;  %vm844_vm0 = vcmask 261120   ;;  %vm1169_vm1 = vcmask 64512  }
  0x7c   : > { %860 = vmatpush.msra.mxu0 %v792_v0  ;;  %880 = vmatpush.msra.mxu1 %v793_v1  ;;  %v795_v3 = vld [vmem:[#allocation10 + $0x198] sm:$0xff]  ;;  %v776_v4 = vld [vmem:[#allocation10 + $0x100] sm:$0xff]  ;;  %v777_v5 = vld [vmem:[#allocation10 + $0x108] sm:$0xff] }
  0x7d   : > { %900 = vmatpush.msra.mxu2 %v794_v2  ;;  %920 = vmatpush.msra.mxu3 %v795_v3  ;;  %v778_v6 = vld [vmem:[#allocation10 + $0x110] sm:$0xff]  ;;  %v779_v7 = vld [vmem:[#allocation10 + $0x118] sm:$0xff]  ;;  %v760_v8 = vld [vmem:[#allocation10 + $0x80] sm:$0xff] }
  0x7e   : > { %861 = vmatpush.msra.mxu0 %v776_v4  ;;  %881 = vmatpush.msra.mxu1 %v777_v5  ;;  %v761_v9 = vld [vmem:[#allocation10 + $0x88] sm:$0xff]  ;;  %v762_v10 = vld [vmem:[#allocation10 + $0x90] sm:$0xff]  ;;  %v763_v11 = vld [vmem:[#allocation10 + $0x98] sm:$0xff] }
  0x7f   : > { %901 = vmatpush.msra.mxu2 %v778_v6  ;;  %921 = vmatpush.msra.mxu3 %v779_v7  ;;  %v744_v12 = vld [vmem:[#allocation10] sm:$0xff]  ;;  %v745_v13 = vld [vmem:[#allocation10 + $0x8] sm:$0xff]  ;;  %v746_v14 = vld [vmem:[#allocation10 + $0x10] sm:$0xff] }
  0x80   : > { %862 = vmatpush.msra.mxu0 %v760_v8  ;;  %882 = vmatpush.msra.mxu1 %v761_v9  ;;  %v747_v15 = vld [vmem:[#allocation10 + $0x18] sm:$0xff]  ;;  %v18144_v16 = vld [vmem:[#allocation4] sm:$0xff]  ;;  %v796_v17 = vld [vmem:[#allocation10 + $0x1a0] sm:$0xff] }
  0x81   : > { %902 = vmatpush.msra.mxu2 %v762_v10  ;;  %922 = vmatpush.msra.mxu3 %v763_v11  ;;  %v797_v18 = vld [vmem:[#allocation10 + $0x1a8] sm:$0xff]  ;;  %v798_v19 = vld [vmem:[#allocation10 + $0x1b0] sm:$0xff]  ;;  %v799_v20 = vld [vmem:[#allocation10 + $0x1b8] sm:$0xff] }
  0x82   : > { %863 = vmatpush.msra.mxu0 %v744_v12  ;;  %883 = vmatpush.msra.mxu1 %v745_v13  ;;  %v780_v21 = vld [vmem:[#allocation10 + $0x120] sm:$0xff]  ;;  %v781_v22 = vld [vmem:[#allocation10 + $0x128] sm:$0xff]  ;;  %v782_v23 = vld [vmem:[#allocation10 + $0x130] sm:$0xff] }
  0x83   : > { %903 = vmatpush.msra.mxu2 %v746_v14  ;;  %923 = vmatpush.msra.mxu3 %v747_v15  ;;  %v783_v24 = vld [vmem:[#allocation10 + $0x138] sm:$0xff]  ;;  %v764_v25 = vld [vmem:[#allocation10 + $0xa0] sm:$0xff]  ;;  %v765_v26 = vld [vmem:[#allocation10 + $0xa8] sm:$0xff] }
  0x84   : > { %11661 = vmatmul.msk.f32.vlgmr.msra.gmra.mxu0 %vm844_vm0, %v18144_v16  ;;  %11662 = vmatmul.msk.f32.vlgmr.msra.gmra.mxu1 %vm844_vm0, %v18144_v16  ;;  %v766_v27 = vld [vmem:[#allocation10 + $0xb0] sm:$0xff]  ;;  %v767_v28 = vld [vmem:[#allocation10 + $0xb8] sm:$0xff]  ;;  %v748_v29 = vld [vmem:[#allocation10 + $0x20] sm:$0xff] }
  0x85   : > { %11663 = vmatmul.msk.f32.vlgmr.msra.gmra.mxu2 %vm844_vm0, %v18144_v16  ;;  %11664 = vmatmul.msk.f32.vlgmr.msra.gmra.mxu3 %vm844_vm0, %v18144_v16  ;;  %v749_v30 = vld [vmem:[#allocation10 + $0x28] sm:$0xff]  ;;  %v750_v31 = vld [vmem:[#allocation10 + $0x30] sm:$0xff]  ;;  %v751_v32 = vld [vmem:[#allocation10 + $0x38] sm:$0xff] }
  0x86   : > { %940 = vmatpush.msrb.mxu0 %v796_v17  ;;  %960 = vmatpush.msrb.mxu1 %v797_v18  ;;  %v800_v33 = vld [vmem:[#allocation10 + $0x1c0] sm:$0xff]  ;;  %v801_v34 = vld [vmem:[#allocation10 + $0x1c8] sm:$0xff]  ;;  %v802_v35 = vld [vmem:[#allocation10 + $0x1d0] sm:$0xff] }
  0x87   : > { %980 = vmatpush.msrb.mxu2 %v798_v19  ;;  %1000 = vmatpush.msrb.mxu3 %v799_v20  ;;  %v803_v36 = vld [vmem:[#allocation10 + $0x1d8] sm:$0xff]  ;;  %v784_v37 = vld [vmem:[#allocation10 + $0x140] sm:$0xff]  ;;  %v785_v38 = vld [vmem:[#allocation10 + $0x148] sm:$0xff] }
  0x88   : > { %941 = vmatpush.msrb.mxu0 %v780_v21  ;;  %961 = vmatpush.msrb.mxu1 %v781_v22  ;;  %v786_v39 = vld [vmem:[#allocation10 + $0x150] sm:$0xff]  ;;  %v787_v40 = vld [vmem:[#allocation10 + $0x158] sm:$0xff]  ;;  %v768_v41 = vld [vmem:[#allocation10 + $0xc0] sm:$0xff] }
  0x89   : > { %981 = vmatpush.msrb.mxu2 %v782_v23  ;;  %1001 = vmatpush.msrb.mxu3 %v783_v24  ;;  %v769_v42 = vld [vmem:[#allocation10 + $0xc8] sm:$0xff]  ;;  %v770_v43 = vld [vmem:[#allocation10 + $0xd0] sm:$0xff]  ;;  %v771_v44 = vld [vmem:[#allocation10 + $0xd8] sm:$0xff] }
  0x8a   : > { %942 = vmatpush.msrb.mxu0 %v764_v25  ;;  %962 = vmatpush.msrb.mxu1 %v765_v26  ;;  %v752_v45 = vld [vmem:[#allocation10 + $0x40] sm:$0xff]  ;;  %v753_v46 = vld [vmem:[#allocation10 + $0x48] sm:$0xff]  ;;  %v754_v47 = vld [vmem:[#allocation10 + $0x50] sm:$0xff] }
  0x8b   : > { %982 = vmatpush.msrb.mxu2 %v766_v27  ;;  %1002 = vmatpush.msrb.mxu3 %v767_v28  ;;  %v755_v48 = vld [vmem:[#allocation10 + $0x58] sm:$0xff]  ;;  %v804_v49 = vld [vmem:[#allocation10 + $0x1e0] sm:$0xff]  ;;  %v805_v50 = vld [vmem:[#allocation10 + $0x1e8] sm:$0xff] }
  0x8c   : > { %943 = vmatpush.msrb.mxu0 %v748_v29  ;;  %963 = vmatpush.msrb.mxu1 %v749_v30  ;;  %v806_v51 = vld [vmem:[#allocation10 + $0x1f0] sm:$0xff]  ;;  %v807_v52 = vld [vmem:[#allocation10 + $0x1f8] sm:$0xff]  ;;  %v788_v53 = vld [vmem:[#allocation10 + $0x160] sm:$0xff] }
  0x8d   : > { %983 = vmatpush.msrb.mxu2 %v750_v31  ;;  %1003 = vmatpush.msrb.mxu3 %v751_v32  ;;  %v789_v54 = vld [vmem:[#allocation10 + $0x168] sm:$0xff]  ;;  %v790_v55 = vld [vmem:[#allocation10 + $0x170] sm:$0xff]  ;;  %v791_v56 = vld [vmem:[#allocation10 + $0x178] sm:$0xff] }
  0x8e   : > { %11665 = vmatmul.msk.f32.vlgmr.msrb.gmra.mxu0 %vm844_vm0, %v18144_v16  ;;  %11666 = vmatmul.msk.f32.vlgmr.msrb.gmra.mxu1 %vm844_vm0, %v18144_v16  ;;  %v772_v57 = vld [vmem:[#allocation10 + $0xe0] sm:$0xff]  ;;  %v773_v58 = vld [vmem:[#allocation10 + $0xe8] sm:$0xff]  ;;  %v774_v59 = vld [vmem:[#allocation10 + $0xf0] sm:$0xff] }
  0x8f   : > { %11667 = vmatmul.msk.f32.vlgmr.msrb.gmra.mxu2 %vm844_vm0, %v18144_v16  ;;  %11668 = vmatmul.msk.f32.vlgmr.msrb.gmra.mxu3 %vm844_vm0, %v18144_v16  ;;  %v775_v60 = vld [vmem:[#allocation10 + $0xf8] sm:$0xff]  ;;  %v756_v61 = vld [vmem:[#allocation10 + $0x60] sm:$0xff]  ;;  %v757_v62 = vld [vmem:[#allocation10 + $0x68] sm:$0xff] }
  0x90   : > { %1020 = vmatpush.msra.mxu0 %v800_v33  ;;  %1040 = vmatpush.msra.mxu1 %v801_v34  ;;  %v758_v63 = vld [vmem:[#allocation10 + $0x70] sm:$0xff]  ;;  %v759_v0 = vld [vmem:[#allocation10 + $0x78] sm:$0xff]  ;;  %v808_v1 = vld [vmem:[#allocation12] sm:$0xff] }
  0x91   : > { %1060 = vmatpush.msra.mxu2 %v802_v35  ;;  %1080 = vmatpush.msra.mxu3 %v803_v36  ;;  %v812_v2 = vperm.slane %v808_v1, 0  ;;  %v813_v3 = vperm.slane %v808_v1, 1  ;;  %v18178_v8 = vld [vmem:[#allocation7] sm:$0xff]  ;;  %v814_v9 = vperm.slane %v808_v1, 2  ;;  %v815_v10 = vperm.slane %v808_v1, 3  ;;  %v809_v23 = vld [vmem:[#allocation12 + $0x8] sm:$0xff] }
  0x92   : > { %1021 = vmatpush.msra.mxu0 %v784_v37  ;;  %1041 = vmatpush.msra.mxu1 %v785_v38  ;;  %v816_v13 = vperm.slane %v808_v1, 4  ;;  %v817_v14 = vperm.slane %v808_v1, 5  ;;  %v818_v21 = vperm.slane %v808_v1, 6  ;;  %v819_v22 = vperm.slane %v808_v1, 7 }
  0x93   : > { %1061 = vmatpush.msra.mxu2 %v786_v39  ;;  %1081 = vmatpush.msra.mxu3 %v787_v40  ;;  %v820_v26 = vperm.slane %v809_v23, 0  ;;  %v821_v27 = vperm.slane %v809_v23, 1  ;;  %v822_v34 = vperm.slane %v809_v23, 2  ;;  %v823_v35 = vperm.slane %v809_v23, 3 }
  0x94   : > { %1022 = vmatpush.msra.mxu0 %v768_v41  ;;  %1042 = vmatpush.msra.mxu1 %v769_v42  ;;  %v824_v38 = vperm.slane %v809_v23, 4  ;;  %v825_v39 = vperm.slane %v809_v23, 5 }
  0x95   : > { %1062 = vmatpush.msra.mxu2 %v770_v43  ;;  %1082 = vmatpush.msra.mxu3 %v771_v44 }
  0x96   : > { %1023 = vmatpush.msra.mxu0 %v752_v45  ;;  %1043 = vmatpush.msra.mxu1 %v753_v46  ;;  %v826_v46 = vperm.slane %v809_v23, 6 }
  0x97   : > { %1063 = vmatpush.msra.mxu2 %v754_v47  ;;  %1083 = vmatpush.msra.mxu3 %v755_v48  ;;  %v827_v47 = vperm.slane %v809_v23, 7 }
  0x98   : > { %11669 = vmatmul.msk.f32.vlgmr.msra.gmra.mxu0 %vm844_vm0, %v18144_v16  ;;  %11670 = vmatmul.msk.f32.vlgmr.msra.gmra.mxu1 %vm844_vm0, %v18144_v16 }
  0x99   : > { %11671 = vmatmul.msk.f32.vlgmr.msra.gmra.mxu2 %vm844_vm0, %v18144_v16  ;;  %11672 = vmatmul.msk.f32.vlgmr.msra.gmra.mxu3 %vm844_vm0, %v18144_v16 }
  0x9a   : > { %1100 = vmatpush.msrb.mxu0 %v804_v49  ;;  %1120 = vmatpush.msrb.mxu1 %v805_v50 }
  0x9b   : > { %1140 = vmatpush.msrb.mxu2 %v806_v51  ;;  %1160 = vmatpush.msrb.mxu3 %v807_v52  ;;  %v17856_v52 = vmov 8.0  }
  0x9c   : > { %1101 = vmatpush.msrb.mxu0 %v788_v53  ;;  %1121 = vmatpush.msrb.mxu1 %v789_v54  ;;  %17197 = vrcp.f32 %v17856_v52 }
  0x9d   : > { %1141 = vmatpush.msrb.mxu2 %v790_v55  ;;  %1161 = vmatpush.msrb.mxu3 %v791_v56 }
  0x9e   : > { %1102 = vmatpush.msrb.mxu0 %v772_v57  ;;  %1122 = vmatpush.msrb.mxu1 %v773_v58 }
  0x9f   : > { %1142 = vmatpush.msrb.mxu2 %v774_v59  ;;  %1162 = vmatpush.msrb.mxu3 %v775_v60 }
  0xa0   : > { %1103 = vmatpush.msrb.mxu0 %v756_v61  ;;  %1123 = vmatpush.msrb.mxu1 %v757_v62 }
  0xa1   : > { %1143 = vmatpush.msrb.mxu2 %v758_v63  ;;  %1163 = vmatpush.msrb.mxu3 %v759_v0 }
  0xa2   : > { %11673 = vmatmul.msk.f32.vlgmr.msrb.gmra.mxu0 %vm844_vm0, %v18144_v16  ;;  %11674 = vmatmul.msk.f32.vlgmr.msrb.gmra.mxu1 %vm844_vm0, %v18144_v16  ;;  %v17198_v53 = vpop.eup %17197 }
  0xa3   : > { %11675 = vmatmul.msk.f32.vlgmr.msrb.gmra.mxu2 %vm844_vm0, %v18144_v16  ;;  %11676 = vmatmul.msk.f32.vlgmr.msrb.gmra.mxu3 %vm844_vm0, %v18144_v16  ;;  %v1594_v54 = vmul.f32 8.0, %v17198_v53  ;;  %vm1598_vm2 = vweird.f32 %v17198_v53 }
  0xa5   : > { %v1595_v55 = vsub.f32 1.0, %v1594_v54 }
  0xa7   : > { %v1596_v62 = vmul.f32 %v17198_v53, %v1595_v55 }
 0x101   : > { %v865_v4 = vpop.f32.mrf.mxu0  ;;  %v885_v5 = vpop.f32.mrf.mxu1 }
 0x102   : > { %v866_v6 = vadd.f32 %v865_v4, %v812_v2  ;;  %v886_v7 = vadd.f32 %v885_v5, %v813_v3 }
 0x104   : > { %1188 = vmatpush.msra.mxu0 %v866_v6  ;;  %1208 = vmatpush.msra.mxu1 %v886_v7  ;;  %v1597_v7 = vadd.f32 %v17198_v53, %v1596_v62 }
 0x105   : > { %11677 = vmatmul.msk.f32.vlgmr.msra.gmra.mxu0 %vm1169_vm1, %v18178_v8  ;;  %11678 = vmatmul.msk.f32.vlgmr.msra.gmra.mxu1 %vm1169_vm1, %v18178_v8 }
 0x108   : > { %v905_v11 = vpop.f32.mrf.mxu2  ;;  %v925_v12 = vpop.f32.mrf.mxu3 }
 0x109   : > { %v906_v15 = vadd.f32 %v905_v11, %v814_v9  ;;  %v926_v16 = vadd.f32 %v925_v12, %v815_v10 }
 0x10b   : > { %v945_v17 = vpop.f32.mrf.mxu0  ;;  %v965_v18 = vpop.f32.mrf.mxu1  ;;  %1228 = vmatpush.msra.mxu2 %v906_v15  ;;  %1248 = vmatpush.msra.mxu3 %v926_v16  ;;  %v18224_v15 = vsel %vm1598_vm2, %v17198_v53, %v1597_v7 }
 0x10c   : > { %v946_v19 = vadd.f32 %v945_v17, %v816_v13  ;;  %v966_v20 = vadd.f32 %v965_v18, %v817_v14  ;;  %11679 = vmatmul.msk.f32.vlgmr.msra.gmra.mxu2 %vm1169_vm1, %v18178_v8  ;;  %11680 = vmatmul.msk.f32.vlgmr.msra.gmra.mxu3 %vm1169_vm1, %v18178_v8 }
 0x10e   : > { %1268 = vmatpush.msrb.mxu0 %v946_v19  ;;  %1288 = vmatpush.msrb.mxu1 %v966_v20 }
 0x10f   : > { %11681 = vmatmul.msk.f32.vlgmr.msrb.gmra.mxu0 %vm1169_vm1, %v18178_v8  ;;  %11682 = vmatmul.msk.f32.vlgmr.msrb.gmra.mxu1 %vm1169_vm1, %v18178_v8 }
 0x112   : > { %v985_v24 = vpop.f32.mrf.mxu2  ;;  %v1005_v25 = vpop.f32.mrf.mxu3 }
 0x113   : > { %v986_v28 = vadd.f32 %v985_v24, %v818_v21  ;;  %v1006_v29 = vadd.f32 %v1005_v25, %v819_v22 }
 0x115   : > { %v1025_v30 = vpop.f32.mrf.mxu0  ;;  %v1045_v31 = vpop.f32.mrf.mxu1  ;;  %1308 = vmatpush.msrb.mxu2 %v986_v28  ;;  %1328 = vmatpush.msrb.mxu3 %v1006_v29 }
 0x116   : > { %v1026_v32 = vadd.f32 %v1025_v30, %v820_v26  ;;  %v1046_v33 = vadd.f32 %v1045_v31, %v821_v27  ;;  %11683 = vmatmul.msk.f32.vlgmr.msrb.gmra.mxu2 %vm1169_vm1, %v18178_v8  ;;  %11684 = vmatmul.msk.f32.vlgmr.msrb.gmra.mxu3 %vm1169_vm1, %v18178_v8 }
 0x118   : > { %1348 = vmatpush.msra.mxu0 %v1026_v32  ;;  %1368 = vmatpush.msra.mxu1 %v1046_v33 }
 0x119   : > { %11685 = vmatmul.msk.f32.vlgmr.msra.gmra.mxu0 %vm1169_vm1, %v18178_v8  ;;  %11686 = vmatmul.msk.f32.vlgmr.msra.gmra.mxu1 %vm1169_vm1, %v18178_v8 }
 0x11c   : > { %v1065_v36 = vpop.f32.mrf.mxu2  ;;  %v1085_v37 = vpop.f32.mrf.mxu3 }
 0x11d   : > { %v1066_v40 = vadd.f32 %v1065_v36, %v822_v34  ;;  %v1086_v41 = vadd.f32 %v1085_v37, %v823_v35 }
 0x11f   : > { %v1105_v42 = vpop.f32.mrf.mxu0  ;;  %v1125_v43 = vpop.f32.mrf.mxu1  ;;  %1388 = vmatpush.msra.mxu2 %v1066_v40  ;;  %1408 = vmatpush.msra.mxu3 %v1086_v41 }
 0x120   : > { %v1106_v44 = vadd.f32 %v1105_v42, %v824_v38  ;;  %v1126_v45 = vadd.f32 %v1125_v43, %v825_v39  ;;  %11687 = vmatmul.msk.f32.vlgmr.msra.gmra.mxu2 %vm1169_vm1, %v18178_v8  ;;  %11688 = vmatmul.msk.f32.vlgmr.msra.gmra.mxu3 %vm1169_vm1, %v18178_v8 }
 0x122   : > { %1428 = vmatpush.msrb.mxu0 %v1106_v44  ;;  %1448 = vmatpush.msrb.mxu1 %v1126_v45 }
 0x123   : > { %11689 = vmatmul.msk.f32.vlgmr.msrb.gmra.mxu0 %vm1169_vm1, %v18178_v8  ;;  %11690 = vmatmul.msk.f32.vlgmr.msrb.gmra.mxu1 %vm1169_vm1, %v18178_v8 }
 0x126   : > { %v1145_v48 = vpop.f32.mrf.mxu2  ;;  %v1165_v49 = vpop.f32.mrf.mxu3 }
 0x127   : > { %v1146_v50 = vadd.f32 %v1145_v48, %v826_v46  ;;  %v1166_v51 = vadd.f32 %v1165_v49, %v827_v47 }
 0x129   : > { %1468 = vmatpush.msrb.mxu2 %v1146_v50  ;;  %1488 = vmatpush.msrb.mxu3 %v1166_v51 }
 0x12a   : > { %11691 = vmatmul.msk.f32.vlgmr.msrb.gmra.mxu2 %vm1169_vm1, %v18178_v8  ;;  %11692 = vmatmul.msk.f32.vlgmr.msrb.gmra.mxu3 %vm1169_vm1, %v18178_v8 }
 0x182   : > { %v18212_v56 = vpop.f32.mrf.mxu0  ;;  %v18214_v57 = vpop.f32.mrf.mxu1 }
 0x183   : > { %v1497_v58 = vrot.slane %v18212_v56, 4  ;;  %v1616_v59 = vmul.f32 %v18212_v56, %v18212_v56  ;;  %v1503_v60 = vrot.slane %v18214_v57, 4  ;;  %v1617_v61 = vmul.f32 %v18214_v57, %v18214_v57 }
 0x185   : > { %v1498_v63 = vadd.f32 %v1497_v58, %v18212_v56  ;;  %v1632_v0 = vrot.slane %v1616_v59, 4  ;;  %v1504_v1 = vadd.f32 %v1503_v60, %v18214_v57  ;;  %v1638_v2 = vrot.slane %v1617_v61, 4  ;;  %v18258_v60 = vld [vmem:[#allocation13] sm:$0xff] }
 0x187   : > { %v1499_v3 = vrot.slane %v1498_v63, 2  ;;  %v1633_v4 = vadd.f32 %v1632_v0, %v1616_v59  ;;  %v1505_v5 = vrot.slane %v1504_v1, 2  ;;  %v1639_v6 = vadd.f32 %v1638_v2, %v1617_v61 }
 0x189   : > { %v1500_v8 = vadd.f32 %v1499_v3, %v1498_v63  ;;  %v1634_v9 = vrot.slane %v1633_v4, 2  ;;  %v1506_v10 = vadd.f32 %v1505_v5, %v1504_v1  ;;  %v1640_v11 = vrot.slane %v1639_v6, 2 }
 0x18b   : > { %v1501_v12 = vrot.slane %v1500_v8, 1  ;;  %v1635_v13 = vadd.f32 %v1634_v9, %v1633_v4  ;;  %v1507_v14 = vrot.slane %v1506_v10, 1  ;;  %v1641_v16 = vadd.f32 %v1640_v11, %v1639_v6  ;;  %v18265_v4 = vld [vmem:[#allocation15] sm:$0xff] }
 0x18c   : > { %v18226_v17 = vpop.f32.mrf.mxu0  ;;  %v18228_v18 = vpop.f32.mrf.mxu1  ;;  %v2002_v6 = vperm.slane %v18258_v60, 0 }
 0x18d   : > { %v1502_v19 = vadd.f32 %v1501_v12, %v1500_v8  ;;  %v1636_v20 = vrot.slane %v1635_v13, 1  ;;  %v1508_v21 = vadd.f32 %v1507_v14, %v1506_v10  ;;  %v1642_v22 = vrot.slane %v1641_v16, 1 }
 0x18e   : > { %v1521_v23 = vrot.slane %v18226_v17, 4  ;;  %v1620_v24 = vmul.f32 %v18226_v17, %v18226_v17  ;;  %v1527_v25 = vrot.slane %v18228_v18, 4  ;;  %v1621_v29 = vmul.f32 %v18228_v18, %v18228_v18 }
 0x18f   : > { %v18235_v26 = vmul.f32 %v18224_v15, %v1502_v19  ;;  %v1637_v27 = vadd.f32 %v1636_v20, %v1635_v13  ;;  %v18238_v28 = vmul.f32 %v18224_v15, %v1508_v21  ;;  %v1643_v30 = vadd.f32 %v1642_v22, %v1641_v16  ;;  %v18249_v37 = vpop.f32.mrf.mxu2  ;;  %v18263_v3 = vpop.f32.mrf.mxu3 }
 0x190   : > { %v1522_v31 = vadd.f32 %v1521_v23, %v18226_v17  ;;  %v1656_v32 = vrot.slane %v1620_v24, 4  ;;  %v1528_v33 = vadd.f32 %v1527_v25, %v18228_v18  ;;  %v1662_v44 = vrot.slane %v1621_v29, 4 }
 0x191   : > { %v1728_v34 = vmul.f32 %v1637_v27, %v18224_v15  ;;  %v1744_v35 = vmul.f32 %v18235_v26, %v18235_v26  ;;  %v1745_v36 = vmul.f32 %v18238_v28, %v18238_v28  ;;  %v1729_v38 = vmul.f32 %v1643_v30, %v18224_v15 }
 0x192   : > { %v1523_v40 = vrot.slane %v1522_v31, 2  ;;  %v1657_v41 = vadd.f32 %v1656_v32, %v1620_v24  ;;  %v1529_v42 = vrot.slane %v1528_v33, 2  ;;  %v1509_v45 = vrot.slane %v18249_v37, 4 }
 0x193   : > { %v1760_v39 = vsub.f32 %v1728_v34, %v1744_v35  ;;  %v1761_v43 = vsub.f32 %v1729_v38, %v1745_v36  ;;  %v1618_v46 = vmul.f32 %v18249_v37, %v18249_v37  ;;  %v1663_v52 = vadd.f32 %v1662_v44, %v1621_v29 }
 0x194   : > { %v1524_v48 = vadd.f32 %v1523_v40, %v1522_v31  ;;  %v1658_v49 = vrot.slane %v1657_v41, 2  ;;  %v1530_v50 = vadd.f32 %v1529_v42, %v1528_v33  ;;  %v1510_v53 = vadd.f32 %v1509_v45, %v18249_v37 }
 0x195   : > { %v1776_v47 = vmax.f32 %v1760_v39, 0.0  ;;  %v1777_v51 = vmax.f32 %v1761_v43, 0.0  ;;  %v1644_v59 = vrot.slane %v1618_v46, 4  ;;  %v1664_v63 = vrot.slane %v1663_v52, 2 }
 0x196   : > { %v1525_v55 = vrot.slane %v1524_v48, 1  ;;  %v1659_v58 = vadd.f32 %v1658_v49, %v1657_v41  ;;  %v1531_v62 = vrot.slane %v1530_v50, 1  ;;  %v1511_v0 = vrot.slane %v1510_v53, 2 }
 0x197   : > { %v18256_v54 = vadd.f32 1e-05, %v1776_v47  ;;  %v18260_v61 = vadd.f32 1e-05, %v1777_v51  ;;  %v1665_v9 = vadd.f32 %v1664_v63, %v1663_v52  ;;  %v1645_v12 = vadd.f32 %v1644_v59, %v1618_v46  ;;  %v18301_v47 = vpop.f32.mrf.mxu0 }
 0x198   : > { %v1526_v1 = vadd.f32 %v1525_v55, %v1524_v48  ;;  %v1660_v2 = vrot.slane %v1659_v58, 1  ;;  %v1532_v5 = vadd.f32 %v1531_v62, %v1530_v50  ;;  %v1512_v11 = vadd.f32 %v1511_v0, %v1510_v53 }
 0x199   : > { %17199 = vrsqrt.f32 %v18256_v54  ;;  %v1515_v13 = vrot.slane %v18263_v3, 4  ;;  %v2052_v14 = vperm.slane %v18265_v4, 0  ;;  %v1666_v20 = vrot.slane %v1665_v9, 1 }
 0x19a   : > { %17201 = vrsqrt.f32 %v18260_v61  ;;  %v18270_v7 = vmul.f32 %v18224_v15, %v1526_v1  ;;  %v1661_v8 = vadd.f32 %v1660_v2, %v1659_v58  ;;  %v18273_v10 = vmul.f32 %v18224_v15, %v1532_v5 }
 0x19b   : > { %v1792_v21 = vsub.f32 %v18212_v56, %v18235_v26  ;;  %v1793_v22 = vsub.f32 %v18214_v57, %v18238_v28  ;;  %v1513_v24 = vrot.slane %v1512_v11, 1  ;;  %v1667_v29 = vadd.f32 %v1666_v20, %v1665_v9 }
 0x19c   : > { %v1732_v16 = vmul.f32 %v1661_v8, %v18224_v15  ;;  %v1748_v19 = vmul.f32 %v18270_v7, %v18270_v7  ;;  %v1749_v23 = vmul.f32 %v18273_v10, %v18273_v10  ;;  %v1646_v30 = vrot.slane %v1645_v12, 2 }
 0x19d   : > { %v1516_v31 = vadd.f32 %v1515_v13, %v18263_v3  ;;  %v2003_v34 = vperm.slane %v18258_v60, 1  ;;  %v2053_v56 = vperm.slane %v18265_v4, 1  ;;  %v1514_v26 = vadd.f32 %v1513_v24, %v1512_v11 }
 0x19e   : > { %v1764_v27 = vsub.f32 %v1732_v16, %v1748_v19  ;;  %vm1830_vm3 = vweird.f32 %v18256_v54  ;;  %v1733_v35 = vmul.f32 %v1667_v29, %v18224_v15  ;;  %v1647_v39 = vadd.f32 %v1646_v30, %v1645_v12 }
 0x19f   : > { %v17200_v25 = vpop.eup %17199  ;;  %v18294_v38 = vmul.f32 %v18224_v15, %v1514_v26  ;;  %v1517_v40 = vrot.slane %v1516_v31, 2  ;;  %v1619_v44 = vmul.f32 %v18263_v3, %v18263_v3  ;;  %vm1840_vm5 = vweird.f32 %v18260_v61 }
 0x1a0   : > { %v17202_v32 = vpop.eup %17201  ;;  %v1825_v33 = vmul.f32 %v17200_v25, %v18256_v54  ;;  %v1780_v28 = vmax.f32 %v1764_v27, 0.0  ;;  %v1765_v43 = vsub.f32 %v1733_v35, %v1749_v23  ;;  %vm1831_vm4 = vweird.f32 %v17200_v25 }
 0x1a1   : > { %v1835_v57 = vmul.f32 %v17202_v32, %v18260_v61  ;;  %v1648_v46 = vrot.slane %v1647_v39, 1  ;;  %vm1841_vm6 = vweird.f32 %v17202_v32  ;;  %v1746_v52 = vmul.f32 %v18294_v38, %v18294_v38  ;;  %vm1832_vm7 = vmor %vm1830_vm3, %vm1831_vm4 }
 0x1a2   : > { %v1826_v36 = vmul.f32 %v17200_v25, %v1825_v33  ;;  %v18296_v42 = vadd.f32 1e-05, %v1780_v28  ;;  %v1781_v49 = vmax.f32 %v1765_v43, 0.0  ;;  %v1518_v53 = vadd.f32 %v1517_v40, %v1516_v31  ;;  %vm1842_vm8 = vmor %vm1840_vm5, %vm1841_vm6  ;;  %v18341_v40 = vpop.f32.mrf.mxu1 }
 0x1a3   : > { %v1836_v41 = vmul.f32 %v17202_v32, %v1835_v57  ;;  %v1649_v51 = vadd.f32 %v1648_v46, %v1647_v39  ;;  %v1650_v59 = vrot.slane %v1619_v44, 4  ;;  %v1545_v62 = vrot.slane %v18301_v47, 4 }
 0x1a4   : > { %v1827_v45 = vmul.f32 0.5, %v1826_v36  ;;  %17203 = vrsqrt.f32 %v18296_v42  ;;  %v18306_v58 = vadd.f32 1e-05, %v1781_v49  ;;  %v2006_v0 = vperm.slane %v18258_v60, 4 }
 0x1a5   : > { %v1837_v48 = vmul.f32 0.5, %v1836_v41  ;;  %v1730_v1 = vmul.f32 %v1649_v51, %v18224_v15  ;;  %v1519_v2 = vrot.slane %v1518_v53, 1  ;;  %v2056_v8 = vperm.slane %v18265_v4, 4 }
 0x1a6   : > { %v1828_v50 = vsub.f32 1.5, %v1827_v45  ;;  %17205 = vrsqrt.f32 %v18306_v58  ;;  %v1651_v9 = vadd.f32 %v1650_v59, %v1619_v44  ;;  %v1624_v16 = vmul.f32 %v18301_v47, %v18301_v47 }
 0x1a7   : > { %v1838_v55 = vsub.f32 1.5, %v1837_v48  ;;  %v1762_v12 = vsub.f32 %v1730_v1, %v1746_v52  ;;  %v1520_v13 = vadd.f32 %v1519_v2, %v1518_v53  ;;  %v1546_v24 = vadd.f32 %v1545_v62, %v18301_v47 }
 0x1a8   : > { %v1829_v63 = vmul.f32 %v17200_v25, %v1828_v50  ;;  %v1652_v23 = vrot.slane %v1651_v9, 2  ;;  %v1796_v31 = vsub.f32 %v18226_v17, %v18270_v7  ;;  %v1680_v39 = vrot.slane %v1624_v16, 4 }
 0x1a9   : > { %v1839_v5 = vmul.f32 %v17202_v32, %v1838_v55  ;;  %v1778_v30 = vmax.f32 %v1762_v12, 0.0  ;;  %v18329_v33 = vmul.f32 %v18224_v15, %v1520_v13  ;;  %vm1870_vm9 = vweird.f32 %v18296_v42  ;;  %v18354_v13 = vpop.f32.mrf.mxu2 }
 0x1aa   : > { %v1833_v11 = vsel %vm1832_vm7, %v17200_v25, %v1829_v63  ;;  %v17204_v19 = vpop.eup %17203  ;;  %v2007_v25 = vperm.slane %v18258_v60, 5  ;;  %v1681_v46 = vadd.f32 %v1680_v39, %v1624_v16  ;;  %v1551_v48 = vrot.slane %v18341_v40, 4 }
 0x1ab   : > { %v1984_v20 = vmul.f32 %v1833_v11, %v1792_v21  ;;  %v1843_v54 = vsel %vm1842_vm8, %v17202_v32, %v1839_v5  ;;  %v1865_v29 = vmul.f32 %v17204_v19, %v18296_v42  ;;  %v1653_v21 = vadd.f32 %v1652_v23, %v1651_v9 }
 0x1ac   : > { %v1985_v27 = vmul.f32 %v1843_v54, %v1793_v22  ;;  %v1797_v22 = vsub.f32 %v18228_v18, %v18273_v10  ;;  %v18333_v57 = vadd.f32 1e-05, %v1778_v30  ;;  %v17206_v28 = vpop.eup %17205  ;;  %vm1871_vm10 = vweird.f32 %v17204_v19 }
 0x1ad   : > { %v2034_v61 = vmul.f32 %v2002_v6, %v1984_v20  ;;  %v1866_v26 = vmul.f32 %v17204_v19, %v1865_v29  ;;  %v1654_v36 = vrot.slane %v1653_v21, 1  ;;  %v1547_v6 = vrot.slane %v1546_v24, 2  ;;  %vm1872_vm11 = vmor %vm1870_vm9, %vm1871_vm10 }
 0x1ae   : > { %v2035_v32 = vmul.f32 %v2003_v34, %v1985_v27  ;;  %v1875_v34 = vmul.f32 %v17206_v28, %v18306_v58  ;;  %17207 = vrsqrt.f32 %v18333_v57  ;;  %v1625_v52 = vmul.f32 %v18341_v40, %v18341_v40 }
 0x1af   : > { %v2084_v35 = vadd.f32 %v2052_v14, %v2034_v61  ;;  %v1867_v7 = vmul.f32 0.5, %v1866_v26  ;;  %v1655_v10 = vadd.f32 %v1654_v36, %v1653_v21  ;;  %v1747_v14 = vmul.f32 %v18329_v33, %v18329_v33 }
 0x1b0   : > { %v2085_v17 = vadd.f32 %v2053_v56, %v2035_v32  ;;  %v1876_v44 = vmul.f32 %v17206_v28, %v1875_v34  ;;  %v1548_v45 = vadd.f32 %v1547_v6, %v1546_v24  ;;  %vm1880_vm12 = vweird.f32 %v18306_v58 }
 0x1b1   : > { %v2100_v18 = vmax.f32 %v2084_v35, 0.0  ;;  %v1868_v43 = vsub.f32 1.5, %v1867_v7  ;;  %v1731_v56 = vmul.f32 %v1655_v10, %v18224_v15  ;;  %v1682_v59 = vrot.slane %v1681_v46, 2 }
 0x1b2   : > { %v2101_v41 = vmax.f32 %v2085_v17, 0.0  ;;  %v1877_v51 = vmul.f32 0.5, %v1876_v44  ;;  %v1549_v55 = vrot.slane %v1548_v45, 1  ;;  %vm1881_vm13 = vweird.f32 %v17206_v28 }
 0x1b3   : > { %v1869_v50 = vmul.f32 %v17204_v19, %v1868_v43  ;;  %v1763_v53 = vsub.f32 %v1731_v56, %v1747_v14  ;;  %v1552_v1 = vadd.f32 %v1551_v48, %v18341_v40  ;;  %v1683_v12 = vadd.f32 %v1682_v59, %v1681_v46  ;;  %vm1882_vm14 = vmor %vm1880_vm12, %vm1881_vm13 }
 0x1b4   : > { %v2116_v49 = vpack.c.bf16 %v2101_v41, %v2100_v18  ;;  %v1878_v63 = vsub.f32 1.5, %v1877_v51  ;;  %v17208_v2 = vpop.eup %17207  ;;  %v1550_v11 = vadd.f32 %v1549_v55, %v1548_v45  ;;  %v2057_v16 = vperm.slane %v18265_v4, 5 }
 0x1b5   : > { %v1873_v62 = vsel %vm1872_vm11, %v17204_v19, %v1869_v50  ;;  %v1779_v9 = vmax.f32 %v1763_v53, 0.0  ;;  %v1845_v20 = vmul.f32 %v17208_v2, %v18333_v57  ;;  %v1686_v54 = vrot.slane %v1625_v52, 4 }
 0x1b6   : > { %2124 = vst [vmem:[#allocation2] sm:$0xff] %v2116_v49  ;;  %v1988_v5 = vmul.f32 %v1873_v62, %v1796_v31  ;;  %v1879_v42 = vmul.f32 %v17206_v28, %v1878_v63  ;;  %v18365_v24 = vmul.f32 %v18224_v15, %v1550_v11  ;;  %v1684_v27 = vrot.slane %v1683_v12, 1  ;;  %v18397_v11 = vpop.f32.mrf.mxu0 }
 0x1b7   : > { %v18362_v23 = vadd.f32 1e-05, %v1779_v9  ;;  %v1846_v30 = vmul.f32 %v17208_v2, %v1845_v20  ;;  %v1553_v61 = vrot.slane %v1552_v1, 2  ;;  %v1533_v31 = vrot.slane %v18354_v13, 4 }
 0x1b8   : > { %v2038_v19 = vmul.f32 %v2006_v0, %v1988_v5  ;;  %v1883_v29 = vsel %vm1882_vm14, %v17206_v28, %v1879_v42  ;;  %v2004_v0 = vperm.slane %v18258_v60, 2  ;;  %v1794_v58 = vsub.f32 %v18249_v37, %v18294_v38  ;;  %v18382_v37 = vpop.f32.mrf.mxu3 }
 0x1b9   : > { %v1989_v32 = vmul.f32 %v1883_v29, %v1797_v22  ;;  %17209 = vrsqrt.f32 %v18362_v23  ;;  %v1847_v26 = vmul.f32 0.5, %v1846_v30  ;;  %v1685_v35 = vadd.f32 %v1684_v27, %v1683_v12 }
 0x1ba   : > { %v2088_v21 = vadd.f32 %v2056_v8, %v2038_v19  ;;  %v1752_v28 = vmul.f32 %v18365_v24, %v18365_v24  ;;  %vm1851_vm15 = vweird.f32 %v17208_v2  ;;  %v1554_v6 = vadd.f32 %v1553_v61, %v1552_v1 }
 0x1bb   : > { %v2039_v36 = vmul.f32 %v2007_v25, %v1989_v32  ;;  %v1687_v39 = vadd.f32 %v1686_v54, %v1625_v52  ;;  %v1848_v8 = vsub.f32 1.5, %v1847_v26  ;;  %v1736_v22 = vmul.f32 %v1685_v35, %v18224_v15 }
 0x1bc   : > { %v1534_v17 = vadd.f32 %v1533_v31, %v18354_v13  ;;  %v1622_v7 = vmul.f32 %v18354_v13, %v18354_v13  ;;  %v2104_v38 = vmax.f32 %v2088_v21, 0.0  ;;  %v1555_v18 = vrot.slane %v1554_v6, 1 }
 0x1bd   : > { %v2089_v34 = vadd.f32 %v2057_v16, %v2039_v36  ;;  %v1688_v10 = vrot.slane %v1687_v39, 2  ;;  %v1849_v14 = vmul.f32 %v17208_v2, %v1848_v8  ;;  %vm1850_vm0 = vweird.f32 %v18333_v57 }
 0x1be   : > { %v1768_v25 = vsub.f32 %v1736_v22, %v1752_v28  ;;  %v1535_v41 = vrot.slane %v1534_v17, 2  ;;  %vm1852_vm1 = vmor %vm1850_vm0, %vm1851_vm15  ;;  %v1556_v56 = vadd.f32 %v1555_v18, %v1554_v6  ;;  %v1539_v46 = vrot.slane %v18382_v37, 4 }
 0x1bf   : > { %v17210_v43 = vpop.eup %17209  ;;  %v2105_v44 = vmax.f32 %v2089_v34, 0.0  ;;  %v1689_v45 = vadd.f32 %v1688_v10, %v1687_v39  ;;  %v1853_v48 = vsel %vm1852_vm1, %v17208_v2, %v1849_v14  ;;  %v1668_v51 = vrot.slane %v1622_v7, 4 }
 0x1c0   : > { %v1855_v49 = vmul.f32 %v17210_v43, %v18362_v23  ;;  %v1784_v50 = vmax.f32 %v1768_v25, 0.0  ;;  %v1986_v53 = vmul.f32 %v1853_v48, %v1794_v58  ;;  %v18389_v55 = vmul.f32 %v18224_v15, %v1556_v56  ;;  %v18423_v48 = vpop.f32.mrf.mxu1 }
 0x1c1   : > { %v2118_v52 = vpack.c.bf16 %v2105_v44, %v2104_v38  ;;  %v1690_v57 = vrot.slane %v1689_v45, 1  ;;  %v1536_v63 = vadd.f32 %v1535_v41, %v1534_v17  ;;  %v2054_v1 = vperm.slane %v18265_v4, 2 }
 0x1c2   : > { %v1856_v59 = vmul.f32 %v17210_v43, %v1855_v49  ;;  %v18391_v62 = vadd.f32 1e-05, %v1784_v50  ;;  %v2005_v5 = vperm.slane %v18258_v60, 3  ;;  %v1753_v9 = vmul.f32 %v18389_v55, %v18389_v55  ;;  %v18425_v50 = vld [vmem:[#allocation13 + $0x8] sm:$0xff] }
 0x1c3   : > { %2127 = vst [vmem:[#allocation2 + $0x10] sm:$0xff] %v2118_v52  ;;  %v1691_v2 = vadd.f32 %v1690_v57, %v1689_v45  ;;  %v2036_v12 = vmul.f32 %v2004_v0, %v1986_v53  ;;  %v1537_v16 = vrot.slane %v1536_v63, 1  ;;  %vm1861_vm2 = vweird.f32 %v17210_v43 }
 0x1c4   : > { %v1857_v42 = vmul.f32 0.5, %v1856_v59  ;;  %17211 = vrsqrt.f32 %v18391_v62  ;;  %v1669_v54 = vadd.f32 %v1668_v51, %v1622_v7  ;;  %v1540_v19 = vadd.f32 %v1539_v46, %v18382_v37 }
 0x1c5   : > { %v1737_v20 = vmul.f32 %v1691_v2, %v18224_v15  ;;  %v1538_v29 = vadd.f32 %v1537_v16, %v1536_v63  ;;  %v1623_v30 = vmul.f32 %v18382_v37, %v18382_v37  ;;  %v1569_v61 = vrot.slane %v18397_v11, 4 }
 0x1c6   : > { %v1858_v27 = vsub.f32 1.5, %v1857_v42  ;;  %v1795_v31 = vsub.f32 %v18263_v3, %v18329_v33  ;;  %v1670_v32 = vrot.slane %v1669_v54, 2  ;;  %v1541_v0 = vrot.slane %v1540_v19, 2 }
 0x1c7   : > { %v1769_v21 = vsub.f32 %v1737_v20, %v1753_v9  ;;  %v2086_v58 = vadd.f32 %v2054_v1, %v2036_v12  ;;  %vm1860_vm3 = vweird.f32 %v18362_v23  ;;  %v1674_v35 = vrot.slane %v1623_v30, 4 }
 0x1c8   : > { %v1859_v26 = vmul.f32 %v17210_v43, %v1858_v27  ;;  %vm1862_vm4 = vmor %vm1860_vm3, %vm1861_vm2  ;;  %v18410_v36 = vmul.f32 %v18224_v15, %v1538_v29  ;;  %v1671_v6 = vadd.f32 %v1670_v32, %v1669_v54  ;;  %v1542_v39 = vadd.f32 %v1541_v0, %v1540_v19 }
 0x1c9   : > { %v1785_v28 = vmax.f32 %v1769_v21, 0.0  ;;  %v2055_v3 = vperm.slane %v18265_v4, 3  ;;  %vm1910_vm5 = vweird.f32 %v18391_v62  ;;  %v1570_v33 = vadd.f32 %v1569_v61, %v18397_v11 }
 0x1ca   : > { %v17212_v8 = vpop.eup %17211  ;;  %v1863_v22 = vsel %vm1862_vm4, %v17210_v43, %v1859_v26  ;;  %v1628_v38 = vmul.f32 %v18397_v11, %v18397_v11  ;;  %v2102_v34 = vmax.f32 %v2086_v58, 0.0  ;;  %v1672_v18 = vrot.slane %v1671_v6, 1 }
 0x1cb   : > { %v1987_v17 = vmul.f32 %v1863_v22, %v1795_v31  ;;  %v1905_v23 = vmul.f32 %v17212_v8, %v18391_v62  ;;  %v18416_v7 = vadd.f32 1e-05, %v1785_v28  ;;  %v1543_v10 = vrot.slane %v1542_v39, 1 }
 0x1cc   : > { %v1675_v14 = vadd.f32 %v1674_v35, %v1623_v30  ;;  %v1750_v43 = vmul.f32 %v18410_v36, %v18410_v36  ;;  %v1673_v44 = vadd.f32 %v1672_v18, %v1671_v6  ;;  %v1571_v46 = vrot.slane %v1570_v33, 2  ;;  %v18435_v30 = vld [vmem:[#allocation15 + $0x8] sm:$0xff] }
 0x1cd   : > { %v2037_v25 = vmul.f32 %v2005_v5, %v1987_v17  ;;  %v1906_v41 = vmul.f32 %v17212_v8, %v1905_v23  ;;  %17213 = vrsqrt.f32 %v18416_v7  ;;  %v1544_v56 = vadd.f32 %v1543_v10, %v1542_v39  ;;  %v18458_v10 = vpop.f32.mrf.mxu2 }
 0x1ce   : > { %v1676_v45 = vrot.slane %v1675_v14, 2  ;;  %vm1911_vm6 = vweird.f32 %v17212_v8  ;;  %v1704_v52 = vrot.slane %v1628_v38, 4  ;;  %v1734_v53 = vmul.f32 %v1673_v44, %v18224_v15 }
 0x1cf   : > { %v2087_v49 = vadd.f32 %v2055_v3, %v2037_v25  ;;  %v1907_v51 = vmul.f32 0.5, %v1906_v41  ;;  %v18429_v57 = vmul.f32 %v18224_v15, %v1544_v56  ;;  %v1572_v63 = vadd.f32 %v1571_v46, %v1570_v33  ;;  %vm1912_vm7 = vmor %vm1910_vm5, %vm1911_vm6 }
 0x1d0   : > { %v1677_v59 = vadd.f32 %v1676_v45, %v1675_v14  ;;  %v1705_v2 = vadd.f32 %v1704_v52, %v1628_v38  ;;  %v1575_v9 = vrot.slane %v18423_v48, 4  ;;  %v2010_v12 = vperm.slane %v18425_v50, 0 }
 0x1d1   : > { %v2103_v1 = vmax.f32 %v2087_v49, 0.0  ;;  %v1908_v5 = vsub.f32 1.5, %v1907_v51  ;;  %v1766_v42 = vsub.f32 %v1734_v53, %v1750_v43  ;;  %v1800_v19 = vsub.f32 %v18301_v47, %v18365_v24  ;;  %v18469_v53 = vpop.f32.mrf.mxu3 }
 0x1d2   : > { %v1678_v16 = vrot.slane %v1677_v59, 1  ;;  %v1573_v29 = vrot.slane %v1572_v63, 1  ;;  %v1751_v32 = vmul.f32 %v18429_v57, %v18429_v57  ;;  %v1706_v26 = vrot.slane %v1705_v2, 2 }
 0x1d3   : > { %v17214_v20 = vpop.eup %17213  ;;  %v2117_v54 = vpack.c.bf16 %v2103_v1, %v2102_v34  ;;  %v1909_v27 = vmul.f32 %v17212_v8, %v1908_v5  ;;  %v1782_v31 = vmax.f32 %v1766_v42, 0.0  ;;  %v1576_v47 = vadd.f32 %v1575_v9, %v18423_v48 }
 0x1d4   : > { %v1915_v61 = vmul.f32 %v17214_v20, %v18416_v7  ;;  %v1679_v21 = vadd.f32 %v1678_v16, %v1677_v59  ;;  %v1574_v58 = vadd.f32 %v1573_v29, %v1572_v63  ;;  %v2060_v6 = vperm.slane %v18435_v30, 0 }
 0x1d5   : > { %2125 = vst [vmem:[#allocation2 + $0x8] sm:$0xff] %v2117_v54  ;;  %v1913_v0 = vsel %vm1912_vm7, %v17212_v8, %v1909_v27  ;;  %v18444_v28 = vadd.f32 1e-05, %v1782_v31  ;;  %v1707_v39 = vadd.f32 %v1706_v26, %v1705_v2  ;;  %v1577_v22 = vrot.slane %v1576_v47, 2 }
 0x1d6   : > { %v1992_v24 = vmul.f32 %v1913_v0, %v1800_v19  ;;  %v1916_v35 = vmul.f32 %v17214_v20, %v1915_v61  ;;  %v1735_v62 = vmul.f32 %v1679_v21, %v18224_v15  ;;  %v1629_v3 = vmul.f32 %v18423_v48, %v18423_v48 }
 0x1d7   : > { %v2011_v8 = vperm.slane %v18425_v50, 1  ;;  %17215 = vrsqrt.f32 %v18444_v28  ;;  %v18453_v17 = vmul.f32 %v18224_v15, %v1574_v58  ;;  %v1801_v23 = vsub.f32 %v18341_v40, %v18389_v55 }
 0x1d8   : > { %v1917_v33 = vmul.f32 0.5, %v1916_v35  ;;  %v2061_v38 = vperm.slane %v18435_v30, 1  ;;  %v1767_v34 = vsub.f32 %v1735_v62, %v1751_v32  ;;  %v1708_v18 = vrot.slane %v1707_v39, 1 }
 0x1d9   : > { %v2042_v14 = vmul.f32 %v2010_v12, %v1992_v24  ;;  %vm1920_vm8 = vweird.f32 %v18416_v7  ;;  %vm1921_vm9 = vweird.f32 %v17214_v20  ;;  %v1578_v44 = vadd.f32 %v1577_v22, %v1576_v47 }
 0x1da   : > { %v1918_v25 = vsub.f32 1.5, %v1917_v33  ;;  %v1783_v41 = vmax.f32 %v1767_v34, 0.0  ;;  %v1709_v43 = vadd.f32 %v1708_v18, %v1707_v39  ;;  %v1710_v56 = vrot.slane %v1629_v3, 4  ;;  %vm1922_vm10 = vmor %vm1920_vm8, %vm1921_vm9 }
 0x1db   : > { %v1756_v46 = vmul.f32 %v18453_v17, %v18453_v17  ;;  %v1557_v40 = vrot.slane %v18458_v10, 4  ;;  %v1626_v55 = vmul.f32 %v18458_v10, %v18458_v10  ;;  %v1579_v7 = vrot.slane %v1578_v44, 1 }
 0x1dc   : > { %v1919_v45 = vmul.f32 %v17214_v20, %v1918_v25  ;;  %v18466_v49 = vadd.f32 1e-05, %v1783_v41  ;;  %v1740_v51 = vmul.f32 %v1709_v43, %v18224_v15  ;;  %v1711_v52 = vadd.f32 %v1710_v56, %v1629_v3  ;;  %v18491_v56 = vpop.f32.mrf.mxu2 }
 0x1dd   : > { %v17216_v59 = vpop.eup %17215  ;;  %v2092_v63 = vadd.f32 %v2060_v6, %v2042_v14  ;;  %v1798_v5 = vsub.f32 %v18354_v13, %v18410_v36  ;;  %v1558_v2 = vadd.f32 %v1557_v40, %v18458_v10  ;;  %v1692_v42 = vrot.slane %v1626_v55, 4 }
 0x1de   : > { %v1923_v1 = vsel %vm1922_vm10, %v17214_v20, %v1919_v45  ;;  %v1885_v12 = vmul.f32 %v17216_v59, %v18444_v28  ;;  %17217 = vrsqrt.f32 %v18466_v49  ;;  %v1772_v16 = vsub.f32 %v1740_v51, %v1756_v46 }
 0x1df   : > { %v1993_v9 = vmul.f32 %v1923_v1, %v1801_v23  ;;  %v1580_v54 = vadd.f32 %v1579_v7, %v1578_v44  ;;  %v1712_v19 = vrot.slane %v1711_v52, 2  ;;  %v1563_v27 = vrot.slane %v18469_v53, 4 }
 0x1e0   : > { %v1886_v61 = vmul.f32 %v17216_v59, %v1885_v12  ;;  %v2008_v20 = vperm.slane %v18258_v60, 6  ;;  %v1559_v31 = vrot.slane %v1558_v2, 2  ;;  %v2058_v13 = vperm.slane %v18265_v4, 6 }
 0x1e1   : > { %v2043_v29 = vmul.f32 %v2011_v8, %v1993_v9  ;;  %v1788_v36 = vmax.f32 %v1772_v16, 0.0  ;;  %v18480_v21 = vmul.f32 %v18224_v15, %v1580_v54  ;;  %v1713_v32 = vadd.f32 %v1712_v19, %v1711_v52 }
 0x1e2   : > { %v2108_v0 = vmax.f32 %v2092_v63, 0.0  ;;  %v1887_v26 = vmul.f32 0.5, %v1886_v61  ;;  %v1560_v47 = vadd.f32 %v1559_v31, %v1558_v2  ;;  %v1693_v62 = vadd.f32 %v1692_v42, %v1626_v55 }
 0x1e3   : > { %v2093_v58 = vadd.f32 %v2061_v38, %v2043_v29  ;;  %v18482_v24 = vadd.f32 1e-05, %v1788_v36  ;;  %v1714_v35 = vrot.slane %v1713_v32, 1  ;;  %v1564_v6 = vadd.f32 %v1563_v27, %v18469_v53 }
 0x1e4   : > { %v17218_v39 = vpop.eup %17217  ;;  %v1888_v3 = vsub.f32 1.5, %v1887_v26  ;;  %vm1891_vm11 = vweird.f32 %v17216_v59  ;;  %v1561_v33 = vrot.slane %v1560_v47, 1  ;;  %vm1890_vm12 = vweird.f32 %v18444_v28 }
 0x1e5   : > { %v2109_v22 = vmax.f32 %v2093_v58, 0.0  ;;  %v1895_v8 = vmul.f32 %v17218_v39, %v18466_v49  ;;  %17219 = vrsqrt.f32 %v18482_v24  ;;  %v1757_v23 = vmul.f32 %v18480_v21, %v18480_v21  ;;  %vm1892_vm13 = vmor %vm1890_vm12, %vm1891_vm11  ;;  %v18515_v58 = vpop.f32.mrf.mxu3 }
 0x1e6   : > { %v1889_v34 = vmul.f32 %v17216_v59, %v1888_v3  ;;  %v1715_v18 = vadd.f32 %v1714_v35, %v1713_v32  ;;  %v1562_v14 = vadd.f32 %v1561_v33, %v1560_v47  ;;  %v2009_v41 = vperm.slane %v18258_v60, 7 }
 0x1e7   : > { %v2120_v38 = vpack.c.bf16 %v2109_v22, %v2108_v0  ;;  %v1896_v25 = vmul.f32 %v17218_v39, %v1895_v8  ;;  %v1694_v43 = vrot.slane %v1693_v62, 2  ;;  %v1565_v44 = vrot.slane %v1564_v6, 2 }
 0x1e8   : > { %v1893_v28 = vsel %vm1892_vm13, %v17216_v59, %v1889_v34  ;;  %v1799_v45 = vsub.f32 %v18382_v37, %v18429_v57  ;;  %v1741_v46 = vmul.f32 %v1715_v18, %v18224_v15  ;;  %v18497_v40 = vmul.f32 %v18224_v15, %v1562_v14 }
 0x1e9   : > { %2130 = vst [vmem:[#allocation2 + $0x20] sm:$0xff] %v2120_v38  ;;  %v1990_v55 = vmul.f32 %v1893_v28, %v1798_v5  ;;  %v1897_v51 = vmul.f32 0.5, %v1896_v25  ;;  %v1695_v7 = vadd.f32 %v1694_v43, %v1693_v62  ;;  %v1566_v52 = vadd.f32 %v1565_v44, %v1564_v6 }
 0x1ea   : > { %v2059_v60 = vperm.slane %v18265_v4, 7  ;;  %v1773_v63 = vsub.f32 %v1741_v46, %v1757_v23  ;;  %v1627_v1 = vmul.f32 %v18469_v53, %v18469_v53  ;;  %v1581_v59 = vrot.slane %v18491_v56, 4 }
 0x1eb   : > { %v17220_v2 = vpop.eup %17219  ;;  %v2040_v9 = vmul.f32 %v2008_v20, %v1990_v55  ;;  %v1898_v37 = vsub.f32 1.5, %v1897_v51  ;;  %vm1901_vm14 = vweird.f32 %v17218_v39  ;;  %v1696_v57 = vrot.slane %v1695_v7, 1 }
 0x1ec   : > { %vm1900_vm15 = vweird.f32 %v18466_v49  ;;  %v1945_v5 = vmul.f32 %v17220_v2, %v18482_v24  ;;  %v1789_v12 = vmax.f32 %v1773_v63, 0.0  ;;  %v1567_v42 = vrot.slane %v1566_v52, 1 }
 0x1ed   : > { %v2090_v16 = vadd.f32 %v2058_v13, %v2040_v9  ;;  %v1899_v54 = vmul.f32 %v17218_v39, %v1898_v37  ;;  %v1697_v4 = vadd.f32 %v1696_v57, %v1695_v7  ;;  %v1754_v19 = vmul.f32 %v18497_v40, %v18497_v40  ;;  %vm1902_vm0 = vmor %vm1900_vm15, %vm1901_vm14 }
 0x1ee   : > { %v1946_v27 = vmul.f32 %v17220_v2, %v1945_v5  ;;  %v18507_v29 = vadd.f32 1e-05, %v1789_v12  ;;  %v1698_v61 = vrot.slane %v1627_v1, 4  ;;  %v1582_v20 = vadd.f32 %v1581_v59, %v18491_v56 }
 0x1ef   : > { %v1903_v31 = vsel %vm1902_vm0, %v17218_v39, %v1899_v54  ;;  %v1804_v49 = vsub.f32 %v18397_v11, %v18453_v17  ;;  %vm1950_vm1 = vweird.f32 %v18482_v24  ;;  %v1738_v13 = vmul.f32 %v1697_v4, %v18224_v15 }
 0x1f0   : > { %v1991_v36 = vmul.f32 %v1903_v31, %v1799_v45  ;;  %v1947_v32 = vmul.f32 0.5, %v1946_v27  ;;  %17221 = vrsqrt.f32 %v18507_v29  ;;  %v1568_v0 = vadd.f32 %v1567_v42, %v1566_v52 }
 0x1f1   : > { %v2106_v26 = vmax.f32 %v2090_v16, 0.0  ;;  %vm1951_vm2 = vweird.f32 %v17220_v2  ;;  %v1770_v47 = vsub.f32 %v1738_v13, %v1754_v19  ;;  %v1699_v35 = vadd.f32 %v1698_v61, %v1627_v1 }
 0x1f2   : > { %v2041_v62 = vmul.f32 %v2009_v41, %v1991_v36  ;;  %v1948_v6 = vsub.f32 1.5, %v1947_v32  ;;  %v1583_v39 = vrot.slane %v1582_v20, 2  ;;  %v1630_v11 = vmul.f32 %v18491_v56, %v18491_v56  ;;  %vm1952_vm3 = vmor %vm1950_vm1, %vm1951_vm2 }
 0x1f3   : > { %v1786_v17 = vmax.f32 %v1770_v47, 0.0  ;;  %v1700_v22 = vrot.slane %v1699_v35, 2  ;;  %v1587_v3 = vrot.slane %v18515_v58, 4  ;;  %v1631_v33 = vmul.f32 %v18515_v58, %v18515_v58 }
 0x1f4   : > { %v2091_v8 = vadd.f32 %v2059_v60, %v2041_v62  ;;  %v1949_v23 = vmul.f32 %v17220_v2, %v1948_v6  ;;  %v18523_v38 = vmul.f32 %v18224_v15, %v1568_v0  ;;  %v1584_v34 = vadd.f32 %v1583_v39, %v1582_v20 }
 0x1f5   : > { %v18528_v18 = vadd.f32 1e-05, %v1786_v17  ;;  %v1701_v14 = vadd.f32 %v1700_v22, %v1699_v35  ;;  %v1716_v25 = vrot.slane %v1630_v11, 4  ;;  %v1588_v41 = vadd.f32 %v1587_v3, %v18515_v58 }
 0x1f6   : > { %v17222_v43 = vpop.eup %17221  ;;  %v2107_v44 = vmax.f32 %v2091_v8, 0.0  ;;  %v1953_v28 = vsel %vm1952_vm3, %v17220_v2, %v1949_v23  ;;  %v1585_v45 = vrot.slane %v1584_v34, 1  ;;  %v1722_v46 = vrot.slane %v1631_v33, 4 }
 0x1f7   : > { %v1955_v55 = vmul.f32 %v17222_v43, %v18507_v29  ;;  %17223 = vrsqrt.f32 %v18528_v18  ;;  %v1996_v7 = vmul.f32 %v1953_v28, %v1804_v49  ;;  %v2014_v24 = vperm.slane %v18425_v50, 4 }
 0x1f8   : > { %v2119_v51 = vpack.c.bf16 %v2107_v44, %v2106_v26  ;;  %v1702_v52 = vrot.slane %v1701_v14, 1  ;;  %v1586_v63 = vadd.f32 %v1585_v45, %v1584_v34  ;;  %v1717_v1 = vadd.f32 %v1716_v25, %v1630_v11 }
 0x1f9   : > { %v1956_v60 = vmul.f32 %v17222_v43, %v1955_v55  ;;  %v1755_v9 = vmul.f32 %v18523_v38, %v18523_v38  ;;  %v1589_v2 = vrot.slane %v1588_v41, 2  ;;  %v1723_v37 = vadd.f32 %v1722_v46, %v1631_v33 }
 0x1fa   : > { %2128 = vst [vmem:[#allocation2 + $0x18] sm:$0xff] %v2119_v51  ;;  %v1703_v59 = vadd.f32 %v1702_v52, %v1701_v14  ;;  %v2064_v57 = vperm.slane %v18435_v30, 4  ;;  %vm1960_vm4 = vweird.f32 %v18507_v29  ;;  %v1718_v12 = vrot.slane %v1717_v1, 2 }
 0x1fb   : > { %v1957_v5 = vmul.f32 0.5, %v1956_v60  ;;  %v2046_v42 = vmul.f32 %v2014_v24, %v1996_v7  ;;  %v1590_v54 = vadd.f32 %v1589_v2, %v1588_v41  ;;  %v1724_v4 = vrot.slane %v1723_v37, 2 }
 0x1fc   : > { %v1739_v16 = vmul.f32 %v1703_v59, %v18224_v15  ;;  %vm1961_vm5 = vweird.f32 %v17222_v43  ;;  %v18540_v61 = vmul.f32 %v18224_v15, %v1586_v63  ;;  %v1719_v20 = vadd.f32 %v1718_v12, %v1717_v1 }
 0x1fd   : > { %v17224_v19 = vpop.eup %17223  ;;  %v1958_v27 = vsub.f32 1.5, %v1957_v5  ;;  %v1805_v31 = vsub.f32 %v18423_v48, %v18480_v21  ;;  %v2015_v49 = vperm.slane %v18425_v50, 5  ;;  %v2065_v0 = vperm.slane %v18435_v30, 5  ;;  %vm1962_vm6 = vmor %vm1960_vm4, %vm1961_vm5 }
 0x1fe   : > { %v1925_v13 = vmul.f32 %v17224_v19, %v18528_v18  ;;  %v1771_v36 = vsub.f32 %v1739_v16, %v1755_v9  ;;  %v1720_v26 = vrot.slane %v1719_v20, 1  ;;  %v1591_v47 = vrot.slane %v1590_v54, 1 }
 0x1ff   : > { %v1959_v32 = vmul.f32 %v17222_v43, %v1958_v27  ;;  %v2096_v35 = vadd.f32 %v2064_v57, %v2046_v42  ;;  %v1725_v39 = vadd.f32 %v1724_v4, %v1723_v37  ;;  %v1758_v48 = vmul.f32 %v18540_v61, %v18540_v61 }
 0x200   : > { %v1926_v62 = vmul.f32 %v17224_v19, %v1925_v13  ;;  %v1787_v6 = vmax.f32 %v1771_v36, 0.0  ;;  %v1721_v17 = vadd.f32 %v1720_v26, %v1719_v20  ;;  %v1592_v21 = vadd.f32 %v1591_v47, %v1590_v54 }
 0x201   : > { %v1963_v11 = vsel %vm1962_vm6, %v17222_v43, %v1959_v32  ;;  %v1726_v8 = vrot.slane %v1725_v39, 1  ;;  %v2112_v44 = vmax.f32 %v2096_v35, 0.0  ;;  %vm1931_vm7 = vweird.f32 %v17224_v19 }
 0x202   : > { %v1997_v22 = vmul.f32 %v1963_v11, %v1805_v31  ;;  %v1927_v3 = vmul.f32 0.5, %v1926_v62  ;;  %v1819_v33 = vadd.f32 1e-05, %v1787_v6  ;;  %v1742_v23 = vmul.f32 %v1721_v17, %v18224_v15 }
 0x203   : > { %v18553_v34 = vmul.f32 %v18224_v15, %v1592_v21  ;;  %v1727_v41 = vadd.f32 %v1726_v8, %v1725_v39  ;;  %vm1930_vm8 = vweird.f32 %v18528_v18  ;;  %v1802_v59 = vsub.f32 %v18458_v10, %v18497_v40 }
 0x204   : > { %v2047_v29 = vmul.f32 %v2015_v49, %v1997_v22  ;;  %v1928_v14 = vsub.f32 1.5, %v1927_v3  ;;  %17225 = vrsqrt.f32 %v1819_v33  ;;  %v1774_v25 = vsub.f32 %v1742_v23, %v1758_v48  ;;  %vm1932_vm9 = vmor %vm1930_vm8, %vm1931_vm7 }
 0x205   : > { %v1759_v43 = vmul.f32 %v18553_v34, %v18553_v34  ;;  %v1743_v55 = vmul.f32 %v1727_v41, %v18224_v15  ;;  %v17857_v37 = vmov 0.0   ;;  %v2012_v57 = vperm.slane %v18425_v50, 2 }
 0x206   : > { %v2097_v28 = vadd.f32 %v2065_v0, %v2047_v29  ;;  %v1929_v45 = vmul.f32 %v17224_v19, %v1928_v14  ;;  %v1790_v46 = vmax.f32 %v1774_v25, 0.0  ;;  %2135 = vst [vmem:[#allocation3 + $0x30] sm:$0xff] %v17857_v37  ;;  %v2062_v10 = vperm.slane %v18435_v30, 2 }
 0x207   : > { %v1775_v24 = vsub.f32 %v1743_v55, %v1759_v43  ;;  %2136 = vst [vmem:[#allocation3] sm:$0xff] %v17857_v37  ;;  %vm1940_vm11 = vweird.f32 %v1819_v33  ;;  %v1803_v4 = vsub.f32 %v18469_v53, %v18523_v38  ;;  %v2063_v36 = vperm.slane %v18435_v30, 3 }
 0x208   : > { %v2113_v51 = vmax.f32 %v2097_v28, 0.0  ;;  %v1822_v7 = vadd.f32 1e-05, %v1790_v46  ;;  %v1933_v63 = vsel %vm1932_vm9, %v17224_v19, %v1929_v45  ;;  %2137 = vst [vmem:[#allocation3 + $0x58] sm:$0xff] %v17857_v37  ;;  %v2013_v19 = vperm.slane %v18425_v50, 3 }
 0x209   : > { %v1791_v9 = vmax.f32 %v1775_v24, 0.0  ;;  %v1994_v15 = vmul.f32 %v1933_v63, %v1802_v59  ;;  %2138 = vst [vmem:[#allocation3 + $0x18] sm:$0xff] %v17857_v37  ;;  %v1806_v6 = vsub.f32 %v18491_v56, %v18540_v61  ;;  %v2016_v39 = vperm.slane %v18425_v50, 6 }
 0x20a   : > { %v17226_v52 = vpop.eup %17225  ;;  %v2122_v60 = vpack.c.bf16 %v2113_v51, %v2112_v44  ;;  %17227 = vrsqrt.f32 %v1822_v7  ;;  %2139 = vst [vmem:[#allocation3 + $0x50] sm:$0xff] %v17857_v37  ;;  %vm1970_vm14 = vweird.f32 %v1822_v7  ;;  %v1807_v56 = vsub.f32 %v18515_v58, %v18553_v34 }
 0x20b   : > { %v1935_v1 = vmul.f32 %v17226_v52, %v1819_v33  ;;  %v1823_v18 = vadd.f32 1e-05, %v1791_v9  ;;  %vm1941_vm10 = vweird.f32 %v17226_v52  ;;  %v2044_v16 = vmul.f32 %v2012_v57, %v1994_v15  ;;  %2140 = vst [vmem:[#allocation3 + $0x68] sm:$0xff] %v17857_v37 }
 0x20c   : > { %2133 = vst [vmem:[#allocation2 + $0x30] sm:$0xff] %v2122_v60  ;;  %vm1942_vm12 = vmor %vm1940_vm11, %vm1941_vm10  ;;  %v2066_v33 = vperm.slane %v18435_v30, 6  ;;  %v2017_v61 = vperm.slane %v18425_v50, 7  ;;  %v2067_v41 = vperm.slane %v18435_v30, 7 }
 0x20d   : > { %v1936_v2 = vmul.f32 %v17226_v52, %v1935_v1  ;;  %17229 = vrsqrt.f32 %v1823_v18  ;;  %2141 = vst [vmem:[#allocation3 + $0x8] sm:$0xff] %v17857_v37  ;;  %v2094_v49 = vadd.f32 %v2062_v10, %v2044_v16  ;;  %vm1980_vm1 = vweird.f32 %v1823_v18 }
 0x20e   : > { %2142 = vst [vmem:[#allocation3 + $0x48] sm:$0xff] %v17857_v37 }
 0x20f   : > { %v1937_v5 = vmul.f32 0.5, %v1936_v2  ;;  %2143 = vst [vmem:[#allocation3 + $0x40] sm:$0xff] %v17857_v37  ;;  %v2110_v38 = vmax.f32 %v2094_v49, 0.0 }
 0x210   : > { %v17228_v12 = vpop.eup %17227  ;;  %2144 = vst [vmem:[#allocation3 + $0x20] sm:$0xff] %v17857_v37 }
 0x211   : > { %v1938_v42 = vsub.f32 1.5, %v1937_v5  ;;  %v1965_v40 = vmul.f32 %v17228_v12, %v1822_v7  ;;  %2145 = vst [vmem:[#allocation3 + $0x10] sm:$0xff] %v17857_v37  ;;  %vm1971_vm13 = vweird.f32 %v17228_v12 }
 0x212   : > { %2146 = vst [vmem:[#allocation3 + $0x38] sm:$0xff] %v17857_v37  ;;  %vm1972_vm15 = vmor %vm1970_vm14, %vm1971_vm13 }
 0x213   : > { %v1939_v54 = vmul.f32 %v17226_v52, %v1938_v42  ;;  %v1966_v27 = vmul.f32 %v17228_v12, %v1965_v40  ;;  %v17230_v31 = vpop.eup %17229  ;;  %2147 = vst [vmem:[#allocation3 + $0x60] sm:$0xff] %v17857_v37 }
 0x214   : > { %v1975_v0 = vmul.f32 %v17230_v31, %v1823_v18  ;;  %2148 = vst [vmem:[#allocation3 + $0x70] sm:$0xff] %v17857_v37  ;;  %vm1981_vm0 = vweird.f32 %v17230_v31 }
 0x215   : > { %v1943_v20 = vsel %vm1942_vm12, %v17226_v52, %v1939_v54  ;;  %v1967_v32 = vmul.f32 0.5, %v1966_v27  ;;  %2149 = vst [vmem:[#allocation3 + $0x78] sm:$0xff] %v17857_v37  ;;  %vm1982_vm2 = vmor %vm1980_vm1, %vm1981_vm0 }
 0x216   : > { %v1995_v13 = vmul.f32 %v1943_v20, %v1803_v4  ;;  %v1976_v53 = vmul.f32 %v17230_v31, %v1975_v0  ;;  %2150 = vst [vmem:[#allocation3 + $0x28] sm:$0xff] %v17857_v37 }
 0x217   : > { %v1968_v47 = vsub.f32 1.5, %v1967_v32 }
 0x218   : > { %v2045_v26 = vmul.f32 %v2013_v19, %v1995_v13  ;;  %v1977_v11 = vmul.f32 0.5, %v1976_v53 }
 0x219   : > { %v1969_v62 = vmul.f32 %v17228_v12, %v1968_v47 }
 0x21a   : > { %v2095_v35 = vadd.f32 %v2063_v36, %v2045_v26  ;;  %v1978_v22 = vsub.f32 1.5, %v1977_v11 }
 0x21b   : > { %v1973_v48 = vsel %vm1972_vm15, %v17228_v12, %v1969_v62 }
 0x21c   : > { %v2111_v17 = vmax.f32 %v2095_v35, 0.0  ;;  %v1998_v21 = vmul.f32 %v1973_v48, %v1806_v6  ;;  %v1979_v23 = vmul.f32 %v17230_v31, %v1978_v22 }
 0x21e   : > { %v2121_v3 = vpack.c.bf16 %v2111_v17, %v2110_v38  ;;  %v2048_v8 = vmul.f32 %v2016_v39, %v1998_v21  ;;  %v1983_v29 = vsel %vm1982_vm2, %v17230_v31, %v1979_v23 }
 0x21f   : > { %v1999_v25 = vmul.f32 %v1983_v29, %v1807_v56 }
 0x220   : > { %2131 = vst [vmem:[#allocation2 + $0x28] sm:$0xff] %v2121_v3  ;;  %v2098_v14 = vadd.f32 %v2066_v33, %v2048_v8 }
 0x221   : > { %v2049_v43 = vmul.f32 %v2017_v61, %v1999_v25 }
 0x222   : > { %v2114_v44 = vmax.f32 %v2098_v14, 0.0 }
 0x223   : > { %v2099_v28 = vadd.f32 %v2067_v41, %v2049_v43 }
 0x225   : > { %v2115_v45 = vmax.f32 %v2099_v28, 0.0 }
 0x227   : > { %v2123_v46 = vpack.c.bf16 %v2115_v45, %v2114_v44 }
 0x229   : > { %2134 = vst [vmem:[#allocation2 + $0x38] sm:$0xff] %v2123_v46 }
 0x22a PF: > { %v12145_v50 = vld [vmem:[%s18120_s18 + $0x380] sm:$0xf]  ;;  %s20760_s2 = sld [smem:[#allocation39_spill]] }
 0x22b   : > { %v16064_v30 = vld [vmem:[%s18120_s18 + $0x3bc] sm:$0xf0] }
 0x22c   : > { %v12657_v58 = vld [vmem:[%s18120_s18 + $0x780] sm:$0xf]  ;;  %v12146_v34 = vor.u32 %v16064_v30, %v12145_v50 }
 0x22d   : > { %v16192_v55 = vld [vmem:[%s18120_s18 + $0x7bc] sm:$0xf0] }
 0x22e   : > { %v13169_v51 = vld [vmem:[%s18120_s18 + $0xb80] sm:$0xf]  ;;  %v12658_v24 = vor.u32 %v16192_v55, %v12657_v58  ;;  %5258 = vmatpush.bf16.msra.mxu0 %v12146_v34 }
 0x22f   : > { %v16320_v7 = vld [vmem:[%s18120_s18 + $0xbbc] sm:$0xf0] }
 0x230   : > { %v13170_v52 = vor.u32 %v16320_v7, %v13169_v51  ;;  %v13681_v60 = vld [vmem:[%s18120_s18 + $0xf80] sm:$0xf]  ;;  %5271 = vmatpush.bf16.msra.mxu1 %v12658_v24  ;;  %s15943_s27 = sshll.u32 %s20760_s2, 4  ;;  %p13743_p1 = scmp.ne.s32.totalorder %s20760_s2, 3 }
 0x231   : > { %v16448_v63 = vld [vmem:[%s18120_s18 + $0xfbc] sm:$0xf0]  ;;  %s2169_s15 = scalar_lea.vmem [#allocation2], %s15943_s27 }
 0x232   : > { %v12081_v1 = vld [vmem:[%s18120_s18 + $0x300] sm:$0xf]  ;;  %v13682_v59 = vor.u32 %v16448_v63, %v13681_v60  ;;  %5284 = vmatpush.bf16.msra.mxu2 %v13170_v52 }
 0x233   : > { %v16048_v9 = vld [vmem:[%s18120_s18 + $0x33c] sm:$0xf0] }
 0x234   : > { %v12593_v2 = vld [vmem:[%s18120_s18 + $0x700] sm:$0xf]  ;;  %v12082_v15 = vor.u32 %v16048_v9, %v12081_v1  ;;  %5297 = vmatpush.bf16.msra.mxu3 %v13682_v59 }
 0x235   : > { %v16176_v37 = vld [vmem:[%s18120_s18 + $0x73c] sm:$0xf0] }
 0x236   : > { %v12594_v57 = vor.u32 %v16176_v37, %v12593_v2  ;;  %v13105_v18 = vld [vmem:[%s18120_s18 + $0xb00] sm:$0xf]  ;;  %5259 = vmatpush.bf16.msra.mxu0 %v12082_v15 }
 0x237   : > { %v16304_v5 = vld [vmem:[%s18120_s18 + $0xb3c] sm:$0xf0] }
 0x238   : > { %v13617_v12 = vld [vmem:[%s18120_s18 + $0xf00] sm:$0xf]  ;;  %v13106_v42 = vor.u32 %v16304_v5, %v13105_v18  ;;  %5272 = vmatpush.bf16.msra.mxu1 %v12594_v57 }
 0x239   : > { %v16432_v16 = vld [vmem:[%s18120_s18 + $0xf3c] sm:$0xf0] }
 0x23a   : > { %v12017_v10 = vld [vmem:[%s18120_s18 + $0x280] sm:$0xf]  ;;  %v13618_v54 = vor.u32 %v16432_v16, %v13617_v12  ;;  %5285 = vmatpush.bf16.msra.mxu2 %v13106_v42 }
 0x23b   : > { %v16032_v40 = vld [vmem:[%s18120_s18 + $0x2bc] sm:$0xf0] }
 0x23c   : > { %v12529_v4 = vld [vmem:[%s18120_s18 + $0x680] sm:$0xf]  ;;  %v12018_v20 = vor.u32 %v16032_v40, %v12017_v10  ;;  %5298 = vmatpush.bf16.msra.mxu3 %v13618_v54 }
 0x23d   : > { %v16160_v19 = vld [vmem:[%s18120_s18 + $0x6bc] sm:$0xf0] }
 0x23e   : > { %v13041_v27 = vld [vmem:[%s18120_s18 + $0xa80] sm:$0xf]  ;;  %v12530_v36 = vor.u32 %v16160_v19, %v12529_v4  ;;  %5260 = vmatpush.bf16.msra.mxu0 %v12018_v20  ;;  %v12147_v20 = vld [vmem:[%s18120_s18 + $0x3c0] sm:$0xf0] }
 0x23f   : > { %v16288_v31 = vld [vmem:[%s18120_s18 + $0xabc] sm:$0xf0] }
 0x240   : > { %v13553_v49 = vld [vmem:[%s18120_s18 + $0xe80] sm:$0xf]  ;;  %v13042_v32 = vor.u32 %v16288_v31, %v13041_v27  ;;  %5273 = vmatpush.bf16.msra.mxu1 %v12530_v36  ;;  %v16056_v27 = vld [vmem:[%s18120_s18 + $0x384] sm:$0xf] }
 0x241   : > { %v16416_v13 = vld [vmem:[%s18120_s18 + $0xebc] sm:$0xf0]  ;;  %v16184_v31 = vld [vmem:[%s18120_s18 + $0x784] sm:$0xf] }
 0x242   : > { %v11953_v0 = vld [vmem:[%s18120_s18 + $0x200] sm:$0xf]  ;;  %v13554_v53 = vor.u32 %v16416_v13, %v13553_v49  ;;  %5286 = vmatpush.bf16.msra.mxu2 %v13042_v32  ;;  %v12659_v13 = vld [vmem:[%s18120_s18 + $0x7c0] sm:$0xf0] }
 0x243   : > { %v16016_v26 = vld [vmem:[%s18120_s18 + $0x23c] sm:$0xf0]  ;;  %v16312_v36 = vld [vmem:[%s18120_s18 + $0xb84] sm:$0xf] }
 0x244   : > { %v12465_v47 = vld [vmem:[%s18120_s18 + $0x600] sm:$0xf]  ;;  %v11954_v11 = vor.u32 %v16016_v26, %v11953_v0  ;;  %5299 = vmatpush.bf16.msra.mxu3 %v13554_v53  ;;  %v13171_v32 = vld [vmem:[%s18120_s18 + $0xbc0] sm:$0xf0] }
 0x245   : > { %v16144_v38 = vld [vmem:[%s18120_s18 + $0x63c] sm:$0xf0]  ;;  %v13683_v53 = vld [vmem:[%s18120_s18 + $0xfc0] sm:$0xf0] }
 0x246   : > { %v12977_v35 = vld [vmem:[%s18120_s18 + $0xa00] sm:$0xf]  ;;  %v12466_v17 = vor.u32 %v16144_v38, %v12465_v47  ;;  %5261 = vmatpush.bf16.msra.mxu0 %v11954_v11  ;;  %v16440_v47 = vld [vmem:[%s18120_s18 + $0xf84] sm:$0xf] }
 0x247   : > { %v16272_v62 = vld [vmem:[%s18120_s18 + $0xa3c] sm:$0xf0]  ;;  %v12083_v11 = vld [vmem:[%s18120_s18 + $0x340] sm:$0xf0] }
 0x248   : > { %v13489_v6 = vld [vmem:[%s18120_s18 + $0xe00] sm:$0xf]  ;;  %v12978_v48 = vor.u32 %v16272_v62, %v12977_v35  ;;  %5274 = vmatpush.bf16.msra.mxu1 %v12466_v17  ;;  %v12150_v35 = vor.u32 %v16056_v27, %v12147_v20  ;;  %v12662_v62 = vor.u32 %v16184_v31, %v12659_v13  ;;  %v16168_v17 = vld [vmem:[%s18120_s18 + $0x704] sm:$0xf] }
 0x249   : > { %v16400_v39 = vld [vmem:[%s18120_s18 + $0xe3c] sm:$0xf0]  ;;  %v16248_v27 = vld [vmem:[%s18120_s18 + $0x984] sm:$0xf] }
 0x24a   : > { %v11889_v21 = vld [vmem:[%s18120_s18 + $0x180] sm:$0xf]  ;;  %v13490_v33 = vor.u32 %v16400_v39, %v13489_v6  ;;  %5287 = vmatpush.bf16.msra.mxu2 %v12978_v48  ;;  %v13174_v6 = vor.u32 %v16312_v36, %v13171_v32  ;;  %v16040_v39 = vld [vmem:[%s18120_s18 + $0x304] sm:$0xf]  ;;  %v13686_v48 = vor.u32 %v16440_v47, %v13683_v53 }
 0x24b   : > { %v16000_v22 = vld [vmem:[%s18120_s18 + $0x1bc] sm:$0xf0]  ;;  %v12915_v20 = vld [vmem:[%s18120_s18 + $0x9c0] sm:$0xf0] }
 0x24c   : > { %v12401_v3 = vld [vmem:[%s18120_s18 + $0x580] sm:$0xf]  ;;  %v11890_v14 = vor.u32 %v16000_v22, %v11889_v21  ;;  %5300 = vmatpush.bf16.msra.mxu3 %v13490_v33  ;;  %v12595_v21 = vld [vmem:[%s18120_s18 + $0x740] sm:$0xf0] }
 0x24d   : > { %v16128_v8 = vld [vmem:[%s18120_s18 + $0x5bc] sm:$0xf0]  ;;  %v16296_v22 = vld [vmem:[%s18120_s18 + $0xb04] sm:$0xf] }
 0x24e   : > { %v12913_v23 = vld [vmem:[%s18120_s18 + $0x980] sm:$0xf]  ;;  %v12402_v25 = vor.u32 %v16128_v8, %v12401_v3  ;;  %5262 = vmatpush.bf16.msra.mxu0 %v11890_v14  ;;  %v13107_v3 = vld [vmem:[%s18120_s18 + $0xb40] sm:$0xf0] }
 0x24f   : > { %v16256_v56 = vld [vmem:[%s18120_s18 + $0x9bc] sm:$0xf0]  ;;  %v16424_v33 = vld [vmem:[%s18120_s18 + $0xf04] sm:$0xf] }
 0x250   : > { %v13425_v61 = vld [vmem:[%s18120_s18 + $0xd80] sm:$0xf]  ;;  %v12914_v41 = vor.u32 %v16256_v56, %v12913_v23  ;;  %5275 = vmatpush.bf16.msra.mxu1 %v12402_v25  ;;  %v13619_v8 = vld [vmem:[%s18120_s18 + $0xf40] sm:$0xf0]  ;;  %v12086_v23 = vor.u32 %v16040_v39, %v12083_v11 }
 0x251   : > { %v16384_v29 = vld [vmem:[%s18120_s18 + $0xdbc] sm:$0xf0]  ;;  %v16024_v56 = vld [vmem:[%s18120_s18 + $0x284] sm:$0xf] }
 0x252   : > { %v11825_v43 = vld [vmem:[%s18120_s18 + $0x100] sm:$0xf]  ;;  %v13426_v45 = vor.u32 %v16384_v29, %v13425_v61  ;;  %5288 = vmatpush.bf16.msra.mxu2 %v12914_v41  ;;  %v12598_v61 = vor.u32 %v16168_v17, %v12595_v21  ;;  %v13110_v29 = vor.u32 %v16296_v22, %v13107_v3  ;;  %v12019_v14 = vld [vmem:[%s18120_s18 + $0x2c0] sm:$0xf0] }
 0x253   : > { %v15984_v44 = vld [vmem:[%s18120_s18 + $0x13c] sm:$0xf0]  ;;  %v16152_v25 = vld [vmem:[%s18120_s18 + $0x684] sm:$0xf] }
 0x254   : > { %v12337_v28 = vld [vmem:[%s18120_s18 + $0x500] sm:$0xf]  ;;  %v11826_v55 = vor.u32 %v15984_v44, %v11825_v43  ;;  %5301 = vmatpush.bf16.msra.mxu3 %v13426_v45  ;;  %v12531_v41 = vld [vmem:[%s18120_s18 + $0x6c0] sm:$0xf0]  ;;  %v13622_v43 = vor.u32 %v16424_v33, %v13619_v8 }
 0x255   : > { %v16112_v46 = vld [vmem:[%s18120_s18 + $0x53c] sm:$0xf0]  ;;  %v16280_v44 = vld [vmem:[%s18120_s18 + $0xa84] sm:$0xf] }
 0x256   : > { %v12849_v50 = vld [vmem:[%s18120_s18 + $0x900] sm:$0xf]  ;;  %v12338_v51 = vor.u32 %v16112_v46, %v12337_v28  ;;  %5263 = vmatpush.bf16.msra.mxu0 %v11826_v55  ;;  %v13043_v28 = vld [vmem:[%s18120_s18 + $0xac0] sm:$0xf0] }
 0x257   : > { %v16240_v30 = vld [vmem:[%s18120_s18 + $0x93c] sm:$0xf0]  ;;  %v16408_v45 = vld [vmem:[%s18120_s18 + $0xe84] sm:$0xf] }
 0x258   : > { %v13361_v58 = vld [vmem:[%s18120_s18 + $0xd00] sm:$0xf]  ;;  %v12850_v7 = vor.u32 %v16240_v30, %v12849_v50  ;;  %5276 = vmatpush.bf16.msra.mxu1 %v12338_v51  ;;  %v13555_v46 = vld [vmem:[%s18120_s18 + $0xec0] sm:$0xf0]  ;;  %v12534_v51 = vor.u32 %v16152_v25, %v12531_v41 }
 0x259   : > { %v16368_v34 = vld [vmem:[%s18120_s18 + $0xd3c] sm:$0xf0]  ;;  %v16008_v50 = vld [vmem:[%s18120_s18 + $0x204] sm:$0xf] }
 0x25a   : > { %v11761_v24 = vld [vmem:[%s18120_s18 + $0x80] sm:$0xf]  ;;  %v13362_v63 = vor.u32 %v16368_v34, %v13361_v58  ;;  %5289 = vmatpush.bf16.msra.mxu2 %v12850_v7  ;;  %v11955_v30 = vld [vmem:[%s18120_s18 + $0x240] sm:$0xf0]  ;;  %v12022_v58 = vor.u32 %v16024_v56, %v12019_v14  ;;  %v13046_v7 = vor.u32 %v16280_v44, %v13043_v28 }
 0x25b   : > { %v15968_v52 = vld [vmem:[%s18120_s18 + $0xbc] sm:$0xf0]  ;;  %v16136_v34 = vld [vmem:[%s18120_s18 + $0x604] sm:$0xf] }
 0x25c   : > { %v12273_v60 = vld [vmem:[%s18120_s18 + $0x480] sm:$0xf]  ;;  %v11762_v15 = vor.u32 %v15968_v52, %v11761_v24  ;;  %5302 = vmatpush.bf16.msra.mxu3 %v13362_v63  ;;  %v12467_v55 = vld [vmem:[%s18120_s18 + $0x640] sm:$0xf0] }
 0x25d   : > { %v16096_v1 = vld [vmem:[%s18120_s18 + $0x4bc] sm:$0xf0]  ;;  %v16264_v24 = vld [vmem:[%s18120_s18 + $0xa04] sm:$0xf] }
 0x25e   : > { %v12785_v59 = vld [vmem:[%s18120_s18 + $0x880] sm:$0xf]  ;;  %v12274_v5 = vor.u32 %v16096_v1, %v12273_v60  ;;  %5264 = vmatpush.bf16.msra.mxu0 %v11762_v15  ;;  %v12979_v52 = vld [vmem:[%s18120_s18 + $0xa40] sm:$0xf0]  ;;  %v13558_v60 = vor.u32 %v16408_v45, %v13555_v46  ;;  %v12470_v15 = vor.u32 %v16136_v34, %v12467_v55 }
 0x25f   : > { %v16224_v9 = vld [vmem:[%s18120_s18 + $0x8bc] sm:$0xf0]  ;;  %v16392_v1 = vld [vmem:[%s18120_s18 + $0xe04] sm:$0xf] }
 0x260   : > { %v13297_v2 = vld [vmem:[%s18120_s18 + $0xc80] sm:$0xf]  ;;  %v12786_v12 = vor.u32 %v16224_v9, %v12785_v59  ;;  %5277 = vmatpush.bf16.msra.mxu1 %v12274_v5  ;;  %v13491_v59 = vld [vmem:[%s18120_s18 + $0xe40] sm:$0xf0] }
 0x261   : > { %v16352_v37 = vld [vmem:[%s18120_s18 + $0xcbc] sm:$0xf0]  ;;  %v15992_v5 = vld [vmem:[%s18120_s18 + $0x184] sm:$0xf] }
 0x262   : > { %v11697_v57 = vld [vmem:[%s18120_s18] sm:$0xf]  ;;  %v13298_v40 = vor.u32 %v16352_v37, %v13297_v2  ;;  %5290 = vmatpush.bf16.msra.mxu2 %v12786_v12  ;;  %v11958_v37 = vor.u32 %v16008_v50, %v11955_v30  ;;  %v11891_v12 = vld [vmem:[%s18120_s18 + $0x1c0] sm:$0xf0] }
 0x263   : > { %v15952_v18 = vld [vmem:[%s18120_s18 + $0x3c] sm:$0xf0]  ;;  %v16376_v31 = vld [vmem:[%s18120_s18 + $0xd84] sm:$0xf]  ;;  %v11894_v32 = vor.u32 %v15992_v5, %v11891_v12 }
 0x264   : > { %v12209_v42 = vld [vmem:[%s18120_s18 + $0x400] sm:$0xf]  ;;  %v11698_v49 = vor.u32 %v15952_v18, %v11697_v57  ;;  %5303 = vmatpush.bf16.msra.mxu3 %v13298_v40  ;;  %v12982_v57 = vor.u32 %v16264_v24, %v12979_v52  ;;  %v2170_v18 = vld [vmem:[%s2169_s15] sm:$0xff]  ;;  %v15976_v47 = vld [vmem:[%s18120_s18 + $0x104] sm:$0xf] }
 0x265   : > { %v16080_v16 = vld [vmem:[%s18120_s18 + $0x43c] sm:$0xf0]  ;;  %v2686_v40 = vunpack.c.l.b16 %v2170_v18  ;;  %v11827_v53 = vld [vmem:[%s18120_s18 + $0x140] sm:$0xf0]  ;;  %v16065_v24 = vld [vmem:[%s18120_s18 + $0x3c4] sm:$0xf0] }
 0x266   : > { %v12721_v10 = vld [vmem:[%s18120_s18 + $0x800] sm:$0xf]  ;;  %v12210_v0 = vor.u32 %v16080_v16, %v12209_v42  ;;  %5265 = vmatpush.bf16.msra.mxu0 %v11698_v49  ;;  %v16120_v42 = vld [vmem:[%s18120_s18 + $0x584] sm:$0xf]  ;;  %v12665_v52 = vld [vmem:[%s18120_s18 + $0x788] sm:$0xf] }
 0x267   : > { %v16208_v54 = vld [vmem:[%s18120_s18 + $0x83c] sm:$0xf0]  ;;  %v13427_v49 = vld [vmem:[%s18120_s18 + $0xdc0] sm:$0xf0]  ;;  %v18686_v13 = vpack.c.b16 %v2686_v40, %v2686_v40  ;;  %v16049_v40 = vld [vmem:[%s18120_s18 + $0x344] sm:$0xf0] }
 0x268   : > { %v13233_v4 = vld [vmem:[%s18120_s18 + $0xc00] sm:$0xf]  ;;  %v12722_v26 = vor.u32 %v16208_v54, %v12721_v10  ;;  %5278 = vmatpush.bf16.msra.mxu1 %v12210_v0  ;;  %v2687_v54 = vunpack.c.h.b16 %v2170_v18  ;;  %v12851_v39 = vld [vmem:[%s18120_s18 + $0x940] sm:$0xf0] }
 0x269   : > { %v16336_v19 = vld [vmem:[%s18120_s18 + $0xc3c] sm:$0xf0]  ;;  %5266 = vmatmul.bf16.vlgmr.msra.gmra.mxu0 %v18686_v13  ;;  %v16360_v11 = vld [vmem:[%s18120_s18 + $0xd04] sm:$0xf] }
 0x26a   : > { %v13234_v38 = vor.u32 %v16336_v19, %v13233_v4  ;;  %5291 = vmatpush.bf16.msra.mxu2 %v12722_v26  ;;  %5310 = vmatpush.bf16.msrb.mxu0 %v12150_v35  ;;  %v2171_v63 = vld [vmem:[%s2169_s15 + $0x8] sm:$0xff]  ;;  %v13494_v4 = vor.u32 %v16392_v1, %v13491_v59  ;;  %v18688_v36 = vpack.c.b16 %v2687_v54, %v2687_v54  ;;  %v13177_v1 = vld [vmem:[%s18120_s18 + $0xb88] sm:$0xf] }
 0x26b   : > { %v2688_v9 = vunpack.c.l.b16 %v2171_v63  ;;  %v2689_v2 = vunpack.c.h.b16 %v2171_v63  ;;  %v12403_v19 = vld [vmem:[%s18120_s18 + $0x5c0] sm:$0xf0]  ;;  %v12918_v26 = vor.u32 %v16248_v27, %v12915_v20  ;;  %v13430_v35 = vor.u32 %v16376_v31, %v13427_v49  ;;  %v16193_v63 = vld [vmem:[%s18120_s18 + $0x7c4] sm:$0xf0] }
 0x26c   : > { %5304 = vmatpush.bf16.msra.mxu3 %v13234_v38  ;;  %5323 = vmatpush.bf16.msrb.mxu1 %v12662_v62  ;;  %v12406_v0 = vor.u32 %v16120_v42, %v12403_v19  ;;  %v16104_v38 = vld [vmem:[%s18120_s18 + $0x504] sm:$0xf]  ;;  %v16321_v59 = vld [vmem:[%s18120_s18 + $0xbc4] sm:$0xf0]  ;;  %v12666_v5 = vor.u32 %v16193_v63, %v12665_v52 }
 0x26d   : > { %v18675_v16 = vpack.c.b16 %v2688_v9, %v2688_v9  ;;  %v18677_v10 = vpack.c.b16 %v2689_v2, %v2689_v2  ;;  %v12339_v62 = vld [vmem:[%s18120_s18 + $0x540] sm:$0xf0]  ;;  %5279 = vmatmul.bf16.vlgmr.msra.gmra.mxu1 %v18688_v36  ;;  %v13178_v12 = vor.u32 %v16321_v59, %v13177_v1  ;;  %v12089_v42 = vld [vmem:[%s18120_s18 + $0x308] sm:$0xf] }
 0x26e   : > { %5336 = vmatpush.bf16.msrb.mxu2 %v13174_v6  ;;  %5311 = vmatpush.bf16.msrb.mxu0 %v12086_v23  ;;  %v16232_v6 = vld [vmem:[%s18120_s18 + $0x904] sm:$0xf]  ;;  %v12342_v21 = vor.u32 %v16104_v38, %v12339_v62  ;;  %v12601_v54 = vld [vmem:[%s18120_s18 + $0x708] sm:$0xf] }
 0x26f   : > { %5292 = vmatmul.bf16.vlgmr.msra.gmra.mxu2 %v18675_v16  ;;  %5305 = vmatmul.bf16.vlgmr.msra.gmra.mxu3 %v18677_v10  ;;  %v13363_v17 = vld [vmem:[%s18120_s18 + $0xd40] sm:$0xf0]  ;;  %v12854_v22 = vor.u32 %v16232_v6, %v12851_v39  ;;  %v16177_v19 = vld [vmem:[%s18120_s18 + $0x744] sm:$0xf0] }
 0x270   : > { %5349 = vmatpush.bf16.msrb.mxu3 %v13686_v48  ;;  %5324 = vmatpush.bf16.msrb.mxu1 %v12598_v61  ;;  %v11830_v48 = vor.u32 %v15976_v47, %v11827_v53  ;;  %v15960_v3 = vld [vmem:[%s18120_s18 + $0x84] sm:$0xf]  ;;  %v13366_v23 = vor.u32 %v16360_v11, %v13363_v17  ;;  %v13113_v27 = vld [vmem:[%s18120_s18 + $0xb08] sm:$0xf] }
 0x271   : > { %v11763_v33 = vld [vmem:[%s18120_s18 + $0xc0] sm:$0xf0]  ;;  %v16305_v20 = vld [vmem:[%s18120_s18 + $0xb44] sm:$0xf0] }
 0x272   : > { %5337 = vmatpush.bf16.msrb.mxu2 %v13110_v29  ;;  %5312 = vmatpush.bf16.msrb.mxu0 %v12022_v58  ;;  %v16088_v8 = vld [vmem:[%s18120_s18 + $0x484] sm:$0xf]  ;;  %v11766_v41 = vor.u32 %v15960_v3, %v11763_v33  ;;  %v13625_v31 = vld [vmem:[%s18120_s18 + $0xf08] sm:$0xf] }
 0x273   : > { %v12275_v56 = vld [vmem:[%s18120_s18 + $0x4c0] sm:$0xf0]  ;;  %v16433_v49 = vld [vmem:[%s18120_s18 + $0xf44] sm:$0xf0] }
 0x274   : > { %5350 = vmatpush.bf16.msrb.mxu3 %v13622_v43  ;;  %5325 = vmatpush.bf16.msrb.mxu1 %v12534_v51  ;;  %v16216_v61 = vld [vmem:[%s18120_s18 + $0x884] sm:$0xf]  ;;  %v12278_v28 = vor.u32 %v16088_v8, %v12275_v56  ;;  %v12025_v47 = vld [vmem:[%s18120_s18 + $0x288] sm:$0xf] }
 0x275   : > { %v12787_v29 = vld [vmem:[%s18120_s18 + $0x8c0] sm:$0xf0]  ;;  %v16033_v53 = vld [vmem:[%s18120_s18 + $0x2c4] sm:$0xf0] }
 0x276   : > { %5338 = vmatpush.bf16.msrb.mxu2 %v13046_v7  ;;  %5313 = vmatpush.bf16.msrb.mxu0 %v11958_v37  ;;  %v16344_v14 = vld [vmem:[%s18120_s18 + $0xc84] sm:$0xf]  ;;  %v12790_v45 = vor.u32 %v16216_v61, %v12787_v29  ;;  %v12153_v7 = vld [vmem:[%s18120_s18 + $0x388] sm:$0xf] }
 0x277   : > { %v13299_v25 = vld [vmem:[%s18120_s18 + $0xcc0] sm:$0xf0]  ;;  %v13689_v37 = vld [vmem:[%s18120_s18 + $0xf88] sm:$0xf]  ;;  %v12154_v18 = vor.u32 %v16065_v24, %v12153_v7 }
 0x278   : > { %5351 = vmatpush.bf16.msrb.mxu3 %v13558_v60  ;;  %5326 = vmatpush.bf16.msrb.mxu1 %v12470_v15  ;;  %v15944_v43 = vld [vmem:[%s18120_s18 + $0x4] sm:$0xf]  ;;  %v13302_v58 = vor.u32 %v16344_v14, %v13299_v25  ;;  %v16449_v15 = vld [vmem:[%s18120_s18 + $0xfc4] sm:$0xf0] }
 0x279   : > { %v11699_v44 = vld [vmem:[%s18120_s18 + $0x40] sm:$0xf0]  ;;  %v12537_v38 = vld [vmem:[%s18120_s18 + $0x688] sm:$0xf] }
 0x27a   : > { %5339 = vmatpush.bf16.msrb.mxu2 %v12982_v57  ;;  %5314 = vmatpush.bf16.msrb.mxu0 %v11894_v32  ;;  %v16072_v46 = vld [vmem:[%s18120_s18 + $0x404] sm:$0xf]  ;;  %v11702_v60 = vor.u32 %v15944_v43, %v11699_v44  ;;  %v12090_v32 = vor.u32 %v16049_v40, %v12089_v42  ;;  %v16161_v62 = vld [vmem:[%s18120_s18 + $0x6c4] sm:$0xf0] }
 0x27b   : > { %v12211_v50 = vld [vmem:[%s18120_s18 + $0x440] sm:$0xf0]  ;;  %v13049_v6 = vld [vmem:[%s18120_s18 + $0xa88] sm:$0xf] }
 0x27c   : > { %5352 = vmatpush.bf16.msrb.mxu3 %v13494_v4  ;;  %5327 = vmatpush.bf16.msrb.mxu1 %v12406_v0  ;;  %v16200_v30 = vld [vmem:[%s18120_s18 + $0x804] sm:$0xf]  ;;  %v12214_v9 = vor.u32 %v16072_v46, %v12211_v50  ;;  %v13690_v4 = vor.u32 %v16449_v15, %v13689_v37  ;;  %v12602_v0 = vor.u32 %v16177_v19, %v12601_v54  ;;  %v16289_v39 = vld [vmem:[%s18120_s18 + $0xac4] sm:$0xf0] }
 0x27d   : > { %v12723_v34 = vld [vmem:[%s18120_s18 + $0x840] sm:$0xf0]  ;;  %v13561_v11 = vld [vmem:[%s18120_s18 + $0xe88] sm:$0xf] }
 0x27e   : > { %5340 = vmatpush.bf16.msrb.mxu2 %v12918_v26  ;;  %5315 = vmatpush.bf16.msrb.mxu0 %v11830_v48  ;;  %v16328_v55 = vld [vmem:[%s18120_s18 + $0xc04] sm:$0xf]  ;;  %v12726_v2 = vor.u32 %v16200_v30, %v12723_v34  ;;  %v13114_v26 = vor.u32 %v16305_v20, %v13113_v27  ;;  %v16417_v17 = vld [vmem:[%s18120_s18 + $0xec4] sm:$0xf0]  ;;  %v12026_v48 = vor.u32 %v16033_v53, %v12025_v47 }
 0x27f   : > { %v13235_v51 = vld [vmem:[%s18120_s18 + $0xc40] sm:$0xf0]  ;;  %v11961_v3 = vld [vmem:[%s18120_s18 + $0x208] sm:$0xf] }
 0x280   : > { %5353 = vmatpush.bf16.msrb.mxu3 %v13430_v35  ;;  %5328 = vmatpush.bf16.msrb.mxu1 %v12342_v21  ;;  %v13238_v57 = vor.u32 %v16328_v55, %v13235_v51  ;;  %v13626_v35 = vor.u32 %v16433_v49, %v13625_v31  ;;  %v12538_v21 = vor.u32 %v16161_v62, %v12537_v38  ;;  %v16017_v33 = vld [vmem:[%s18120_s18 + $0x244] sm:$0xf0] }
 0x281   : > { %v12473_v8 = vld [vmem:[%s18120_s18 + $0x608] sm:$0xf] }
 0x282   : > { %5341 = vmatpush.bf16.msrb.mxu2 %v12854_v22  ;;  %5316 = vmatpush.bf16.msrb.mxu0 %v11766_v41  ;;  %v13050_v22 = vor.u32 %v16289_v39, %v13049_v6  ;;  %v16145_v56 = vld [vmem:[%s18120_s18 + $0x644] sm:$0xf0]  ;;  %v11962_v41 = vor.u32 %v16017_v33, %v11961_v3  ;;  %v12667_v33 = vld [vmem:[%s18120_s18 + $0x7c8] sm:$0xf0] }
 0x283   : > { %v12985_v61 = vld [vmem:[%s18120_s18 + $0xa08] sm:$0xf]  ;;  %v12474_v43 = vor.u32 %v16145_v56, %v12473_v8  ;;  %v16313_v8 = vld [vmem:[%s18120_s18 + $0xb8c] sm:$0xf] }
 0x284   : > { %5354 = vmatpush.bf16.msrb.mxu3 %v13366_v23  ;;  %5329 = vmatpush.bf16.msrb.mxu1 %v12278_v28  ;;  %v13562_v23 = vor.u32 %v16417_v17, %v13561_v11  ;;  %v16273_v29 = vld [vmem:[%s18120_s18 + $0xa44] sm:$0xf0] }
 0x285   : > { %v13497_v14 = vld [vmem:[%s18120_s18 + $0xe08] sm:$0xf]  ;;  %v12986_v44 = vor.u32 %v16273_v29, %v12985_v61  ;;  %v16441_v29 = vld [vmem:[%s18120_s18 + $0xf8c] sm:$0xf] }
 0x286   : > { %5342 = vmatpush.bf16.msrb.mxu2 %v12790_v45  ;;  %5317 = vmatpush.bf16.msrb.mxu0 %v11702_v60  ;;  %v16401_v25 = vld [vmem:[%s18120_s18 + $0xe44] sm:$0xf0] }
 0x287   : > { %v11897_v28 = vld [vmem:[%s18120_s18 + $0x188] sm:$0xf]  ;;  %v13498_v50 = vor.u32 %v16401_v25, %v13497_v14  ;;  %v13691_v14 = vld [vmem:[%s18120_s18 + $0xfc8] sm:$0xf0] }
 0x288   : > { %5355 = vmatpush.bf16.msrb.mxu3 %v13302_v58  ;;  %5330 = vmatpush.bf16.msrb.mxu1 %v12214_v9  ;;  %v16001_v45 = vld [vmem:[%s18120_s18 + $0x1c4] sm:$0xf0] }
 0x289   : > { %5318 = vmatmul.bf16.vlgmr.msrb.gmra.mxu0 %v18686_v13  ;;  %v12409_v46 = vld [vmem:[%s18120_s18 + $0x588] sm:$0xf]  ;;  %v11898_v7 = vor.u32 %v16001_v45, %v11897_v28  ;;  %v16041_v28 = vld [vmem:[%s18120_s18 + $0x30c] sm:$0xf] }
 0x28a   : > { %5343 = vmatpush.bf16.msrb.mxu2 %v12726_v2  ;;  %5362 = vmatpush.bf16.msra.mxu0 %v12154_v18  ;;  %v16129_v30 = vld [vmem:[%s18120_s18 + $0x5c4] sm:$0xf0]  ;;  %v12091_v45 = vld [vmem:[%s18120_s18 + $0x348] sm:$0xf0] }
 0x28b   : > { %5331 = vmatmul.bf16.vlgmr.msrb.gmra.mxu1 %v18688_v36  ;;  %v12921_v58 = vld [vmem:[%s18120_s18 + $0x988] sm:$0xf]  ;;  %v12410_v24 = vor.u32 %v16129_v30, %v12409_v46  ;;  %v16169_v46 = vld [vmem:[%s18120_s18 + $0x70c] sm:$0xf] }
 0x28c   : > { %5356 = vmatpush.bf16.msrb.mxu3 %v13238_v57  ;;  %5375 = vmatpush.bf16.msra.mxu1 %v12666_v5  ;;  %v16257_v34 = vld [vmem:[%s18120_s18 + $0x9c4] sm:$0xf0]  ;;  %v12603_v30 = vld [vmem:[%s18120_s18 + $0x748] sm:$0xf0] }
 0x28d   : > { %5344 = vmatmul.bf16.vlgmr.msrb.gmra.mxu2 %v18675_v16  ;;  %v13433_v55 = vld [vmem:[%s18120_s18 + $0xd88] sm:$0xf]  ;;  %v12922_v52 = vor.u32 %v16257_v34, %v12921_v58  ;;  %v16297_v58 = vld [vmem:[%s18120_s18 + $0xb0c] sm:$0xf] }
 0x28e   : > { %5388 = vmatpush.bf16.msra.mxu2 %v13178_v12  ;;  %5363 = vmatpush.bf16.msra.mxu0 %v12090_v32  ;;  %v16385_v51 = vld [vmem:[%s18120_s18 + $0xdc4] sm:$0xf0]  ;;  %v13115_v34 = vld [vmem:[%s18120_s18 + $0xb48] sm:$0xf0] }
 0x28f   : > { %5357 = vmatmul.bf16.vlgmr.msrb.gmra.mxu3 %v18677_v10  ;;  %v11833_v60 = vld [vmem:[%s18120_s18 + $0x108] sm:$0xf]  ;;  %v13434_v59 = vor.u32 %v16385_v51, %v13433_v55  ;;  %v16425_v55 = vld [vmem:[%s18120_s18 + $0xf0c] sm:$0xf] }
 0x290   : > { %5401 = vmatpush.bf16.msra.mxu3 %v13690_v4  ;;  %5376 = vmatpush.bf16.msra.mxu1 %v12602_v0  ;;  %v15985_v63 = vld [vmem:[%s18120_s18 + $0x144] sm:$0xf0]  ;;  %v13627_v51 = vld [vmem:[%s18120_s18 + $0xf48] sm:$0xf0] }
 0x291   : > { %v12345_v1 = vld [vmem:[%s18120_s18 + $0x508] sm:$0xf]  ;;  %v11834_v18 = vor.u32 %v15985_v63, %v11833_v60  ;;  %v16025_v60 = vld [vmem:[%s18120_s18 + $0x28c] sm:$0xf] }
 0x292   : > { %5389 = vmatpush.bf16.msra.mxu2 %v13114_v26  ;;  %5364 = vmatpush.bf16.msra.mxu0 %v12026_v48  ;;  %v16113_v9 = vld [vmem:[%s18120_s18 + $0x544] sm:$0xf0]  ;;  %v16057_v48 = vld [vmem:[%s18120_s18 + $0x38c] sm:$0xf] }
 0x293   : > { %v12857_v2 = vld [vmem:[%s18120_s18 + $0x908] sm:$0xf]  ;;  %v12346_v5 = vor.u32 %v16113_v9, %v12345_v1  ;;  %v12027_v63 = vld [vmem:[%s18120_s18 + $0x2c8] sm:$0xf0] }
 0x294   : > { %5402 = vmatpush.bf16.msra.mxu3 %v13626_v35  ;;  %5377 = vmatpush.bf16.msra.mxu1 %v12538_v21  ;;  %v16241_v37 = vld [vmem:[%s18120_s18 + $0x944] sm:$0xf0]  ;;  %v12155_v21 = vld [vmem:[%s18120_s18 + $0x3c8] sm:$0xf0] }
 0x295   : > { %v13369_v15 = vld [vmem:[%s18120_s18 + $0xd08] sm:$0xf]  ;;  %v12858_v12 = vor.u32 %v16241_v37, %v12857_v2  ;;  %v16153_v1 = vld [vmem:[%s18120_s18 + $0x68c] sm:$0xf] }
 0x296   : > { %5390 = vmatpush.bf16.msra.mxu2 %v13050_v22  ;;  %5365 = vmatpush.bf16.msra.mxu0 %v11962_v41  ;;  %v16369_v57 = vld [vmem:[%s18120_s18 + $0xd44] sm:$0xf0]  ;;  %v16185_v22 = vld [vmem:[%s18120_s18 + $0x78c] sm:$0xf]  ;;  %v12158_v41 = vor.u32 %v16057_v48, %v12155_v21 }
 0x297   : > { %v11769_v42 = vld [vmem:[%s18120_s18 + $0x88] sm:$0xf]  ;;  %v13370_v4 = vor.u32 %v16369_v57, %v13369_v15  ;;  %v12539_v9 = vld [vmem:[%s18120_s18 + $0x6c8] sm:$0xf0] }
 0x298   : > { %5403 = vmatpush.bf16.msra.mxu3 %v13562_v23  ;;  %5378 = vmatpush.bf16.msra.mxu1 %v12474_v43  ;;  %v15969_v40 = vld [vmem:[%s18120_s18 + $0xc4] sm:$0xf0]  ;;  %v13179_v23 = vld [vmem:[%s18120_s18 + $0xbc8] sm:$0xf0]  ;;  %v12670_v43 = vor.u32 %v16185_v22, %v12667_v33 }
 0x299   : > { %v12281_v54 = vld [vmem:[%s18120_s18 + $0x488] sm:$0xf]  ;;  %v11770_v32 = vor.u32 %v15969_v40, %v11769_v42  ;;  %v16281_v2 = vld [vmem:[%s18120_s18 + $0xa8c] sm:$0xf] }
 0x29a   : > { %5391 = vmatpush.bf16.msra.mxu2 %v12986_v44  ;;  %5366 = vmatpush.bf16.msra.mxu0 %v11898_v7  ;;  %v16097_v19 = vld [vmem:[%s18120_s18 + $0x4c4] sm:$0xf0]  ;;  %v13182_v44 = vor.u32 %v16313_v8, %v13179_v23  ;;  %v12094_v7 = vor.u32 %v16041_v28, %v12091_v45  ;;  %v13051_v37 = vld [vmem:[%s18120_s18 + $0xac8] sm:$0xf0] }
 0x29b   : > { %v12793_v27 = vld [vmem:[%s18120_s18 + $0x888] sm:$0xf]  ;;  %v12282_v47 = vor.u32 %v16097_v19, %v12281_v54  ;;  %v16409_v15 = vld [vmem:[%s18120_s18 + $0xe8c] sm:$0xf] }
 0x29c   : > { %5404 = vmatpush.bf16.msra.mxu3 %v13498_v50  ;;  %5379 = vmatpush.bf16.msra.mxu1 %v12410_v24  ;;  %v16225_v20 = vld [vmem:[%s18120_s18 + $0x8c4] sm:$0xf0]  ;;  %v13694_v50 = vor.u32 %v16441_v29, %v13691_v14  ;;  %v12606_v24 = vor.u32 %v16169_v46, %v12603_v30  ;;  %v13563_v57 = vld [vmem:[%s18120_s18 + $0xec8] sm:$0xf0] }
 0x29d   : > { %v13305_v31 = vld [vmem:[%s18120_s18 + $0xc88] sm:$0xf]  ;;  %v12794_v53 = vor.u32 %v16225_v20, %v12793_v27  ;;  %v16009_v42 = vld [vmem:[%s18120_s18 + $0x20c] sm:$0xf] }
 0x29e   : > { %5392 = vmatpush.bf16.msra.mxu2 %v12922_v52  ;;  %v16353_v49 = vld [vmem:[%s18120_s18 + $0xcc4] sm:$0xf0]  ;;  %5367 = vmatpush.bf16.msra.mxu0 %v11834_v18  ;;  %v13118_v52 = vor.u32 %v16297_v58, %v13115_v34  ;;  %v12030_v18 = vor.u32 %v16025_v60, %v12027_v63  ;;  %v11963_v40 = vld [vmem:[%s18120_s18 + $0x248] sm:$0xf0] }
 0x29f   : > { %v11705_v0 = vld [vmem:[%s18120_s18 + $0x8] sm:$0xf]  ;;  %v13306_v6 = vor.u32 %v16353_v49, %v13305_v31  ;;  %v16137_v54 = vld [vmem:[%s18120_s18 + $0x60c] sm:$0xf] }
 0x2a0   : > { %5405 = vmatpush.bf16.msra.mxu3 %v13434_v59  ;;  %v15953_v26 = vld [vmem:[%s18120_s18 + $0x44] sm:$0xf0]  ;;  %5380 = vmatpush.bf16.msra.mxu1 %v12346_v5  ;;  %v13630_v59 = vor.u32 %v16425_v55, %v13627_v51  ;;  %v12542_v5 = vor.u32 %v16153_v1, %v12539_v9  ;;  %v12475_v19 = vld [vmem:[%s18120_s18 + $0x648] sm:$0xf0] }
 0x2a1   : > { %v12217_v38 = vld [vmem:[%s18120_s18 + $0x408] sm:$0xf]  ;;  %v11706_v3 = vor.u32 %v15953_v26, %v11705_v0  ;;  %v16265_v27 = vld [vmem:[%s18120_s18 + $0xa0c] sm:$0xf]  ;;  %v12478_v0 = vor.u32 %v16137_v54, %v12475_v19  ;;  %v13185_v54 = vld [vmem:[%s18120_s18 + $0xb90] sm:$0xf] }
 0x2a2   : > { %5393 = vmatpush.bf16.msra.mxu2 %v12858_v12  ;;  %v16081_v35 = vld [vmem:[%s18120_s18 + $0x444] sm:$0xf0]  ;;  %5368 = vmatpush.bf16.msra.mxu0 %v11770_v32  ;;  %v13054_v12 = vor.u32 %v16281_v2, %v13051_v37  ;;  %v12987_v20 = vld [vmem:[%s18120_s18 + $0xa48] sm:$0xf0]  ;;  %v11966_v32 = vor.u32 %v16009_v42, %v11963_v40  ;;  %v16194_v40 = vld [vmem:[%s18120_s18 + $0x7cc] sm:$0xf0] }
 0x2a3   : > { %v12729_v62 = vld [vmem:[%s18120_s18 + $0x808] sm:$0xf]  ;;  %v12218_v56 = vor.u32 %v16081_v35, %v12217_v38  ;;  %v16393_v31 = vld [vmem:[%s18120_s18 + $0xe0c] sm:$0xf]  ;;  %v12990_v26 = vor.u32 %v16265_v27, %v12987_v20  ;;  %v13697_v20 = vld [vmem:[%s18120_s18 + $0xf90] sm:$0xf] }
 0x2a4   : > { %5406 = vmatpush.bf16.msra.mxu3 %v13370_v4  ;;  %v16209_v39 = vld [vmem:[%s18120_s18 + $0x844] sm:$0xf0]  ;;  %5381 = vmatpush.bf16.msra.mxu1 %v12282_v47  ;;  %v13566_v4 = vor.u32 %v16409_v15, %v13563_v57  ;;  %v13499_v49 = vld [vmem:[%s18120_s18 + $0xe48] sm:$0xf0] }
 0x2a5   : > { %v13241_v11 = vld [vmem:[%s18120_s18 + $0xc08] sm:$0xf]  ;;  %v12730_v61 = vor.u32 %v16209_v39, %v12729_v62  ;;  %v15993_v47 = vld [vmem:[%s18120_s18 + $0x18c] sm:$0xf]  ;;  %v13502_v35 = vor.u32 %v16393_v31, %v13499_v49  ;;  %v16450_v31 = vld [vmem:[%s18120_s18 + $0xfcc] sm:$0xf0] }
 0x2a6   : > { %v16337_v17 = vld [vmem:[%s18120_s18 + $0xc44] sm:$0xf0]  ;;  %5394 = vmatpush.bf16.msra.mxu2 %v12794_v53  ;;  %5369 = vmatpush.bf16.msra.mxu0 %v11706_v3  ;;  %v11899_v53 = vld [vmem:[%s18120_s18 + $0x1c8] sm:$0xf0] }
 0x2a7   : > { %v13242_v25 = vor.u32 %v16337_v17, %v13241_v11  ;;  %v16121_v38 = vld [vmem:[%s18120_s18 + $0x58c] sm:$0xf]  ;;  %v11902_v48 = vor.u32 %v15993_v47, %v11899_v53  ;;  %v12097_v47 = vld [vmem:[%s18120_s18 + $0x310] sm:$0xf] }
 0x2a8   : > { %5407 = vmatpush.bf16.msra.mxu3 %v13306_v6  ;;  %5382 = vmatpush.bf16.msra.mxu1 %v12218_v56  ;;  %v12411_v62 = vld [vmem:[%s18120_s18 + $0x5c8] sm:$0xf0]  ;;  %v16050_v53 = vld [vmem:[%s18120_s18 + $0x34c] sm:$0xf0] }
 0x2a9   : > { %5370 = vmatmul.bf16.vlgmr.msra.gmra.mxu0 %v18686_v13  ;;  %v16249_v6 = vld [vmem:[%s18120_s18 + $0x98c] sm:$0xf]  ;;  %v12414_v21 = vor.u32 %v16121_v38, %v12411_v62  ;;  %v12609_v38 = vld [vmem:[%s18120_s18 + $0x710] sm:$0xf] }
 0x2aa   : > { %5395 = vmatpush.bf16.msra.mxu2 %v12730_v61  ;;  %5414 = vmatpush.bf16.msrb.mxu0 %v12158_v41  ;;  %v12923_v39 = vld [vmem:[%s18120_s18 + $0x9c8] sm:$0xf0]  ;;  %v16178_v62 = vld [vmem:[%s18120_s18 + $0x74c] sm:$0xf0] }
 0x2ab   : > { %5383 = vmatmul.bf16.vlgmr.msra.gmra.mxu1 %v18688_v36  ;;  %v16377_v11 = vld [vmem:[%s18120_s18 + $0xd8c] sm:$0xf]  ;;  %v12926_v22 = vor.u32 %v16249_v6, %v12923_v39  ;;  %v13121_v6 = vld [vmem:[%s18120_s18 + $0xb10] sm:$0xf] }
 0x2ac   : > { %5408 = vmatpush.bf16.msra.mxu3 %v13242_v25  ;;  %5427 = vmatpush.bf16.msrb.mxu1 %v12670_v43  ;;  %v13435_v17 = vld [vmem:[%s18120_s18 + $0xdc8] sm:$0xf0]  ;;  %v16306_v39 = vld [vmem:[%s18120_s18 + $0xb4c] sm:$0xf0] }
 0x2ad   : > { %5396 = vmatmul.bf16.vlgmr.msra.gmra.mxu2 %v18675_v16  ;;  %v15977_v3 = vld [vmem:[%s18120_s18 + $0x10c] sm:$0xf]  ;;  %v13438_v23 = vor.u32 %v16377_v11, %v13435_v17  ;;  %v13633_v11 = vld [vmem:[%s18120_s18 + $0xf10] sm:$0xf] }
 0x2ae   : > { %5440 = vmatpush.bf16.msrb.mxu2 %v13182_v44  ;;  %5415 = vmatpush.bf16.msrb.mxu0 %v12094_v7  ;;  %v11835_v33 = vld [vmem:[%s18120_s18 + $0x148] sm:$0xf0]  ;;  %v16434_v17 = vld [vmem:[%s18120_s18 + $0xf4c] sm:$0xf0] }
 0x2af   : > { %5409 = vmatmul.bf16.vlgmr.msra.gmra.mxu3 %v18677_v10  ;;  %v16105_v8 = vld [vmem:[%s18120_s18 + $0x50c] sm:$0xf]  ;;  %v11838_v41 = vor.u32 %v15977_v3, %v11835_v33  ;;  %v12033_v3 = vld [vmem:[%s18120_s18 + $0x290] sm:$0xf] }
 0x2b0   : > { %5453 = vmatpush.bf16.msrb.mxu3 %v13694_v50  ;;  %5428 = vmatpush.bf16.msrb.mxu1 %v12606_v24  ;;  %v12347_v56 = vld [vmem:[%s18120_s18 + $0x548] sm:$0xf0]  ;;  %v16034_v33 = vld [vmem:[%s18120_s18 + $0x2cc] sm:$0xf0] }
 0x2b1   : > { %v16233_v61 = vld [vmem:[%s18120_s18 + $0x90c] sm:$0xf]  ;;  %v12350_v43 = vor.u32 %v16105_v8, %v12347_v56  ;;  %v12545_v8 = vld [vmem:[%s18120_s18 + $0x690] sm:$0xf] }
 0x2b2   : > { %5441 = vmatpush.bf16.msrb.mxu2 %v13118_v52  ;;  %5416 = vmatpush.bf16.msrb.mxu0 %v12030_v18  ;;  %v12859_v29 = vld [vmem:[%s18120_s18 + $0x948] sm:$0xf0]  ;;  %v12161_v18 = vld [vmem:[%s18120_s18 + $0x390] sm:$0xf] }
 0x2b3   : > { %v16361_v14 = vld [vmem:[%s18120_s18 + $0xd0c] sm:$0xf]  ;;  %v12862_v44 = vor.u32 %v16233_v61, %v12859_v29  ;;  %v16162_v56 = vld [vmem:[%s18120_s18 + $0x6cc] sm:$0xf0] }
 0x2b4   : > { %5454 = vmatpush.bf16.msrb.mxu3 %v13630_v59  ;;  %5429 = vmatpush.bf16.msrb.mxu1 %v12542_v5  ;;  %v13371_v25 = vld [vmem:[%s18120_s18 + $0xd48] sm:$0xf0]  ;;  %v16066_v5 = vld [vmem:[%s18120_s18 + $0x3cc] sm:$0xf0] }
 0x2b5   : > { %v15961_v28 = vld [vmem:[%s18120_s18 + $0x8c] sm:$0xf]  ;;  %v13374_v50 = vor.u32 %v16361_v14, %v13371_v25  ;;  %v13057_v61 = vld [vmem:[%s18120_s18 + $0xa90] sm:$0xf] }
 0x2b6   : > { %5442 = vmatpush.bf16.msrb.mxu2 %v13054_v12  ;;  %5417 = vmatpush.bf16.msrb.mxu0 %v11966_v32  ;;  %v11771_v45 = vld [vmem:[%s18120_s18 + $0xc8] sm:$0xf0]  ;;  %v12673_v12 = vld [vmem:[%s18120_s18 + $0x790] sm:$0xf]  ;;  %v12162_v32 = vor.u32 %v16066_v5, %v12161_v18 }
 0x2b7   : > { %v16089_v46 = vld [vmem:[%s18120_s18 + $0x48c] sm:$0xf]  ;;  %v11774_v7 = vor.u32 %v15961_v28, %v11771_v45  ;;  %v16290_v29 = vld [vmem:[%s18120_s18 + $0xacc] sm:$0xf0] }
 0x2b8   : > { %5455 = vmatpush.bf16.msrb.mxu3 %v13566_v4  ;;  %5430 = vmatpush.bf16.msrb.mxu1 %v12478_v0  ;;  %v12283_v30 = vld [vmem:[%s18120_s18 + $0x4c8] sm:$0xf0]  ;;  %v16322_v4 = vld [vmem:[%s18120_s18 + $0xbcc] sm:$0xf0]  ;;  %v12674_v0 = vor.u32 %v16194_v40, %v12673_v12 }
 0x2b9   : > { %v16217_v58 = vld [vmem:[%s18120_s18 + $0x88c] sm:$0xf]  ;;  %v12286_v60 = vor.u32 %v16089_v46, %v12283_v30  ;;  %v13569_v14 = vld [vmem:[%s18120_s18 + $0xe90] sm:$0xf] }
 0x2ba   : > { %5443 = vmatpush.bf16.msrb.mxu2 %v12990_v26  ;;  %5418 = vmatpush.bf16.msrb.mxu0 %v11902_v48  ;;  %v12795_v34 = vld [vmem:[%s18120_s18 + $0x8c8] sm:$0xf0]  ;;  %v13186_v26 = vor.u32 %v16322_v4, %v13185_v54  ;;  %v12098_v48 = vor.u32 %v16050_v53, %v12097_v47  ;;  %v16418_v25 = vld [vmem:[%s18120_s18 + $0xecc] sm:$0xf0] }
 0x2bb   : > { %v16345_v55 = vld [vmem:[%s18120_s18 + $0xc8c] sm:$0xf]  ;;  %v12798_v63 = vor.u32 %v16217_v58, %v12795_v34  ;;  %v11969_v28 = vld [vmem:[%s18120_s18 + $0x210] sm:$0xf] }
 0x2bc   : > { %5456 = vmatpush.bf16.msrb.mxu3 %v13502_v35  ;;  %5431 = vmatpush.bf16.msrb.mxu1 %v12414_v21  ;;  %v13307_v51 = vld [vmem:[%s18120_s18 + $0xcc8] sm:$0xf0]  ;;  %v13698_v35 = vor.u32 %v16450_v31, %v13697_v20  ;;  %v12610_v21 = vor.u32 %v16178_v62, %v12609_v38  ;;  %v16018_v45 = vld [vmem:[%s18120_s18 + $0x24c] sm:$0xf0] }
 0x2bd   : > { %v15945_v24 = vld [vmem:[%s18120_s18 + $0xc] sm:$0xf]  ;;  %v13310_v2 = vor.u32 %v16345_v55, %v13307_v51  ;;  %v12481_v46 = vld [vmem:[%s18120_s18 + $0x610] sm:$0xf] }
 0x2be   : > { %5444 = vmatpush.bf16.msrb.mxu2 %v12926_v22  ;;  %5419 = vmatpush.bf16.msrb.mxu0 %v11838_v41  ;;  %v11707_v52 = vld [vmem:[%s18120_s18 + $0x48] sm:$0xf0]  ;;  %v13122_v22 = vor.u32 %v16306_v39, %v13121_v6  ;;  %v12034_v41 = vor.u32 %v16034_v33, %v12033_v3  ;;  %v16146_v30 = vld [vmem:[%s18120_s18 + $0x64c] sm:$0xf0] }
 0x2bf   : > { %v16073_v1 = vld [vmem:[%s18120_s18 + $0x40c] sm:$0xf]  ;;  %v11710_v42 = vor.u32 %v15945_v24, %v11707_v52  ;;  %v12993_v58 = vld [vmem:[%s18120_s18 + $0xa10] sm:$0xf]  ;;  %v12482_v24 = vor.u32 %v16146_v30, %v12481_v46  ;;  %v16314_v46 = vld [vmem:[%s18120_s18 + $0xb94] sm:$0xf] }
 0x2c0   : > { %5457 = vmatpush.bf16.msrb.mxu3 %v13438_v23  ;;  %5432 = vmatpush.bf16.msrb.mxu1 %v12350_v43  ;;  %v12219_v59 = vld [vmem:[%s18120_s18 + $0x448] sm:$0xf0]  ;;  %v13634_v23 = vor.u32 %v16434_v17, %v13633_v11  ;;  %v12546_v43 = vor.u32 %v16162_v56, %v12545_v8  ;;  %v16274_v34 = vld [vmem:[%s18120_s18 + $0xa4c] sm:$0xf0] }
 0x2c1   : > { %v16201_v9 = vld [vmem:[%s18120_s18 + $0x80c] sm:$0xf]  ;;  %v12222_v19 = vor.u32 %v16073_v1, %v12219_v59  ;;  %v13505_v55 = vld [vmem:[%s18120_s18 + $0xe10] sm:$0xf]  ;;  %v12994_v52 = vor.u32 %v16274_v34, %v12993_v58  ;;  %v16442_v34 = vld [vmem:[%s18120_s18 + $0xf94] sm:$0xf] }
 0x2c2   : > { %5445 = vmatpush.bf16.msrb.mxu2 %v12862_v44  ;;  %v12731_v37 = vld [vmem:[%s18120_s18 + $0x848] sm:$0xf0]  ;;  %5420 = vmatpush.bf16.msrb.mxu0 %v11774_v7  ;;  %v13058_v44 = vor.u32 %v16290_v29, %v13057_v61  ;;  %v16402_v51 = vld [vmem:[%s18120_s18 + $0xe4c] sm:$0xf0]  ;;  %v11970_v7 = vor.u32 %v16018_v45, %v11969_v28  ;;  %v12675_v45 = vld [vmem:[%s18120_s18 + $0x7d0] sm:$0xf0] }
 0x2c3   : > { %v16329_v15 = vld [vmem:[%s18120_s18 + $0xc0c] sm:$0xf]  ;;  %v12734_v27 = vor.u32 %v16201_v9, %v12731_v37  ;;  %v12417_v1 = vld [vmem:[%s18120_s18 + $0x590] sm:$0xf]  ;;  %v13506_v59 = vor.u32 %v16402_v51, %v13505_v55  ;;  %v13699_v55 = vld [vmem:[%s18120_s18 + $0xfd0] sm:$0xf0] }
 0x2c4   : > { %5458 = vmatpush.bf16.msrb.mxu3 %v13374_v50  ;;  %v13243_v57 = vld [vmem:[%s18120_s18 + $0xc48] sm:$0xf0]  ;;  %5433 = vmatpush.bf16.msrb.mxu1 %v12286_v60  ;;  %v13570_v50 = vor.u32 %v16418_v25, %v13569_v14  ;;  %v11905_v60 = vld [vmem:[%s18120_s18 + $0x190] sm:$0xf] }
 0x2c5   : > { %v13246_v49 = vor.u32 %v16329_v15, %v13243_v57  ;;  %v16130_v9 = vld [vmem:[%s18120_s18 + $0x5cc] sm:$0xf0] }
 0x2c6   : > { %5446 = vmatpush.bf16.msrb.mxu2 %v12798_v63  ;;  %5421 = vmatpush.bf16.msrb.mxu0 %v11710_v42  ;;  %v16002_v63 = vld [vmem:[%s18120_s18 + $0x1cc] sm:$0xf0]  ;;  %v12418_v5 = vor.u32 %v16130_v9, %v12417_v1  ;;  %v16170_v1 = vld [vmem:[%s18120_s18 + $0x714] sm:$0xf] }
 0x2c7   : > { %v16258_v37 = vld [vmem:[%s18120_s18 + $0x9cc] sm:$0xf0]  ;;  %v11906_v18 = vor.u32 %v16002_v63, %v11905_v60  ;;  %v16042_v60 = vld [vmem:[%s18120_s18 + $0x314] sm:$0xf] }
 0x2c8   : > { %5459 = vmatpush.bf16.msrb.mxu3 %v13310_v2  ;;  %5434 = vmatpush.bf16.msrb.mxu1 %v12222_v19  ;;  %v12929_v2 = vld [vmem:[%s18120_s18 + $0x990] sm:$0xf]  ;;  %v12099_v63 = vld [vmem:[%s18120_s18 + $0x350] sm:$0xf0] }
 0x2c9   : > { %5422 = vmatmul.bf16.vlgmr.msrb.gmra.mxu0 %v18686_v13  ;;  %v13441_v15 = vld [vmem:[%s18120_s18 + $0xd90] sm:$0xf]  ;;  %v12930_v12 = vor.u32 %v16258_v37, %v12929_v2  ;;  %v12611_v9 = vld [vmem:[%s18120_s18 + $0x750] sm:$0xf0] }
 0x2ca   : > { %5447 = vmatpush.bf16.msrb.mxu2 %v12734_v27  ;;  %5466 = vmatpush.bf16.msra.mxu0 %v12162_v32  ;;  %v16386_v57 = vld [vmem:[%s18120_s18 + $0xdcc] sm:$0xf0]  ;;  %v16298_v2 = vld [vmem:[%s18120_s18 + $0xb14] sm:$0xf] }
 0x2cb   : > { %5435 = vmatmul.bf16.vlgmr.msrb.gmra.mxu1 %v18688_v36  ;;  %v11841_v42 = vld [vmem:[%s18120_s18 + $0x110] sm:$0xf]  ;;  %v13442_v4 = vor.u32 %v16386_v57, %v13441_v15  ;;  %v13123_v37 = vld [vmem:[%s18120_s18 + $0xb50] sm:$0xf0] }
 0x2cc   : > { %5460 = vmatpush.bf16.msrb.mxu3 %v13246_v49  ;;  %5479 = vmatpush.bf16.msra.mxu1 %v12674_v0  ;;  %v15986_v40 = vld [vmem:[%s18120_s18 + $0x14c] sm:$0xf0]  ;;  %v16426_v15 = vld [vmem:[%s18120_s18 + $0xf14] sm:$0xf] }
 0x2cd   : > { %5448 = vmatmul.bf16.vlgmr.msrb.gmra.mxu2 %v18675_v16  ;;  %v12353_v54 = vld [vmem:[%s18120_s18 + $0x510] sm:$0xf]  ;;  %v11842_v32 = vor.u32 %v15986_v40, %v11841_v42  ;;  %v13635_v57 = vld [vmem:[%s18120_s18 + $0xf50] sm:$0xf0] }
 0x2ce   : > { %5492 = vmatpush.bf16.msra.mxu2 %v13186_v26  ;;  %5467 = vmatpush.bf16.msra.mxu0 %v12098_v48  ;;  %v16114_v19 = vld [vmem:[%s18120_s18 + $0x54c] sm:$0xf0]  ;;  %v16026_v42 = vld [vmem:[%s18120_s18 + $0x294] sm:$0xf] }
 0x2cf   : > { %5461 = vmatmul.bf16.vlgmr.msrb.gmra.mxu3 %v18677_v10  ;;  %v12865_v27 = vld [vmem:[%s18120_s18 + $0x910] sm:$0xf]  ;;  %v12354_v0 = vor.u32 %v16114_v19, %v12353_v54  ;;  %v12035_v40 = vld [vmem:[%s18120_s18 + $0x2d0] sm:$0xf0] }
 0x2d0   : > { %5505 = vmatpush.bf16.msra.mxu3 %v13698_v35  ;;  %5480 = vmatpush.bf16.msra.mxu1 %v12610_v21  ;;  %v16242_v20 = vld [vmem:[%s18120_s18 + $0x94c] sm:$0xf0]  ;;  %v16154_v54 = vld [vmem:[%s18120_s18 + $0x694] sm:$0xf] }
 0x2d1   : > { %v13377_v31 = vld [vmem:[%s18120_s18 + $0xd10] sm:$0xf]  ;;  %v12866_v26 = vor.u32 %v16242_v20, %v12865_v27  ;;  %v12547_v19 = vld [vmem:[%s18120_s18 + $0x6d0] sm:$0xf0] }
 0x2d2   : > { %5493 = vmatpush.bf16.msra.mxu2 %v13122_v22  ;;  %5468 = vmatpush.bf16.msra.mxu0 %v12034_v41  ;;  %v16370_v49 = vld [vmem:[%s18120_s18 + $0xd4c] sm:$0xf0]  ;;  %v16058_v41 = vld [vmem:[%s18120_s18 + $0x394] sm:$0xf] }
 0x2d3   : > { %v11777_v47 = vld [vmem:[%s18120_s18 + $0x90] sm:$0xf]  ;;  %v13378_v35 = vor.u32 %v16370_v49, %v13377_v31  ;;  %v16282_v27 = vld [vmem:[%s18120_s18 + $0xa94] sm:$0xf] }
 0x2d4   : > { %5506 = vmatpush.bf16.msra.mxu3 %v13634_v23  ;;  %5481 = vmatpush.bf16.msra.mxu1 %v12546_v43  ;;  %v15970_v53 = vld [vmem:[%s18120_s18 + $0xcc] sm:$0xf0]  ;;  %v12163_v43 = vld [vmem:[%s18120_s18 + $0x3d0] sm:$0xf0] }
 0x2d5   : > { %v12289_v38 = vld [vmem:[%s18120_s18 + $0x490] sm:$0xf]  ;;  %v11778_v48 = vor.u32 %v15970_v53, %v11777_v47  ;;  %v13059_v20 = vld [vmem:[%s18120_s18 + $0xad0] sm:$0xf0] }
 0x2d6   : > { %5494 = vmatpush.bf16.msra.mxu2 %v13058_v44  ;;  %5469 = vmatpush.bf16.msra.mxu0 %v11970_v7  ;;  %v16098_v62 = vld [vmem:[%s18120_s18 + $0x4cc] sm:$0xf0]  ;;  %v16186_v44 = vld [vmem:[%s18120_s18 + $0x794] sm:$0xf]  ;;  %v12166_v7 = vor.u32 %v16058_v41, %v12163_v43 }
 0x2d7   : > { %v12801_v6 = vld [vmem:[%s18120_s18 + $0x890] sm:$0xf]  ;;  %v12290_v3 = vor.u32 %v16098_v62, %v12289_v38  ;;  %v16410_v31 = vld [vmem:[%s18120_s18 + $0xe94] sm:$0xf] }
 0x2d8   : > { %5507 = vmatpush.bf16.msra.mxu3 %v13570_v50  ;;  %5482 = vmatpush.bf16.msra.mxu1 %v12482_v24  ;;  %v16226_v39 = vld [vmem:[%s18120_s18 + $0x8cc] sm:$0xf0]  ;;  %v13187_v50 = vld [vmem:[%s18120_s18 + $0xbd0] sm:$0xf0]  ;;  %v12678_v24 = vor.u32 %v16186_v44, %v12675_v45 }
 0x2d9   : > { %v13313_v11 = vld [vmem:[%s18120_s18 + $0xc90] sm:$0xf]  ;;  %v12802_v33 = vor.u32 %v16226_v39, %v12801_v6  ;;  %v13571_v49 = vld [vmem:[%s18120_s18 + $0xed0] sm:$0xf0] }
 0x2da   : > { %5495 = vmatpush.bf16.msra.mxu2 %v12994_v52  ;;  %5470 = vmatpush.bf16.msra.mxu0 %v11906_v18  ;;  %v16354_v17 = vld [vmem:[%s18120_s18 + $0xccc] sm:$0xf0]  ;;  %v13190_v52 = vor.u32 %v16314_v46, %v13187_v50  ;;  %v12102_v18 = vor.u32 %v16042_v60, %v12099_v63  ;;  %v16010_v47 = vld [vmem:[%s18120_s18 + $0x214] sm:$0xf] }
 0x2db   : > { %v11713_v21 = vld [vmem:[%s18120_s18 + $0x10] sm:$0xf]  ;;  %v13314_v61 = vor.u32 %v16354_v17, %v13313_v11  ;;  %v11971_v53 = vld [vmem:[%s18120_s18 + $0x250] sm:$0xf0] }
 0x2dc   : > { %5508 = vmatpush.bf16.msra.mxu3 %v13506_v59  ;;  %5483 = vmatpush.bf16.msra.mxu1 %v12418_v5  ;;  %v15954_v22 = vld [vmem:[%s18120_s18 + $0x4c] sm:$0xf0]  ;;  %v13702_v59 = vor.u32 %v16442_v34, %v13699_v55  ;;  %v12614_v5 = vor.u32 %v16170_v1, %v12611_v9  ;;  %v16138_v38 = vld [vmem:[%s18120_s18 + $0x614] sm:$0xf] }
 0x2dd   : > { %v12225_v8 = vld [vmem:[%s18120_s18 + $0x410] sm:$0xf]  ;;  %v11714_v28 = vor.u32 %v15954_v22, %v11713_v21  ;;  %v12483_v62 = vld [vmem:[%s18120_s18 + $0x650] sm:$0xf0] }
 0x2de   : > { %5496 = vmatpush.bf16.msra.mxu2 %v12930_v12  ;;  %5471 = vmatpush.bf16.msra.mxu0 %v11842_v32  ;;  %v16082_v23 = vld [vmem:[%s18120_s18 + $0x44c] sm:$0xf0]  ;;  %v13126_v12 = vor.u32 %v16298_v2, %v13123_v37  ;;  %v12038_v32 = vor.u32 %v16026_v42, %v12035_v40  ;;  %v16266_v6 = vld [vmem:[%s18120_s18 + $0xa14] sm:$0xf]  ;;  %v12486_v21 = vor.u32 %v16138_v38, %v12483_v62  ;;  %v12681_v62 = vld [vmem:[%s18120_s18 + $0x798] sm:$0xf] }
 0x2df   : > { %v12737_v56 = vld [vmem:[%s18120_s18 + $0x810] sm:$0xf]  ;;  %v12226_v30 = vor.u32 %v16082_v23, %v12225_v8  ;;  %v12995_v39 = vld [vmem:[%s18120_s18 + $0xa50] sm:$0xf0] }
 0x2e0   : > { %5509 = vmatpush.bf16.msra.mxu3 %v13442_v4  ;;  %5484 = vmatpush.bf16.msra.mxu1 %v12354_v0  ;;  %v16210_v29 = vld [vmem:[%s18120_s18 + $0x84c] sm:$0xf0]  ;;  %v13638_v4 = vor.u32 %v16426_v15, %v13635_v57  ;;  %v12550_v0 = vor.u32 %v16154_v54, %v12547_v19  ;;  %v16394_v11 = vld [vmem:[%s18120_s18 + $0xe14] sm:$0xf]  ;;  %v12998_v22 = vor.u32 %v16266_v6, %v12995_v39  ;;  %v16195_v6 = vld [vmem:[%s18120_s18 + $0x7d4] sm:$0xf0] }
 0x2e1   : > { %v13249_v14 = vld [vmem:[%s18120_s18 + $0xc10] sm:$0xf]  ;;  %v12738_v58 = vor.u32 %v16210_v29, %v12737_v56  ;;  %v13507_v17 = vld [vmem:[%s18120_s18 + $0xe50] sm:$0xf0] }
 0x2e2   : > { %5497 = vmatpush.bf16.msra.mxu2 %v12866_v26  ;;  %v16338_v25 = vld [vmem:[%s18120_s18 + $0xc4c] sm:$0xf0]  ;;  %5472 = vmatpush.bf16.msra.mxu0 %v11778_v48  ;;  %v13062_v26 = vor.u32 %v16282_v27, %v13059_v20  ;;  %v11974_v48 = vor.u32 %v16010_v47, %v11971_v53  ;;  %v16122_v8 = vld [vmem:[%s18120_s18 + $0x594] sm:$0xf]  ;;  %v13510_v23 = vor.u32 %v16394_v11, %v13507_v17  ;;  %v12169_v47 = vld [vmem:[%s18120_s18 + $0x398] sm:$0xf] }
 0x2e3   : > { %v13250_v51 = vor.u32 %v16338_v25, %v13249_v14  ;;  %v12419_v56 = vld [vmem:[%s18120_s18 + $0x5d0] sm:$0xf0]  ;;  %v13193_v17 = vld [vmem:[%s18120_s18 + $0xb98] sm:$0xf] }
 0x2e4   : > { %5510 = vmatpush.bf16.msra.mxu3 %v13378_v35  ;;  %5485 = vmatpush.bf16.msra.mxu1 %v12290_v3  ;;  %v13574_v35 = vor.u32 %v16410_v31, %v13571_v49  ;;  %v15994_v3 = vld [vmem:[%s18120_s18 + $0x194] sm:$0xf]  ;;  %v12422_v43 = vor.u32 %v16122_v8, %v12419_v56  ;;  %v16451_v8 = vld [vmem:[%s18120_s18 + $0xfd4] sm:$0xf0] }
 0x2e5   : > { %v12931_v29 = vld [vmem:[%s18120_s18 + $0x9d0] sm:$0xf0] }
 0x2e6   : > { %5498 = vmatpush.bf16.msra.mxu2 %v12802_v33  ;;  %5473 = vmatpush.bf16.msra.mxu0 %v11714_v28  ;;  %v11907_v33 = vld [vmem:[%s18120_s18 + $0x1d0] sm:$0xf0] }
 0x2e7   : > { %v16378_v14 = vld [vmem:[%s18120_s18 + $0xd94] sm:$0xf]  ;;  %v11910_v41 = vor.u32 %v15994_v3, %v11907_v33  ;;  %v13705_v33 = vld [vmem:[%s18120_s18 + $0xf98] sm:$0xf] }
 0x2e8   : > { %5511 = vmatpush.bf16.msra.mxu3 %v13314_v61  ;;  %5486 = vmatpush.bf16.msra.mxu1 %v12226_v30  ;;  %v16250_v61 = vld [vmem:[%s18120_s18 + $0x994] sm:$0xf] }
 0x2e9   : > { %5474 = vmatmul.bf16.vlgmr.msra.gmra.mxu0 %v18686_v13  ;;  %v13443_v25 = vld [vmem:[%s18120_s18 + $0xdd0] sm:$0xf0]  ;;  %v12934_v44 = vor.u32 %v16250_v61, %v12931_v29  ;;  %v12682_v29 = vor.u32 %v16195_v6, %v12681_v62  ;;  %v12425_v62 = vld [vmem:[%s18120_s18 + $0x598] sm:$0xf] }
 0x2ea   : > { %5499 = vmatpush.bf16.msra.mxu2 %v12738_v58  ;;  %5518 = vmatpush.bf16.msrb.mxu0 %v12166_v7  ;;  %v15978_v28 = vld [vmem:[%s18120_s18 + $0x114] sm:$0xf]  ;;  %v13446_v50 = vor.u32 %v16378_v14, %v13443_v25  ;;  %v5280_v54 = vpop.f32.mrf.mxu1  ;;  %v12105_v25 = vld [vmem:[%s18120_s18 + $0x318] sm:$0xf] }
 0x2eb   : > { %5487 = vmatmul.bf16.vlgmr.msra.gmra.mxu1 %v18688_v36  ;;  %v11843_v45 = vld [vmem:[%s18120_s18 + $0x150] sm:$0xf0] }
 0x2ec   : > { %5512 = vmatpush.bf16.msra.mxu3 %v13250_v51  ;;  %5531 = vmatpush.bf16.msrb.mxu1 %v12678_v24  ;;  %v16106_v46 = vld [vmem:[%s18120_s18 + $0x514] sm:$0xf]  ;;  %v11846_v7 = vor.u32 %v15978_v28, %v11843_v45  ;;  %v13706_v45 = vor.u32 %v16451_v8, %v13705_v33 }
 0x2ed   : > { %5500 = vmatmul.bf16.vlgmr.msra.gmra.mxu2 %v18675_v16  ;;  %v12355_v30 = vld [vmem:[%s18120_s18 + $0x550] sm:$0xf0] }
 0x2ee   : > { %5544 = vmatpush.bf16.msrb.mxu2 %v13190_v52  ;;  %5519 = vmatpush.bf16.msrb.mxu0 %v12102_v18  ;;  %v16234_v58 = vld [vmem:[%s18120_s18 + $0x914] sm:$0xf]  ;;  %v12358_v24 = vor.u32 %v16106_v46, %v12355_v30  ;;  %v5267_v18 = vpop.f32.mrf.mxu0  ;;  %v16179_v46 = vld [vmem:[%s18120_s18 + $0x754] sm:$0xf0] }
 0x2ef   : > { %5513 = vmatmul.bf16.vlgmr.msra.gmra.mxu3 %v18677_v10  ;;  %v12867_v34 = vld [vmem:[%s18120_s18 + $0x950] sm:$0xf0]  ;;  %v5281_v49 = vadd.f32 %v5280_v54, %v5267_v18  ;;  %v16307_v30 = vld [vmem:[%s18120_s18 + $0xb54] sm:$0xf0] }
 0x2f0   : > { %5557 = vmatpush.bf16.msrb.mxu3 %v13702_v59  ;;  %5532 = vmatpush.bf16.msrb.mxu1 %v12614_v5  ;;  %v16362_v55 = vld [vmem:[%s18120_s18 + $0xd14] sm:$0xf]  ;;  %v12870_v52 = vor.u32 %v16234_v58, %v12867_v34  ;;  %v13641_v34 = vld [vmem:[%s18120_s18 + $0xf18] sm:$0xf] }
 0x2f1   : > { %v13379_v51 = vld [vmem:[%s18120_s18 + $0xd50] sm:$0xf0]  ;;  %v16419_v18 = vld [vmem:[%s18120_s18 + $0xed4] sm:$0xf0] }
 0x2f2   : > { %5545 = vmatpush.bf16.msrb.mxu2 %v13126_v12  ;;  %5520 = vmatpush.bf16.msrb.mxu0 %v12038_v32  ;;  %v15962_v60 = vld [vmem:[%s18120_s18 + $0x94] sm:$0xf]  ;;  %v13382_v59 = vor.u32 %v16362_v55, %v13379_v51  ;;  %v5293_v53 = vpop.f32.mrf.mxu2  ;;  %v5306_v38 = vpop.f32.mrf.mxu3  ;;  %v16435_v55 = vld [vmem:[%s18120_s18 + $0xf54] sm:$0xf0] }
 0x2f3   : > { %v11779_v63 = vld [vmem:[%s18120_s18 + $0xd0] sm:$0xf0]  ;;  %v5294_v39 = vadd.f32 %v5293_v53, %v5281_v49  ;;  %v5282_v58 = vpop.f32.mrf.mxu1  ;;  %v16019_v54 = vld [vmem:[%s18120_s18 + $0x254] sm:$0xf0] }
 0x2f4   : > { %5558 = vmatpush.bf16.msrb.mxu3 %v13638_v4  ;;  %5533 = vmatpush.bf16.msrb.mxu1 %v12550_v0  ;;  %v16090_v1 = vld [vmem:[%s18120_s18 + $0x494] sm:$0xf]  ;;  %v11782_v5 = vor.u32 %v15962_v60, %v11779_v63  ;;  %v12041_v63 = vld [vmem:[%s18120_s18 + $0x298] sm:$0xf] }
 0x2f5   : > { %v12291_v9 = vld [vmem:[%s18120_s18 + $0x4d0] sm:$0xf0]  ;;  %v13513_v49 = vld [vmem:[%s18120_s18 + $0xe18] sm:$0xf] }
 0x2f6   : > { %5546 = vmatpush.bf16.msrb.mxu2 %v13062_v26  ;;  %5521 = vmatpush.bf16.msrb.mxu0 %v11974_v48  ;;  %v16218_v2 = vld [vmem:[%s18120_s18 + $0x894] sm:$0xf]  ;;  %v12294_v4 = vor.u32 %v16090_v1, %v12291_v9  ;;  %v16323_v48 = vld [vmem:[%s18120_s18 + $0xbd4] sm:$0xf0]  ;;  %v5269_v28 = vpop.f32.mrf.mxu0  ;;  %v13642_v9 = vor.u32 %v16435_v55, %v13641_v34 }
 0x2f7   : > { %v12803_v37 = vld [vmem:[%s18120_s18 + $0x8d0] sm:$0xf0]  ;;  %v13194_v14 = vor.u32 %v16323_v48, %v13193_v17  ;;  %v16035_v1 = vld [vmem:[%s18120_s18 + $0x2d4] sm:$0xf0] }
 0x2f8   : > { %5559 = vmatpush.bf16.msrb.mxu3 %v13574_v35  ;;  %5534 = vmatpush.bf16.msrb.mxu1 %v12486_v21  ;;  %v16346_v15 = vld [vmem:[%s18120_s18 + $0xc94] sm:$0xf]  ;;  %v12806_v19 = vor.u32 %v16218_v2, %v12803_v37  ;;  %v16067_v35 = vld [vmem:[%s18120_s18 + $0x3d4] sm:$0xf0]  ;;  %v2151_v21 = vld [vmem:[#allocation3 + $0x30] sm:$0xff] }
 0x2f9   : > { %v13315_v57 = vld [vmem:[%s18120_s18 + $0xcd0] sm:$0xf0]  ;;  %v12170_v61 = vor.u32 %v16067_v35, %v12169_v47  ;;  %v16163_v2 = vld [vmem:[%s18120_s18 + $0x6d4] sm:$0xf0] }
 0x2fa   : > { %5547 = vmatpush.bf16.msrb.mxu2 %v12998_v22  ;;  %5522 = vmatpush.bf16.msrb.mxu0 %v11910_v41  ;;  %v15946_v12 = vld [vmem:[%s18120_s18 + $0x14] sm:$0xf]  ;;  %v13318_v32 = vor.u32 %v16346_v15, %v13315_v57  ;;  %v16051_v41 = vld [vmem:[%s18120_s18 + $0x354] sm:$0xf0] }
 0x2fb   : > { %v11715_v42 = vld [vmem:[%s18120_s18 + $0x50] sm:$0xf0]  ;;  %v12106_v51 = vor.u32 %v16051_v41, %v12105_v25  ;;  %v13065_v37 = vld [vmem:[%s18120_s18 + $0xa98] sm:$0xf] }
 0x2fc   : > { %5560 = vmatpush.bf16.msrb.mxu3 %v13510_v23  ;;  %5535 = vmatpush.bf16.msrb.mxu1 %v12422_v43  ;;  %v16074_v40 = vld [vmem:[%s18120_s18 + $0x414] sm:$0xf]  ;;  %v11718_v11 = vor.u32 %v15946_v12, %v11715_v42  ;;  %v5307_v23 = vadd.f32 %v5306_v38, %v5294_v39  ;;  %v12617_v43 = vld [vmem:[%s18120_s18 + $0x718] sm:$0xf] }
 0x2fd   : > { %v12227_v27 = vld [vmem:[%s18120_s18 + $0x450] sm:$0xf0]  ;;  %v16291_v15 = vld [vmem:[%s18120_s18 + $0xad4] sm:$0xf0] }
 0x2fe   : > { %5548 = vmatpush.bf16.msrb.mxu2 %v12934_v44  ;;  %5523 = vmatpush.bf16.msrb.mxu0 %v11846_v7  ;;  %v16202_v20 = vld [vmem:[%s18120_s18 + $0x814] sm:$0xf]  ;;  %v12230_v22 = vor.u32 %v16074_v40, %v12227_v27  ;;  %v6090_v44 = vadd.f32 %v5307_v23, %v2151_v21  ;;  %v5295_v7 = vpop.f32.mrf.mxu2  ;;  %v13577_v57 = vld [vmem:[%s18120_s18 + $0xe98] sm:$0xf]  ;;  %v13066_v42 = vor.u32 %v16291_v15, %v13065_v37 }
 0x2ff   : > { %v12739_v31 = vld [vmem:[%s18120_s18 + $0x850] sm:$0xf0]  ;;  %v11977_v40 = vld [vmem:[%s18120_s18 + $0x218] sm:$0xf] }
 0x300   : > { %5561 = vmatpush.bf16.msrb.mxu3 %v13446_v50  ;;  %5536 = vmatpush.bf16.msrb.mxu1 %v12358_v24  ;;  %v16330_v0 = vld [vmem:[%s18120_s18 + $0xc14] sm:$0xf]  ;;  %v12742_v3 = vor.u32 %v16202_v20, %v12739_v31  ;;  %v13129_v50 = vld [vmem:[%s18120_s18 + $0xb18] sm:$0xf]  ;;  %6106 = vst [vmem:[#allocation3 + $0x30] sm:$0xff] %v6090_v44  ;;  %v5308_v24 = vpop.f32.mrf.mxu3 }
 0x301   : > { %v13251_v26 = vld [vmem:[%s18120_s18 + $0xc50] sm:$0xf0]  ;;  %v13130_v60 = vor.u32 %v16307_v30, %v13129_v50  ;;  %v16147_v27 = vld [vmem:[%s18120_s18 + $0x654] sm:$0xf0] }
 0x302   : > { %5549 = vmatpush.bf16.msrb.mxu2 %v12870_v52  ;;  %5524 = vmatpush.bf16.msrb.mxu0 %v11782_v5  ;;  %v13254_v56 = vor.u32 %v16330_v0, %v13251_v26  ;;  %v12618_v52 = vor.u32 %v16179_v46, %v12617_v43  ;;  %v12042_v5 = vor.u32 %v16035_v1, %v12041_v63  ;;  %v13001_v20 = vld [vmem:[%s18120_s18 + $0xa18] sm:$0xf] }
 0x303   : > { %v16275_v31 = vld [vmem:[%s18120_s18 + $0xa54] sm:$0xf0]  ;;  %v11978_v0 = vor.u32 %v16019_v54, %v11977_v40 }
 0x304   : > { %5562 = vmatpush.bf16.msrb.mxu3 %v13382_v59  ;;  %5537 = vmatpush.bf16.msrb.mxu1 %v12294_v4  ;;  %v12553_v59 = vld [vmem:[%s18120_s18 + $0x698] sm:$0xf]  ;;  %v13002_v53 = vor.u32 %v16275_v31, %v13001_v20 }
 0x305   : > { %v12554_v12 = vor.u32 %v16163_v2, %v12553_v59  ;;  %v12489_v4 = vld [vmem:[%s18120_s18 + $0x618] sm:$0xf] }
 0x306   : > { %5550 = vmatpush.bf16.msrb.mxu2 %v12806_v19  ;;  %5525 = vmatpush.bf16.msrb.mxu0 %v11718_v11  ;;  %v13578_v19 = vor.u32 %v16419_v18, %v13577_v57  ;;  %v5319_v26 = vpop.f32.mrf.mxu0  ;;  %v12490_v47 = vor.u32 %v16147_v27, %v12489_v4  ;;  %v11913_v38 = vld [vmem:[%s18120_s18 + $0x198] sm:$0xf] }
 0x307   : > { %v16003_v35 = vld [vmem:[%s18120_s18 + $0x1d4] sm:$0xf0] }
 0x308   : > { %5563 = vmatpush.bf16.msrb.mxu3 %v13318_v32  ;;  %5538 = vmatpush.bf16.msrb.mxu1 %v12230_v22  ;;  %v16403_v32 = vld [vmem:[%s18120_s18 + $0xe54] sm:$0xf0]  ;;  %v5332_v6 = vpop.f32.mrf.mxu1  ;;  %v11914_v33 = vor.u32 %v16003_v35, %v11913_v38  ;;  %v12683_v35 = vld [vmem:[%s18120_s18 + $0x7d8] sm:$0xf0] }
 0x309   : > { %5526 = vmatmul.bf16.vlgmr.msrb.gmra.mxu0 %v18686_v13  ;;  %v13514_v39 = vor.u32 %v16403_v32, %v13513_v49  ;;  %v16131_v11 = vld [vmem:[%s18120_s18 + $0x5d4] sm:$0xf0]  ;;  %v5333_v21 = vadd.f32 %v5332_v6, %v5319_v26  ;;  %v16059_v26 = vld [vmem:[%s18120_s18 + $0x39c] sm:$0xf] }
 0x30a   : > { %5551 = vmatpush.bf16.msrb.mxu2 %v12742_v3  ;;  %5570 = vmatpush.bf16.msra.mxu0 %v12170_v61  ;;  %v12937_v17 = vld [vmem:[%s18120_s18 + $0x998] sm:$0xf]  ;;  %v12426_v8 = vor.u32 %v16131_v11, %v12425_v62  ;;  %v16315_v62 = vld [vmem:[%s18120_s18 + $0xb9c] sm:$0xf] }
 0x30b   : > { %5539 = vmatmul.bf16.vlgmr.msrb.gmra.mxu1 %v18688_v36  ;;  %v16259_v48 = vld [vmem:[%s18120_s18 + $0x9d4] sm:$0xf0]  ;;  %v13195_v6 = vld [vmem:[%s18120_s18 + $0xbd8] sm:$0xf0] }
 0x30c   : > { %5564 = vmatpush.bf16.msrb.mxu3 %v13254_v56  ;;  %5583 = vmatpush.bf16.msra.mxu1 %v12682_v29  ;;  %v13449_v22 = vld [vmem:[%s18120_s18 + $0xd98] sm:$0xf]  ;;  %v12938_v23 = vor.u32 %v16259_v48, %v12937_v17  ;;  %v16443_v17 = vld [vmem:[%s18120_s18 + $0xf9c] sm:$0xf] }
 0x30d   : > { %5552 = vmatmul.bf16.vlgmr.msrb.gmra.mxu2 %v18675_v16  ;;  %v16387_v3 = vld [vmem:[%s18120_s18 + $0xdd4] sm:$0xf0]  ;;  %v13707_v48 = vld [vmem:[%s18120_s18 + $0xfd8] sm:$0xf0] }
 0x30e   : > { %5596 = vmatpush.bf16.msra.mxu2 %v13194_v14  ;;  %5571 = vmatpush.bf16.msra.mxu0 %v12106_v51  ;;  %v11849_v56 = vld [vmem:[%s18120_s18 + $0x118] sm:$0xf]  ;;  %v13450_v25 = vor.u32 %v16387_v3, %v13449_v22  ;;  %v5321_v55 = vpop.f32.mrf.mxu0 }
 0x30f   : > { %5565 = vmatmul.bf16.vlgmr.msrb.gmra.mxu3 %v18677_v10  ;;  %v15987_v61 = vld [vmem:[%s18120_s18 + $0x154] sm:$0xf0]  ;;  %v16283_v55 = vld [vmem:[%s18120_s18 + $0xa9c] sm:$0xf] }
 0x310   : > { %5609 = vmatpush.bf16.msra.mxu3 %v13706_v45  ;;  %5584 = vmatpush.bf16.msra.mxu1 %v12618_v52  ;;  %v12361_v29 = vld [vmem:[%s18120_s18 + $0x518] sm:$0xf]  ;;  %v5345_v14 = vpop.f32.mrf.mxu2  ;;  %v11850_v58 = vor.u32 %v15987_v61, %v11849_v56  ;;  %v5334_v63 = vpop.f32.mrf.mxu1  ;;  %v16171_v56 = vld [vmem:[%s18120_s18 + $0x71c] sm:$0xf]  ;;  %v13710_v61 = vor.u32 %v16443_v17, %v13707_v48 }
 0x311   : > { %v16115_v41 = vld [vmem:[%s18120_s18 + $0x554] sm:$0xf0]  ;;  %v5346_v28 = vadd.f32 %v5345_v14, %v5333_v21  ;;  %v16299_v14 = vld [vmem:[%s18120_s18 + $0xb1c] sm:$0xf] }
 0x312   : > { %5597 = vmatpush.bf16.msra.mxu2 %v13130_v60  ;;  %5572 = vmatpush.bf16.msra.mxu0 %v12042_v5  ;;  %v12873_v43 = vld [vmem:[%s18120_s18 + $0x918] sm:$0xf]  ;;  %v5358_v45 = vpop.f32.mrf.mxu3  ;;  %v12362_v51 = vor.u32 %v16115_v41, %v12361_v29  ;;  %v12619_v29 = vld [vmem:[%s18120_s18 + $0x758] sm:$0xf0] }
 0x313   : > { %v16243_v44 = vld [vmem:[%s18120_s18 + $0x954] sm:$0xf0]  ;;  %v5359_v34 = vadd.f32 %v5358_v45, %v5346_v28  ;;  %v16427_v41 = vld [vmem:[%s18120_s18 + $0xf1c] sm:$0xf]  ;;  %v12622_v28 = vor.u32 %v16171_v56, %v12619_v29 }
 0x314   : > { %5610 = vmatpush.bf16.msra.mxu3 %v13642_v9  ;;  %5585 = vmatpush.bf16.msra.mxu1 %v12554_v12  ;;  %v13385_v46 = vld [vmem:[%s18120_s18 + $0xd18] sm:$0xf]  ;;  %v12874_v7 = vor.u32 %v16243_v44, %v12873_v43  ;;  %v13643_v43 = vld [vmem:[%s18120_s18 + $0xf58] sm:$0xf0] }
 0x315   : > { %v16371_v50 = vld [vmem:[%s18120_s18 + $0xd54] sm:$0xf0]  ;;  %v13387_v56 = vld [vmem:[%s18120_s18 + $0xd58] sm:$0xf0] }
 0x316   : > { %5598 = vmatpush.bf16.msra.mxu2 %v13066_v42  ;;  %5573 = vmatpush.bf16.msra.mxu0 %v11978_v0  ;;  %v2152_v30 = vld [vmem:[#allocation3] sm:$0xff]  ;;  %v13386_v1 = vor.u32 %v16371_v50, %v13385_v46 }
 0x317   : > { %v11785_v24 = vld [vmem:[%s18120_s18 + $0x98] sm:$0xf]  ;;  %v6091_v37 = vadd.f32 %v5359_v34, %v2152_v30  ;;  %v16027_v46 = vld [vmem:[%s18120_s18 + $0x29c] sm:$0xf] }
 0x318   : > { %5611 = vmatpush.bf16.msra.mxu3 %v13578_v19  ;;  %5586 = vmatpush.bf16.msra.mxu1 %v12490_v47  ;;  %v15971_v52 = vld [vmem:[%s18120_s18 + $0xd4] sm:$0xf0]  ;;  %v5347_v27 = vpop.f32.mrf.mxu2  ;;  %v12171_v47 = vld [vmem:[%s18120_s18 + $0x3d8] sm:$0xf0] }
 0x319   : > { %v12297_v60 = vld [vmem:[%s18120_s18 + $0x498] sm:$0xf]  ;;  %v11786_v18 = vor.u32 %v15971_v52, %v11785_v24  ;;  %6107 = vst [vmem:[#allocation3] sm:$0xff] %v6091_v37  ;;  %v12174_v22 = vor.u32 %v16059_v26, %v12171_v47  ;;  %v12043_v50 = vld [vmem:[%s18120_s18 + $0x2d8] sm:$0xf0] }
 0x31a   : > { %5599 = vmatpush.bf16.msra.mxu2 %v13002_v53  ;;  %5574 = vmatpush.bf16.msra.mxu0 %v11914_v33  ;;  %v16099_v59 = vld [vmem:[%s18120_s18 + $0x4d4] sm:$0xf0]  ;;  %v5360_v0 = vpop.f32.mrf.mxu3  ;;  %v16187_v53 = vld [vmem:[%s18120_s18 + $0x79c] sm:$0xf]  ;;  %v13198_v33 = vor.u32 %v16315_v62, %v13195_v6  ;;  %v12046_v52 = vor.u32 %v16027_v46, %v12043_v50 }
 0x31b   : > { %v12809_v9 = vld [vmem:[%s18120_s18 + $0x898] sm:$0xf]  ;;  %v12298_v42 = vor.u32 %v16099_v59, %v12297_v60  ;;  %v12686_v3 = vor.u32 %v16187_v53, %v12683_v35  ;;  %v16155_v30 = vld [vmem:[%s18120_s18 + $0x69c] sm:$0xf] }
 0x31c   : > { %5612 = vmatpush.bf16.msra.mxu3 %v13514_v39  ;;  %5587 = vmatpush.bf16.msra.mxu1 %v12426_v8  ;;  %v16227_v2 = vld [vmem:[%s18120_s18 + $0x8d4] sm:$0xf0]  ;;  %v16043_v8 = vld [vmem:[%s18120_s18 + $0x31c] sm:$0xf] }
 0x31d   : > { %v13321_v15 = vld [vmem:[%s18120_s18 + $0xc98] sm:$0xf]  ;;  %v12810_v40 = vor.u32 %v16227_v2, %v12809_v9  ;;  %v12555_v34 = vld [vmem:[%s18120_s18 + $0x6d8] sm:$0xf0] }
 0x31e   : > { %5600 = vmatpush.bf16.msra.mxu2 %v12938_v23  ;;  %v16355_v57 = vld [vmem:[%s18120_s18 + $0xcd4] sm:$0xf0]  ;;  %5575 = vmatpush.bf16.msra.mxu0 %v11850_v58  ;;  %v12107_v23 = vld [vmem:[%s18120_s18 + $0x358] sm:$0xf0]  ;;  %v13646_v58 = vor.u32 %v16427_v41, %v13643_v43  ;;  %v12558_v60 = vor.u32 %v16155_v30, %v12555_v34 }
 0x31f   : > { %v11721_v5 = vld [vmem:[%s18120_s18 + $0x18] sm:$0xf]  ;;  %v13322_v20 = vor.u32 %v16355_v57, %v13321_v15  ;;  %v12110_v44 = vor.u32 %v16043_v8, %v12107_v23  ;;  %v13579_v24 = vld [vmem:[%s18120_s18 + $0xed8] sm:$0xf0] }
 0x320   : > { %5613 = vmatpush.bf16.msra.mxu3 %v13450_v25  ;;  %v15955_v12 = vld [vmem:[%s18120_s18 + $0x54] sm:$0xf0]  ;;  %5588 = vmatpush.bf16.msra.mxu1 %v12362_v51  ;;  %v13131_v25 = vld [vmem:[%s18120_s18 + $0xb58] sm:$0xf0] }
 0x321   : > { %v12233_v54 = vld [vmem:[%s18120_s18 + $0x418] sm:$0xf]  ;;  %v11722_v38 = vor.u32 %v15955_v12, %v11721_v5  ;;  %v13134_v45 = vor.u32 %v16299_v14, %v13131_v25  ;;  %v13067_v51 = vld [vmem:[%s18120_s18 + $0xad8] sm:$0xf0] }
 0x322   : > { %5601 = vmatpush.bf16.msra.mxu2 %v12874_v7  ;;  %v16083_v4 = vld [vmem:[%s18120_s18 + $0x454] sm:$0xf0]  ;;  %5576 = vmatpush.bf16.msra.mxu0 %v11786_v18  ;;  %v16411_v7 = vld [vmem:[%s18120_s18 + $0xe9c] sm:$0xf]  ;;  %v13070_v63 = vor.u32 %v16283_v55, %v13067_v51 }
 0x323   : > { %v12745_v19 = vld [vmem:[%s18120_s18 + $0x818] sm:$0xf]  ;;  %v12234_v39 = vor.u32 %v16083_v4, %v12233_v54  ;;  %v11979_v59 = vld [vmem:[%s18120_s18 + $0x258] sm:$0xf0]  ;;  %v13582_v2 = vor.u32 %v16411_v7, %v13579_v24 }
 0x324   : > { %5614 = vmatpush.bf16.msra.mxu3 %v13386_v1  ;;  %v16211_v31 = vld [vmem:[%s18120_s18 + $0x854] sm:$0xf0]  ;;  %5589 = vmatpush.bf16.msra.mxu1 %v12298_v42  ;;  %v16011_v1 = vld [vmem:[%s18120_s18 + $0x21c] sm:$0xf] }
 0x325   : > { %v13257_v49 = vld [vmem:[%s18120_s18 + $0xc18] sm:$0xf]  ;;  %v12746_v11 = vor.u32 %v16211_v31, %v12745_v19  ;;  %v16139_v9 = vld [vmem:[%s18120_s18 + $0x61c] sm:$0xf]  ;;  %v11982_v12 = vor.u32 %v16011_v1, %v11979_v59 }
 0x326   : > { %v16339_v32 = vld [vmem:[%s18120_s18 + $0xc54] sm:$0xf0]  ;;  %5602 = vmatpush.bf16.msra.mxu2 %v12810_v40  ;;  %5577 = vmatpush.bf16.msra.mxu0 %v11722_v38  ;;  %v12491_v37 = vld [vmem:[%s18120_s18 + $0x658] sm:$0xf0]  ;;  %v5371_v42 = vpop.f32.mrf.mxu0 }
 0x327   : > { %v13258_v21 = vor.u32 %v16339_v32, %v13257_v49  ;;  %v16267_v15 = vld [vmem:[%s18120_s18 + $0xa1c] sm:$0xf]  ;;  %v12494_v40 = vor.u32 %v16139_v9, %v12491_v37 }
 0x328   : > { %5615 = vmatpush.bf16.msra.mxu3 %v13322_v20  ;;  %5590 = vmatpush.bf16.msra.mxu1 %v12234_v39  ;;  %v13003_v57 = vld [vmem:[%s18120_s18 + $0xa58] sm:$0xf0]  ;;  %v5384_v20 = vpop.f32.mrf.mxu1 }
 0x329   : > { %5578 = vmatmul.bf16.vlgmr.msra.gmra.mxu0 %v18686_v13  ;;  %v16395_v18 = vld [vmem:[%s18120_s18 + $0xe1c] sm:$0xf]  ;;  %v13006_v54 = vor.u32 %v16267_v15, %v13003_v57  ;;  %v5385_v26 = vadd.f32 %v5384_v20, %v5371_v42  ;;  %v12177_v42 = vld [vmem:[%s18120_s18 + $0x3a0] sm:$0xf] }
 0x32a   : > { %5603 = vmatpush.bf16.msra.mxu2 %v12746_v11  ;;  %5622 = vmatpush.bf16.msrb.mxu0 %v12174_v22  ;;  %v13515_v5 = vld [vmem:[%s18120_s18 + $0xe58] sm:$0xf0]  ;;  %v16324_v20 = vld [vmem:[%s18120_s18 + $0xbdc] sm:$0xf0] }
 0x32b   : > { %5591 = vmatmul.bf16.vlgmr.msra.gmra.mxu1 %v18688_v36  ;;  %v15995_v4 = vld [vmem:[%s18120_s18 + $0x19c] sm:$0xf]  ;;  %v13518_v31 = vor.u32 %v16395_v18, %v13515_v5 }
 0x32c   : > { %5616 = vmatpush.bf16.msra.mxu3 %v13258_v21  ;;  %5635 = vmatpush.bf16.msrb.mxu1 %v12686_v3  ;;  %v11915_v19 = vld [vmem:[%s18120_s18 + $0x1d8] sm:$0xf0] }
 0x32d   : > { %5604 = vmatmul.bf16.vlgmr.msra.gmra.mxu2 %v18675_v16  ;;  %v16123_v27 = vld [vmem:[%s18120_s18 + $0x59c] sm:$0xf]  ;;  %v11918_v38 = vor.u32 %v15995_v4, %v11915_v19  ;;  %v16196_v19 = vld [vmem:[%s18120_s18 + $0x7dc] sm:$0xf0] }
 0x32e   : > { %5648 = vmatpush.bf16.msrb.mxu2 %v13198_v33  ;;  %5623 = vmatpush.bf16.msrb.mxu0 %v12110_v44  ;;  %v12427_v49 = vld [vmem:[%s18120_s18 + $0x5d8] sm:$0xf0]  ;;  %v5373_v25 = vpop.f32.mrf.mxu0 }
 0x32f   : > { %5617 = vmatmul.bf16.vlgmr.msra.gmra.mxu3 %v18677_v10  ;;  %v16251_v32 = vld [vmem:[%s18120_s18 + $0x99c] sm:$0xf]  ;;  %v12430_v35 = vor.u32 %v16123_v27, %v12427_v49  ;;  %v13201_v27 = vld [vmem:[%s18120_s18 + $0xba0] sm:$0xf] }
 0x330   : > { %5661 = vmatpush.bf16.msrb.mxu3 %v13710_v61  ;;  %5636 = vmatpush.bf16.msrb.mxu1 %v12622_v28  ;;  %v12939_v0 = vld [vmem:[%s18120_s18 + $0x9d8] sm:$0xf0]  ;;  %v5397_v17 = vpop.f32.mrf.mxu2  ;;  %v2153_v61 = vld [vmem:[#allocation3 + $0x58] sm:$0xff]  ;;  %v5386_v46 = vpop.f32.mrf.mxu1  ;;  %v13073_v25 = vld [vmem:[%s18120_s18 + $0xaa0] sm:$0xf] }
 0x331   : > { %v16379_v47 = vld [vmem:[%s18120_s18 + $0xd9c] sm:$0xf]  ;;  %v12942_v62 = vor.u32 %v16251_v32, %v12939_v0  ;;  %v5398_v33 = vadd.f32 %v5397_v17, %v5385_v26  ;;  %v13713_v32 = vld [vmem:[%s18120_s18 + $0xfa0] sm:$0xf] }
 0x332   : > { %5649 = vmatpush.bf16.msrb.mxu2 %v13134_v45  ;;  %5624 = vmatpush.bf16.msrb.mxu0 %v12046_v52  ;;  %v13451_v53 = vld [vmem:[%s18120_s18 + $0xdd8] sm:$0xf0]  ;;  %v5410_v8 = vpop.f32.mrf.mxu3  ;;  %v16452_v0 = vld [vmem:[%s18120_s18 + $0xfdc] sm:$0xf0] }
 0x333   : > { %v15979_v6 = vld [vmem:[%s18120_s18 + $0x11c] sm:$0xf]  ;;  %v13454_v48 = vor.u32 %v16379_v47, %v13451_v53  ;;  %v5411_v14 = vadd.f32 %v5410_v8, %v5398_v33  ;;  %v13137_v17 = vld [vmem:[%s18120_s18 + $0xb20] sm:$0xf] }
 0x334   : > { %5662 = vmatpush.bf16.msrb.mxu3 %v13646_v58  ;;  %5637 = vmatpush.bf16.msrb.mxu1 %v12558_v60  ;;  %v11851_v39 = vld [vmem:[%s18120_s18 + $0x158] sm:$0xf0] }
 0x335   : > { %v16107_v11 = vld [vmem:[%s18120_s18 + $0x51c] sm:$0xf]  ;;  %v11854_v29 = vor.u32 %v15979_v6, %v11851_v39  ;;  %v6092_v55 = vadd.f32 %v5411_v14, %v2153_v61  ;;  %v12625_v6 = vld [vmem:[%s18120_s18 + $0x720] sm:$0xf]  ;;  %v13714_v39 = vor.u32 %v16452_v0, %v13713_v32 }
 0x336   : > { %5650 = vmatpush.bf16.msrb.mxu2 %v13070_v63  ;;  %5625 = vmatpush.bf16.msrb.mxu0 %v11982_v12  ;;  %v12363_v21 = vld [vmem:[%s18120_s18 + $0x558] sm:$0xf0]  ;;  %v12561_v61 = vld [vmem:[%s18120_s18 + $0x6a0] sm:$0xf] }
 0x337   : > { %v16235_v22 = vld [vmem:[%s18120_s18 + $0x91c] sm:$0xf]  ;;  %v12366_v41 = vor.u32 %v16107_v11, %v12363_v21  ;;  %6108 = vst [vmem:[#allocation3 + $0x58] sm:$0xff] %v6092_v55  ;;  %v16180_v11 = vld [vmem:[%s18120_s18 + $0x75c] sm:$0xf0] }
 0x338   : > { %5663 = vmatpush.bf16.msrb.mxu3 %v13582_v2  ;;  %5638 = vmatpush.bf16.msrb.mxu1 %v12494_v40  ;;  %v12875_v3 = vld [vmem:[%s18120_s18 + $0x958] sm:$0xf0]  ;;  %v5399_v37 = vpop.f32.mrf.mxu2  ;;  %v16068_v40 = vld [vmem:[%s18120_s18 + $0x3dc] sm:$0xf0]  ;;  %v12626_v33 = vor.u32 %v16180_v11, %v12625_v6 }
 0x339   : > { %v16363_v23 = vld [vmem:[%s18120_s18 + $0xd1c] sm:$0xf]  ;;  %v12878_v43 = vor.u32 %v16235_v22, %v12875_v3  ;;  %v12178_v47 = vor.u32 %v16068_v40, %v12177_v42  ;;  %v13649_v21 = vld [vmem:[%s18120_s18 + $0xf20] sm:$0xf] }
 0x33a   : > { %5651 = vmatpush.bf16.msrb.mxu2 %v13006_v54  ;;  %5626 = vmatpush.bf16.msrb.mxu0 %v11918_v38  ;;  %v15963_v44 = vld [vmem:[%s18120_s18 + $0x9c] sm:$0xf]  ;;  %v13390_v50 = vor.u32 %v16363_v23, %v13387_v56  ;;  %v5412_v12 = vpop.f32.mrf.mxu3  ;;  %v12689_v54 = vld [vmem:[%s18120_s18 + $0x7a0] sm:$0xf]  ;;  %v13202_v38 = vor.u32 %v16324_v20, %v13201_v27 }
 0x33b   : > { %v11787_v28 = vld [vmem:[%s18120_s18 + $0xd8] sm:$0xf0]  ;;  %v12690_v53 = vor.u32 %v16196_v19, %v12689_v54  ;;  %v16436_v22 = vld [vmem:[%s18120_s18 + $0xf5c] sm:$0xf0] }
 0x33c   : > { %5664 = vmatpush.bf16.msrb.mxu3 %v13518_v31  ;;  %5639 = vmatpush.bf16.msrb.mxu1 %v12430_v35  ;;  %v16091_v45 = vld [vmem:[%s18120_s18 + $0x49c] sm:$0xf]  ;;  %v11790_v24 = vor.u32 %v15963_v44, %v11787_v28  ;;  %v12113_v35 = vld [vmem:[%s18120_s18 + $0x320] sm:$0xf] }
 0x33d   : > { %v12299_v30 = vld [vmem:[%s18120_s18 + $0x4d8] sm:$0xf0]  ;;  %v12049_v23 = vld [vmem:[%s18120_s18 + $0x2a0] sm:$0xf] }
 0x33e   : > { %5652 = vmatpush.bf16.msrb.mxu2 %v12942_v62  ;;  %v16219_v58 = vld [vmem:[%s18120_s18 + $0x89c] sm:$0xf]  ;;  %5627 = vmatpush.bf16.msrb.mxu0 %v11854_v29  ;;  %v12302_v63 = vor.u32 %v16091_v45, %v12299_v30  ;;  %v16052_v62 = vld [vmem:[%s18120_s18 + $0x35c] sm:$0xf0]  ;;  %v13650_v29 = vor.u32 %v16436_v22, %v13649_v21 }
 0x33f   : > { %v12811_v34 = vld [vmem:[%s18120_s18 + $0x8d8] sm:$0xf0]  ;;  %v12114_v3 = vor.u32 %v16052_v62, %v12113_v35  ;;  %v16036_v56 = vld [vmem:[%s18120_s18 + $0x2dc] sm:$0xf0] }
 0x340   : > { %5665 = vmatpush.bf16.msrb.mxu3 %v13454_v48  ;;  %v16347_v51 = vld [vmem:[%s18120_s18 + $0xc9c] sm:$0xf]  ;;  %5640 = vmatpush.bf16.msrb.mxu1 %v12366_v41  ;;  %v12814_v1 = vor.u32 %v16219_v58, %v12811_v34  ;;  %v16308_v48 = vld [vmem:[%s18120_s18 + $0xb5c] sm:$0xf0]  ;;  %v12050_v28 = vor.u32 %v16036_v56, %v12049_v23 }
 0x341   : > { %v13323_v7 = vld [vmem:[%s18120_s18 + $0xcd8] sm:$0xf0]  ;;  %v13138_v8 = vor.u32 %v16308_v48, %v13137_v17  ;;  %v16164_v14 = vld [vmem:[%s18120_s18 + $0x6dc] sm:$0xf0] }
 0x342   : > { %v15947_v52 = vld [vmem:[%s18120_s18 + $0x1c] sm:$0xf]  ;;  %5653 = vmatpush.bf16.msrb.mxu2 %v12878_v43  ;;  %v13326_v15 = vor.u32 %v16347_v51, %v13323_v7  ;;  %5628 = vmatpush.bf16.msrb.mxu0 %v11790_v24  ;;  %v16292_v41 = vld [vmem:[%s18120_s18 + $0xadc] sm:$0xf0]  ;;  %v12562_v45 = vor.u32 %v16164_v14, %v12561_v61 }
 0x343   : > { %v11723_v60 = vld [vmem:[%s18120_s18 + $0x58] sm:$0xf0]  ;;  %v13585_v43 = vld [vmem:[%s18120_s18 + $0xea0] sm:$0xf]  ;;  %v13074_v46 = vor.u32 %v16292_v41, %v13073_v25 }
 0x344   : > { %v16075_v59 = vld [vmem:[%s18120_s18 + $0x41c] sm:$0xf]  ;;  %5666 = vmatpush.bf16.msrb.mxu3 %v13390_v50  ;;  %v11726_v4 = vor.u32 %v15947_v52, %v11723_v60  ;;  %5641 = vmatpush.bf16.msrb.mxu1 %v12302_v63  ;;  %v16420_v44 = vld [vmem:[%s18120_s18 + $0xedc] sm:$0xf0] }
 0x345   : > { %v12235_v9 = vld [vmem:[%s18120_s18 + $0x458] sm:$0xf0]  ;;  %v11985_v50 = vld [vmem:[%s18120_s18 + $0x220] sm:$0xf]  ;;  %v13586_v34 = vor.u32 %v16420_v44, %v13585_v43 }
 0x346   : > { %v16203_v2 = vld [vmem:[%s18120_s18 + $0x81c] sm:$0xf]  ;;  %5654 = vmatpush.bf16.msrb.mxu2 %v12814_v1  ;;  %v12238_v31 = vor.u32 %v16075_v59, %v12235_v9  ;;  %5629 = vmatpush.bf16.msrb.mxu0 %v11726_v4  ;;  %v16020_v30 = vld [vmem:[%s18120_s18 + $0x25c] sm:$0xf0]  ;;  %v5423_v63 = vpop.f32.mrf.mxu0 }
 0x347   : > { %v12747_v57 = vld [vmem:[%s18120_s18 + $0x858] sm:$0xf0]  ;;  %v12497_v58 = vld [vmem:[%s18120_s18 + $0x620] sm:$0xf]  ;;  %v11986_v60 = vor.u32 %v16020_v30, %v11985_v50 }
 0x348   : > { %v16331_v18 = vld [vmem:[%s18120_s18 + $0xc1c] sm:$0xf]  ;;  %v12750_v49 = vor.u32 %v16203_v2, %v12747_v57  ;;  %5667 = vmatpush.bf16.msrb.mxu3 %v13326_v15  ;;  %5642 = vmatpush.bf16.msrb.mxu1 %v12238_v31  ;;  %v16148_v55 = vld [vmem:[%s18120_s18 + $0x65c] sm:$0xf0]  ;;  %v5436_v15 = vpop.f32.mrf.mxu1 }
 0x349   : > { %v13259_v5 = vld [vmem:[%s18120_s18 + $0xc58] sm:$0xf0]  ;;  %5630 = vmatmul.bf16.vlgmr.msrb.gmra.mxu0 %v18686_v13  ;;  %v13009_v51 = vld [vmem:[%s18120_s18 + $0xa20] sm:$0xf]  ;;  %v12498_v1 = vor.u32 %v16148_v55, %v12497_v58  ;;  %v5437_v42 = vadd.f32 %v5436_v15, %v5423_v63  ;;  %v16060_v63 = vld [vmem:[%s18120_s18 + $0x3a4] sm:$0xf] }
 0x34a   : > { %v13262_v26 = vor.u32 %v16331_v18, %v13259_v5  ;;  %5655 = vmatpush.bf16.msrb.mxu2 %v12750_v49  ;;  %5674 = vmatpush.bf16.msra.mxu0 %v12178_v47  ;;  %v16276_v7 = vld [vmem:[%s18120_s18 + $0xa5c] sm:$0xf0]  ;;  %v13203_v15 = vld [vmem:[%s18120_s18 + $0xbe0] sm:$0xf0] }
 0x34b   : > { %5643 = vmatmul.bf16.vlgmr.msrb.gmra.mxu1 %v18688_v36  ;;  %v13521_v24 = vld [vmem:[%s18120_s18 + $0xe20] sm:$0xf]  ;;  %v13010_v59 = vor.u32 %v16276_v7, %v13009_v51 }
 0x34c   : > { %5668 = vmatpush.bf16.msrb.mxu3 %v13262_v26  ;;  %5687 = vmatpush.bf16.msra.mxu1 %v12690_v53  ;;  %v16404_v52 = vld [vmem:[%s18120_s18 + $0xe5c] sm:$0xf0] }
 0x34d   : > { %5656 = vmatmul.bf16.vlgmr.msrb.gmra.mxu2 %v18675_v16  ;;  %v11921_v9 = vld [vmem:[%s18120_s18 + $0x1a0] sm:$0xf]  ;;  %v13522_v57 = vor.u32 %v16404_v52, %v13521_v24 }
 0x34e   : > { %5700 = vmatpush.bf16.msra.mxu2 %v13202_v38  ;;  %5675 = vmatpush.bf16.msra.mxu0 %v12114_v3  ;;  %v16004_v2 = vld [vmem:[%s18120_s18 + $0x1dc] sm:$0xf0]  ;;  %v5425_v48 = vpop.f32.mrf.mxu0 }
 0x34f   : > { %5669 = vmatmul.bf16.vlgmr.msrb.gmra.mxu3 %v18677_v10  ;;  %v12433_v37 = vld [vmem:[%s18120_s18 + $0x5a0] sm:$0xf]  ;;  %v11922_v4 = vor.u32 %v16004_v2, %v11921_v9  ;;  %v12691_v2 = vld [vmem:[%s18120_s18 + $0x7e0] sm:$0xf0] }
 0x350   : > { %5713 = vmatpush.bf16.msra.mxu3 %v13714_v39  ;;  %5688 = vmatpush.bf16.msra.mxu1 %v12626_v33  ;;  %v16132_v18 = vld [vmem:[%s18120_s18 + $0x5dc] sm:$0xf0]  ;;  %v5449_v32 = vpop.f32.mrf.mxu2  ;;  %v2154_v39 = vld [vmem:[#allocation3 + $0x18] sm:$0xff]  ;;  %v5438_v23 = vpop.f32.mrf.mxu1  ;;  %v16284_v48 = vld [vmem:[%s18120_s18 + $0xaa4] sm:$0xf] }
 0x351   : > { %v12945_v5 = vld [vmem:[%s18120_s18 + $0x9a0] sm:$0xf]  ;;  %v12434_v19 = vor.u32 %v16132_v18, %v12433_v37  ;;  %v5450_v38 = vadd.f32 %v5449_v32, %v5437_v42  ;;  %v16316_v37 = vld [vmem:[%s18120_s18 + $0xba4] sm:$0xf] }
 0x352   : > { %5701 = vmatpush.bf16.msra.mxu2 %v13138_v8  ;;  %5676 = vmatpush.bf16.msra.mxu0 %v12050_v28  ;;  %v16260_v12 = vld [vmem:[%s18120_s18 + $0x9dc] sm:$0xf0]  ;;  %v5462_v35 = vpop.f32.mrf.mxu3  ;;  %v16300_v32 = vld [vmem:[%s18120_s18 + $0xb24] sm:$0xf] }
 0x353   : > { %v13457_v40 = vld [vmem:[%s18120_s18 + $0xda0] sm:$0xf]  ;;  %v12946_v27 = vor.u32 %v16260_v12, %v12945_v5  ;;  %v5463_v17 = vadd.f32 %v5462_v35, %v5450_v38  ;;  %v16444_v5 = vld [vmem:[%s18120_s18 + $0xfa4] sm:$0xf] }
 0x354   : > { %5714 = vmatpush.bf16.msra.mxu3 %v13650_v29  ;;  %5689 = vmatpush.bf16.msra.mxu1 %v12562_v45  ;;  %v16388_v54 = vld [vmem:[%s18120_s18 + $0xddc] sm:$0xf0]  ;;  %v13715_v12 = vld [vmem:[%s18120_s18 + $0xfe0] sm:$0xf0] }
 0x355   : > { %v11857_v20 = vld [vmem:[%s18120_s18 + $0x120] sm:$0xf]  ;;  %v13458_v0 = vor.u32 %v16388_v54, %v13457_v40  ;;  %v6093_v25 = vadd.f32 %v5463_v17, %v2154_v39  ;;  %v16156_v39 = vld [vmem:[%s18120_s18 + $0x6a4] sm:$0xf] }
 0x356   : > { %5702 = vmatpush.bf16.msra.mxu2 %v13074_v46  ;;  %5677 = vmatpush.bf16.msra.mxu0 %v11986_v60  ;;  %v15988_v31 = vld [vmem:[%s18120_s18 + $0x15c] sm:$0xf0]  ;;  %v12563_v17 = vld [vmem:[%s18120_s18 + $0x6e0] sm:$0xf0] }
 0x357   : > { %v12369_v49 = vld [vmem:[%s18120_s18 + $0x520] sm:$0xf]  ;;  %v11858_v11 = vor.u32 %v15988_v31, %v11857_v20  ;;  %6109 = vst [vmem:[#allocation3 + $0x18] sm:$0xff] %v6093_v25  ;;  %v16172_v20 = vld [vmem:[%s18120_s18 + $0x724] sm:$0xf]  ;;  %v13718_v31 = vor.u32 %v16444_v5, %v13715_v12 }
 0x358   : > { %5715 = vmatpush.bf16.msra.mxu3 %v13586_v34  ;;  %5690 = vmatpush.bf16.msra.mxu1 %v12498_v1  ;;  %v16116_v26 = vld [vmem:[%s18120_s18 + $0x55c] sm:$0xf0]  ;;  %v5451_v55 = vpop.f32.mrf.mxu2  ;;  %v12179_v1 = vld [vmem:[%s18120_s18 + $0x3e0] sm:$0xf0] }
 0x359   : > { %v12881_v47 = vld [vmem:[%s18120_s18 + $0x920] sm:$0xf]  ;;  %v12370_v21 = vor.u32 %v16116_v26, %v12369_v49  ;;  %v12182_v40 = vor.u32 %v16060_v63, %v12179_v1  ;;  %v12627_v49 = vld [vmem:[%s18120_s18 + $0x760] sm:$0xf0] }
 0x35a   : > { %5703 = vmatpush.bf16.msra.mxu2 %v13010_v59  ;;  %v16244_v53 = vld [vmem:[%s18120_s18 + $0x95c] sm:$0xf0]  ;;  %5678 = vmatpush.bf16.msra.mxu0 %v11922_v4  ;;  %v5464_v60 = vpop.f32.mrf.mxu3  ;;  %v16188_v59 = vld [vmem:[%s18120_s18 + $0x7a4] sm:$0xf]  ;;  %v13206_v4 = vor.u32 %v16316_v37, %v13203_v15  ;;  %v12630_v38 = vor.u32 %v16172_v20, %v12627_v49 }
 0x35b   : > { %v13393_v62 = vld [vmem:[%s18120_s18 + $0xd20] sm:$0xf]  ;;  %v12882_v22 = vor.u32 %v16244_v53, %v12881_v47  ;;  %v12694_v54 = vor.u32 %v16188_v59, %v12691_v2  ;;  %v16428_v26 = vld [vmem:[%s18120_s18 + $0xf24] sm:$0xf] }
 0x35c   : > { %5716 = vmatpush.bf16.msra.mxu3 %v13522_v57  ;;  %v16372_v6 = vld [vmem:[%s18120_s18 + $0xd5c] sm:$0xf0]  ;;  %5691 = vmatpush.bf16.msra.mxu1 %v12434_v19  ;;  %v16044_v19 = vld [vmem:[%s18120_s18 + $0x324] sm:$0xf] }
 0x35d   : > { %v11793_v3 = vld [vmem:[%s18120_s18 + $0xa0] sm:$0xf]  ;;  %v13394_v56 = vor.u32 %v16372_v6, %v13393_v62  ;;  %v13651_v47 = vld [vmem:[%s18120_s18 + $0xf60] sm:$0xf0] }
 0x35e   : > { %5704 = vmatpush.bf16.msra.mxu2 %v12946_v27  ;;  %v15972_v33 = vld [vmem:[%s18120_s18 + $0xdc] sm:$0xf0]  ;;  %5679 = vmatpush.bf16.msra.mxu0 %v11858_v11  ;;  %v12115_v27 = vld [vmem:[%s18120_s18 + $0x360] sm:$0xf0]  ;;  %v13654_v11 = vor.u32 %v16428_v26, %v13651_v47 }
 0x35f   : > { %v12305_v8 = vld [vmem:[%s18120_s18 + $0x4a0] sm:$0xf]  ;;  %v11794_v44 = vor.u32 %v15972_v33, %v11793_v3  ;;  %v12118_v53 = vor.u32 %v16044_v19, %v12115_v27  ;;  %v16028_v62 = vld [vmem:[%s18120_s18 + $0x2a4] sm:$0xf] }
 0x360   : > { %5717 = vmatpush.bf16.msra.mxu3 %v13458_v0  ;;  %v16100_v61 = vld [vmem:[%s18120_s18 + $0x4dc] sm:$0xf0]  ;;  %5692 = vmatpush.bf16.msra.mxu1 %v12370_v21  ;;  %v13139_v0 = vld [vmem:[%s18120_s18 + $0xb60] sm:$0xf0] }
 0x361   : > { %v12817_v29 = vld [vmem:[%s18120_s18 + $0x8a0] sm:$0xf]  ;;  %v12306_v46 = vor.u32 %v16100_v61, %v12305_v8  ;;  %v13142_v35 = vor.u32 %v16300_v32, %v13139_v0  ;;  %v12051_v6 = vld [vmem:[%s18120_s18 + $0x2e0] sm:$0xf0]  ;;  %v12566_v8 = vor.u32 %v16156_v39, %v12563_v17 }
 0x362   : > { %v16228_v14 = vld [vmem:[%s18120_s18 + $0x8dc] sm:$0xf0]  ;;  %5705 = vmatpush.bf16.msra.mxu2 %v12882_v22  ;;  %5680 = vmatpush.bf16.msra.mxu0 %v11794_v44  ;;  %v13075_v21 = vld [vmem:[%s18120_s18 + $0xae0] sm:$0xf0]  ;;  %v12054_v33 = vor.u32 %v16028_v62, %v12051_v6 }
 0x363   : > { %v13329_v41 = vld [vmem:[%s18120_s18 + $0xca0] sm:$0xf]  ;;  %v12818_v50 = vor.u32 %v16228_v14, %v12817_v29  ;;  %v16412_v22 = vld [vmem:[%s18120_s18 + $0xea4] sm:$0xf]  ;;  %v13078_v23 = vor.u32 %v16284_v48, %v13075_v21 }
 0x364   : > { %v16356_v43 = vld [vmem:[%s18120_s18 + $0xcdc] sm:$0xf0]  ;;  %5718 = vmatpush.bf16.msra.mxu3 %v13394_v56  ;;  %5693 = vmatpush.bf16.msra.mxu1 %v12306_v46  ;;  %v13587_v3 = vld [vmem:[%s18120_s18 + $0xee0] sm:$0xf0] }
 0x365   : > { %v11729_v28 = vld [vmem:[%s18120_s18 + $0x20] sm:$0xf]  ;;  %v13330_v51 = vor.u32 %v16356_v43, %v13329_v41  ;;  %v16012_v56 = vld [vmem:[%s18120_s18 + $0x224] sm:$0xf]  ;;  %v13590_v14 = vor.u32 %v16412_v22, %v13587_v3 }
 0x366   : > { %v15956_v45 = vld [vmem:[%s18120_s18 + $0x5c] sm:$0xf0]  ;;  %5706 = vmatpush.bf16.msra.mxu2 %v12818_v50  ;;  %v11987_v61 = vld [vmem:[%s18120_s18 + $0x260] sm:$0xf0]  ;;  %v5475_v46 = vpop.f32.mrf.mxu0 }
 0x367   : > { %v12241_v30 = vld [vmem:[%s18120_s18 + $0x420] sm:$0xf]  ;;  %v11730_v9 = vor.u32 %v15956_v45, %v11729_v28  ;;  %v16140_v29 = vld [vmem:[%s18120_s18 + $0x624] sm:$0xf]  ;;  %v11990_v45 = vor.u32 %v16012_v56, %v11987_v61 }
 0x368   : > { %v16084_v58 = vld [vmem:[%s18120_s18 + $0x45c] sm:$0xf0]  ;;  %5719 = vmatpush.bf16.msra.mxu3 %v13330_v51  ;;  %v12499_v25 = vld [vmem:[%s18120_s18 + $0x660] sm:$0xf0]  ;;  %v5488_v51 = vpop.f32.mrf.mxu1 }
 0x369   : > { %v12753_v34 = vld [vmem:[%s18120_s18 + $0x820] sm:$0xf]  ;;  %v12242_v57 = vor.u32 %v16084_v58, %v12241_v30  ;;  %5681 = vmatpush.bf16.msra.mxu0 %v11730_v9  ;;  %v16268_v41 = vld [vmem:[%s18120_s18 + $0xa24] sm:$0xf]  ;;  %v12502_v50 = vor.u32 %v16140_v29, %v12499_v25  ;;  %v5489_v63 = vadd.f32 %v5488_v51, %v5475_v46  ;;  %v12185_v46 = vld [vmem:[%s18120_s18 + $0x3a8] sm:$0xf] }
 0x36a   : > { %v16212_v7 = vld [vmem:[%s18120_s18 + $0x85c] sm:$0xf0]  ;;  %v13011_v43 = vld [vmem:[%s18120_s18 + $0xa60] sm:$0xf0]  ;;  %v16325_v51 = vld [vmem:[%s18120_s18 + $0xbe4] sm:$0xf0] }
 0x36b   : > { %v13265_v24 = vld [vmem:[%s18120_s18 + $0xc20] sm:$0xf]  ;;  %v12754_v18 = vor.u32 %v16212_v7, %v12753_v34  ;;  %5694 = vmatpush.bf16.msra.mxu1 %v12242_v57  ;;  %v16396_v44 = vld [vmem:[%s18120_s18 + $0xe24] sm:$0xf]  ;;  %v13014_v30 = vor.u32 %v16268_v41, %v13011_v43 }
 0x36c   : > { %v16340_v52 = vld [vmem:[%s18120_s18 + $0xc5c] sm:$0xf0]  ;;  %5682 = vmatmul.bf16.vlgmr.msra.gmra.mxu0 %v18686_v13  ;;  %v13523_v28 = vld [vmem:[%s18120_s18 + $0xe60] sm:$0xf0] }
 0x36d   : > { %v13266_v42 = vor.u32 %v16340_v52, %v13265_v24  ;;  %5707 = vmatpush.bf16.msra.mxu2 %v12754_v18  ;;  %5726 = vmatpush.bf16.msrb.mxu0 %v12182_v40  ;;  %v15996_v58 = vld [vmem:[%s18120_s18 + $0x1a4] sm:$0xf]  ;;  %v13526_v7 = vor.u32 %v16396_v44, %v13523_v28 }
 0x36e   : > { %5695 = vmatmul.bf16.vlgmr.msra.gmra.mxu1 %v18688_v36  ;;  %v11923_v34 = vld [vmem:[%s18120_s18 + $0x1e0] sm:$0xf0]  ;;  %v5477_v0 = vpop.f32.mrf.mxu0 }
 0x36f   : > { %5720 = vmatpush.bf16.msra.mxu3 %v13266_v42  ;;  %5739 = vmatpush.bf16.msrb.mxu1 %v12694_v54  ;;  %v16124_v55 = vld [vmem:[%s18120_s18 + $0x5a4] sm:$0xf]  ;;  %v11926_v9 = vor.u32 %v15996_v58, %v11923_v34  ;;  %v16197_v34 = vld [vmem:[%s18120_s18 + $0x7e4] sm:$0xf0] }
 0x370   : > { %5708 = vmatmul.bf16.vlgmr.msra.gmra.mxu2 %v18675_v16  ;;  %v12435_v24 = vld [vmem:[%s18120_s18 + $0x5e0] sm:$0xf0]  ;;  %v5501_v5 = vpop.f32.mrf.mxu2  ;;  %v5490_v62 = vpop.f32.mrf.mxu1  ;;  %v13081_v0 = vld [vmem:[%s18120_s18 + $0xaa8] sm:$0xf] }
 0x371   : > { %5752 = vmatpush.bf16.msrb.mxu2 %v13206_v4  ;;  %5727 = vmatpush.bf16.msrb.mxu0 %v12118_v53  ;;  %v16252_v52 = vld [vmem:[%s18120_s18 + $0x9a4] sm:$0xf]  ;;  %v12438_v2 = vor.u32 %v16124_v55, %v12435_v24  ;;  %v5502_v4 = vadd.f32 %v5501_v5, %v5489_v63  ;;  %v13209_v55 = vld [vmem:[%s18120_s18 + $0xba8] sm:$0xf] }
 0x372   : > { %5721 = vmatmul.bf16.vlgmr.msra.gmra.mxu3 %v18677_v10  ;;  %v12947_v60 = vld [vmem:[%s18120_s18 + $0x9e0] sm:$0xf0]  ;;  %v5514_v19 = vpop.f32.mrf.mxu3  ;;  %v13145_v5 = vld [vmem:[%s18120_s18 + $0xb28] sm:$0xf] }
 0x373   : > { %5765 = vmatpush.bf16.msrb.mxu3 %v13718_v31  ;;  %5740 = vmatpush.bf16.msrb.mxu1 %v12630_v38  ;;  %v16380_v1 = vld [vmem:[%s18120_s18 + $0xda4] sm:$0xf]  ;;  %v12950_v37 = vor.u32 %v16252_v52, %v12947_v60  ;;  %v2155_v31 = vld [vmem:[#allocation3 + $0x50] sm:$0xff]  ;;  %v5515_v32 = vadd.f32 %v5514_v19, %v5502_v4 }
 0x374   : > { %v13459_v59 = vld [vmem:[%s18120_s18 + $0xde0] sm:$0xf0]  ;;  %v13721_v52 = vld [vmem:[%s18120_s18 + $0xfa8] sm:$0xf] }
 0x375   : > { %5753 = vmatpush.bf16.msrb.mxu2 %v13142_v35  ;;  %5728 = vmatpush.bf16.msrb.mxu0 %v12054_v33  ;;  %v15980_v15 = vld [vmem:[%s18120_s18 + $0x124] sm:$0xf]  ;;  %v13462_v12 = vor.u32 %v16380_v1, %v13459_v59  ;;  %v6094_v48 = vadd.f32 %v5515_v32, %v2155_v31  ;;  %v16453_v60 = vld [vmem:[%s18120_s18 + $0xfe4] sm:$0xf0] }
 0x376   : > { %v11859_v57 = vld [vmem:[%s18120_s18 + $0x160] sm:$0xf0]  ;;  %v12569_v31 = vld [vmem:[%s18120_s18 + $0x6a8] sm:$0xf] }
 0x377   : > { %5766 = vmatpush.bf16.msrb.mxu3 %v13654_v11  ;;  %5741 = vmatpush.bf16.msrb.mxu1 %v12566_v8  ;;  %v16108_v18 = vld [vmem:[%s18120_s18 + $0x524] sm:$0xf]  ;;  %v11862_v49 = vor.u32 %v15980_v15, %v11859_v57  ;;  %6110 = vst [vmem:[#allocation3 + $0x50] sm:$0xff] %v6094_v48  ;;  %v12633_v15 = vld [vmem:[%s18120_s18 + $0x728] sm:$0xf]  ;;  %v13722_v57 = vor.u32 %v16453_v60, %v13721_v52 }
 0x378   : > { %v12371_v42 = vld [vmem:[%s18120_s18 + $0x560] sm:$0xf0]  ;;  %v5503_v25 = vpop.f32.mrf.mxu2  ;;  %v16165_v32 = vld [vmem:[%s18120_s18 + $0x6e4] sm:$0xf0] }
 0x379   : > { %5754 = vmatpush.bf16.msrb.mxu2 %v13078_v23  ;;  %5729 = vmatpush.bf16.msrb.mxu0 %v11990_v45  ;;  %v16236_v40 = vld [vmem:[%s18120_s18 + $0x924] sm:$0xf]  ;;  %v12374_v26 = vor.u32 %v16108_v18, %v12371_v42  ;;  %v16181_v18 = vld [vmem:[%s18120_s18 + $0x764] sm:$0xf0] }
 0x37a   : > { %v12883_v54 = vld [vmem:[%s18120_s18 + $0x960] sm:$0xf0]  ;;  %v5516_v45 = vpop.f32.mrf.mxu3  ;;  %v13657_v42 = vld [vmem:[%s18120_s18 + $0xf28] sm:$0xf]  ;;  %v12634_v4 = vor.u32 %v16181_v18, %v12633_v15 }
 0x37b   : > { %5767 = vmatpush.bf16.msrb.mxu3 %v13590_v14  ;;  %5742 = vmatpush.bf16.msrb.mxu1 %v12502_v50  ;;  %v16364_v27 = vld [vmem:[%s18120_s18 + $0xd24] sm:$0xf]  ;;  %v12886_v47 = vor.u32 %v16236_v40, %v12883_v54  ;;  %v16069_v50 = vld [vmem:[%s18120_s18 + $0x3e4] sm:$0xf0] }
 0x37c   : > { %v13395_v20 = vld [vmem:[%s18120_s18 + $0xd60] sm:$0xf0]  ;;  %v12186_v1 = vor.u32 %v16069_v50, %v12185_v46  ;;  %v16437_v40 = vld [vmem:[%s18120_s18 + $0xf64] sm:$0xf0] }
 0x37d   : > { %5755 = vmatpush.bf16.msrb.mxu2 %v13014_v30  ;;  %5730 = vmatpush.bf16.msrb.mxu0 %v11926_v9  ;;  %v15964_v53 = vld [vmem:[%s18120_s18 + $0xa4] sm:$0xf]  ;;  %v13398_v6 = vor.u32 %v16364_v27, %v13395_v20  ;;  %v12697_v30 = vld [vmem:[%s18120_s18 + $0x7a8] sm:$0xf]  ;;  %v13210_v9 = vor.u32 %v16325_v51, %v13209_v55 }
 0x37e   : > { %v11795_v38 = vld [vmem:[%s18120_s18 + $0xe0] sm:$0xf0]  ;;  %v12698_v59 = vor.u32 %v16197_v34, %v12697_v30  ;;  %v12057_v27 = vld [vmem:[%s18120_s18 + $0x2a8] sm:$0xf] }
 0x37f   : > { %5768 = vmatpush.bf16.msrb.mxu3 %v13526_v7  ;;  %5743 = vmatpush.bf16.msrb.mxu1 %v12438_v2  ;;  %v16092_v35 = vld [vmem:[%s18120_s18 + $0x4a4] sm:$0xf]  ;;  %v11798_v3 = vor.u32 %v15964_v53, %v11795_v38  ;;  %v12121_v2 = vld [vmem:[%s18120_s18 + $0x328] sm:$0xf] }
 0x380   : > { %v12307_v39 = vld [vmem:[%s18120_s18 + $0x4e0] sm:$0xf0]  ;;  %v16037_v20 = vld [vmem:[%s18120_s18 + $0x2e4] sm:$0xf0] }
 0x381   : > { %5756 = vmatpush.bf16.msrb.mxu2 %v12950_v37  ;;  %v16220_v11 = vld [vmem:[%s18120_s18 + $0x8a4] sm:$0xf]  ;;  %5731 = vmatpush.bf16.msrb.mxu0 %v11862_v49  ;;  %v12310_v23 = vor.u32 %v16092_v35, %v12307_v39  ;;  %v16053_v37 = vld [vmem:[%s18120_s18 + $0x364] sm:$0xf0]  ;;  %v13658_v49 = vor.u32 %v16437_v40, %v13657_v42  ;;  %v12058_v38 = vor.u32 %v16037_v20, %v12057_v27 }
 0x382   : > { %v12819_v17 = vld [vmem:[%s18120_s18 + $0x8e0] sm:$0xf0]  ;;  %v12122_v54 = vor.u32 %v16053_v37, %v12121_v2  ;;  %v16421_v53 = vld [vmem:[%s18120_s18 + $0xee4] sm:$0xf0]  ;;  %v12570_v35 = vor.u32 %v16165_v32, %v12569_v31 }
 0x383   : > { %5769 = vmatpush.bf16.msrb.mxu3 %v13462_v12  ;;  %v16348_v21 = vld [vmem:[%s18120_s18 + $0xca4] sm:$0xf]  ;;  %5744 = vmatpush.bf16.msrb.mxu1 %v12374_v26  ;;  %v12822_v56 = vor.u32 %v16220_v11, %v12819_v17  ;;  %v16309_v12 = vld [vmem:[%s18120_s18 + $0xb64] sm:$0xf0] }
 0x384   : > { %v13331_v22 = vld [vmem:[%s18120_s18 + $0xce0] sm:$0xf0]  ;;  %v13146_v19 = vor.u32 %v16309_v12, %v13145_v5  ;;  %v16293_v26 = vld [vmem:[%s18120_s18 + $0xae4] sm:$0xf0] }
 0x385   : > { %v15948_v33 = vld [vmem:[%s18120_s18 + $0x24] sm:$0xf]  ;;  %5757 = vmatpush.bf16.msrb.mxu2 %v12886_v47  ;;  %v13334_v41 = vor.u32 %v16348_v21, %v13331_v22  ;;  %5732 = vmatpush.bf16.msrb.mxu0 %v11798_v3  ;;  %v13593_v47 = vld [vmem:[%s18120_s18 + $0xea8] sm:$0xf]  ;;  %v13082_v62 = vor.u32 %v16293_v26, %v13081_v0 }
 0x386   : > { %v11731_v8 = vld [vmem:[%s18120_s18 + $0x60] sm:$0xf0]  ;;  %v16021_v39 = vld [vmem:[%s18120_s18 + $0x264] sm:$0xf0]  ;;  %v13594_v17 = vor.u32 %v16421_v53, %v13593_v47 }
 0x387   : > { %v16076_v61 = vld [vmem:[%s18120_s18 + $0x424] sm:$0xf]  ;;  %5770 = vmatpush.bf16.msrb.mxu3 %v13398_v6  ;;  %v11734_v58 = vor.u32 %v15948_v33, %v11731_v8  ;;  %5745 = vmatpush.bf16.msrb.mxu1 %v12310_v23  ;;  %v11993_v6 = vld [vmem:[%s18120_s18 + $0x228] sm:$0xf]  ;;  %v5527_v23 = vpop.f32.mrf.mxu0 }
 0x388   : > { %v12243_v29 = vld [vmem:[%s18120_s18 + $0x460] sm:$0xf0]  ;;  %v12505_v11 = vld [vmem:[%s18120_s18 + $0x628] sm:$0xf]  ;;  %v11994_v8 = vor.u32 %v16021_v39, %v11993_v6 }
 0x389   : > { %v16204_v14 = vld [vmem:[%s18120_s18 + $0x824] sm:$0xf]  ;;  %5758 = vmatpush.bf16.msrb.mxu2 %v12822_v56  ;;  %v12246_v7 = vor.u32 %v16076_v61, %v12243_v29  ;;  %5733 = vmatpush.bf16.msrb.mxu0 %v11734_v58  ;;  %v16149_v48 = vld [vmem:[%s18120_s18 + $0x664] sm:$0xf0] }
 0x38a   : > { %v12755_v43 = vld [vmem:[%s18120_s18 + $0x860] sm:$0xf0]  ;;  %v13017_v21 = vld [vmem:[%s18120_s18 + $0xa28] sm:$0xf]  ;;  %v12506_v56 = vor.u32 %v16149_v48, %v12505_v11 }
 0x38b   : > { %v16332_v44 = vld [vmem:[%s18120_s18 + $0xc24] sm:$0xf]  ;;  %v12758_v24 = vor.u32 %v16204_v14, %v12755_v43  ;;  %5771 = vmatpush.bf16.msrb.mxu3 %v13334_v41  ;;  %5746 = vmatpush.bf16.msrb.mxu1 %v12246_v7  ;;  %v16277_v22 = vld [vmem:[%s18120_s18 + $0xa64] sm:$0xf0]  ;;  %v5540_v41 = vpop.f32.mrf.mxu1 }
 0x38c   : > { %v13267_v28 = vld [vmem:[%s18120_s18 + $0xc60] sm:$0xf0]  ;;  %5734 = vmatmul.bf16.vlgmr.msrb.gmra.mxu0 %v18686_v13  ;;  %v13529_v3 = vld [vmem:[%s18120_s18 + $0xe28] sm:$0xf]  ;;  %v13018_v61 = vor.u32 %v16277_v22, %v13017_v21  ;;  %v5541_v46 = vadd.f32 %v5540_v41, %v5527_v23  ;;  %v16061_v23 = vld [vmem:[%s18120_s18 + $0x3ac] sm:$0xf] }
 0x38d   : > { %v13270_v63 = vor.u32 %v16332_v44, %v13267_v28  ;;  %5759 = vmatpush.bf16.msrb.mxu2 %v12758_v24  ;;  %5778 = vmatpush.bf16.msra.mxu0 %v12186_v1  ;;  %v16405_v33 = vld [vmem:[%s18120_s18 + $0xe64] sm:$0xf0]  ;;  %v13211_v41 = vld [vmem:[%s18120_s18 + $0xbe8] sm:$0xf0] }
 0x38e   : > { %5747 = vmatmul.bf16.vlgmr.msrb.gmra.mxu1 %v18688_v36  ;;  %v11929_v29 = vld [vmem:[%s18120_s18 + $0x1a8] sm:$0xf]  ;;  %v13530_v43 = vor.u32 %v16405_v33, %v13529_v3 }
 0x38f   : > { %5772 = vmatpush.bf16.msrb.mxu3 %v13270_v63  ;;  %5791 = vmatpush.bf16.msra.mxu1 %v12698_v59  ;;  %v16005_v14 = vld [vmem:[%s18120_s18 + $0x1e4] sm:$0xf0]  ;;  %v5529_v12 = vpop.f32.mrf.mxu0 }
 0x390   : > { %5760 = vmatmul.bf16.vlgmr.msrb.gmra.mxu2 %v18675_v16  ;;  %v12441_v25 = vld [vmem:[%s18120_s18 + $0x5a8] sm:$0xf]  ;;  %v11930_v58 = vor.u32 %v16005_v14, %v11929_v29  ;;  %v5553_v52 = vpop.f32.mrf.mxu2  ;;  %v12699_v14 = vld [vmem:[%s18120_s18 + $0x7e8] sm:$0xf0] }
 0x391   : > { %5804 = vmatpush.bf16.msra.mxu2 %v13210_v9  ;;  %5779 = vmatpush.bf16.msra.mxu0 %v12122_v54  ;;  %v16133_v44 = vld [vmem:[%s18120_s18 + $0x5e4] sm:$0xf0]  ;;  %v5554_v9 = vadd.f32 %v5553_v52, %v5541_v46  ;;  %v16301_v52 = vld [vmem:[%s18120_s18 + $0xb2c] sm:$0xf] }
 0x392   : > { %5773 = vmatmul.bf16.vlgmr.msrb.gmra.mxu3 %v18677_v10  ;;  %v12953_v28 = vld [vmem:[%s18120_s18 + $0x9a8] sm:$0xf]  ;;  %v12442_v34 = vor.u32 %v16133_v44, %v12441_v25  ;;  %v5566_v2 = vpop.f32.mrf.mxu3  ;;  %v16317_v25 = vld [vmem:[%s18120_s18 + $0xbac] sm:$0xf] }
 0x393   : > { %5817 = vmatpush.bf16.msra.mxu3 %v13722_v57  ;;  %5792 = vmatpush.bf16.msra.mxu1 %v12634_v4  ;;  %v16261_v45 = vld [vmem:[%s18120_s18 + $0x9e4] sm:$0xf0]  ;;  %v2156_v57 = vld [vmem:[#allocation3 + $0x68] sm:$0xff]  ;;  %v5567_v5 = vadd.f32 %v5566_v2, %v5554_v9  ;;  %v5542_v27 = vpop.f32.mrf.mxu1  ;;  %v16285_v12 = vld [vmem:[%s18120_s18 + $0xaac] sm:$0xf] }
 0x394   : > { %v13465_v50 = vld [vmem:[%s18120_s18 + $0xda8] sm:$0xf]  ;;  %v12954_v55 = vor.u32 %v16261_v45, %v12953_v28  ;;  %v16445_v28 = vld [vmem:[%s18120_s18 + $0xfac] sm:$0xf] }
 0x395   : > { %5805 = vmatpush.bf16.msra.mxu2 %v13146_v19  ;;  %5780 = vmatpush.bf16.msra.mxu0 %v12058_v38  ;;  %v16389_v30 = vld [vmem:[%s18120_s18 + $0xde4] sm:$0xf0]  ;;  %v6095_v0 = vadd.f32 %v5567_v5, %v2156_v57  ;;  %v13723_v45 = vld [vmem:[%s18120_s18 + $0xfe8] sm:$0xf0] }
 0x396   : > { %v11865_v51 = vld [vmem:[%s18120_s18 + $0x128] sm:$0xf]  ;;  %v13466_v60 = vor.u32 %v16389_v30, %v13465_v50  ;;  %v16157_v57 = vld [vmem:[%s18120_s18 + $0x6ac] sm:$0xf] }
 0x397   : > { %5818 = vmatpush.bf16.msra.mxu3 %v13658_v49  ;;  %5793 = vmatpush.bf16.msra.mxu1 %v12570_v35  ;;  %v15989_v7 = vld [vmem:[%s18120_s18 + $0x164] sm:$0xf0]  ;;  %6111 = vst [vmem:[#allocation3 + $0x68] sm:$0xff] %v6095_v0  ;;  %v12571_v5 = vld [vmem:[%s18120_s18 + $0x6e8] sm:$0xf0] }
 0x398   : > { %v12377_v24 = vld [vmem:[%s18120_s18 + $0x528] sm:$0xf]  ;;  %v11866_v18 = vor.u32 %v15989_v7, %v11865_v51  ;;  %v5555_v48 = vpop.f32.mrf.mxu2  ;;  %v16173_v51 = vld [vmem:[%s18120_s18 + $0x72c] sm:$0xf]  ;;  %v13726_v7 = vor.u32 %v16445_v28, %v13723_v45 }
 0x399   : > { %5806 = vmatpush.bf16.msra.mxu2 %v13082_v62  ;;  %5781 = vmatpush.bf16.msra.mxu0 %v11994_v8  ;;  %v16117_v63 = vld [vmem:[%s18120_s18 + $0x564] sm:$0xf0]  ;;  %v12507_v0 = vld [vmem:[%s18120_s18 + $0x668] sm:$0xf0] }
 0x39a   : > { %v12889_v1 = vld [vmem:[%s18120_s18 + $0x928] sm:$0xf]  ;;  %v12378_v42 = vor.u32 %v16117_v63, %v12377_v24  ;;  %v5568_v8 = vpop.f32.mrf.mxu3  ;;  %v12635_v24 = vld [vmem:[%s18120_s18 + $0x768] sm:$0xf0] }
 0x39b   : > { %5819 = vmatpush.bf16.msra.mxu3 %v13594_v17  ;;  %5794 = vmatpush.bf16.msra.mxu1 %v12506_v56  ;;  %v16245_v59 = vld [vmem:[%s18120_s18 + $0x964] sm:$0xf0]  ;;  %v12187_v56 = vld [vmem:[%s18120_s18 + $0x3e8] sm:$0xf0]  ;;  %v12638_v9 = vor.u32 %v16173_v51, %v12635_v24 }
 0x39c   : > { %v13401_v37 = vld [vmem:[%s18120_s18 + $0xd28] sm:$0xf]  ;;  %v12890_v40 = vor.u32 %v16245_v59, %v12889_v1  ;;  %v12190_v50 = vor.u32 %v16061_v23, %v12187_v56  ;;  %v16429_v63 = vld [vmem:[%s18120_s18 + $0xf2c] sm:$0xf] }
 0x39d   : > { %5807 = vmatpush.bf16.msra.mxu2 %v13018_v61  ;;  %v16373_v15 = vld [vmem:[%s18120_s18 + $0xd64] sm:$0xf0]  ;;  %5782 = vmatpush.bf16.msra.mxu0 %v11930_v58  ;;  %v16189_v61 = vld [vmem:[%s18120_s18 + $0x7ac] sm:$0xf]  ;;  %v13214_v58 = vor.u32 %v16317_v25, %v13211_v41 }
 0x39e   : > { %v11801_v54 = vld [vmem:[%s18120_s18 + $0xa8] sm:$0xf]  ;;  %v13402_v20 = vor.u32 %v16373_v15, %v13401_v37  ;;  %v12702_v30 = vor.u32 %v16189_v61, %v12699_v14  ;;  %v13659_v1 = vld [vmem:[%s18120_s18 + $0xf68] sm:$0xf0] }
 0x39f   : > { %5820 = vmatpush.bf16.msra.mxu3 %v13530_v43  ;;  %5795 = vmatpush.bf16.msra.mxu1 %v12442_v34  ;;  %v15973_v4 = vld [vmem:[%s18120_s18 + $0xe4] sm:$0xf0]  ;;  %v16045_v34 = vld [vmem:[%s18120_s18 + $0x32c] sm:$0xf] }
 0x3a0   : > { %v12313_v19 = vld [vmem:[%s18120_s18 + $0x4a8] sm:$0xf]  ;;  %v11802_v53 = vor.u32 %v15973_v4, %v11801_v54  ;;  %v16029_v37 = vld [vmem:[%s18120_s18 + $0x2ac] sm:$0xf] }
 0x3a1   : > { %5808 = vmatpush.bf16.msra.mxu2 %v12954_v55  ;;  %v16101_v31 = vld [vmem:[%s18120_s18 + $0x4e4] sm:$0xf0]  ;;  %5783 = vmatpush.bf16.msra.mxu0 %v11866_v18  ;;  %v12123_v55 = vld [vmem:[%s18120_s18 + $0x368] sm:$0xf0]  ;;  %v13662_v18 = vor.u32 %v16429_v63, %v13659_v1 }
 0x3a2   : > { %v12825_v49 = vld [vmem:[%s18120_s18 + $0x8a8] sm:$0xf]  ;;  %v12314_v62 = vor.u32 %v16101_v31, %v12313_v19  ;;  %v12126_v59 = vor.u32 %v16045_v34, %v12123_v55  ;;  %v12059_v15 = vld [vmem:[%s18120_s18 + $0x2e8] sm:$0xf0]  ;;  %v12574_v19 = vor.u32 %v16157_v57, %v12571_v5 }
 0x3a3   : > { %5821 = vmatpush.bf16.msra.mxu3 %v13466_v60  ;;  %v16229_v32 = vld [vmem:[%s18120_s18 + $0x8e4] sm:$0xf0]  ;;  %5796 = vmatpush.bf16.msra.mxu1 %v12378_v42  ;;  %v13147_v60 = vld [vmem:[%s18120_s18 + $0xb68] sm:$0xf0]  ;;  %v12062_v4 = vor.u32 %v16029_v37, %v12059_v15 }
 0x3a4   : > { %v13337_v26 = vld [vmem:[%s18120_s18 + $0xca8] sm:$0xf]  ;;  %v12826_v6 = vor.u32 %v16229_v32, %v12825_v49  ;;  %v13150_v2 = vor.u32 %v16301_v52, %v13147_v60  ;;  %v13083_v42 = vld [vmem:[%s18120_s18 + $0xae8] sm:$0xf0] }
 0x3a5   : > { %v16357_v47 = vld [vmem:[%s18120_s18 + $0xce4] sm:$0xf0]  ;;  %5809 = vmatpush.bf16.msra.mxu2 %v12890_v40  ;;  %5784 = vmatpush.bf16.msra.mxu0 %v11802_v53  ;;  %v16413_v40 = vld [vmem:[%s18120_s18 + $0xeac] sm:$0xf]  ;;  %v13086_v27 = vor.u32 %v16285_v12, %v13083_v42 }
 0x3a6   : > { %v11737_v38 = vld [vmem:[%s18120_s18 + $0x28] sm:$0xf]  ;;  %v13338_v21 = vor.u32 %v16357_v47, %v13337_v26  ;;  %v13595_v54 = vld [vmem:[%s18120_s18 + $0xee8] sm:$0xf0] }
 0x3a7   : > { %v15957_v35 = vld [vmem:[%s18120_s18 + $0x64] sm:$0xf0]  ;;  %5822 = vmatpush.bf16.msra.mxu3 %v13402_v20  ;;  %5797 = vmatpush.bf16.msra.mxu1 %v12314_v62  ;;  %v16013_v20 = vld [vmem:[%s18120_s18 + $0x22c] sm:$0xf]  ;;  %v13598_v32 = vor.u32 %v16413_v40, %v13595_v54  ;;  %v5579_v62 = vpop.f32.mrf.mxu0 }
 0x3a8   : > { %v12249_v39 = vld [vmem:[%s18120_s18 + $0x428] sm:$0xf]  ;;  %v11738_v29 = vor.u32 %v15957_v35, %v11737_v38  ;;  %v11995_v31 = vld [vmem:[%s18120_s18 + $0x268] sm:$0xf0] }
 0x3a9   : > { %v16085_v11 = vld [vmem:[%s18120_s18 + $0x464] sm:$0xf0]  ;;  %5810 = vmatpush.bf16.msra.mxu2 %v12826_v6  ;;  %v16141_v49 = vld [vmem:[%s18120_s18 + $0x62c] sm:$0xf]  ;;  %v11998_v35 = vor.u32 %v16013_v20, %v11995_v31 }
 0x3aa   : > { %v12761_v17 = vld [vmem:[%s18120_s18 + $0x828] sm:$0xf]  ;;  %v12250_v43 = vor.u32 %v16085_v11, %v12249_v39  ;;  %5785 = vmatpush.bf16.msra.mxu0 %v11738_v29  ;;  %v16269_v26 = vld [vmem:[%s18120_s18 + $0xa2c] sm:$0xf]  ;;  %v12510_v6 = vor.u32 %v16141_v49, %v12507_v0 }
 0x3ab   : > { %v16213_v22 = vld [vmem:[%s18120_s18 + $0x864] sm:$0xf0]  ;;  %5823 = vmatpush.bf16.msra.mxu3 %v13338_v21  ;;  %v13019_v47 = vld [vmem:[%s18120_s18 + $0xa68] sm:$0xf0]  ;;  %v5592_v21 = vpop.f32.mrf.mxu1 }
 0x3ac   : > { %v13273_v3 = vld [vmem:[%s18120_s18 + $0xc28] sm:$0xf]  ;;  %v12762_v44 = vor.u32 %v16213_v22, %v12761_v17  ;;  %5798 = vmatpush.bf16.msra.mxu1 %v12250_v43  ;;  %v16397_v53 = vld [vmem:[%s18120_s18 + $0xe2c] sm:$0xf]  ;;  %v13022_v39 = vor.u32 %v16269_v26, %v13019_v47  ;;  %v5593_v23 = vadd.f32 %v5592_v21, %v5579_v62  ;;  %v12193_v62 = vld [vmem:[%s18120_s18 + $0x3b0] sm:$0xf] }
 0x3ad   : > { %v16341_v33 = vld [vmem:[%s18120_s18 + $0xc64] sm:$0xf0]  ;;  %5786 = vmatmul.bf16.vlgmr.msra.gmra.mxu0 %v18686_v13  ;;  %v13531_v38 = vld [vmem:[%s18120_s18 + $0xe68] sm:$0xf0]  ;;  %v16326_v21 = vld [vmem:[%s18120_s18 + $0xbec] sm:$0xf0] }
 0x3ae   : > { %v13274_v46 = vor.u32 %v16341_v33, %v13273_v3  ;;  %5811 = vmatpush.bf16.msra.mxu2 %v12762_v44  ;;  %5830 = vmatpush.bf16.msrb.mxu0 %v12190_v50  ;;  %v15997_v11 = vld [vmem:[%s18120_s18 + $0x1ac] sm:$0xf]  ;;  %v13534_v22 = vor.u32 %v16397_v53, %v13531_v38 }
 0x3af   : > { %5799 = vmatmul.bf16.vlgmr.msra.gmra.mxu1 %v18688_v36  ;;  %v11931_v17 = vld [vmem:[%s18120_s18 + $0x1e8] sm:$0xf0]  ;;  %v5581_v60 = vpop.f32.mrf.mxu0 }
 0x3b0   : > { %5824 = vmatpush.bf16.msra.mxu3 %v13274_v46  ;;  %5843 = vmatpush.bf16.msrb.mxu1 %v12702_v30  ;;  %v16125_v48 = vld [vmem:[%s18120_s18 + $0x5ac] sm:$0xf]  ;;  %v11934_v29 = vor.u32 %v15997_v11, %v11931_v17  ;;  %v5605_v28 = vpop.f32.mrf.mxu2  ;;  %v16198_v17 = vld [vmem:[%s18120_s18 + $0x7ec] sm:$0xf0] }
 0x3b1   : > { %5812 = vmatmul.bf16.vlgmr.msra.gmra.mxu2 %v18675_v16  ;;  %v12443_v3 = vld [vmem:[%s18120_s18 + $0x5e8] sm:$0xf0]  ;;  %v13089_v60 = vld [vmem:[%s18120_s18 + $0xab0] sm:$0xf] }
 0x3b2   : > { %5856 = vmatpush.bf16.msrb.mxu2 %v13214_v58  ;;  %5831 = vmatpush.bf16.msrb.mxu0 %v12126_v59  ;;  %v16253_v33 = vld [vmem:[%s18120_s18 + $0x9ac] sm:$0xf]  ;;  %v12446_v14 = vor.u32 %v16125_v48, %v12443_v3  ;;  %v5606_v58 = vadd.f32 %v5605_v28, %v5593_v23  ;;  %v5618_v34 = vpop.f32.mrf.mxu3  ;;  %v13217_v48 = vld [vmem:[%s18120_s18 + $0xbb0] sm:$0xf] }
 0x3b3   : > { %5825 = vmatmul.bf16.vlgmr.msra.gmra.mxu3 %v18677_v10  ;;  %v12955_v8 = vld [vmem:[%s18120_s18 + $0x9e8] sm:$0xf0]  ;;  %v5594_v37 = vpop.f32.mrf.mxu1  ;;  %v13153_v28 = vld [vmem:[%s18120_s18 + $0xb30] sm:$0xf] }
 0x3b4   : > { %5869 = vmatpush.bf16.msrb.mxu3 %v13726_v7  ;;  %5844 = vmatpush.bf16.msrb.mxu1 %v12638_v9  ;;  %v16381_v56 = vld [vmem:[%s18120_s18 + $0xdac] sm:$0xf]  ;;  %v12958_v25 = vor.u32 %v16253_v33, %v12955_v8  ;;  %v2157_v7 = vld [vmem:[#allocation3 + $0x8] sm:$0xff]  ;;  %v5619_v52 = vadd.f32 %v5618_v34, %v5606_v58  ;;  %v13729_v33 = vld [vmem:[%s18120_s18 + $0xfb0] sm:$0xf] }
 0x3b5   : > { %v13467_v61 = vld [vmem:[%s18120_s18 + $0xde8] sm:$0xf0]  ;;  %v16454_v8 = vld [vmem:[%s18120_s18 + $0xfec] sm:$0xf0] }
 0x3b6   : > { %5857 = vmatpush.bf16.msrb.mxu2 %v13150_v2  ;;  %5832 = vmatpush.bf16.msrb.mxu0 %v12062_v4  ;;  %v15981_v41 = vld [vmem:[%s18120_s18 + $0x12c] sm:$0xf]  ;;  %v13470_v45 = vor.u32 %v16381_v56, %v13467_v61  ;;  %v6096_v12 = vadd.f32 %v5619_v52, %v2157_v7  ;;  %v12577_v7 = vld [vmem:[%s18120_s18 + $0x6b0] sm:$0xf] }
 0x3b7   : > { %v11867_v43 = vld [vmem:[%s18120_s18 + $0x168] sm:$0xf0]  ;;  %v16166_v52 = vld [vmem:[%s18120_s18 + $0x6ec] sm:$0xf0] }
 0x3b8   : > { %5870 = vmatpush.bf16.msrb.mxu3 %v13662_v18  ;;  %5845 = vmatpush.bf16.msrb.mxu1 %v12574_v19  ;;  %v16109_v44 = vld [vmem:[%s18120_s18 + $0x52c] sm:$0xf]  ;;  %v11870_v24 = vor.u32 %v15981_v41, %v11867_v43  ;;  %6112 = vst [vmem:[#allocation3 + $0x8] sm:$0xff] %v6096_v12  ;;  %v5607_v0 = vpop.f32.mrf.mxu2  ;;  %v12641_v41 = vld [vmem:[%s18120_s18 + $0x730] sm:$0xf]  ;;  %v13730_v43 = vor.u32 %v16454_v8, %v13729_v33 }
 0x3b9   : > { %v12379_v46 = vld [vmem:[%s18120_s18 + $0x568] sm:$0xf0]  ;;  %v16150_v12 = vld [vmem:[%s18120_s18 + $0x66c] sm:$0xf0] }
 0x3ba   : > { %5858 = vmatpush.bf16.msrb.mxu2 %v13086_v27  ;;  %5833 = vmatpush.bf16.msrb.mxu0 %v11998_v35  ;;  %v16237_v50 = vld [vmem:[%s18120_s18 + $0x92c] sm:$0xf]  ;;  %v12382_v63 = vor.u32 %v16109_v44, %v12379_v46  ;;  %v5620_v35 = vpop.f32.mrf.mxu3  ;;  %v16182_v44 = vld [vmem:[%s18120_s18 + $0x76c] sm:$0xf0] }
 0x3bb   : > { %v12891_v30 = vld [vmem:[%s18120_s18 + $0x968] sm:$0xf0]  ;;  %v13665_v46 = vld [vmem:[%s18120_s18 + $0xf30] sm:$0xf]  ;;  %v12642_v58 = vor.u32 %v16182_v44, %v12641_v41 }
 0x3bc   : > { %5871 = vmatpush.bf16.msrb.mxu3 %v13598_v32  ;;  %5846 = vmatpush.bf16.msrb.mxu1 %v12510_v6  ;;  %v16365_v55 = vld [vmem:[%s18120_s18 + $0xd2c] sm:$0xf]  ;;  %v12894_v1 = vor.u32 %v16237_v50, %v12891_v30  ;;  %v16070_v6 = vld [vmem:[%s18120_s18 + $0x3ec] sm:$0xf0] }
 0x3bd   : > { %v13403_v51 = vld [vmem:[%s18120_s18 + $0xd68] sm:$0xf0]  ;;  %v12194_v56 = vor.u32 %v16070_v6, %v12193_v62  ;;  %v16438_v50 = vld [vmem:[%s18120_s18 + $0xf6c] sm:$0xf0] }
 0x3be   : > { %5859 = vmatpush.bf16.msrb.mxu2 %v13022_v39  ;;  %5834 = vmatpush.bf16.msrb.mxu0 %v11934_v29  ;;  %v15965_v59 = vld [vmem:[%s18120_s18 + $0xac] sm:$0xf]  ;;  %v13406_v15 = vor.u32 %v16365_v55, %v13403_v51  ;;  %v12705_v39 = vld [vmem:[%s18120_s18 + $0x7b0] sm:$0xf]  ;;  %v13218_v29 = vor.u32 %v16326_v21, %v13217_v48 }
 0x3bf   : > { %v11803_v9 = vld [vmem:[%s18120_s18 + $0xe8] sm:$0xf0]  ;;  %v12706_v61 = vor.u32 %v16198_v17, %v12705_v39  ;;  %v12065_v55 = vld [vmem:[%s18120_s18 + $0x2b0] sm:$0xf] }
 0x3c0   : > { %5872 = vmatpush.bf16.msrb.mxu3 %v13534_v22  ;;  %5847 = vmatpush.bf16.msrb.mxu1 %v12446_v14  ;;  %v16093_v2 = vld [vmem:[%s18120_s18 + $0x4ac] sm:$0xf]  ;;  %v11806_v54 = vor.u32 %v15965_v59, %v11803_v9  ;;  %v12129_v14 = vld [vmem:[%s18120_s18 + $0x330] sm:$0xf] }
 0x3c1   : > { %v12315_v57 = vld [vmem:[%s18120_s18 + $0x4e8] sm:$0xf0]  ;;  %v16038_v51 = vld [vmem:[%s18120_s18 + $0x2ec] sm:$0xf0] }
 0x3c2   : > { %5860 = vmatpush.bf16.msrb.mxu2 %v12958_v25  ;;  %v16221_v18 = vld [vmem:[%s18120_s18 + $0x8ac] sm:$0xf]  ;;  %5835 = vmatpush.bf16.msrb.mxu0 %v11870_v24  ;;  %v12318_v27 = vor.u32 %v16093_v2, %v12315_v57  ;;  %v16054_v25 = vld [vmem:[%s18120_s18 + $0x36c] sm:$0xf0]  ;;  %v13666_v24 = vor.u32 %v16438_v50, %v13665_v46  ;;  %v12066_v9 = vor.u32 %v16038_v51, %v12065_v55 }
 0x3c3   : > { %v12827_v5 = vld [vmem:[%s18120_s18 + $0x8e8] sm:$0xf0]  ;;  %v12130_v30 = vor.u32 %v16054_v25, %v12129_v14  ;;  %v16422_v59 = vld [vmem:[%s18120_s18 + $0xeec] sm:$0xf0]  ;;  %v12578_v2 = vor.u32 %v16166_v52, %v12577_v7 }
 0x3c4   : > { %5873 = vmatpush.bf16.msrb.mxu3 %v13470_v45  ;;  %v16349_v42 = vld [vmem:[%s18120_s18 + $0xcac] sm:$0xf]  ;;  %5848 = vmatpush.bf16.msrb.mxu1 %v12382_v63  ;;  %v12830_v20 = vor.u32 %v16221_v18, %v12827_v5  ;;  %v16310_v45 = vld [vmem:[%s18120_s18 + $0xb6c] sm:$0xf0] }
 0x3c5   : > { %v13339_v40 = vld [vmem:[%s18120_s18 + $0xce8] sm:$0xf0]  ;;  %v13154_v34 = vor.u32 %v16310_v45, %v13153_v28  ;;  %v16294_v63 = vld [vmem:[%s18120_s18 + $0xaec] sm:$0xf0] }
 0x3c6   : > { %v15949_v4 = vld [vmem:[%s18120_s18 + $0x2c] sm:$0xf]  ;;  %5861 = vmatpush.bf16.msrb.mxu2 %v12894_v1  ;;  %v13342_v26 = vor.u32 %v16349_v42, %v13339_v40  ;;  %5836 = vmatpush.bf16.msrb.mxu0 %v11806_v54  ;;  %v13601_v1 = vld [vmem:[%s18120_s18 + $0xeb0] sm:$0xf]  ;;  %v13090_v37 = vor.u32 %v16294_v63, %v13089_v60 }
 0x3c7   : > { %v11739_v19 = vld [vmem:[%s18120_s18 + $0x68] sm:$0xf0]  ;;  %v16022_v57 = vld [vmem:[%s18120_s18 + $0x26c] sm:$0xf0]  ;;  %v13602_v5 = vor.u32 %v16422_v59, %v13601_v1 }
 0x3c8   : > { %v16077_v31 = vld [vmem:[%s18120_s18 + $0x42c] sm:$0xf]  ;;  %5874 = vmatpush.bf16.msrb.mxu3 %v13406_v15  ;;  %v11742_v11 = vor.u32 %v15949_v4, %v11739_v19  ;;  %5849 = vmatpush.bf16.msrb.mxu1 %v12318_v27  ;;  %v12001_v15 = vld [vmem:[%s18120_s18 + $0x230] sm:$0xf]  ;;  %v5631_v27 = vpop.f32.mrf.mxu0 }
 0x3c9   : > { %v12251_v49 = vld [vmem:[%s18120_s18 + $0x468] sm:$0xf0]  ;;  %v12513_v18 = vld [vmem:[%s18120_s18 + $0x630] sm:$0xf]  ;;  %v12002_v19 = vor.u32 %v16022_v57, %v12001_v15 }
 0x3ca   : > { %v16205_v32 = vld [vmem:[%s18120_s18 + $0x82c] sm:$0xf]  ;;  %5862 = vmatpush.bf16.msrb.mxu2 %v12830_v20  ;;  %v12254_v22 = vor.u32 %v16077_v31, %v12251_v49  ;;  %5837 = vmatpush.bf16.msrb.mxu0 %v11742_v11  ;;  %v13025_v42 = vld [vmem:[%s18120_s18 + $0xa30] sm:$0xf]  ;;  %v12514_v20 = vor.u32 %v16150_v12, %v12513_v18 }
 0x3cb   : > { %v12763_v47 = vld [vmem:[%s18120_s18 + $0x868] sm:$0xf0]  ;;  %v16278_v40 = vld [vmem:[%s18120_s18 + $0xa6c] sm:$0xf0] }
 0x3cc   : > { %v16333_v53 = vld [vmem:[%s18120_s18 + $0xc2c] sm:$0xf]  ;;  %v12766_v3 = vor.u32 %v16205_v32, %v12763_v47  ;;  %5875 = vmatpush.bf16.msrb.mxu3 %v13342_v26  ;;  %5850 = vmatpush.bf16.msrb.mxu1 %v12254_v22  ;;  %v13537_v54 = vld [vmem:[%s18120_s18 + $0xe30] sm:$0xf]  ;;  %v13026_v31 = vor.u32 %v16278_v40, %v13025_v42  ;;  %v5644_v26 = vpop.f32.mrf.mxu1 }
 0x3cd   : > { %v13275_v38 = vld [vmem:[%s18120_s18 + $0xc68] sm:$0xf0]  ;;  %5838 = vmatmul.bf16.vlgmr.msrb.gmra.mxu0 %v18686_v13  ;;  %v16406_v4 = vld [vmem:[%s18120_s18 + $0xe6c] sm:$0xf0]  ;;  %v5645_v62 = vadd.f32 %v5644_v26, %v5631_v27  ;;  %v16062_v27 = vld [vmem:[%s18120_s18 + $0x3b4] sm:$0xf] }
 0x3ce   : > { %v13278_v23 = vor.u32 %v16333_v53, %v13275_v38  ;;  %5863 = vmatpush.bf16.msrb.mxu2 %v12766_v3  ;;  %5882 = vmatpush.bf16.msra.mxu0 %v12194_v56  ;;  %v11937_v49 = vld [vmem:[%s18120_s18 + $0x1b0] sm:$0xf]  ;;  %v13538_v47 = vor.u32 %v16406_v4, %v13537_v54  ;;  %v13219_v26 = vld [vmem:[%s18120_s18 + $0xbf0] sm:$0xf0] }
 0x3cf   : > { %5851 = vmatmul.bf16.vlgmr.msrb.gmra.mxu1 %v18688_v36  ;;  %v16006_v32 = vld [vmem:[%s18120_s18 + $0x1ec] sm:$0xf0] }
 0x3d0   : > { %5876 = vmatpush.bf16.msrb.mxu3 %v13278_v23  ;;  %5895 = vmatpush.bf16.msra.mxu1 %v12706_v61  ;;  %v12449_v0 = vld [vmem:[%s18120_s18 + $0x5b0] sm:$0xf]  ;;  %v11938_v11 = vor.u32 %v16006_v32, %v11937_v49  ;;  %v5657_v33 = vpop.f32.mrf.mxu2  ;;  %v5633_v45 = vpop.f32.mrf.mxu0  ;;  %v12707_v32 = vld [vmem:[%s18120_s18 + $0x7f0] sm:$0xf0] }
 0x3d1   : > { %5864 = vmatmul.bf16.vlgmr.msrb.gmra.mxu2 %v18675_v16  ;;  %v16134_v53 = vld [vmem:[%s18120_s18 + $0x5ec] sm:$0xf0]  ;;  %v16286_v45 = vld [vmem:[%s18120_s18 + $0xab4] sm:$0xf] }
 0x3d2   : > { %5908 = vmatpush.bf16.msra.mxu2 %v13218_v29  ;;  %5883 = vmatpush.bf16.msra.mxu0 %v12130_v30  ;;  %v12961_v38 = vld [vmem:[%s18120_s18 + $0x9b0] sm:$0xf]  ;;  %v12450_v17 = vor.u32 %v16134_v53, %v12449_v0  ;;  %v5658_v29 = vadd.f32 %v5657_v33, %v5645_v62  ;;  %v5670_v14 = vpop.f32.mrf.mxu3  ;;  %v16318_v0 = vld [vmem:[%s18120_s18 + $0xbb4] sm:$0xf] }
 0x3d3   : > { %5877 = vmatmul.bf16.vlgmr.msrb.gmra.mxu3 %v18677_v10  ;;  %v16262_v35 = vld [vmem:[%s18120_s18 + $0x9ec] sm:$0xf0]  ;;  %v16302_v33 = vld [vmem:[%s18120_s18 + $0xb34] sm:$0xf] }
 0x3d4   : > { %5921 = vmatpush.bf16.msra.mxu3 %v13730_v43  ;;  %5896 = vmatpush.bf16.msra.mxu1 %v12642_v58  ;;  %v13473_v6 = vld [vmem:[%s18120_s18 + $0xdb0] sm:$0xf]  ;;  %v12962_v48 = vor.u32 %v16262_v35, %v12961_v38  ;;  %v2158_v43 = vld [vmem:[#allocation3 + $0x48] sm:$0xff]  ;;  %v5671_v28 = vadd.f32 %v5670_v14, %v5658_v29  ;;  %v5646_v55 = vpop.f32.mrf.mxu1  ;;  %v16446_v38 = vld [vmem:[%s18120_s18 + $0xfb4] sm:$0xf] }
 0x3d5   : > { %v16390_v39 = vld [vmem:[%s18120_s18 + $0xdec] sm:$0xf0]  ;;  %v13731_v35 = vld [vmem:[%s18120_s18 + $0xff0] sm:$0xf0] }
 0x3d6   : > { %5909 = vmatpush.bf16.msra.mxu2 %v13154_v34  ;;  %5884 = vmatpush.bf16.msra.mxu0 %v12066_v9  ;;  %v11873_v21 = vld [vmem:[%s18120_s18 + $0x130] sm:$0xf]  ;;  %v13474_v8 = vor.u32 %v16390_v39, %v13473_v6  ;;  %v6097_v60 = vadd.f32 %v5671_v28, %v2158_v43  ;;  %v16158_v43 = vld [vmem:[%s18120_s18 + $0x6b4] sm:$0xf] }
 0x3d7   : > { %v15990_v22 = vld [vmem:[%s18120_s18 + $0x16c] sm:$0xf0]  ;;  %v12579_v28 = vld [vmem:[%s18120_s18 + $0x6f0] sm:$0xf0] }
 0x3d8   : > { %5922 = vmatpush.bf16.msra.mxu3 %v13666_v24  ;;  %5897 = vmatpush.bf16.msra.mxu1 %v12578_v2  ;;  %v12385_v3 = vld [vmem:[%s18120_s18 + $0x530] sm:$0xf]  ;;  %v11874_v44 = vor.u32 %v15990_v22, %v11873_v21  ;;  %6113 = vst [vmem:[#allocation3 + $0x48] sm:$0xff] %v6097_v60  ;;  %v5659_v12 = vpop.f32.mrf.mxu2  ;;  %v16174_v21 = vld [vmem:[%s18120_s18 + $0x734] sm:$0xf]  ;;  %v13734_v22 = vor.u32 %v16446_v38, %v13731_v35 }
 0x3d9   : > { %v16118_v23 = vld [vmem:[%s18120_s18 + $0x56c] sm:$0xf0]  ;;  %v12515_v60 = vld [vmem:[%s18120_s18 + $0x670] sm:$0xf0] }
 0x3da   : > { %5910 = vmatpush.bf16.msra.mxu2 %v13090_v37  ;;  %5885 = vmatpush.bf16.msra.mxu0 %v12002_v19  ;;  %v12897_v56 = vld [vmem:[%s18120_s18 + $0x930] sm:$0xf]  ;;  %v12386_v46 = vor.u32 %v16118_v23, %v12385_v3  ;;  %v5672_v19 = vpop.f32.mrf.mxu3  ;;  %v12643_v3 = vld [vmem:[%s18120_s18 + $0x770] sm:$0xf0] }
 0x3db   : > { %v16246_v61 = vld [vmem:[%s18120_s18 + $0x96c] sm:$0xf0]  ;;  %v16430_v23 = vld [vmem:[%s18120_s18 + $0xf34] sm:$0xf]  ;;  %v12646_v29 = vor.u32 %v16174_v21, %v12643_v3 }
 0x3dc   : > { %5923 = vmatpush.bf16.msra.mxu3 %v13602_v5  ;;  %5898 = vmatpush.bf16.msra.mxu1 %v12514_v20  ;;  %v13409_v25 = vld [vmem:[%s18120_s18 + $0xd30] sm:$0xf]  ;;  %v12898_v50 = vor.u32 %v16246_v61, %v12897_v56  ;;  %v12195_v20 = vld [vmem:[%s18120_s18 + $0x3f0] sm:$0xf0] }
 0x3dd   : > { %v16374_v41 = vld [vmem:[%s18120_s18 + $0xd6c] sm:$0xf0]  ;;  %v12198_v6 = vor.u32 %v16062_v27, %v12195_v20  ;;  %v13667_v56 = vld [vmem:[%s18120_s18 + $0xf70] sm:$0xf0] }
 0x3de   : > { %5911 = vmatpush.bf16.msra.mxu2 %v13026_v31  ;;  %5886 = vmatpush.bf16.msra.mxu0 %v11938_v11  ;;  %v11809_v30 = vld [vmem:[%s18120_s18 + $0xb0] sm:$0xf]  ;;  %v13410_v51 = vor.u32 %v16374_v41, %v13409_v25  ;;  %v16190_v31 = vld [vmem:[%s18120_s18 + $0x7b4] sm:$0xf]  ;;  %v13222_v11 = vor.u32 %v16318_v0, %v13219_v26 }
 0x3df   : > { %v15974_v58 = vld [vmem:[%s18120_s18 + $0xec] sm:$0xf0]  ;;  %v12710_v39 = vor.u32 %v16190_v31, %v12707_v32  ;;  %v16030_v25 = vld [vmem:[%s18120_s18 + $0x2b4] sm:$0xf] }
 0x3e0   : > { %5924 = vmatpush.bf16.msra.mxu3 %v13538_v47  ;;  %5899 = vmatpush.bf16.msra.mxu1 %v12450_v17  ;;  %v12321_v34 = vld [vmem:[%s18120_s18 + $0x4b0] sm:$0xf]  ;;  %v11810_v59 = vor.u32 %v15974_v58, %v11809_v30  ;;  %v16046_v17 = vld [vmem:[%s18120_s18 + $0x334] sm:$0xf] }
 0x3e1   : > { %v16102_v7 = vld [vmem:[%s18120_s18 + $0x4ec] sm:$0xf0]  ;;  %v12067_v41 = vld [vmem:[%s18120_s18 + $0x2f0] sm:$0xf0] }
 0x3e2   : > { %5912 = vmatpush.bf16.msra.mxu2 %v12962_v48  ;;  %v12833_v24 = vld [vmem:[%s18120_s18 + $0x8b0] sm:$0xf]  ;;  %5887 = vmatpush.bf16.msra.mxu0 %v11874_v44  ;;  %v12322_v37 = vor.u32 %v16102_v7, %v12321_v34  ;;  %v12131_v48 = vld [vmem:[%s18120_s18 + $0x370] sm:$0xf0]  ;;  %v13670_v44 = vor.u32 %v16430_v23, %v13667_v56  ;;  %v12070_v58 = vor.u32 %v16030_v25, %v12067_v41 }
 0x3e3   : > { %v16230_v52 = vld [vmem:[%s18120_s18 + $0x8ec] sm:$0xf0]  ;;  %v12134_v61 = vor.u32 %v16046_v17, %v12131_v48  ;;  %v13603_v30 = vld [vmem:[%s18120_s18 + $0xef0] sm:$0xf0]  ;;  %v12582_v34 = vor.u32 %v16158_v43, %v12579_v28 }
 0x3e4   : > { %5925 = vmatpush.bf16.msra.mxu3 %v13474_v8  ;;  %v13345_v63 = vld [vmem:[%s18120_s18 + $0xcb0] sm:$0xf]  ;;  %5900 = vmatpush.bf16.msra.mxu1 %v12386_v46  ;;  %v12834_v15 = vor.u32 %v16230_v52, %v12833_v24  ;;  %v13155_v8 = vld [vmem:[%s18120_s18 + $0xb70] sm:$0xf0] }
 0x3e5   : > { %v16358_v1 = vld [vmem:[%s18120_s18 + $0xcec] sm:$0xf0]  ;;  %v13158_v14 = vor.u32 %v16302_v33, %v13155_v8  ;;  %v13091_v46 = vld [vmem:[%s18120_s18 + $0xaf0] sm:$0xf0] }
 0x3e6   : > { %v11745_v9 = vld [vmem:[%s18120_s18 + $0x30] sm:$0xf]  ;;  %5913 = vmatpush.bf16.msra.mxu2 %v12898_v50  ;;  %v13346_v42 = vor.u32 %v16358_v1, %v13345_v63  ;;  %5888 = vmatpush.bf16.msra.mxu0 %v11810_v59  ;;  %v16414_v50 = vld [vmem:[%s18120_s18 + $0xeb4] sm:$0xf]  ;;  %v13094_v55 = vor.u32 %v16286_v45, %v13091_v46 }
 0x3e7   : > { %v15958_v2 = vld [vmem:[%s18120_s18 + $0x6c] sm:$0xf0]  ;;  %v12003_v7 = vld [vmem:[%s18120_s18 + $0x270] sm:$0xf0]  ;;  %v13606_v52 = vor.u32 %v16414_v50, %v13603_v30 }
 0x3e8   : > { %v12257_v57 = vld [vmem:[%s18120_s18 + $0x430] sm:$0xf]  ;;  %5926 = vmatpush.bf16.msra.mxu3 %v13410_v51  ;;  %v11746_v49 = vor.u32 %v15958_v2, %v11745_v9  ;;  %5901 = vmatpush.bf16.msra.mxu1 %v12322_v37  ;;  %v16014_v51 = vld [vmem:[%s18120_s18 + $0x234] sm:$0xf] }
 0x3e9   : > { %v16086_v18 = vld [vmem:[%s18120_s18 + $0x46c] sm:$0xf0]  ;;  %v16142_v24 = vld [vmem:[%s18120_s18 + $0x634] sm:$0xf]  ;;  %v12006_v2 = vor.u32 %v16014_v51, %v12003_v7  ;;  %v5683_v37 = vpop.f32.mrf.mxu0 }
 0x3ea   : > { %v12769_v5 = vld [vmem:[%s18120_s18 + $0x830] sm:$0xf]  ;;  %5914 = vmatpush.bf16.msra.mxu2 %v12834_v15  ;;  %v12258_v47 = vor.u32 %v16086_v18, %v12257_v57  ;;  %5889 = vmatpush.bf16.msra.mxu0 %v11746_v49  ;;  %v16270_v63 = vld [vmem:[%s18120_s18 + $0xa34] sm:$0xf]  ;;  %v12518_v15 = vor.u32 %v16142_v24, %v12515_v60 }
 0x3eb   : > { %v16214_v40 = vld [vmem:[%s18120_s18 + $0x86c] sm:$0xf0]  ;;  %v13027_v1 = vld [vmem:[%s18120_s18 + $0xa70] sm:$0xf0] }
 0x3ec   : > { %v13281_v54 = vld [vmem:[%s18120_s18 + $0xc30] sm:$0xf]  ;;  %v12770_v53 = vor.u32 %v16214_v40, %v12769_v5  ;;  %5927 = vmatpush.bf16.msra.mxu3 %v13346_v42  ;;  %5902 = vmatpush.bf16.msra.mxu1 %v12258_v47  ;;  %v16398_v59 = vld [vmem:[%s18120_s18 + $0xe34] sm:$0xf]  ;;  %v13030_v57 = vor.u32 %v16270_v63, %v13027_v1  ;;  %v5696_v42 = vpop.f32.mrf.mxu1 }
 0x3ed   : > { %v16342_v4 = vld [vmem:[%s18120_s18 + $0xc6c] sm:$0xf0]  ;;  %5890 = vmatmul.bf16.vlgmr.msra.gmra.mxu0 %v18686_v13  ;;  %v13539_v9 = vld [vmem:[%s18120_s18 + $0xe70] sm:$0xf0]  ;;  %v5697_v27 = vadd.f32 %v5696_v42, %v5683_v37  ;;  %v12201_v37 = vld [vmem:[%s18120_s18 + $0x3b8] sm:$0xf] }
 0x3ee   : > { %v13282_v62 = vor.u32 %v16342_v4, %v13281_v54  ;;  %5915 = vmatpush.bf16.msra.mxu2 %v12770_v53  ;;  %5934 = vmatpush.bf16.msrb.mxu0 %v12198_v6  ;;  %v15998_v18 = vld [vmem:[%s18120_s18 + $0x1b4] sm:$0xf]  ;;  %v13542_v40 = vor.u32 %v16398_v59, %v13539_v9  ;;  %v16327_v42 = vld [vmem:[%s18120_s18 + $0xbf4] sm:$0xf0] }
 0x3ef   : > { %5903 = vmatmul.bf16.vlgmr.msra.gmra.mxu1 %v18688_v36  ;;  %v11939_v5 = vld [vmem:[%s18120_s18 + $0x1f0] sm:$0xf0] }
 0x3f0   : > { %5928 = vmatpush.bf16.msra.mxu3 %v13282_v62  ;;  %5947 = vmatpush.bf16.msrb.mxu1 %v12710_v39  ;;  %v16126_v12 = vld [vmem:[%s18120_s18 + $0x5b4] sm:$0xf]  ;;  %v11942_v49 = vor.u32 %v15998_v18, %v11939_v5  ;;  %v16199_v5 = vld [vmem:[%s18120_s18 + $0x7f4] sm:$0xf0] }
 0x3f1   : > { %5916 = vmatmul.bf16.vlgmr.msra.gmra.mxu2 %v18675_v16  ;;  %v12451_v54 = vld [vmem:[%s18120_s18 + $0x5f0] sm:$0xf0]  ;;  %v5685_v8 = vpop.f32.mrf.mxu0 }
 0x3f2   : > { %5960 = vmatpush.bf16.msrb.mxu2 %v13222_v11  ;;  %5935 = vmatpush.bf16.msrb.mxu0 %v12134_v61  ;;  %v16254_v4 = vld [vmem:[%s18120_s18 + $0x9b4] sm:$0xf]  ;;  %v12454_v32 = vor.u32 %v16126_v12, %v12451_v54  ;;  %v13225_v12 = vld [vmem:[%s18120_s18 + $0xbb8] sm:$0xf] }
 0x3f3   : > { %5929 = vmatmul.bf16.vlgmr.msra.gmra.mxu3 %v18677_v10  ;;  %v12963_v19 = vld [vmem:[%s18120_s18 + $0x9f0] sm:$0xf0]  ;;  %v5709_v38 = vpop.f32.mrf.mxu2  ;;  %v13097_v8 = vld [vmem:[%s18120_s18 + $0xab8] sm:$0xf] }
 0x3f4   : > { %5973 = vmatpush.bf16.msrb.mxu3 %v13734_v22  ;;  %5948 = vmatpush.bf16.msrb.mxu1 %v12646_v29  ;;  %v16382_v20 = vld [vmem:[%s18120_s18 + $0xdb4] sm:$0xf]  ;;  %v12966_v0 = vor.u32 %v16254_v4, %v12963_v19  ;;  %v5710_v11 = vadd.f32 %v5709_v38, %v5697_v27  ;;  %v2159_v22 = vld [vmem:[#allocation3 + $0x40] sm:$0xff]  ;;  %v5698_v25 = vpop.f32.mrf.mxu1 }
 0x3f5   : > { %v13475_v31 = vld [vmem:[%s18120_s18 + $0xdf0] sm:$0xf0]  ;;  %v5722_v17 = vpop.f32.mrf.mxu3  ;;  %v13737_v4 = vld [vmem:[%s18120_s18 + $0xfb8] sm:$0xf] }
 0x3f6   : > { %5961 = vmatpush.bf16.msrb.mxu2 %v13158_v14  ;;  %5936 = vmatpush.bf16.msrb.mxu0 %v12070_v58  ;;  %v15982_v26 = vld [vmem:[%s18120_s18 + $0x134] sm:$0xf]  ;;  %v13478_v35 = vor.u32 %v16382_v20, %v13475_v31  ;;  %v5723_v33 = vadd.f32 %v5722_v17, %v5710_v11  ;;  %v16455_v19 = vld [vmem:[%s18120_s18 + $0xff4] sm:$0xf0] }
 0x3f7   : > { %v11875_v47 = vld [vmem:[%s18120_s18 + $0x170] sm:$0xf0]  ;;  %v13161_v38 = vld [vmem:[%s18120_s18 + $0xb38] sm:$0xf] }
 0x3f8   : > { %5974 = vmatpush.bf16.msrb.mxu3 %v13670_v44  ;;  %5949 = vmatpush.bf16.msrb.mxu1 %v12582_v34  ;;  %v16110_v53 = vld [vmem:[%s18120_s18 + $0x534] sm:$0xf]  ;;  %v11878_v3 = vor.u32 %v15982_v26, %v11875_v47  ;;  %v6098_v45 = vadd.f32 %v5723_v33, %v2159_v22  ;;  %v12649_v26 = vld [vmem:[%s18120_s18 + $0x738] sm:$0xf]  ;;  %v13738_v47 = vor.u32 %v16455_v19, %v13737_v4 }
 0x3f9   : > { %v12387_v62 = vld [vmem:[%s18120_s18 + $0x570] sm:$0xf0]  ;;  %v12585_v22 = vld [vmem:[%s18120_s18 + $0x6b8] sm:$0xf] }
 0x3fa   : > { %5962 = vmatpush.bf16.msrb.mxu2 %v13094_v55  ;;  %5937 = vmatpush.bf16.msrb.mxu0 %v12006_v2  ;;  %v16238_v6 = vld [vmem:[%s18120_s18 + $0x934] sm:$0xf]  ;;  %v12390_v23 = vor.u32 %v16110_v53, %v12387_v62  ;;  %6114 = vst [vmem:[#allocation3 + $0x40] sm:$0xff] %v6098_v45  ;;  %v16183_v53 = vld [vmem:[%s18120_s18 + $0x774] sm:$0xf0] }
 0x3fb   : > { %v12899_v39 = vld [vmem:[%s18120_s18 + $0x970] sm:$0xf0]  ;;  %v5711_v60 = vpop.f32.mrf.mxu2  ;;  %v13673_v62 = vld [vmem:[%s18120_s18 + $0xf38] sm:$0xf]  ;;  %v12650_v11 = vor.u32 %v16183_v53, %v12649_v26 }
 0x3fc   : > { %5975 = vmatpush.bf16.msrb.mxu3 %v13606_v52  ;;  %5950 = vmatpush.bf16.msrb.mxu1 %v12518_v15  ;;  %v16366_v48 = vld [vmem:[%s18120_s18 + $0xd34] sm:$0xf]  ;;  %v12902_v56 = vor.u32 %v16238_v6, %v12899_v39  ;;  %v16071_v15 = vld [vmem:[%s18120_s18 + $0x3f4] sm:$0xf0] }
 0x3fd   : > { %v13411_v21 = vld [vmem:[%s18120_s18 + $0xd70] sm:$0xf0]  ;;  %v5724_v2 = vpop.f32.mrf.mxu3  ;;  %v12202_v20 = vor.u32 %v16071_v15, %v12201_v37  ;;  %v16439_v6 = vld [vmem:[%s18120_s18 + $0xf74] sm:$0xf0] }
 0x3fe   : > { %5963 = vmatpush.bf16.msrb.mxu2 %v13030_v57  ;;  %5938 = vmatpush.bf16.msrb.mxu0 %v11942_v49  ;;  %v15966_v61 = vld [vmem:[%s18120_s18 + $0xb4] sm:$0xf]  ;;  %v13414_v41 = vor.u32 %v16366_v48, %v13411_v21  ;;  %v12713_v57 = vld [vmem:[%s18120_s18 + $0x7b8] sm:$0xf]  ;;  %v13226_v49 = vor.u32 %v16327_v42, %v13225_v12 }
 0x3ff   : > { %v11811_v29 = vld [vmem:[%s18120_s18 + $0xf0] sm:$0xf0]  ;;  %v12714_v31 = vor.u32 %v16199_v5, %v12713_v57  ;;  %v12073_v48 = vld [vmem:[%s18120_s18 + $0x2b8] sm:$0xf] }
 0x400   : > { %5976 = vmatpush.bf16.msrb.mxu3 %v13542_v40  ;;  %5951 = vmatpush.bf16.msrb.mxu1 %v12454_v32  ;;  %v16094_v14 = vld [vmem:[%s18120_s18 + $0x4b4] sm:$0xf]  ;;  %v11814_v30 = vor.u32 %v15966_v61, %v11811_v29  ;;  %v12137_v32 = vld [vmem:[%s18120_s18 + $0x338] sm:$0xf] }
 0x401   : > { %v12323_v43 = vld [vmem:[%s18120_s18 + $0x4f0] sm:$0xf0]  ;;  %v16039_v21 = vld [vmem:[%s18120_s18 + $0x2f4] sm:$0xf0] }
 0x402   : > { %5964 = vmatpush.bf16.msrb.mxu2 %v12966_v0  ;;  %v16222_v44 = vld [vmem:[%s18120_s18 + $0x8b4] sm:$0xf]  ;;  %5939 = vmatpush.bf16.msrb.mxu0 %v11878_v3  ;;  %v12326_v55 = vor.u32 %v16094_v14, %v12323_v43  ;;  %v16055_v0 = vld [vmem:[%s18120_s18 + $0x374] sm:$0xf0]  ;;  %v13674_v3 = vor.u32 %v16439_v6, %v13673_v62  ;;  %v12074_v29 = vor.u32 %v16039_v21, %v12073_v48 }
 0x403   : > { %v12835_v28 = vld [vmem:[%s18120_s18 + $0x8f0] sm:$0xf0]  ;;  %v12138_v39 = vor.u32 %v16055_v0, %v12137_v32  ;;  %v16167_v33 = vld [vmem:[%s18120_s18 + $0x6f4] sm:$0xf0] }
 0x404   : > { %5977 = vmatpush.bf16.msrb.mxu3 %v13478_v35  ;;  %v16350_v46 = vld [vmem:[%s18120_s18 + $0xcb4] sm:$0xf]  ;;  %5952 = vmatpush.bf16.msrb.mxu1 %v12390_v23  ;;  %v12838_v51 = vor.u32 %v16222_v44, %v12835_v28  ;;  %v16311_v35 = vld [vmem:[%s18120_s18 + $0xb74] sm:$0xf0]  ;;  %v12586_v14 = vor.u32 %v16167_v33, %v12585_v22 }
 0x405   : > { %v13347_v50 = vld [vmem:[%s18120_s18 + $0xcf0] sm:$0xf0]  ;;  %v13162_v17 = vor.u32 %v16311_v35, %v13161_v38  ;;  %v16295_v23 = vld [vmem:[%s18120_s18 + $0xaf4] sm:$0xf0] }
 0x406   : > { %v15950_v58 = vld [vmem:[%s18120_s18 + $0x34] sm:$0xf]  ;;  %5965 = vmatpush.bf16.msrb.mxu2 %v12902_v56  ;;  %v13350_v63 = vor.u32 %v16350_v46, %v13347_v50  ;;  %5940 = vmatpush.bf16.msrb.mxu0 %v11814_v30  ;;  %v13609_v56 = vld [vmem:[%s18120_s18 + $0xeb8] sm:$0xf]  ;;  %v13098_v25 = vor.u32 %v16295_v23, %v13097_v8 }
 0x407   : > { %v11747_v34 = vld [vmem:[%s18120_s18 + $0x70] sm:$0xf0]  ;;  %v16423_v61 = vld [vmem:[%s18120_s18 + $0xef4] sm:$0xf0] }
 0x408   : > { %v16078_v7 = vld [vmem:[%s18120_s18 + $0x434] sm:$0xf]  ;;  %5978 = vmatpush.bf16.msrb.mxu3 %v13414_v41  ;;  %v11750_v18 = vor.u32 %v15950_v58, %v11747_v34  ;;  %5953 = vmatpush.bf16.msrb.mxu1 %v12326_v55  ;;  %v12009_v41 = vld [vmem:[%s18120_s18 + $0x238] sm:$0xf]  ;;  %v13610_v28 = vor.u32 %v16423_v61, %v13609_v56 }
 0x409   : > { %v12259_v24 = vld [vmem:[%s18120_s18 + $0x470] sm:$0xf0]  ;;  %v16023_v43 = vld [vmem:[%s18120_s18 + $0x274] sm:$0xf0]  ;;  %v5735_v55 = vpop.f32.mrf.mxu0 }
 0x40a   : > { %v16206_v52 = vld [vmem:[%s18120_s18 + $0x834] sm:$0xf]  ;;  %5966 = vmatpush.bf16.msrb.mxu2 %v12838_v51  ;;  %v12262_v40 = vor.u32 %v16078_v7, %v12259_v24  ;;  %5941 = vmatpush.bf16.msrb.mxu0 %v11750_v18  ;;  %v12521_v44 = vld [vmem:[%s18120_s18 + $0x638] sm:$0xf]  ;;  %v12010_v34 = vor.u32 %v16023_v43, %v12009_v41 }
 0x40b   : > { %v12771_v1 = vld [vmem:[%s18120_s18 + $0x870] sm:$0xf0]  ;;  %v16151_v45 = vld [vmem:[%s18120_s18 + $0x674] sm:$0xf0] }
 0x40c   : > { %v16334_v59 = vld [vmem:[%s18120_s18 + $0xc34] sm:$0xf]  ;;  %v12774_v54 = vor.u32 %v16206_v52, %v12771_v1  ;;  %5979 = vmatpush.bf16.msrb.mxu3 %v13350_v63  ;;  %5954 = vmatpush.bf16.msrb.mxu1 %v12262_v40  ;;  %v13033_v46 = vld [vmem:[%s18120_s18 + $0xa38] sm:$0xf]  ;;  %v12522_v51 = vor.u32 %v16151_v45, %v12521_v44  ;;  %v5748_v63 = vpop.f32.mrf.mxu1 }
 0x40d   : > { %v13283_v9 = vld [vmem:[%s18120_s18 + $0xc70] sm:$0xf0]  ;;  %5942 = vmatmul.bf16.vlgmr.msrb.gmra.mxu0 %v18686_v13  ;;  %v16279_v50 = vld [vmem:[%s18120_s18 + $0xa74] sm:$0xf0]  ;;  %v5749_v37 = vadd.f32 %v5748_v63, %v5735_v55  ;;  %v16063_v55 = vld [vmem:[%s18120_s18 + $0x3bc] sm:$0xf] }
 0x40e   : > { %v13286_v27 = vor.u32 %v16334_v59, %v13283_v9  ;;  %5967 = vmatpush.bf16.msrb.mxu2 %v12774_v54  ;;  %5986 = vmatpush.bf16.msra.mxu0 %v12202_v20  ;;  %v13545_v30 = vld [vmem:[%s18120_s18 + $0xe38] sm:$0xf]  ;;  %v13034_v7 = vor.u32 %v16279_v50, %v13033_v46  ;;  %v13227_v63 = vld [vmem:[%s18120_s18 + $0xbf8] sm:$0xf0] }
 0x40f   : > { %5955 = vmatmul.bf16.vlgmr.msrb.gmra.mxu1 %v18688_v36  ;;  %v16407_v58 = vld [vmem:[%s18120_s18 + $0xe74] sm:$0xf0] }
 0x410   : > { %5980 = vmatpush.bf16.msrb.mxu3 %v13286_v27  ;;  %5999 = vmatpush.bf16.msra.mxu1 %v12714_v31  ;;  %v11945_v24 = vld [vmem:[%s18120_s18 + $0x1b8] sm:$0xf]  ;;  %v13546_v1 = vor.u32 %v16407_v58, %v13545_v30 }
 0x411   : > { %5968 = vmatmul.bf16.vlgmr.msrb.gmra.mxu2 %v18675_v16  ;;  %v16007_v52 = vld [vmem:[%s18120_s18 + $0x1f4] sm:$0xf0]  ;;  %v5737_v35 = vpop.f32.mrf.mxu0 }
 0x412   : > { %6012 = vmatpush.bf16.msra.mxu2 %v13226_v49  ;;  %5987 = vmatpush.bf16.msra.mxu0 %v12138_v39  ;;  %v12457_v60 = vld [vmem:[%s18120_s18 + $0x5b8] sm:$0xf]  ;;  %v11946_v18 = vor.u32 %v16007_v52, %v11945_v24  ;;  %v12715_v52 = vld [vmem:[%s18120_s18 + $0x7f8] sm:$0xf0] }
 0x413   : > { %5981 = vmatmul.bf16.vlgmr.msrb.gmra.mxu3 %v18677_v10  ;;  %v16135_v59 = vld [vmem:[%s18120_s18 + $0x5f4] sm:$0xf0]  ;;  %v5761_v4 = vpop.f32.mrf.mxu2  ;;  %v16287_v35 = vld [vmem:[%s18120_s18 + $0xabc] sm:$0xf] }
 0x414   : > { %6025 = vmatpush.bf16.msra.mxu3 %v13738_v47  ;;  %6000 = vmatpush.bf16.msra.mxu1 %v12650_v11  ;;  %v12969_v9 = vld [vmem:[%s18120_s18 + $0x9b8] sm:$0xf]  ;;  %v12458_v5 = vor.u32 %v16135_v59, %v12457_v60  ;;  %v5762_v49 = vadd.f32 %v5761_v4, %v5749_v37  ;;  %v5750_v48 = vpop.f32.mrf.mxu1  ;;  %v16319_v60 = vld [vmem:[%s18120_s18 + $0xbbc] sm:$0xf] }
 0x415   : > { %v16263_v2 = vld [vmem:[%s18120_s18 + $0x9f4] sm:$0xf0]  ;;  %v5774_v32 = vpop.f32.mrf.mxu3  ;;  %v16303_v4 = vld [vmem:[%s18120_s18 + $0xb3c] sm:$0xf] }
 0x416   : > { %6013 = vmatpush.bf16.msra.mxu2 %v13162_v17  ;;  %5988 = vmatpush.bf16.msra.mxu0 %v12074_v29  ;;  %v13481_v15 = vld [vmem:[%s18120_s18 + $0xdb8] sm:$0xf]  ;;  %v12970_v12 = vor.u32 %v16263_v2, %v12969_v9  ;;  %v5775_v38 = vadd.f32 %v5774_v32, %v5762_v49  ;;  %v16447_v9 = vld [vmem:[%s18120_s18 + $0xfbc] sm:$0xf] }
 0x417   : > { %v16391_v57 = vld [vmem:[%s18120_s18 + $0xdf4] sm:$0xf0]  ;;  %v13739_v2 = vld [vmem:[%s18120_s18 + $0xff8] sm:$0xf0] }
 0x418   : > { %6026 = vmatpush.bf16.msra.mxu3 %v13674_v3  ;;  %6001 = vmatpush.bf16.msra.mxu1 %v12586_v14  ;;  %v11881_v42 = vld [vmem:[%s18120_s18 + $0x138] sm:$0xf]  ;;  %v13482_v19 = vor.u32 %v16391_v57, %v13481_v15 }
 0x419   : > { %v15991_v40 = vld [vmem:[%s18120_s18 + $0x174] sm:$0xf0] }
 0x41a   : > { %6014 = vmatpush.bf16.msra.mxu2 %v13098_v25  ;;  %5989 = vmatpush.bf16.msra.mxu0 %v12010_v34  ;;  %v12393_v54 = vld [vmem:[%s18120_s18 + $0x538] sm:$0xf]  ;;  %v11882_v53 = vor.u32 %v15991_v40, %v11881_v42  ;;  %v16175_v42 = vld [vmem:[%s18120_s18 + $0x73c] sm:$0xf]  ;;  %v13742_v40 = vor.u32 %v16447_v9, %v13739_v2 }
 0x41b   : > { %v16119_v27 = vld [vmem:[%s18120_s18 + $0x574] sm:$0xf0]  ;;  %v5763_v45 = vpop.f32.mrf.mxu2 }
 0x41c   : > { %6027 = vmatpush.bf16.msra.mxu3 %v13610_v28  ;;  %6002 = vmatpush.bf16.msra.mxu1 %v12522_v51  ;;  %v12905_v20 = vld [vmem:[%s18120_s18 + $0x938] sm:$0xf]  ;;  %v12394_v62 = vor.u32 %v16119_v27, %v12393_v54  ;;  %v12203_v51 = vld [vmem:[%s18120_s18 + $0x3f8] sm:$0xf0] }
 0x41d   : > { %v16247_v31 = vld [vmem:[%s18120_s18 + $0x974] sm:$0xf0]  ;;  %v5776_v34 = vpop.f32.mrf.mxu3  ;;  %v12206_v15 = vor.u32 %v16063_v55, %v12203_v51  ;;  %v12651_v54 = vld [vmem:[%s18120_s18 + $0x778] sm:$0xf0] }
 0x41e   : > { %6015 = vmatpush.bf16.msra.mxu2 %v13034_v7  ;;  %v13417_v0 = vld [vmem:[%s18120_s18 + $0xd38] sm:$0xf]  ;;  %5990 = vmatpush.bf16.msra.mxu0 %v11946_v18  ;;  %v12906_v6 = vor.u32 %v16247_v31, %v12905_v20  ;;  %v16191_v7 = vld [vmem:[%s18120_s18 + $0x7bc] sm:$0xf]  ;;  %v13230_v18 = vor.u32 %v16319_v60, %v13227_v63  ;;  %v12654_v49 = vor.u32 %v16175_v42, %v12651_v54 }
 0x41f   : > { %v16375_v26 = vld [vmem:[%s18120_s18 + $0xd74] sm:$0xf0]  ;;  %v12718_v57 = vor.u32 %v16191_v7, %v12715_v52  ;;  %v16431_v27 = vld [vmem:[%s18120_s18 + $0xf3c] sm:$0xf] }
 0x420   : > { %6028 = vmatpush.bf16.msra.mxu3 %v13546_v1  ;;  %v2160_v47 = vld [vmem:[#allocation3 + $0x20] sm:$0xff]  ;;  %6003 = vmatpush.bf16.msra.mxu1 %v12458_v5  ;;  %v13418_v21 = vor.u32 %v16375_v26, %v13417_v0 }
 0x421   : > { %v11817_v39 = vld [vmem:[%s18120_s18 + $0xb8] sm:$0xf]  ;;  %v6099_v8 = vadd.f32 %v5775_v38, %v2160_v47  ;;  %v16047_v5 = vld [vmem:[%s18120_s18 + $0x33c] sm:$0xf] }
 0x422   : > { %6016 = vmatpush.bf16.msra.mxu2 %v12970_v12  ;;  %v15975_v11 = vld [vmem:[%s18120_s18 + $0xf4] sm:$0xf0]  ;;  %5991 = vmatpush.bf16.msra.mxu0 %v11882_v53  ;;  %v12139_v12 = vld [vmem:[%s18120_s18 + $0x378] sm:$0xf0] }
 0x423   : > { %v12329_v17 = vld [vmem:[%s18120_s18 + $0x4b8] sm:$0xf]  ;;  %v11818_v61 = vor.u32 %v15975_v11, %v11817_v39  ;;  %6115 = vst [vmem:[#allocation3 + $0x20] sm:$0xff] %v6099_v8  ;;  %v13675_v20 = vld [vmem:[%s18120_s18 + $0xf78] sm:$0xf0]  ;;  %v12142_v31 = vor.u32 %v16047_v5, %v12139_v12 }
 0x424   : > { %6029 = vmatpush.bf16.msra.mxu3 %v13482_v19  ;;  %v16103_v22 = vld [vmem:[%s18120_s18 + $0x4f4] sm:$0xf0]  ;;  %6004 = vmatpush.bf16.msra.mxu1 %v12394_v62  ;;  %v13163_v19 = vld [vmem:[%s18120_s18 + $0xb78] sm:$0xf0]  ;;  %v13678_v53 = vor.u32 %v16431_v27, %v13675_v20 }
 0x425   : > { %v12841_v3 = vld [vmem:[%s18120_s18 + $0x8b8] sm:$0xf]  ;;  %v12330_v25 = vor.u32 %v16103_v22, %v12329_v17  ;;  %v13166_v32 = vor.u32 %v16303_v4, %v13163_v19  ;;  %v16031_v0 = vld [vmem:[%s18120_s18 + $0x2bc] sm:$0xf] }
 0x426   : > { %v16231_v33 = vld [vmem:[%s18120_s18 + $0x8f4] sm:$0xf0]  ;;  %6017 = vmatpush.bf16.msra.mxu2 %v12906_v6  ;;  %5992 = vmatpush.bf16.msra.mxu0 %v11818_v61  ;;  %v12075_v26 = vld [vmem:[%s18120_s18 + $0x2f8] sm:$0xf0] }
 0x427   : > { %v13353_v23 = vld [vmem:[%s18120_s18 + $0xcb8] sm:$0xf]  ;;  %v12842_v41 = vor.u32 %v16231_v33, %v12841_v3  ;;  %v16159_v47 = vld [vmem:[%s18120_s18 + $0x6bc] sm:$0xf]  ;;  %v12078_v11 = vor.u32 %v16031_v0, %v12075_v26 }
 0x428   : > { %v16359_v56 = vld [vmem:[%s18120_s18 + $0xcf4] sm:$0xf0]  ;;  %6030 = vmatpush.bf16.msra.mxu3 %v13418_v21  ;;  %6005 = vmatpush.bf16.msra.mxu1 %v12330_v25  ;;  %v12587_v38 = vld [vmem:[%s18120_s18 + $0x6f8] sm:$0xf0] }
 0x429   : > { %v11753_v29 = vld [vmem:[%s18120_s18 + $0x38] sm:$0xf]  ;;  %v13354_v46 = vor.u32 %v16359_v56, %v13353_v23  ;;  %v13099_v62 = vld [vmem:[%s18120_s18 + $0xaf8] sm:$0xf0]  ;;  %v12590_v17 = vor.u32 %v16159_v47, %v12587_v38 }
 0x42a   : > { %v15959_v14 = vld [vmem:[%s18120_s18 + $0x74] sm:$0xf0]  ;;  %6018 = vmatpush.bf16.msra.mxu2 %v12842_v41  ;;  %v16415_v6 = vld [vmem:[%s18120_s18 + $0xebc] sm:$0xf]  ;;  %v13102_v48 = vor.u32 %v16287_v35, %v13099_v62  ;;  %v5787_v25 = vpop.f32.mrf.mxu0 }
 0x42b   : > { %v12265_v43 = vld [vmem:[%s18120_s18 + $0x438] sm:$0xf]  ;;  %v11754_v24 = vor.u32 %v15959_v14, %v11753_v29  ;;  %v13611_v39 = vld [vmem:[%s18120_s18 + $0xef8] sm:$0xf0] }
 0x42c   : > { %v16087_v44 = vld [vmem:[%s18120_s18 + $0x474] sm:$0xf0]  ;;  %6031 = vmatpush.bf16.msra.mxu3 %v13354_v46  ;;  %v16015_v21 = vld [vmem:[%s18120_s18 + $0x23c] sm:$0xf]  ;;  %v13614_v33 = vor.u32 %v16415_v6, %v13611_v39  ;;  %v5800_v46 = vpop.f32.mrf.mxu1 }
 0x42d   : > { %v12777_v28 = vld [vmem:[%s18120_s18 + $0x838] sm:$0xf]  ;;  %v12266_v1 = vor.u32 %v16087_v44, %v12265_v43  ;;  %5993 = vmatpush.bf16.msra.mxu0 %v11754_v24  ;;  %v12011_v22 = vld [vmem:[%s18120_s18 + $0x278] sm:$0xf0]  ;;  %v5801_v55 = vadd.f32 %v5800_v46, %v5787_v25 }
 0x42e   : > { %v16215_v50 = vld [vmem:[%s18120_s18 + $0x874] sm:$0xf0]  ;;  %v16143_v3 = vld [vmem:[%s18120_s18 + $0x63c] sm:$0xf]  ;;  %v12014_v14 = vor.u32 %v16015_v21, %v12011_v22 }
 0x42f   : > { %v13289_v30 = vld [vmem:[%s18120_s18 + $0xc38] sm:$0xf]  ;;  %v12778_v59 = vor.u32 %v16215_v50, %v12777_v28  ;;  %6006 = vmatpush.bf16.msra.mxu1 %v12266_v1  ;;  %v12523_v8 = vld [vmem:[%s18120_s18 + $0x678] sm:$0xf0] }
 0x430   : > { %v16343_v58 = vld [vmem:[%s18120_s18 + $0xc74] sm:$0xf0]  ;;  %5994 = vmatmul.bf16.vlgmr.msra.gmra.mxu0 %v18686_v13  ;;  %v16271_v23 = vld [vmem:[%s18120_s18 + $0xa3c] sm:$0xf]  ;;  %v12526_v41 = vor.u32 %v16143_v3, %v12523_v8 }
 0x431   : > { %v13290_v37 = vor.u32 %v16343_v58, %v13289_v30  ;;  %6019 = vmatpush.bf16.msra.mxu2 %v12778_v59  ;;  %6038 = vmatpush.bf16.msrb.mxu0 %v12206_v15  ;;  %v13035_v56 = vld [vmem:[%s18120_s18 + $0xa78] sm:$0xf0] }
 0x432   : > { %6007 = vmatmul.bf16.vlgmr.msra.gmra.mxu1 %v18688_v36  ;;  %v16399_v61 = vld [vmem:[%s18120_s18 + $0xe3c] sm:$0xf]  ;;  %v13038_v43 = vor.u32 %v16271_v23, %v13035_v56  ;;  %v5789_v19 = vpop.f32.mrf.mxu0 }
 0x433   : > { %6032 = vmatpush.bf16.msra.mxu3 %v13290_v37  ;;  %6051 = vmatpush.bf16.msrb.mxu1 %v12718_v57  ;;  %v13547_v29 = vld [vmem:[%s18120_s18 + $0xe78] sm:$0xf0]  ;;  %v2164_v19 = vld [vmem:[#allocation3 + $0x70] sm:$0xff] }
 0x434   : > { %6020 = vmatmul.bf16.vlgmr.msra.gmra.mxu2 %v18675_v16  ;;  %v15999_v44 = vld [vmem:[%s18120_s18 + $0x1bc] sm:$0xf]  ;;  %v13550_v50 = vor.u32 %v16399_v61, %v13547_v29  ;;  %v5813_v9 = vpop.f32.mrf.mxu2  ;;  %v5802_v0 = vpop.f32.mrf.mxu1 }
 0x435   : > { %6064 = vmatpush.bf16.msrb.mxu2 %v13230_v18  ;;  %6039 = vmatpush.bf16.msrb.mxu0 %v12142_v31  ;;  %v11947_v28 = vld [vmem:[%s18120_s18 + $0x1f8] sm:$0xf0]  ;;  %v5814_v18 = vadd.f32 %v5813_v9, %v5801_v55 }
 0x436   : > { %6033 = vmatmul.bf16.vlgmr.msra.gmra.mxu3 %v18677_v10  ;;  %v16127_v45 = vld [vmem:[%s18120_s18 + $0x5bc] sm:$0xf]  ;;  %v11950_v24 = vor.u32 %v15999_v44, %v11947_v28  ;;  %v5826_v5 = vpop.f32.mrf.mxu3 }
 0x437   : > { %6077 = vmatpush.bf16.msrb.mxu3 %v13742_v40  ;;  %6052 = vmatpush.bf16.msrb.mxu1 %v12654_v49  ;;  %v12459_v30 = vld [vmem:[%s18120_s18 + $0x5f8] sm:$0xf0]  ;;  %v2161_v40 = vld [vmem:[#allocation3 + $0x10] sm:$0xff]  ;;  %v5827_v4 = vadd.f32 %v5826_v5, %v5814_v18 }
 0x438   : > { %v16255_v58 = vld [vmem:[%s18120_s18 + $0x9bc] sm:$0xf]  ;;  %v12462_v52 = vor.u32 %v16127_v45, %v12459_v30 }
 0x439   : > { %6065 = vmatpush.bf16.msrb.mxu2 %v13166_v32  ;;  %6040 = vmatpush.bf16.msrb.mxu0 %v12078_v11  ;;  %v12971_v34 = vld [vmem:[%s18120_s18 + $0x9f8] sm:$0xf0]  ;;  %v6100_v35 = vadd.f32 %v5827_v4, %v2161_v40 }
 0x43a   : > { %v16383_v51 = vld [vmem:[%s18120_s18 + $0xdbc] sm:$0xf]  ;;  %v12974_v60 = vor.u32 %v16255_v58, %v12971_v34  ;;  %v2162_v34 = vld [vmem:[#allocation3 + $0x38] sm:$0xff] }
 0x43b   : > { %6078 = vmatpush.bf16.msrb.mxu3 %v13678_v53  ;;  %6053 = vmatpush.bf16.msrb.mxu1 %v12590_v17  ;;  %v13483_v7 = vld [vmem:[%s18120_s18 + $0xdf8] sm:$0xf0]  ;;  %6116 = vst [vmem:[#allocation3 + $0x10] sm:$0xff] %v6100_v35 }
 0x43c   : > { %v15983_v63 = vld [vmem:[%s18120_s18 + $0x13c] sm:$0xf]  ;;  %v13486_v2 = vor.u32 %v16383_v51, %v13483_v7  ;;  %v5815_v3 = vpop.f32.mrf.mxu2 }
 0x43d   : > { %6066 = vmatpush.bf16.msrb.mxu2 %v13102_v48  ;;  %6041 = vmatpush.bf16.msrb.mxu0 %v12014_v14  ;;  %v11883_v1 = vld [vmem:[%s18120_s18 + $0x178] sm:$0xf0] }
 0x43e   : > { %v16111_v59 = vld [vmem:[%s18120_s18 + $0x53c] sm:$0xf]  ;;  %v11886_v54 = vor.u32 %v15983_v63, %v11883_v1  ;;  %v5828_v61 = vpop.f32.mrf.mxu3 }
 0x43f   : > { %6079 = vmatpush.bf16.msrb.mxu3 %v13614_v33  ;;  %6054 = vmatpush.bf16.msrb.mxu1 %v12526_v41  ;;  %v12395_v37 = vld [vmem:[%s18120_s18 + $0x578] sm:$0xf0] }
 0x440   : > { %v16239_v15 = vld [vmem:[%s18120_s18 + $0x93c] sm:$0xf]  ;;  %v12398_v27 = vor.u32 %v16111_v59, %v12395_v37 }
 0x441   : > { %6067 = vmatpush.bf16.msrb.mxu2 %v13038_v43  ;;  %v12907_v57 = vld [vmem:[%s18120_s18 + $0x978] sm:$0xf0]  ;;  %6042 = vmatpush.bf16.msrb.mxu0 %v11950_v24 }
 0x442   : > { %v16367_v12 = vld [vmem:[%s18120_s18 + $0xd3c] sm:$0xf]  ;;  %v12910_v20 = vor.u32 %v16239_v15, %v12907_v57 }
 0x443   : > { %6080 = vmatpush.bf16.msrb.mxu3 %v13550_v50  ;;  %v13419_v42 = vld [vmem:[%s18120_s18 + $0xd78] sm:$0xf0]  ;;  %6055 = vmatpush.bf16.msrb.mxu1 %v12462_v52 }
 0x444   : > { %v15967_v31 = vld [vmem:[%s18120_s18 + $0xbc] sm:$0xf]  ;;  %v13422_v26 = vor.u32 %v16367_v12, %v13419_v42 }
 0x445   : > { %6068 = vmatpush.bf16.msrb.mxu2 %v12974_v60  ;;  %v11819_v49 = vld [vmem:[%s18120_s18 + $0xf8] sm:$0xf0]  ;;  %6043 = vmatpush.bf16.msrb.mxu0 %v11886_v54 }
 0x446   : > { %v16095_v32 = vld [vmem:[%s18120_s18 + $0x4bc] sm:$0xf]  ;;  %v11822_v39 = vor.u32 %v15967_v31, %v11819_v49 }
 0x447   : > { %6081 = vmatpush.bf16.msrb.mxu3 %v13486_v2  ;;  %v12331_v47 = vld [vmem:[%s18120_s18 + $0x4f8] sm:$0xf0]  ;;  %6056 = vmatpush.bf16.msrb.mxu1 %v12398_v27 }
 0x448   : > { %v16223_v53 = vld [vmem:[%s18120_s18 + $0x8bc] sm:$0xf]  ;;  %v12334_v11 = vor.u32 %v16095_v32, %v12331_v47 }
 0x449   : > { %v12843_v38 = vld [vmem:[%s18120_s18 + $0x8f8] sm:$0xf0]  ;;  %6069 = vmatpush.bf16.msrb.mxu2 %v12910_v20  ;;  %6044 = vmatpush.bf16.msrb.mxu0 %v11822_v39 }
 0x44a   : > { %v16351_v62 = vld [vmem:[%s18120_s18 + $0xcbc] sm:$0xf]  ;;  %v12846_v17 = vor.u32 %v16223_v53, %v12843_v38  ;;  %v5839_v28 = vpop.f32.mrf.mxu0 }
 0x44b   : > { %v13355_v6 = vld [vmem:[%s18120_s18 + $0xcf8] sm:$0xf0]  ;;  %6082 = vmatpush.bf16.msrb.mxu3 %v13422_v26  ;;  %6057 = vmatpush.bf16.msrb.mxu1 %v12334_v11 }
 0x44c   : > { %v15951_v48 = vld [vmem:[%s18120_s18 + $0x3c] sm:$0xf]  ;;  %v13358_v33 = vor.u32 %v16351_v62, %v13355_v6  ;;  %v5852_v45 = vpop.f32.mrf.mxu1  ;;  %v2165_v6 = vld [vmem:[#allocation3 + $0x78] sm:$0xff] }
 0x44d   : > { %v11755_v21 = vld [vmem:[%s18120_s18 + $0x78] sm:$0xf0]  ;;  %6070 = vmatpush.bf16.msrb.mxu2 %v12846_v17  ;;  %v5853_v46 = vadd.f32 %v5852_v45, %v5839_v28 }
 0x44e   : > { %v16079_v22 = vld [vmem:[%s18120_s18 + $0x43c] sm:$0xf]  ;;  %v11758_v25 = vor.u32 %v15951_v48, %v11755_v21 }
 0x44f   : > { %v12267_v8 = vld [vmem:[%s18120_s18 + $0x478] sm:$0xf0]  ;;  %6083 = vmatpush.bf16.msrb.mxu3 %v13358_v33 }
 0x450   : > { %v16207_v23 = vld [vmem:[%s18120_s18 + $0x83c] sm:$0xf]  ;;  %v12270_v41 = vor.u32 %v16079_v22, %v12267_v8  ;;  %6045 = vmatpush.bf16.msrb.mxu0 %v11758_v25 }
 0x451   : > { %v12779_v56 = vld [vmem:[%s18120_s18 + $0x878] sm:$0xf0] }
 0x452   : > { %v16335_v29 = vld [vmem:[%s18120_s18 + $0xc3c] sm:$0xf]  ;;  %v12782_v43 = vor.u32 %v16207_v23, %v12779_v56  ;;  %6058 = vmatpush.bf16.msrb.mxu1 %v12270_v41  ;;  %v5841_v51 = vpop.f32.mrf.mxu0 }
 0x453   : > { %v13291_v14 = vld [vmem:[%s18120_s18 + $0xc78] sm:$0xf0]  ;;  %6046 = vmatmul.bf16.vlgmr.msrb.gmra.mxu0 %v18686_v13 }
 0x454   : > { %v13294_v44 = vor.u32 %v16335_v29, %v13291_v14  ;;  %6071 = vmatpush.bf16.msrb.mxu2 %v12782_v43  ;;  %v5865_v50 = vpop.f32.mrf.mxu2  ;;  %v5854_v7 = vpop.f32.mrf.mxu1  ;;  %v2163_v59 = vld [vmem:[#allocation3 + $0x60] sm:$0xff]  ;;  %v2166_v14 = vld [vmem:[#allocation3 + $0x28] sm:$0xff] }
 0x455   : > { %6059 = vmatmul.bf16.vlgmr.msrb.gmra.mxu1 %v18688_v36  ;;  %v5866_v30 = vadd.f32 %v5865_v50, %v5853_v46 }
 0x456   : > { %6084 = vmatpush.bf16.msrb.mxu3 %v13294_v44  ;;  %v5878_v58 = vpop.f32.mrf.mxu3 }
 0x457   : > { %6072 = vmatmul.bf16.vlgmr.msrb.gmra.mxu2 %v18675_v16  ;;  %v5879_v55 = vadd.f32 %v5878_v58, %v5866_v30 }
 0x459   : > { %6085 = vmatmul.bf16.vlgmr.msrb.gmra.mxu3 %v18677_v10  ;;  %v6101_v24 = vadd.f32 %v5879_v55, %v2162_v34 }
 0x45b   : > { %6117 = vst [vmem:[#allocation3 + $0x38] sm:$0xff] %v6101_v24 }
 0x45c   : > { %v5867_v52 = vpop.f32.mrf.mxu2 }
 0x45e   : > { %v5880_v13 = vpop.f32.mrf.mxu3 }
 0x46a   : > { %v5891_v60 = vpop.f32.mrf.mxu0 }
 0x46c   : > { %v5904_v36 = vpop.f32.mrf.mxu1 }
 0x46d   : > { %v5905_v63 = vadd.f32 %v5904_v36, %v5891_v60 }
 0x472   : > { %v5893_v2 = vpop.f32.mrf.mxu0 }
 0x474   : > { %v5917_v16 = vpop.f32.mrf.mxu2  ;;  %v5906_v37 = vpop.f32.mrf.mxu1 }
 0x475   : > { %v5918_v1 = vadd.f32 %v5917_v16, %v5905_v63 }
 0x476   : > { %v5930_v10 = vpop.f32.mrf.mxu3 }
 0x477   : > { %v5931_v9 = vadd.f32 %v5930_v10, %v5918_v1 }
 0x479   : > { %v6102_v15 = vadd.f32 %v5931_v9, %v2163_v59 }
 0x47b   : > { %6118 = vst [vmem:[#allocation3 + $0x60] sm:$0xff] %v6102_v15 }
 0x47c   : > { %v5919_v57 = vpop.f32.mrf.mxu2 }
 0x47e   : > { %v5932_v18 = vpop.f32.mrf.mxu3 }
 0x48a   : > { %v5943_v5 = vpop.f32.mrf.mxu0 }
 0x48c   : > { %v5956_v12 = vpop.f32.mrf.mxu1 }
 0x48d   : > { %v5957_v42 = vadd.f32 %v5956_v12, %v5943_v5 }
 0x492   : > { %v5945_v20 = vpop.f32.mrf.mxu0 }
 0x494   : > { %v5969_v40 = vpop.f32.mrf.mxu2  ;;  %v5958_v31 = vpop.f32.mrf.mxu1 }
 0x495   : > { %v5970_v54 = vadd.f32 %v5969_v40, %v5957_v42 }
 0x496   : > { %v5982_v4 = vpop.f32.mrf.mxu3 }
 0x497   : > { %v5983_v27 = vadd.f32 %v5982_v4, %v5970_v54 }
 0x499   : > { %v6103_v49 = vadd.f32 %v5983_v27, %v2164_v19 }
 0x49b   : > { %6119 = vst [vmem:[#allocation3 + $0x70] sm:$0xff] %v6103_v49 }
 0x49c   : > { %v5971_v32 = vpop.f32.mrf.mxu2 }
 0x49e   : > { %v5984_v0 = vpop.f32.mrf.mxu3 }
 0x4ad   : > { %v5995_v26 = vpop.f32.mrf.mxu0 }
 0x4af   : > { %v6008_v47 = vpop.f32.mrf.mxu1 }
 0x4b0   : > { %v6009_v53 = vadd.f32 %v6008_v47, %v5995_v26 }
 0x4b5   : > { %v5997_v11 = vpop.f32.mrf.mxu0 }
 0x4b7   : > { %v6021_v38 = vpop.f32.mrf.mxu2  ;;  %v6010_v17 = vpop.f32.mrf.mxu1 }
 0x4b8   : > { %v6022_v35 = vadd.f32 %v6021_v38, %v6009_v53 }
 0x4b9   : > { %v6034_v62 = vpop.f32.mrf.mxu3 }
 0x4ba   : > { %v6035_v39 = vadd.f32 %v6034_v62, %v6022_v35 }
 0x4bc   : > { %v6104_v48 = vadd.f32 %v6035_v39, %v2165_v6 }
 0x4be   : > { %6120 = vst [vmem:[#allocation3 + $0x78] sm:$0xff] %v6104_v48 }
 0x4bf   : > { %v6023_v21 = vpop.f32.mrf.mxu2 }
 0x4c1   : > { %v6036_v22 = vpop.f32.mrf.mxu3 }
 0x4d0   : > { %v6047_v3 = vpop.f32.mrf.mxu0 }
 0x4d2   : > { %v6060_v33 = vpop.f32.mrf.mxu1 }
 0x4d3   : > { %v6061_v8 = vadd.f32 %v6060_v33, %v6047_v3 }
 0x4d8   : > { %v6049_v29 = vpop.f32.mrf.mxu0 }
 0x4da   : > { %v6073_v23 = vpop.f32.mrf.mxu2  ;;  %v6062_v25 = vpop.f32.mrf.mxu1 }
 0x4db   : > { %v6074_v56 = vadd.f32 %v6073_v23, %v6061_v8 }
 0x4dc   : > { %v6086_v61 = vpop.f32.mrf.mxu3 }
 0x4dd   : > { %v6087_v41 = vadd.f32 %v6086_v61, %v6074_v56 }
 0x4df   : > { %v6105_v43 = vadd.f32 %v6087_v41, %v2166_v14 }
 0x4e0   : > { %6125 = sbr.rel (%p13743_p1) target bundleno = 2269 (0x8dd), region = 148 }
 0x4e1   : > { %6121 = vst [vmem:[#allocation3 + $0x28] sm:$0xff] %v6105_v43 }
 0x4e2   : > { %v6075_v44 = vpop.f32.mrf.mxu2 }
 0x4e4   : > { %v6088_v28 = vpop.f32.mrf.mxu3 }
 0x4e5   : > { %v6126_v45 = vld [vmem:[#allocation3 + $0x30] sm:$0xff]  ;;  %v6142_v46 = vld [vmem:[#allocation18] sm:$0xff]  ;;  %v6127_v50 = vld [vmem:[#allocation3] sm:$0xff]  ;;  %vm6195_vm3 = vcmask 64512   ;;  %s20830_s30 = sld [smem:[#allocation57_spill]] }
 0x4e6   : > { %v6146_v30 = vperm.slane %v6142_v46, 0  ;;  %v6147_v58 = vperm.slane %v6142_v46, 1  ;;  %v6128_v34 = vld [vmem:[#allocation3 + $0x58] sm:$0xff]  ;;  %v6148_v55 = vperm.slane %v6142_v46, 2  ;;  %v6149_v7 = vperm.slane %v6142_v46, 3  ;;  %v6130_v24 = vld [vmem:[#allocation3 + $0x50] sm:$0xff] }
 0x4e7   : > { %v6129_v51 = vld [vmem:[#allocation3 + $0x18] sm:$0xff]  ;;  %v6150_v52 = vperm.slane %v6142_v46, 4  ;;  %v6131_v13 = vld [vmem:[#allocation3 + $0x68] sm:$0xff]  ;;  %v6151_v60 = vperm.slane %v6142_v46, 5  ;;  %v6152_v36 = vperm.slane %v6142_v46, 6  ;;  %v19673_v59 = vld [vmem:[#allocation9] sm:$0xff] }
 0x4e8   : > { %v6178_v63 = vadd.f32 %v6146_v30, %v6126_v45  ;;  %v6179_v16 = vadd.f32 %v6147_v58, %v6127_v50  ;;  %v6180_v1 = vadd.f32 %v6148_v55, %v6128_v34  ;;  %v6181_v10 = vadd.f32 %v6149_v7, %v6129_v51  ;;  %v6132_v9 = vld [vmem:[#allocation3 + $0x8] sm:$0xff]  ;;  %v6136_v18 = vld [vmem:[#allocation3 + $0x10] sm:$0xff]  ;;  %v6137_v12 = vld [vmem:[#allocation3 + $0x38] sm:$0xff] }
 0x4e9   : > { %v6133_v2 = vld [vmem:[#allocation3 + $0x48] sm:$0xff]  ;;  %v6182_v37 = vadd.f32 %v6150_v52, %v6130_v24  ;;  %v6183_v15 = vadd.f32 %v6151_v60, %v6131_v13  ;;  %v6153_v57 = vperm.slane %v6142_v46, 7  ;;  %v6143_v5 = vld [vmem:[#allocation18 + $0x8] sm:$0xff]  ;;  %v6134_v54 = vld [vmem:[#allocation3 + $0x40] sm:$0xff]  ;;  %v6184_v20 = vadd.f32 %v6152_v36, %v6132_v9 }
 0x4ea   : > { %6214 = vmatpush.msra.mxu0 %v6178_v63  ;;  %6234 = vmatpush.msra.mxu1 %v6179_v16  ;;  %v6156_v42 = vperm.slane %v6143_v5, 2  ;;  %v6157_v40 = vperm.slane %v6143_v5, 3  ;;  %v6154_v4 = vperm.slane %v6143_v5, 0  ;;  %v6135_v19 = vld [vmem:[#allocation3 + $0x20] sm:$0xff]  ;;  %v6155_v27 = vperm.slane %v6143_v5, 1  ;;  %v6140_v38 = vld [vmem:[#allocation3 + $0x78] sm:$0xff] }
 0x4eb   : > { %6254 = vmatpush.msra.mxu2 %v6180_v1  ;;  %6274 = vmatpush.msra.mxu3 %v6181_v10  ;;  %v6185_v31 = vadd.f32 %v6153_v57, %v6133_v2  ;;  %v6160_v47 = vperm.slane %v6143_v5, 6  ;;  %v6161_v53 = vperm.slane %v6143_v5, 7  ;;  %v6141_v35 = vld [vmem:[#allocation3 + $0x28] sm:$0xff]  ;;  %v6158_v62 = vperm.slane %v6143_v5, 4  ;;  %v6138_v39 = vld [vmem:[#allocation3 + $0x60] sm:$0xff]  ;;  %v6139_v11 = vld [vmem:[#allocation3 + $0x70] sm:$0xff] }
 0x4ec   : > { %13744 = vmatmul.msk.f32.vlgmr.msra.gmra.mxu0 %vm6195_vm3, %v19673_v59  ;;  %13745 = vmatmul.msk.f32.vlgmr.msra.gmra.mxu1 %vm6195_vm3, %v19673_v59  ;;  %v6188_v49 = vadd.f32 %v6156_v42, %v6136_v18  ;;  %v6189_v32 = vadd.f32 %v6157_v40, %v6137_v12  ;;  %v6186_v0 = vadd.f32 %v6154_v4, %v6134_v54  ;;  %v6159_v6 = vperm.slane %v6143_v5, 5  ;;  %v13874_v3 = vld [vmem:[#allocation22 + $0xe0] sm:$0xf]  ;;  %v16486_v33 = vld [vmem:[#allocation22 + $0xec] sm:$0xf0] }
 0x4ed   : > { %13746 = vmatmul.msk.f32.vlgmr.msra.gmra.mxu2 %vm6195_vm3, %v19673_v59  ;;  %13747 = vmatmul.msk.f32.vlgmr.msra.gmra.mxu3 %vm6195_vm3, %v19673_v59  ;;  %v6187_v26 = vadd.f32 %v6155_v27, %v6135_v19  ;;  %v6192_v17 = vadd.f32 %v6160_v47, %v6140_v38  ;;  %v6193_v48 = vadd.f32 %v6161_v53, %v6141_v35  ;;  %v14002_v8 = vld [vmem:[#allocation22 + $0x1e0] sm:$0xf]  ;;  %v16518_v23 = vld [vmem:[#allocation22 + $0x1ec] sm:$0xf0]  ;;  %v17858_v54 = vmov 8.0  }
 0x4ee   : > { %6294 = vmatpush.msrb.mxu0 %v6182_v37  ;;  %6314 = vmatpush.msrb.mxu1 %v6183_v15  ;;  %v6190_v21 = vadd.f32 %v6158_v62, %v6138_v39  ;;  %v6191_v22 = vadd.f32 %v6159_v6, %v6139_v11  ;;  %v14130_v56 = vld [vmem:[#allocation22 + $0x2e0] sm:$0xf]  ;;  %v16550_v61 = vld [vmem:[#allocation22 + $0x2ec] sm:$0xf0]  ;;  %v13875_v25 = vor.u32 %v16486_v33, %v13874_v3  ;;  %17232 = vrcp.f32 %v17858_v54 }
 0x4ef   : > { %6334 = vmatpush.msrb.mxu2 %v6184_v20  ;;  %6354 = vmatpush.msrb.mxu3 %v6185_v31  ;;  %v14258_v29 = vld [vmem:[#allocation22 + $0x3e0] sm:$0xf]  ;;  %v16582_v14 = vld [vmem:[#allocation22 + $0x3ec] sm:$0xf0]  ;;  %v14003_v41 = vor.u32 %v16518_v23, %v14002_v8  ;;  %v14131_v46 = vor.u32 %v16550_v61, %v14130_v56 }
 0x4f0   : > { %6374 = vmatpush.msra.mxu0 %v6186_v0  ;;  %6394 = vmatpush.msra.mxu1 %v6187_v26  ;;  %v13858_v43 = vld [vmem:[#allocation22 + $0xc0] sm:$0xf]  ;;  %v16482_v44 = vld [vmem:[#allocation22 + $0xcc] sm:$0xf0]  ;;  %v14259_v50 = vor.u32 %v16582_v14, %v14258_v29 }
 0x4f1   : > { %6414 = vmatpush.msra.mxu2 %v6188_v49  ;;  %6434 = vmatpush.msra.mxu3 %v6189_v32  ;;  %v13986_v28 = vld [vmem:[#allocation22 + $0x1c0] sm:$0xf]  ;;  %v16514_v45 = vld [vmem:[#allocation22 + $0x1cc] sm:$0xf0]  ;;  %v13859_v30 = vor.u32 %v16482_v44, %v13858_v43 }
 0x4f2   : > { %v13987_v58 = vor.u32 %v16514_v45, %v13986_v28  ;;  %v13842_v34 = vld [vmem:[#allocation22 + $0xa0] sm:$0xf]  ;;  %v16478_v55 = vld [vmem:[#allocation22 + $0xac] sm:$0xf0] }
 0x4f3   : > { %v13970_v51 = vld [vmem:[#allocation22 + $0x1a0] sm:$0xf]  ;;  %v13843_v7 = vor.u32 %v16478_v55, %v13842_v34  ;;  %v16510_v24 = vld [vmem:[#allocation22 + $0x1ac] sm:$0xf0] }
 0x4f4   : > { %13748 = vmatmul.msk.f32.vlgmr.msrb.gmra.mxu0 %vm6195_vm3, %v19673_v59  ;;  %13749 = vmatmul.msk.f32.vlgmr.msrb.gmra.mxu1 %vm6195_vm3, %v19673_v59  ;;  %v13971_v52 = vor.u32 %v16510_v24, %v13970_v51  ;;  %v14114_v13 = vld [vmem:[#allocation22 + $0x2c0] sm:$0xf]  ;;  %v16546_v60 = vld [vmem:[#allocation22 + $0x2cc] sm:$0xf0]  ;;  %v17233_v4 = vpop.eup %17232 }
 0x4f5   : > { %13750 = vmatmul.msk.f32.vlgmr.msrb.gmra.mxu2 %vm6195_vm3, %v19673_v59  ;;  %13751 = vmatmul.msk.f32.vlgmr.msrb.gmra.mxu3 %vm6195_vm3, %v19673_v59  ;;  %v14242_v36 = vld [vmem:[#allocation22 + $0x3c0] sm:$0xf]  ;;  %v14115_v63 = vor.u32 %v16546_v60, %v14114_v13  ;;  %v16578_v16 = vld [vmem:[#allocation22 + $0x3cc] sm:$0xf0]  ;;  %v6620_v19 = vmul.f32 8.0, %v17233_v4  ;;  %vm6624_vm4 = vweird.f32 %v17233_v4 }
 0x4f6   : > { %6494 = vmatpush.msrb.mxu2 %v6192_v17  ;;  %6514 = vmatpush.msrb.mxu3 %v6193_v48  ;;  %v14243_v1 = vor.u32 %v16578_v16, %v14242_v36  ;;  %v13826_v10 = vld [vmem:[#allocation22 + $0x80] sm:$0xf]  ;;  %v16474_v9 = vld [vmem:[#allocation22 + $0x8c] sm:$0xf0] }
 0x4f7   : > { %6454 = vmatpush.msrb.mxu0 %v6190_v21  ;;  %6474 = vmatpush.msrb.mxu1 %v6191_v22  ;;  %v13954_v2 = vld [vmem:[#allocation22 + $0x180] sm:$0xf]  ;;  %v13827_v37 = vor.u32 %v16474_v9, %v13826_v10  ;;  %v16542_v18 = vld [vmem:[#allocation22 + $0x2ac] sm:$0xf0]  ;;  %v6621_v38 = vsub.f32 1.0, %v6620_v19 }
 0x4f8   : > { %v14098_v57 = vld [vmem:[#allocation22 + $0x2a0] sm:$0xf]  ;;  %v16574_v42 = vld [vmem:[#allocation22 + $0x3ac] sm:$0xf0] }
 0x4f9   : > { %v14226_v5 = vld [vmem:[#allocation22 + $0x3a0] sm:$0xf]  ;;  %v14099_v12 = vor.u32 %v16542_v18, %v14098_v57  ;;  %v16470_v20 = vld [vmem:[#allocation22 + $0x6c] sm:$0xf0]  ;;  %v6622_v61 = vmul.f32 %v17233_v4, %v6621_v38 }
 0x4fa   : > { %v14227_v40 = vor.u32 %v16574_v42, %v14226_v5  ;;  %v13810_v27 = vld [vmem:[#allocation22 + $0x60] sm:$0xf]  ;;  %v16502_v32 = vld [vmem:[#allocation22 + $0x16c] sm:$0xf0] }
 0x4fb   : > { %v13938_v31 = vld [vmem:[#allocation22 + $0x160] sm:$0xf]  ;;  %v13811_v49 = vor.u32 %v16470_v20, %v13810_v27  ;;  %v16538_v47 = vld [vmem:[#allocation22 + $0x28c] sm:$0xf0] }
 0x4fc   : > { %13752 = vmatmul.msk.f32.vlgmr.msra.gmra.mxu0 %vm6195_vm3, %v19673_v59  ;;  %13753 = vmatmul.msk.f32.vlgmr.msra.gmra.mxu1 %vm6195_vm3, %v19673_v59  ;;  %v13939_v0 = vor.u32 %v16502_v32, %v13938_v31  ;;  %v14082_v26 = vld [vmem:[#allocation22 + $0x280] sm:$0xf]  ;;  %v16570_v62 = vld [vmem:[#allocation22 + $0x38c] sm:$0xf0] }
 0x4fd   : > { %13754 = vmatmul.msk.f32.vlgmr.msra.gmra.mxu2 %vm6195_vm3, %v19673_v59  ;;  %13755 = vmatmul.msk.f32.vlgmr.msra.gmra.mxu3 %vm6195_vm3, %v19673_v59  ;;  %v14210_v53 = vld [vmem:[#allocation22 + $0x380] sm:$0xf]  ;;  %v14083_v35 = vor.u32 %v16538_v47, %v14082_v26  ;;  %v16466_v11 = vld [vmem:[#allocation22 + $0x4c] sm:$0xf0] }
 0x4fe   : > { %10240 = vmatpush.bf16.msra.mxu0 %v13875_v25  ;;  %10253 = vmatpush.bf16.msra.mxu1 %v14003_v41  ;;  %v14211_v6 = vor.u32 %v16570_v62, %v14210_v53  ;;  %v13794_v39 = vld [vmem:[#allocation22 + $0x40] sm:$0xf]  ;;  %v16498_v3 = vld [vmem:[#allocation22 + $0x14c] sm:$0xf0] }
 0x4ff   : > { %10266 = vmatpush.bf16.msra.mxu2 %v14131_v46  ;;  %10279 = vmatpush.bf16.msra.mxu3 %v14259_v50  ;;  %v13922_v17 = vld [vmem:[#allocation22 + $0x140] sm:$0xf]  ;;  %v13795_v22 = vor.u32 %v16466_v11, %v13794_v39  ;;  %v6623_v50 = vadd.f32 %v17233_v4, %v6622_v61 }
 0x500   : > { %v13923_v29 = vor.u32 %v16498_v3, %v13922_v17 }
 0x502   : > { %10241 = vmatpush.bf16.msra.mxu0 %v13859_v30  ;;  %10254 = vmatpush.bf16.msra.mxu1 %v13987_v58 }
 0x503   : > { %10267 = vmatpush.bf16.msra.mxu2 %v14115_v63  ;;  %10280 = vmatpush.bf16.msra.mxu3 %v14243_v1  ;;  %v19729_v1 = vsel %vm6624_vm4, %v17233_v4, %v6623_v50 }
 0x504   : > { %13756 = vmatmul.msk.f32.vlgmr.msrb.gmra.mxu0 %vm6195_vm3, %v19673_v59  ;;  %13757 = vmatmul.msk.f32.vlgmr.msrb.gmra.mxu1 %vm6195_vm3, %v19673_v59 }
 0x505   : > { %13758 = vmatmul.msk.f32.vlgmr.msrb.gmra.mxu2 %vm6195_vm3, %v19673_v59  ;;  %13759 = vmatmul.msk.f32.vlgmr.msrb.gmra.mxu3 %vm6195_vm3, %v19673_v59  ;;  %v16506_v59 = vld [vmem:[#allocation22 + $0x18c] sm:$0xf0] }
 0x506   : > { %10242 = vmatpush.bf16.msra.mxu0 %v13843_v7  ;;  %10255 = vmatpush.bf16.msra.mxu1 %v13971_v52  ;;  %v13955_v15 = vor.u32 %v16506_v59, %v13954_v2 }
 0x507   : > { %10268 = vmatpush.bf16.msra.mxu2 %v14099_v12  ;;  %10281 = vmatpush.bf16.msra.mxu3 %v14227_v40 }
 0x50a   : > { %10243 = vmatpush.bf16.msra.mxu0 %v13827_v37  ;;  %10256 = vmatpush.bf16.msra.mxu1 %v13955_v15 }
 0x50b   : > { %10269 = vmatpush.bf16.msra.mxu2 %v14083_v35  ;;  %10282 = vmatpush.bf16.msra.mxu3 %v14211_v6 }
 0x50e   : > { %10244 = vmatpush.bf16.msra.mxu0 %v13811_v49  ;;  %10257 = vmatpush.bf16.msra.mxu1 %v13939_v0 }
 0x512   : > { %10245 = vmatpush.bf16.msra.mxu0 %v13795_v22  ;;  %10258 = vmatpush.bf16.msra.mxu1 %v13923_v29 }
 0x569   : > { %v19707_v48 = vpop.f32.mrf.mxu0  ;;  %v19709_v21 = vpop.f32.mrf.mxu1 }
 0x56a   : > { %v6523_v33 = vrot.slane %v19707_v48, 4  ;;  %v6642_v8 = vmul.f32 %v19707_v48, %v19707_v48  ;;  %v6529_v23 = vrot.slane %v19709_v21, 4  ;;  %v6643_v56 = vmul.f32 %v19709_v21, %v19709_v21 }
 0x56c   : > { %v6524_v14 = vadd.f32 %v6523_v33, %v19707_v48  ;;  %v6658_v25 = vrot.slane %v6642_v8, 4  ;;  %v6530_v41 = vadd.f32 %v6529_v23, %v19709_v21  ;;  %v6664_v43 = vrot.slane %v6643_v56, 4 }
 0x56e   : > { %v6525_v44 = vrot.slane %v6524_v14, 2  ;;  %v6659_v28 = vadd.f32 %v6658_v25, %v6642_v8  ;;  %v6531_v45 = vrot.slane %v6530_v41, 2  ;;  %v6665_v46 = vadd.f32 %v6664_v43, %v6643_v56 }
 0x570   : > { %v6526_v30 = vadd.f32 %v6525_v44, %v6524_v14  ;;  %v6660_v58 = vrot.slane %v6659_v28, 2  ;;  %v6532_v34 = vadd.f32 %v6531_v45, %v6530_v41  ;;  %v6666_v55 = vrot.slane %v6665_v46, 2  ;;  %v19719_v51 = vpop.f32.mrf.mxu2  ;;  %v19721_v7 = vpop.f32.mrf.mxu3 }
 0x571   : > { %v6535_v24 = vrot.slane %v19719_v51, 4  ;;  %v6644_v52 = vmul.f32 %v19719_v51, %v19719_v51  ;;  %v6541_v13 = vrot.slane %v19721_v7, 4  ;;  %v6645_v60 = vmul.f32 %v19721_v7, %v19721_v7  ;;  %v19744_v47 = vpop.f32.mrf.mxu0 }
 0x572   : > { %v6527_v36 = vrot.slane %v6526_v30, 1  ;;  %v6661_v63 = vadd.f32 %v6660_v58, %v6659_v28  ;;  %v6533_v16 = vrot.slane %v6532_v34, 1  ;;  %v6667_v10 = vadd.f32 %v6666_v55, %v6665_v46 }
 0x573   : > { %v6536_v9 = vadd.f32 %v6535_v24, %v19719_v51  ;;  %v6670_v2 = vrot.slane %v6644_v52, 4  ;;  %v6542_v57 = vadd.f32 %v6541_v13, %v19721_v7  ;;  %v6676_v42 = vrot.slane %v6645_v60, 4 }
 0x574   : > { %v6528_v37 = vadd.f32 %v6527_v36, %v6526_v30  ;;  %v6662_v59 = vrot.slane %v6661_v63, 1  ;;  %v6534_v15 = vadd.f32 %v6533_v16, %v6532_v34  ;;  %v6668_v18 = vrot.slane %v6667_v10, 1  ;;  %v19762_v30 = vpop.f32.mrf.mxu1 }
 0x575   : > { %v6537_v5 = vrot.slane %v6536_v9, 2  ;;  %v6671_v12 = vadd.f32 %v6670_v2, %v6644_v52  ;;  %v6543_v19 = vrot.slane %v6542_v57, 2  ;;  %v6677_v49 = vadd.f32 %v6676_v42, %v6645_v60 }
 0x576   : > { %v19734_v40 = vmul.f32 %v19729_v1, %v6528_v37  ;;  %v6663_v54 = vadd.f32 %v6662_v59, %v6661_v63  ;;  %v19737_v4 = vmul.f32 %v19729_v1, %v6534_v15  ;;  %v6669_v27 = vadd.f32 %v6668_v18, %v6667_v10 }
 0x577   : > { %v6538_v20 = vadd.f32 %v6537_v5, %v6536_v9  ;;  %v6672_v31 = vrot.slane %v6671_v12, 2  ;;  %v6544_v6 = vadd.f32 %v6543_v19, %v6542_v57  ;;  %v6678_v39 = vrot.slane %v6677_v49, 2 }
 0x578   : > { %v6754_v32 = vmul.f32 %v6663_v54, %v19729_v1  ;;  %v6770_v0 = vmul.f32 %v19734_v40, %v19734_v40  ;;  %v6771_v26 = vmul.f32 %v19737_v4, %v19737_v4  ;;  %v6755_v53 = vmul.f32 %v6669_v27, %v19729_v1  ;;  %v19764_v34 = vpop.f32.mrf.mxu2 }
 0x579   : > { %v6539_v38 = vrot.slane %v6538_v20, 1  ;;  %v6673_v35 = vadd.f32 %v6672_v31, %v6671_v12  ;;  %v6547_v3 = vrot.slane %v19744_v47, 4  ;;  %v6545_v8 = vrot.slane %v6544_v6, 1 }
 0x57a   : > { %v6786_v62 = vsub.f32 %v6754_v32, %v6770_v0  ;;  %v6787_v11 = vsub.f32 %v6755_v53, %v6771_v26  ;;  %v6679_v23 = vadd.f32 %v6678_v39, %v6677_v49  ;;  %v6646_v43 = vmul.f32 %v19744_v47, %v19744_v47 }
 0x57b   : > { %v6540_v17 = vadd.f32 %v6539_v38, %v6538_v20  ;;  %v6674_v22 = vrot.slane %v6673_v35, 1  ;;  %v6548_v29 = vadd.f32 %v6547_v3, %v19744_v47  ;;  %v6546_v25 = vadd.f32 %v6545_v8, %v6544_v6  ;;  %v19793_v8 = vld [vmem:[#allocation19] sm:$0xff] }
 0x57c   : > { %v6802_v33 = vmax.f32 %v6786_v62, 0.0  ;;  %v6803_v14 = vmax.f32 %v6787_v11, 0.0  ;;  %v6680_v41 = vrot.slane %v6679_v23, 1  ;;  %v6682_v24 = vrot.slane %v6646_v43, 4 }
 0x57d   : > { %v19749_v56 = vmul.f32 %v19729_v1, %v6540_v17  ;;  %v6675_v61 = vadd.f32 %v6674_v22, %v6673_v35  ;;  %v19760_v46 = vmul.f32 %v19729_v1, %v6546_v25  ;;  %v6549_v58 = vrot.slane %v6548_v29, 2 }
 0x57e   : > { %v19754_v44 = vadd.f32 1e-05, %v6802_v33  ;;  %v6681_v50 = vadd.f32 %v6680_v41, %v6679_v23  ;;  %v19766_v55 = vadd.f32 1e-05, %v6803_v14  ;;  %v6553_v13 = vrot.slane %v19762_v30, 4 }
 0x57f   : > { %v6756_v28 = vmul.f32 %v6675_v61, %v19729_v1  ;;  %v6772_v45 = vmul.f32 %v19749_v56, %v19749_v56  ;;  %v6647_v60 = vmul.f32 %v19762_v30, %v19762_v30  ;;  %v6773_v63 = vmul.f32 %v19760_v46, %v19760_v46 }
 0x580   : > { %17234 = vrsqrt.f32 %v19754_v44  ;;  %v6757_v36 = vmul.f32 %v6681_v50, %v19729_v1  ;;  %v6683_v16 = vadd.f32 %v6682_v24, %v6646_v43  ;;  %v6559_v10 = vrot.slane %v19764_v34, 4  ;;  %v13890_v24 = vld [vmem:[#allocation22 + $0x100] sm:$0xf]  ;;  %v19867_v50 = vpop.f32.mrf.mxu2 }
 0x581   : > { %v6788_v52 = vsub.f32 %v6756_v28, %v6772_v45  ;;  %v6550_v9 = vadd.f32 %v6549_v58, %v6548_v29  ;;  %v6554_v2 = vadd.f32 %v6553_v13, %v19762_v30  ;;  %v6688_v37 = vrot.slane %v6647_v60, 4  ;;  %v19803_v28 = vpop.f32.mrf.mxu3 }
 0x582   : > { %v6684_v59 = vrot.slane %v6683_v16, 2  ;;  %17236 = vrsqrt.f32 %v19766_v55  ;;  %v6789_v57 = vsub.f32 %v6757_v36, %v6773_v63  ;;  %v6560_v18 = vadd.f32 %v6559_v10, %v19764_v34 }
 0x583   : > { %v6804_v15 = vmax.f32 %v6788_v52, 0.0  ;;  %v6551_v12 = vrot.slane %v6550_v9, 1  ;;  %v6555_v54 = vrot.slane %v6554_v2, 2  ;;  %v6689_v19 = vadd.f32 %v6688_v37, %v6647_v60  ;;  %v16526_v37 = vld [vmem:[#allocation22 + $0x22c] sm:$0xf0] }
 0x584   : > { %v6685_v42 = vadd.f32 %v6684_v59, %v6683_v16  ;;  %v6648_v27 = vmul.f32 %v19764_v34, %v19764_v34  ;;  %v6805_v0 = vmax.f32 %v6789_v57, 0.0  ;;  %v6561_v26 = vrot.slane %v6560_v18, 2 }
 0x585   : > { %v6556_v20 = vadd.f32 %v6555_v54, %v6554_v2  ;;  %v6690_v31 = vrot.slane %v6689_v19, 2  ;;  %v19785_v32 = vadd.f32 1e-05, %v6804_v15  ;;  %v6552_v38 = vadd.f32 %v6551_v12, %v6550_v9  ;;  %v14066_v54 = vld [vmem:[#allocation22 + $0x260] sm:$0xf] }
 0x586   : > { %v19779_v5 = vpop.eup %17234  ;;  %v6686_v35 = vrot.slane %v6685_v42, 1  ;;  %v6562_v39 = vadd.f32 %v6561_v26, %v6560_v18  ;;  %v6694_v11 = vrot.slane %v6648_v27, 4  ;;  %v19795_v23 = vadd.f32 1e-05, %v6805_v0  ;;  %v14194_v0 = vld [vmem:[#allocation22 + $0x360] sm:$0xf] }
 0x587   : > { %v6851_v49 = vmul.f32 %v19779_v5, %v19754_v44  ;;  %v6557_v62 = vrot.slane %v6556_v20, 1  ;;  %v6691_v6 = vadd.f32 %v6690_v31, %v6689_v19  ;;  %17238 = vrsqrt.f32 %v19785_v32  ;;  %v16534_v19 = vld [vmem:[#allocation22 + $0x26c] sm:$0xf0] }
 0x588   : > { %v19787_v53 = vpop.eup %17236  ;;  %v19798_v61 = vmul.f32 %v19729_v1, %v6552_v38  ;;  %v6687_v29 = vadd.f32 %v6686_v35, %v6685_v42  ;;  %v6563_v25 = vrot.slane %v6562_v39, 1  ;;  %v6695_v41 = vadd.f32 %v6694_v11, %v6648_v27  ;;  %v16566_v26 = vld [vmem:[#allocation22 + $0x36c] sm:$0xf0] }
 0x589   : > { %v6558_v17 = vadd.f32 %v6557_v62, %v6556_v20  ;;  %v6692_v22 = vrot.slane %v6691_v6, 1  ;;  %v6852_v3 = vmul.f32 %v19779_v5, %v6851_v49  ;;  %v6861_v33 = vmul.f32 %v19787_v53, %v19766_v55  ;;  %v16462_v11 = vld [vmem:[#allocation22 + $0x2c] sm:$0xf0] }
 0x58a   : > { %17240 = vrsqrt.f32 %v19795_v23  ;;  %v6758_v52 = vmul.f32 %v6687_v29, %v19729_v1  ;;  %v6774_v13 = vmul.f32 %v19798_v61, %v19798_v61  ;;  %v6564_v16 = vadd.f32 %v6563_v25, %v6562_v39  ;;  %v13778_v39 = vld [vmem:[#allocation22 + $0x20] sm:$0xf] }
 0x58b   : > { %v19801_v14 = vmul.f32 %v19729_v1, %v6558_v17  ;;  %v6693_v43 = vadd.f32 %v6692_v22, %v6691_v6  ;;  %v6853_v45 = vmul.f32 0.5, %v6852_v3  ;;  %v6862_v58 = vmul.f32 %v19787_v53, %v6861_v33  ;;  %v13906_v17 = vld [vmem:[#allocation22 + $0x120] sm:$0xf]  ;;  %v16494_v22 = vld [vmem:[#allocation22 + $0x12c] sm:$0xf0] }
 0x58c   : > { %v6696_v10 = vrot.slane %v6695_v41, 2  ;;  %v6565_v9 = vrot.slane %v19803_v28, 4  ;;  %v6790_v31 = vsub.f32 %v6758_v52, %v6774_v13  ;;  %v6649_v49 = vmul.f32 %v19803_v28, %v19803_v28  ;;  %v14050_v25 = vld [vmem:[#allocation22 + $0x240] sm:$0xf]  ;;  %v16490_v33 = vld [vmem:[#allocation22 + $0x10c] sm:$0xf0] }
 0x58d   : > { %v6775_v60 = vmul.f32 %v19801_v14, %v19801_v14  ;;  %v19814_v36 = vpop.eup %17238  ;;  %v6759_v63 = vmul.f32 %v6693_v43, %v19729_v1  ;;  %v6854_v57 = vsub.f32 1.5, %v6853_v45  ;;  %v19827_v27 = vmul.f32 0.5, %v6862_v58  ;;  %v14178_v43 = vld [vmem:[#allocation22 + $0x340] sm:$0xf] }
 0x58e   : > { %v6697_v12 = vadd.f32 %v6696_v10, %v6695_v41  ;;  %v6566_v42 = vadd.f32 %v6565_v9, %v19803_v28  ;;  %v6871_v20 = vmul.f32 %v19814_v36, %v19785_v32  ;;  %v19834_v35 = vmul.f32 %v19729_v1, %v6564_v16  ;;  %v16530_v41 = vld [vmem:[#allocation22 + $0x24c] sm:$0xf0] }
 0x58f   : > { %v6791_v38 = vsub.f32 %v6759_v63, %v6775_v60  ;;  %vm6856_vm5 = vweird.f32 %v19754_v44  ;;  %vm6857_vm6 = vweird.f32 %v19779_v5  ;;  %v6700_v29 = vrot.slane %v6649_v49, 4  ;;  %v16562_v60 = vld [vmem:[#allocation22 + $0x34c] sm:$0xf0]  ;;  %v13762_v63 = vld [vmem:[#allocation22] sm:$0xf] }
 0x590   : > { %v6698_v62 = vrot.slane %v6697_v12, 1  ;;  %v6567_v6 = vrot.slane %v6566_v42, 2  ;;  %v19836_v3 = vpop.eup %17240  ;;  %v19843_v45 = vmul.f32 %v19779_v5, %v6854_v57  ;;  %v14067_v13 = vor.u32 %v16534_v19, %v14066_v54  ;;  %v16458_v16 = vld [vmem:[#allocation22 + $0xc] sm:$0xf0]  ;;  %v14386_v54 = vld [vmem:[#allocation22 + $0x4e0] sm:$0xf]  ;;  %vm19858_vm8 = vmor %vm6856_vm5, %vm6857_vm6 }
 0x591   : > { %v6872_v10 = vmul.f32 %v19814_v36, %v6871_v20  ;;  %v6806_v9 = vmax.f32 %v6790_v31, 0.0  ;;  %v6701_v15 = vadd.f32 %v6700_v29, %v6649_v49  ;;  %v14195_v59 = vor.u32 %v16566_v26, %v14194_v0  ;;  %v16614_v19 = vld [vmem:[#allocation22 + $0x4ec] sm:$0xf0]  ;;  %v14514_v26 = vld [vmem:[#allocation22 + $0x5e0] sm:$0xf] }
 0x592   : > { %v6699_v58 = vadd.f32 %v6698_v62, %v6697_v12  ;;  %v6568_v52 = vadd.f32 %v6567_v6, %v6566_v42  ;;  %v6864_v18 = vsub.f32 1.5, %v19827_v27  ;;  %vm6866_vm7 = vweird.f32 %v19766_v55  ;;  %10270 = vmatpush.bf16.msra.mxu2 %v14067_v13  ;;  %v14034_v13 = vld [vmem:[#allocation22 + $0x220] sm:$0xf] }
 0x593   : > { %v6881_v57 = vmul.f32 %v19836_v3, %v19795_v23  ;;  %v6807_v12 = vmax.f32 %v6791_v38, 0.0  ;;  %v19852_v42 = vmul.f32 %v19834_v35, %v19834_v35  ;;  %v6702_v31 = vrot.slane %v6701_v15, 2  ;;  %10283 = vmatpush.bf16.msra.mxu3 %v14195_v59  ;;  %v16646_v38 = vld [vmem:[#allocation22 + $0x5ec] sm:$0xf0] }
 0x594   : > { %v6760_v27 = vmul.f32 %v6699_v58, %v19729_v1  ;;  %v13779_v49 = vor.u32 %v16462_v11, %v13778_v39  ;;  %v13907_v0 = vor.u32 %v16494_v22, %v13906_v17  ;;  %v6859_v62 = vsel %vm19858_vm8, %v19779_v5, %v19843_v45  ;;  %v14162_v45 = vld [vmem:[#allocation22 + $0x320] sm:$0xf] }
 0x595   : > { %v6569_v6 = vrot.slane %v6568_v52, 1  ;;  %v14051_v29 = vor.u32 %v16530_v41, %v14050_v25  ;;  %v14179_v44 = vor.u32 %v16562_v60, %v14178_v43  ;;  %v6873_v2 = vmul.f32 0.5, %v6872_v10  ;;  %v19876_v10 = vpop.f32.mrf.mxu0 }
 0x596   : > { %v19869_v58 = vadd.f32 1e-05, %v6806_v9  ;;  %v6703_v59 = vadd.f32 %v6702_v31, %v6701_v15  ;;  %10246 = vmatpush.bf16.msra.mxu0 %v13779_v49  ;;  %10259 = vmatpush.bf16.msra.mxu1 %v13907_v0  ;;  %v13763_v39 = vor.u32 %v16458_v16, %v13762_v63  ;;  %v6882_v11 = vmul.f32 %v19836_v3, %v6881_v57  ;;  %v16610_v9 = vld [vmem:[#allocation22 + $0x4cc] sm:$0xf0]  ;;  %v14146_v0 = vld [vmem:[#allocation22 + $0x300] sm:$0xf] }
 0x597   : > { %v19872_v17 = vadd.f32 1e-05, %v6807_v12  ;;  %10271 = vmatpush.bf16.msra.mxu2 %v14051_v29  ;;  %v13891_v5 = vor.u32 %v16490_v33, %v13890_v24  ;;  %v14387_v22 = vor.u32 %v16614_v19, %v14386_v54  ;;  %v6792_v25 = vsub.f32 %v6760_v27, %v19852_v42  ;;  %10284 = vmatpush.bf16.msra.mxu3 %v14179_v44  ;;  %v16558_v24 = vld [vmem:[#allocation22 + $0x32c] sm:$0xf0]  ;;  %v14370_v33 = vld [vmem:[#allocation22 + $0x4c0] sm:$0xf] }
 0x598   : > { %v14515_v41 = vor.u32 %v16646_v38, %v14514_v26  ;;  %v14035_v43 = vor.u32 %v16526_v37, %v14034_v13  ;;  %v6583_v60 = vrot.slane %v19867_v50, 4  ;;  %v6865_v15 = vmul.f32 %v19787_v53, %v6864_v18  ;;  %v14498_v18 = vld [vmem:[#allocation22 + $0x5c0] sm:$0xf]  ;;  %v16642_v12 = vld [vmem:[#allocation22 + $0x5cc] sm:$0xf0] }
 0x599   : > { %vm6867_vm9 = vweird.f32 %v19787_v53  ;;  %v6822_v63 = vsub.f32 %v19744_v47, %v19798_v61  ;;  %v6570_v16 = vadd.f32 %v6569_v6, %v6568_v52  ;;  %v6874_v57 = vsub.f32 1.5, %v6873_v2  ;;  %v14018_v2 = vld [vmem:[#allocation22 + $0x200] sm:$0xf]  ;;  %v16522_v19 = vld [vmem:[#allocation22 + $0x20c] sm:$0xf0] }
 0x59a   : > { %vm6876_vm10 = vweird.f32 %v19785_v32  ;;  %vm6877_vm11 = vweird.f32 %v19814_v36  ;;  %17242 = vrsqrt.f32 %v19869_v58  ;;  %v6704_v37 = vrot.slane %v6703_v59, 1  ;;  %10247 = vmatpush.bf16.msra.mxu0 %v13763_v39  ;;  %10260 = vmatpush.bf16.msra.mxu1 %v13891_v5  ;;  %vm19894_vm12 = vmor %vm6866_vm7, %vm6867_vm9  ;;  %v16554_v26 = vld [vmem:[#allocation22 + $0x30c] sm:$0xf0]  ;;  %v14642_v32 = vld [vmem:[#allocation22 + $0x6e0] sm:$0xf] }
 0x59b   : > { %v20763_v42 = vsub.f32 %v19707_v48, %v19734_v40  ;;  %v6883_v52 = vmul.f32 0.5, %v6882_v11  ;;  %17244 = vrsqrt.f32 %v19872_v17  ;;  %v6571_v20 = vrot.slane %v19876_v10, 4  ;;  %10272 = vmatpush.bf16.msra.mxu2 %v14035_v43  ;;  %vm19938_vm15 = vmor %vm6876_vm10, %vm6877_vm11  ;;  %v14882_v47 = vld [vmem:[#allocation22 + $0x8c0] sm:$0xf]  ;;  %v16770_v61 = vld [vmem:[#allocation22 + $0x9cc] sm:$0xf0] }
 0x59c   : > { %vm6887_vm13 = vweird.f32 %v19836_v3  ;;  %v6808_v48 = vmax.f32 %v6792_v25, 0.0  ;;  %v14163_v40 = vor.u32 %v16558_v24, %v14162_v45  ;;  %v6584_v31 = vadd.f32 %v6583_v60, %v19867_v50  ;;  %v19911_v25 = vpop.f32.mrf.mxu3 }
 0x59d   : > { %v7010_v54 = vmul.f32 %v6859_v62, %v20763_v42  ;;  %v6652_v49 = vmul.f32 %v19867_v50, %v19867_v50  ;;  %v6869_v55 = vsel %vm19894_vm12, %v19787_v53, %v6865_v15  ;;  %v19906_v38 = vmul.f32 %v19729_v1, %v6570_v16 }
 0x59e   : > { %10292 = vmatpush.bf16.msrb.mxu0 %v14387_v22  ;;  %10305 = vmatpush.bf16.msrb.mxu1 %v14515_v41  ;;  %v14371_v62 = vor.u32 %v16610_v9, %v14370_v33  ;;  %v14499_v6 = vor.u32 %v16642_v12, %v14498_v18  ;;  %v6875_v29 = vmul.f32 %v19814_v36, %v6874_v57  ;;  %vm6886_vm14 = vweird.f32 %v19795_v23 }
 0x59f   : > { %v6705_v44 = vadd.f32 %v6704_v37, %v6703_v59  ;;  %10285 = vmatpush.bf16.msra.mxu3 %v14163_v40  ;;  %v6585_v13 = vrot.slane %v6584_v31, 2  ;;  %v6718_v39 = vrot.slane %v6652_v49, 4  ;;  %v6884_v11 = vsub.f32 1.5, %v6883_v52  ;;  %v16678_v40 = vld [vmem:[#allocation22 + $0x6ec] sm:$0xf0]  ;;  %vm19958_vm0 = vmor %vm6886_vm14, %vm6887_vm13 }
 0x5a0   : > { %v14019_v5 = vor.u32 %v16522_v19, %v14018_v2  ;;  %v14147_v22 = vor.u32 %v16554_v26, %v14146_v0  ;;  %v6572_v53 = vadd.f32 %v6571_v20, %v19876_v10  ;;  %v19913_v41 = vpop.eup %17242  ;;  %v19915_v43 = vadd.f32 1e-05, %v6808_v48 }
 0x5a1   : > { %v6586_v45 = vadd.f32 %v6585_v13, %v6584_v31  ;;  %v6719_v60 = vadd.f32 %v6718_v39, %v6652_v49  ;;  %v6650_v59 = vmul.f32 %v19876_v10, %v19876_v10  ;;  %v19919_v15 = vpop.eup %17244  ;;  %v20766_v16 = vperm.slane %v19793_v8, 0 }
 0x5a2   : > { %10293 = vmatpush.bf16.msrb.mxu0 %v14371_v62  ;;  %10306 = vmatpush.bf16.msrb.mxu1 %v14499_v6  ;;  %v20767_v33 = vsub.f32 %v19709_v21, %v19737_v4  ;;  %v6777_v57 = vmul.f32 %v19906_v38, %v19906_v38  ;;  %v6573_v37 = vrot.slane %v6572_v53, 2  ;;  %v6761_v18 = vmul.f32 %v6705_v44, %v19729_v1 }
 0x5a3   : > { %v19923_v24 = vmul.f32 %v20766_v16, %v7010_v54  ;;  %10273 = vmatpush.bf16.msra.mxu2 %v14019_v5  ;;  %v6587_v12 = vrot.slane %v6586_v45, 1  ;;  %10286 = vmatpush.bf16.msra.mxu3 %v14147_v22  ;;  %v6589_v42 = vrot.slane %v19911_v25, 4  ;;  %v6653_v52 = vmul.f32 %v19911_v25, %v19911_v25 }
 0x5a4   : > { %v7011_v9 = vmul.f32 %v6869_v55, %v20767_v33  ;;  %v6823_v4 = vsub.f32 %v19762_v30, %v19801_v14  ;;  %v6720_v54 = vrot.slane %v6719_v60, 2  ;;  %v6574_v2 = vadd.f32 %v6573_v37, %v6572_v53 }
 0x5a5   : > { %v6706_v19 = vrot.slane %v6650_v59, 4  ;;  %v6879_v20 = vsel %vm19938_vm15, %v19814_v36, %v6875_v29  ;;  %v6885_v27 = vmul.f32 %v19836_v3, %v6884_v11  ;;  %v6891_v48 = vmul.f32 %v19913_v41, %v19869_v58  ;;  %v14354_v29 = vld [vmem:[#allocation22 + $0x4a0] sm:$0xf] }
 0x5a6   : > { %17246 = vrsqrt.f32 %v19915_v43  ;;  %v6901_v31 = vmul.f32 %v19919_v15, %v19872_v17  ;;  %v6588_v49 = vadd.f32 %v6587_v12, %v6586_v45  ;;  %v6721_v0 = vadd.f32 %v6720_v54, %v6719_v60  ;;  %v14770_v54 = vld [vmem:[#allocation22 + $0x7e0] sm:$0xf]  ;;  %v16598_v12 = vld [vmem:[#allocation22 + $0x46c] sm:$0xf0] }
 0x5a7   : > { %v6575_v26 = vrot.slane %v6574_v2, 1  ;;  %v6793_v55 = vsub.f32 %v6761_v18, %v6777_v57  ;;  %v6707_v62 = vadd.f32 %v6706_v19, %v6650_v59  ;;  %v6590_v6 = vadd.f32 %v6589_v42, %v19911_v25  ;;  %v19987_v19 = vpop.f32.mrf.mxu1 }
 0x5a8   : > { %v6724_v36 = vrot.slane %v6653_v52, 4  ;;  %v19963_v44 = vmul.f32 %v19729_v1, %v6588_v49  ;;  %v6722_v13 = vrot.slane %v6721_v0, 1  ;;  %v14643_v11 = vor.u32 %v16678_v40, %v14642_v32 }
 0x5a9   : > { %v6576_v39 = vadd.f32 %v6575_v26, %v6574_v2  ;;  %v20772_v5 = vsub.f32 %v19719_v51, %v19749_v56  ;;  %v6889_v53 = vsel %vm19958_vm0, %v19836_v3, %v6885_v27  ;;  %v6708_v45 = vrot.slane %v6707_v62, 2  ;;  %v16710_v2 = vld [vmem:[#allocation22 + $0x7ec] sm:$0xf0] }
 0x5aa   : > { %v6591_v23 = vrot.slane %v6590_v6, 2  ;;  %v6892_v60 = vmul.f32 %v19913_v41, %v6891_v48  ;;  %v6902_v59 = vmul.f32 %v19919_v15, %v6901_v31  ;;  %v6723_v16 = vadd.f32 %v6722_v13, %v6721_v0  ;;  %10318 = vmatpush.bf16.msrb.mxu2 %v14643_v11 }
 0x5ab   : > { %v7012_v22 = vmul.f32 %v6879_v20, %v20772_v5  ;;  %v6725_v33 = vadd.f32 %v6724_v36, %v6653_v52  ;;  %v20773_v37 = vperm.slane %v19793_v8, 1  ;;  %v19980_v51 = vmul.f32 %v19729_v1, %v6576_v39  ;;  %v14482_v5 = vld [vmem:[#allocation22 + $0x5a0] sm:$0xf] }
 0x5ac   : > { %v19973_v57 = vpop.eup %17246  ;;  %v6709_v56 = vadd.f32 %v6708_v45, %v6707_v62  ;;  %v6592_v3 = vadd.f32 %v6591_v23, %v6590_v6  ;;  %v6809_v42 = vmax.f32 %v6793_v55, 0.0  ;;  %v6764_v21 = vmul.f32 %v6723_v16, %v19729_v1  ;;  %v16638_v23 = vld [vmem:[#allocation22 + $0x5ac] sm:$0xf0] }
 0x5ad   : > { %v19977_v18 = vmul.f32 %v20773_v37, %v7011_v9  ;;  %v6780_v52 = vmul.f32 %v19963_v44, %v19963_v44  ;;  %v20774_v9 = vperm.slane %v19793_v8, 2  ;;  %v20775_v27 = vsub.f32 %v19721_v7, %v19760_v46  ;;  %v16606_v7 = vld [vmem:[#allocation22 + $0x4ac] sm:$0xf0] }
 0x5ae   : > { %vm6896_vm1 = vweird.f32 %v19869_v58  ;;  %v6710_v32 = vrot.slane %v6709_v56, 1  ;;  %v6593_v40 = vrot.slane %v6592_v3, 1  ;;  %v6893_v31 = vmul.f32 0.5, %v6892_v60  ;;  %v14626_v60 = vld [vmem:[#allocation22 + $0x6c0] sm:$0xf] }
 0x5af   : > { %v19991_v20 = vmul.f32 %v20774_v9, %v7012_v22  ;;  %v7013_v48 = vmul.f32 %v6889_v53, %v20775_v27  ;;  %v6903_v49 = vmul.f32 0.5, %v6902_v59  ;;  %v6911_v0 = vmul.f32 %v19973_v57, %v19915_v43  ;;  %v16674_v59 = vld [vmem:[#allocation22 + $0x6cc] sm:$0xf0]  ;;  %v14338_v9 = vld [vmem:[#allocation22 + $0x480] sm:$0xf] }
 0x5b0   : > { %v6726_v26 = vrot.slane %v6725_v33, 2  ;;  %v6711_v55 = vadd.f32 %v6710_v32, %v6709_v56  ;;  %v6778_v62 = vmul.f32 %v19980_v51, %v19980_v51  ;;  %v14771_v6 = vor.u32 %v16710_v2, %v14770_v54  ;;  %v16602_v27 = vld [vmem:[#allocation22 + $0x48c] sm:$0xf0] }
 0x5b1   : > { %v6577_v36 = vrot.slane %v19987_v19, 4  ;;  %v20002_v46 = vadd.f32 1e-05, %v6809_v42  ;;  %v6796_v13 = vsub.f32 %v6764_v21, %v6780_v52  ;;  %v6594_v39 = vadd.f32 %v6593_v40, %v6592_v3  ;;  %v14754_v3 = vld [vmem:[#allocation22 + $0x7c0] sm:$0xf] }
 0x5b2   : > { %v6727_v11 = vadd.f32 %v6726_v26, %v6725_v33  ;;  %vm6906_vm2 = vweird.f32 %v19872_v17  ;;  %v6762_v22 = vmul.f32 %v6711_v55, %v19729_v1  ;;  %10331 = vmatpush.bf16.msrb.mxu3 %v14771_v6  ;;  %v6651_v45 = vmul.f32 %v19987_v19, %v19987_v19  ;;  %v16706_v42 = vld [vmem:[#allocation22 + $0x7cc] sm:$0xf0] }
 0x5b3   : > { %v6578_v53 = vadd.f32 %v6577_v36, %v19987_v19  ;;  %v20776_v16 = vperm.slane %v19793_v8, 3  ;;  %vm6897_vm3 = vweird.f32 %v19913_v41  ;;  %v14355_v56 = vor.u32 %v16606_v7, %v14354_v29  ;;  %v16634_v26 = vld [vmem:[#allocation22 + $0x58c] sm:$0xf0]  ;;  %v14738_v29 = vld [vmem:[#allocation22 + $0x7a0] sm:$0xf] }
 0x5b4   : > { %v6728_v33 = vrot.slane %v6727_v11, 1  ;;  %v6894_v21 = vsub.f32 1.5, %v6893_v31  ;;  %v6904_v52 = vsub.f32 1.5, %v6903_v49  ;;  %v6794_v54 = vsub.f32 %v6762_v22, %v6778_v62  ;;  %v14610_v49 = vld [vmem:[#allocation22 + $0x6a0] sm:$0xf]  ;;  %vm20030_vm5 = vmor %vm6896_vm1, %vm6897_vm3 }
 0x5b5   : > { %v20011_v37 = vmul.f32 %v20776_v16, %v7013_v48  ;;  %v6579_v2 = vrot.slane %v6578_v53, 2  ;;  %v6912_v32 = vmul.f32 %v19973_v57, %v6911_v0  ;;  %17248 = vrsqrt.f32 %v20002_v46  ;;  %10294 = vmatpush.bf16.msrb.mxu0 %v14355_v56  ;;  %v14466_v48 = vld [vmem:[#allocation22 + $0x580] sm:$0xf]  ;;  %v16670_v62 = vld [vmem:[#allocation22 + $0x6ac] sm:$0xf0] }
 0x5b6   : > { %v6812_v40 = vmax.f32 %v6796_v13, 0.0  ;;  %v20017_v8 = vmul.f32 %v19729_v1, %v6594_v39  ;;  %v6729_v55 = vadd.f32 %v6728_v33, %v6727_v11  ;;  %v6712_v36 = vrot.slane %v6651_v45, 4  ;;  %v16702_v7 = vld [vmem:[#allocation22 + $0x7ac] sm:$0xf0]  ;;  %v14322_v13 = vld [vmem:[#allocation22 + $0x460] sm:$0xf] }
 0x5b7   : > { %v6580_v6 = vadd.f32 %v6579_v2, %v6578_v53  ;;  %v14483_v31 = vor.u32 %v16638_v23, %v14482_v5  ;;  %vm6907_vm4 = vweird.f32 %v19919_v15  ;;  %v6810_v0 = vmax.f32 %v6794_v54, 0.0  ;;  %v14450_v5 = vld [vmem:[#allocation22 + $0x560] sm:$0xf]  ;;  %v16630_v23 = vld [vmem:[#allocation22 + $0x56c] sm:$0xf0] }
 0x5b8   : > { %20777 = vst [vmem:[#allocation41_spill] sm:$0xff] %v20017_v8  ;;  %v14627_v22 = vor.u32 %v16674_v59, %v14626_v60  ;;  %v14755_v16 = vor.u32 %v16706_v42, %v14754_v3  ;;  %v20021_v39 = vmul.f32 %v19913_v41, %v6894_v21  ;;  %v20024_v56 = vmul.f32 %v19919_v15, %v6904_v52  ;;  %v16666_v2 = vld [vmem:[#allocation22 + $0x68c] sm:$0xf0]  ;;  %vm20051_vm6 = vmor %vm6906_vm2, %vm6907_vm4  ;;  %v14706_v60 = vld [vmem:[#allocation22 + $0x760] sm:$0xf] }
 0x5b9   : > { %v6581_v11 = vrot.slane %v6580_v6, 1  ;;  %v6713_v53 = vadd.f32 %v6712_v36, %v6651_v45  ;;  %10307 = vmatpush.bf16.msrb.mxu1 %v14483_v31  ;;  %v20034_v59 = vmul.f32 0.5, %v6912_v32  ;;  %v20036_v33 = vadd.f32 1e-05, %v6812_v40  ;;  %v14594_v45 = vld [vmem:[#allocation22 + $0x680] sm:$0xf] }
 0x5ba   : > { %10319 = vmatpush.bf16.msrb.mxu2 %v14627_v22  ;;  %10332 = vmatpush.bf16.msrb.mxu3 %v14755_v16  ;;  %v14339_v3 = vor.u32 %v16602_v27, %v14338_v9  ;;  %v14467_v42 = vor.u32 %v16634_v26, %v14466_v48  ;;  %v20039_v21 = vmul.f32 %v6729_v55, %v19729_v1  ;;  %v14722_v36 = vld [vmem:[#allocation22 + $0x780] sm:$0xf]  ;;  %v20055_v27 = vadd.f32 1e-05, %v6810_v0  ;;  %v16698_v55 = vld [vmem:[#allocation22 + $0x78c] sm:$0xf0] }
 0x5bb   : > { %v20043_v52 = vmul.f32 %v20017_v8, %v20017_v8  ;;  %v6582_v58 = vadd.f32 %v6581_v11, %v6580_v6  ;;  %v6714_v54 = vrot.slane %v6713_v53, 2  ;;  %v20045_v32 = vpop.eup %17248  ;;  %v14611_v40 = vor.u32 %v16670_v62, %v14610_v49  ;;  %v14306_v6 = vld [vmem:[#allocation22 + $0x440] sm:$0xf]  ;;  %v16594_v0 = vld [vmem:[#allocation22 + $0x44c] sm:$0xf0] }
 0x5bc   : > { %10295 = vmatpush.bf16.msrb.mxu0 %v14339_v3  ;;  %v14739_v48 = vor.u32 %v16702_v7, %v14738_v29  ;;  %v14323_v26 = vor.u32 %v16598_v12, %v14322_v13  ;;  %v6899_v31 = vsel %vm20030_vm5, %v19913_v41, %v20021_v39  ;;  %vm6916_vm7 = vweird.f32 %v19915_v43  ;;  %v14434_v16 = vld [vmem:[#allocation22 + $0x540] sm:$0xf]  ;;  %v16626_v11 = vld [vmem:[#allocation22 + $0x54c] sm:$0xf0] }
 0x5bd   : > { %v20063_v17 = vmul.f32 %v19729_v1, %v6582_v58  ;;  %v6715_v22 = vadd.f32 %v6714_v54, %v6713_v53  ;;  %10308 = vmatpush.bf16.msrb.mxu1 %v14467_v42  ;;  %vm6917_vm8 = vweird.f32 %v19973_v57  ;;  %17250 = vrsqrt.f32 %v20036_v33  ;;  %v14578_v62 = vld [vmem:[#allocation22 + $0x660] sm:$0xf]  ;;  %v16662_v41 = vld [vmem:[#allocation22 + $0x66c] sm:$0xf0]  ;;  %v20079_v54 = vld [vmem:[#allocation19 + $0x8] sm:$0xff] }
 0x5be   : > { %10320 = vmatpush.bf16.msrb.mxu2 %v14611_v40  ;;  %10333 = vmatpush.bf16.msrb.mxu3 %v14739_v48  ;;  %v14451_v12 = vor.u32 %v16630_v23, %v14450_v5  ;;  %v14595_v49 = vor.u32 %v16666_v2, %v14594_v45  ;;  %v20067_v29 = vld [vmem:[#allocation21] sm:$0xff]  ;;  %v6909_v7 = vsel %vm20051_vm6, %v19919_v15, %v20024_v56  ;;  %v6914_v13 = vsub.f32 1.5, %v20034_v59  ;;  %v14290_v45 = vld [vmem:[#allocation22 + $0x420] sm:$0xf]  ;;  %vm20107_vm9 = vmor %vm6916_vm7, %vm6917_vm8 }
 0x5bf   : > { %v6921_v39 = vmul.f32 %v20045_v32, %v20002_v46  ;;  %v6716_v53 = vrot.slane %v6715_v22, 1  ;;  %v16694_v3 = vld [vmem:[#allocation22 + $0x76c] sm:$0xf0]  ;;  %17252 = vrsqrt.f32 %v20055_v27  ;;  %v6797_v5 = vsub.f32 %v20039_v21, %v20043_v52  ;;  %v14418_v2 = vld [vmem:[#allocation22 + $0x520] sm:$0xf] }
 0x5c0   : > { %10296 = vmatpush.bf16.msrb.mxu0 %v14323_v26  ;;  %v14723_v23 = vor.u32 %v16698_v55, %v14722_v36  ;;  %v14307_v42 = vor.u32 %v16594_v0, %v14306_v6  ;;  %v16590_v58 = vld [vmem:[#allocation22 + $0x42c] sm:$0xf0]  ;;  %v6779_v56 = vmul.f32 %v20063_v17, %v20063_v17  ;;  %v14435_v59 = vor.u32 %v16626_v11, %v14434_v16  ;;  %v14562_v48 = vld [vmem:[#allocation22 + $0x640] sm:$0xf] }
 0x5c1   : > { %v6717_v15 = vadd.f32 %v6716_v53, %v6715_v22  ;;  %10309 = vmatpush.bf16.msrb.mxu1 %v14451_v12  ;;  %v16622_v9 = vld [vmem:[#allocation22 + $0x52c] sm:$0xf0]  ;;  %v7078_v40 = vperm.slane %v20067_v29, 0  ;;  %v14579_v52 = vor.u32 %v16662_v41, %v14578_v62  ;;  %v14707_v36 = vor.u32 %v16694_v3, %v14706_v60  ;;  %v14690_v55 = vld [vmem:[#allocation22 + $0x740] sm:$0xf] }
 0x5c2   : > { %10321 = vmatpush.bf16.msrb.mxu2 %v14595_v49  ;;  %10334 = vmatpush.bf16.msrb.mxu3 %v14723_v23  ;;  %v16658_v26 = vld [vmem:[#allocation22 + $0x64c] sm:$0xf0]  ;;  %v20089_v6 = vmul.f32 %v6899_v31, %v6822_v63  ;;  %v6915_v22 = vmul.f32 %v19973_v57, %v6914_v13  ;;  %v6922_v0 = vmul.f32 %v20045_v32, %v6921_v39  ;;  %v20094_v12 = vld [vmem:[#allocation22 + $0x400] sm:$0xf]  ;;  %v6813_v63 = vmax.f32 %v6797_v5, 0.0 }
 0x5c3   : > { %v6763_v16 = vmul.f32 %v6717_v15, %v19729_v1  ;;  %v16690_v11 = vld [vmem:[#allocation22 + $0x74c] sm:$0xf0]  ;;  %v20096_v62 = vpop.eup %17250  ;;  %v20101_v41 = vmul.f32 %v6909_v7, %v6823_v4  ;;  %v14291_v31 = vor.u32 %v16590_v58, %v14290_v45  ;;  %v20112_v13 = vld [vmem:[#allocation22 + $0x500] sm:$0xf]  ;;  %v14419_v14 = vor.u32 %v16622_v9, %v14418_v2  ;;  %v20123_v15 = vpop.f32.mrf.mxu2 }
 0x5c4   : > { %v16586_v49 = vld [vmem:[#allocation22 + $0x40c] sm:$0xf0]  ;;  %10297 = vmatpush.bf16.msrb.mxu0 %v14307_v42  ;;  %v7110_v4 = vadd.f32 %v7078_v40, %v19923_v24  ;;  %v7079_v43 = vperm.slane %v20067_v29, 1  ;;  %v14898_v7 = vld [vmem:[#allocation22 + $0x8e0] sm:$0xf]  ;;  %v14563_v23 = vor.u32 %v16658_v26, %v14562_v48  ;;  %v14691_v42 = vor.u32 %v16690_v11, %v14690_v55  ;;  %20784 = vst [vmem:[#allocation42_spill] sm:$0xff] %v20123_v15  ;;  %v20152_v2 = vpop.f32.mrf.mxu0 }
 0x5c5   : > { %v20114_v39 = vld [vmem:[#allocation22 + $0x50c] sm:$0xf0]  ;;  %v6795_v30 = vsub.f32 %v6763_v16, %v6779_v56  ;;  %10310 = vmatpush.bf16.msrb.mxu1 %v14435_v59  ;;  %v20118_v60 = vpop.eup %17252  ;;  %v15026_v45 = vld [vmem:[#allocation22 + $0x9e0] sm:$0xf]  ;;  %v6919_v24 = vsel %vm20107_vm9, %v19973_v57, %v6915_v22  ;;  %v20128_v56 = vmul.f32 0.5, %v6922_v0  ;;  %v6951_v59 = vmul.f32 %v20096_v62, %v20036_v33  ;;  %20787 = vst [vmem:[#allocation44_spill] sm:$0xff] %v20152_v2 }
 0x5c6   : > { %v16742_v53 = vld [vmem:[#allocation22 + $0x8ec] sm:$0xf0]  ;;  %10322 = vmatpush.bf16.msrb.mxu2 %v14579_v52  ;;  %10335 = vmatpush.bf16.msrb.mxu3 %v14707_v36  ;;  %v14546_v9 = vld [vmem:[#allocation22 + $0x620] sm:$0xf]  ;;  %v20134_v52 = vadd.f32 1e-05, %v6813_v63  ;;  %v14275_v36 = vor.u32 %v16586_v49, %v20094_v12  ;;  %v7111_v26 = vadd.f32 %v7079_v43, %v19977_v18  ;;  %v6931_v57 = vmul.f32 %v20118_v60, %v20055_v27 }
 0x5c7   : > { %v16774_v58 = vld [vmem:[#allocation22 + $0x9ec] sm:$0xf0]  ;;  %v7126_v48 = vmax.f32 %v7110_v4, 0.0  ;;  %v14674_v55 = vld [vmem:[#allocation22 + $0x720] sm:$0xf]  ;;  %v6811_v22 = vmax.f32 %v6795_v30, 0.0  ;;  %v14403_v0 = vor.u32 %v20114_v39, %v20112_v13  ;;  %v20785_v63 = vsub.f32 %v19764_v34, %v19834_v35 }
 0x5c8   : > { %v16654_v40 = vld [vmem:[#allocation22 + $0x62c] sm:$0xf0]  ;;  %10298 = vmatpush.bf16.msrb.mxu0 %v14291_v31  ;;  %v6607_v11 = vrot.slane %v20123_v15, 4  ;;  %v7127_v49 = vmax.f32 %v7111_v26, 0.0  ;;  %v14899_v31 = vor.u32 %v16742_v53, %v14898_v7  ;;  %v6924_v4 = vsub.f32 1.5, %v20128_v56 }
 0x5c9   : > { %10311 = vmatpush.bf16.msrb.mxu1 %v14419_v14  ;;  %v16686_v16 = vld [vmem:[#allocation22 + $0x72c] sm:$0xf0]  ;;  %v20146_v12 = vmul.f32 %v6919_v24, %v20785_v63  ;;  %v20148_v18 = vpack.c.bf16 %v7126_v48, %v7126_v48  ;;  %v15010_v14 = vld [vmem:[#allocation22 + $0x9c0] sm:$0xf]  ;;  %v15027_v13 = vor.u32 %v16774_v58, %v15026_v45  ;;  %v14547_v39 = vor.u32 %v16654_v40, %v14546_v9  ;;  %v20159_v45 = vpop.f32.mrf.mxu3 }
 0x5ca   : > { %10323 = vmatpush.bf16.msrb.mxu2 %v14563_v23  ;;  %10336 = vmatpush.bf16.msrb.mxu3 %v14691_v42  ;;  %v16738_v30 = vld [vmem:[#allocation22 + $0x8cc] sm:$0xf0]  ;;  %v6608_v43 = vadd.f32 %v6607_v11, %v20123_v15  ;;  %v14530_v5 = vld [vmem:[#allocation22 + $0x600] sm:$0xf]  ;;  %v6952_v34 = vmul.f32 %v20096_v62, %v6951_v59  ;;  %v20155_v35 = vpack.c.bf16 %v7127_v49, %v7127_v49  ;;  %17254 = vrsqrt.f32 %v20134_v52 }
 0x5cb   : > { %20786 = vst [vmem:[#allocation43_spill] sm:$0xff] %v20148_v18  ;;  %v14675_v23 = vor.u32 %v16686_v16, %v14674_v55  ;;  %v6656_v7 = vmul.f32 %v20123_v15, %v20123_v15  ;;  %v16650_v53 = vld [vmem:[#allocation22 + $0x60c] sm:$0xf0]  ;;  %v14658_v42 = vld [vmem:[#allocation22 + $0x700] sm:$0xf]  ;;  %v6932_v58 = vmul.f32 %v20118_v60, %v6931_v57  ;;  %10248 = vmatmul.bf16.vlgmr.msra.gmra.mxu0 %v20148_v18  ;;  %v6595_v48 = vrot.slane %v20152_v2, 4 }
 0x5cc   : > { %10299 = vmatpush.bf16.msrb.mxu0 %v14275_v36  ;;  %20788 = vst [vmem:[#allocation45_spill] sm:$0xff] %v20155_v35  ;;  %v16682_v24 = vld [vmem:[#allocation22 + $0x70c] sm:$0xf0]  ;;  %v20163_v56 = vadd.f32 1e-05, %v6811_v22  ;;  %v6609_v59 = vrot.slane %v6608_v43, 2  ;;  %10261 = vmatmul.bf16.vlgmr.msra.gmra.mxu1 %v20155_v35  ;;  %v14883_v40 = vor.u32 %v16738_v30, %v14882_v47  ;;  %v15011_v36 = vor.u32 %v16770_v61, %v15010_v14 }
 0x5cd   : > { %20789 = vst [vmem:[#allocation46_spill] sm:$0xff] %v20159_v45  ;;  %10312 = vmatpush.bf16.msrb.mxu1 %v14403_v0  ;;  %v6742_v9 = vrot.slane %v6656_v7, 4  ;;  %vm6926_vm10 = vweird.f32 %v20002_v46  ;;  %vm6927_vm11 = vweird.f32 %v20045_v32  ;;  %v14531_v55 = vor.u32 %v16650_v53, %v14530_v5  ;;  %v15154_v46 = vld [vmem:[#allocation22 + $0xae0] sm:$0xf]  ;;  %v16806_v47 = vld [vmem:[#allocation22 + $0xaec] sm:$0xf0] }
 0x5ce   : > { %10324 = vmatpush.bf16.msrb.mxu2 %v14547_v39  ;;  %v6610_v26 = vadd.f32 %v6609_v59, %v6608_v43  ;;  %v14659_v57 = vor.u32 %v16682_v24, %v14658_v42  ;;  %v6613_v22 = vrot.slane %v20159_v45, 4  ;;  %10337 = vmatpush.bf16.msrb.mxu3 %v14675_v23  ;;  %v6596_v16 = vadd.f32 %v6595_v48, %v20152_v2  ;;  %vm20205_vm12 = vmor %vm6926_vm10, %vm6927_vm11  ;;  %v15266_v35 = vld [vmem:[#allocation22 + $0xbc0] sm:$0xf]  ;;  %v16834_v18 = vld [vmem:[#allocation22 + $0xbcc] sm:$0xf0] }
 0x5cf   : > { %v6743_v0 = vadd.f32 %v6742_v9, %v6656_v7  ;;  %v6654_v61 = vmul.f32 %v20152_v2, %v20152_v2  ;;  %v6657_v11 = vmul.f32 %v20159_v45, %v20159_v45  ;;  %17256 = vrsqrt.f32 %v20163_v56  ;;  %v16798_v2 = vld [vmem:[#allocation22 + $0xaac] sm:$0xf0] }
 0x5d0   : > { %10344 = vmatpush.bf16.msra.mxu0 %v14899_v31  ;;  %v6611_v63 = vrot.slane %v6610_v26, 1  ;;  %v6614_v5 = vadd.f32 %v6613_v22, %v20159_v45  ;;  %v6953_v49 = vmul.f32 0.5, %v6952_v34  ;;  %v20179_v31 = vmul.f32 0.5, %v6932_v58  ;;  %v16766_v34 = vld [vmem:[#allocation22 + $0x9ac] sm:$0xf0] }
 0x5d1   : > { %10357 = vmatpush.bf16.msra.mxu1 %v15027_v13  ;;  %v6744_v30 = vrot.slane %v6743_v0, 2  ;;  %v7080_v14 = vperm.slane %v20067_v29, 2  ;;  %v20182_v13 = vpop.eup %17254  ;;  %v6597_v43 = vrot.slane %v6596_v16, 2  ;;  %v6730_v23 = vrot.slane %v6654_v61, 4  ;;  %v14850_v45 = vld [vmem:[#allocation22 + $0x880] sm:$0xf] }
 0x5d2   : > { %v6612_v39 = vadd.f32 %v6611_v63, %v6610_v26  ;;  %10325 = vmatpush.bf16.msrb.mxu2 %v14531_v55  ;;  %v6615_v7 = vrot.slane %v6614_v5, 2  ;;  %v20185_v53 = vmul.f32 %v20045_v32, %v6924_v4  ;;  %10338 = vmatpush.bf16.msrb.mxu3 %v14659_v57  ;;  %v6748_v24 = vrot.slane %v6657_v11, 4 }
 0x5d3   : > { %v6745_v42 = vadd.f32 %v6744_v30, %v6743_v0  ;;  %v6598_v59 = vadd.f32 %v6597_v43, %v6596_v16  ;;  %v6731_v9 = vadd.f32 %v6730_v23, %v6654_v61  ;;  %v7112_v55 = vadd.f32 %v7080_v14, %v19991_v20 }
 0x5d4   : > { %10345 = vmatpush.bf16.msra.mxu0 %v14883_v40  ;;  %v20190_v58 = vmul.f32 %v19729_v1, %v6612_v39  ;;  %v6616_v40 = vadd.f32 %v6615_v7, %v6614_v5  ;;  %v6749_v26 = vadd.f32 %v6748_v24, %v6657_v11  ;;  %v6934_v4 = vsub.f32 1.5, %v20179_v31 }
 0x5d5   : > { %10358 = vmatpush.bf16.msra.mxu1 %v15011_v36  ;;  %v6954_v36 = vsub.f32 1.5, %v6953_v49  ;;  %v6746_v48 = vrot.slane %v6745_v42, 1  ;;  %v20193_v22 = vpop.eup %17256  ;;  %v6961_v0 = vmul.f32 %v20182_v13, %v20134_v52  ;;  %v6599_v57 = vrot.slane %v6598_v59, 1 }
 0x5d6   : > { %20790 = vst [vmem:[#allocation47_spill] sm:$0xff] %v20190_v58  ;;  %v6732_v63 = vrot.slane %v6731_v9, 2  ;;  %v6784_v16 = vmul.f32 %v20190_v58, %v20190_v58  ;;  %v6617_v61 = vrot.slane %v6616_v40, 1  ;;  %v6750_v5 = vrot.slane %v6749_v26, 2 }
 0x5d7   : > { %v6747_v30 = vadd.f32 %v6746_v48, %v6745_v42  ;;  %v6600_v49 = vadd.f32 %v6599_v57, %v6598_v59  ;;  %v7128_v11 = vmax.f32 %v7112_v55, 0.0  ;;  %v7081_v20 = vperm.slane %v20067_v29, 3 }
 0x5d8   : > { %v6733_v39 = vadd.f32 %v6732_v63, %v6731_v9  ;;  %v6941_v14 = vmul.f32 %v20193_v22, %v20163_v56  ;;  %v6618_v23 = vadd.f32 %v6617_v61, %v6616_v40  ;;  %v6751_v7 = vadd.f32 %v6750_v5, %v6749_v26  ;;  %v14866_v5 = vld [vmem:[#allocation22 + $0x8a0] sm:$0xf] }
 0x5d9   : > { %v6768_v43 = vmul.f32 %v6747_v30, %v19729_v1  ;;  %v20213_v42 = vmul.f32 %v19729_v1, %v6600_v49  ;;  %v20215_v59 = vpack.c.bf16 %v7128_v11, %v7128_v11  ;;  %v7113_v9 = vadd.f32 %v7081_v20, %v20011_v37  ;;  %v15282_v30 = vld [vmem:[#allocation22 + $0xbe0] sm:$0xf]  ;;  %v16734_v49 = vld [vmem:[#allocation22 + $0x8ac] sm:$0xf0] }
 0x5da   : > { %v6734_v24 = vrot.slane %v6733_v39, 1  ;;  %v6962_v48 = vmul.f32 %v20182_v13, %v6961_v0  ;;  %v20220_v57 = vmul.f32 %v19729_v1, %v6618_v23  ;;  %v6752_v63 = vrot.slane %v6751_v7, 1  ;;  %v16838_v0 = vld [vmem:[#allocation22 + $0xbec] sm:$0xf0] }
 0x5db   : > { %20793 = vst [vmem:[#allocation48_spill] sm:$0xff] %v20213_v42  ;;  %v6800_v55 = vsub.f32 %v6768_v43, %v6784_v16  ;;  %v20227_v26 = vmul.f32 %v20096_v62, %v6954_v36  ;;  %v6782_v37 = vmul.f32 %v20213_v42, %v20213_v42  ;;  %10274 = vmatmul.bf16.vlgmr.msra.gmra.mxu2 %v20215_v59  ;;  %v20232_v16 = vpop.f32.mrf.mxu1  ;;  %v14994_v36 = vld [vmem:[#allocation22 + $0x9a0] sm:$0xf]  ;;  %v7129_v21 = vmax.f32 %v7113_v9, 0.0 }
 0x5dc   : > { %20794 = vst [vmem:[#allocation49_spill] sm:$0xff] %v20215_v59  ;;  %v6735_v61 = vadd.f32 %v6734_v24, %v6733_v39  ;;  %v6942_v11 = vmul.f32 %v20193_v22, %v6941_v14  ;;  %v6753_v43 = vadd.f32 %v6752_v63, %v6751_v7  ;;  %v6785_v23 = vmul.f32 %v20220_v57, %v20220_v57  ;;  %v15138_v39 = vld [vmem:[#allocation22 + $0xac0] sm:$0xf]  ;;  %v16802_v24 = vld [vmem:[#allocation22 + $0xacc] sm:$0xf0] }
 0x5dd   : > { %20795 = vst [vmem:[#allocation50_spill] sm:$0xff] %v20220_v57  ;;  %v6816_v20 = vmax.f32 %v6800_v55, 0.0  ;;  %v20238_v3 = vmul.f32 %v20118_v60, %v6934_v4  ;;  %v15155_v59 = vor.u32 %v16806_v47, %v15154_v46  ;;  %vm6956_vm13 = vweird.f32 %v20036_v33  ;;  %v16730_v4 = vld [vmem:[#allocation22 + $0x88c] sm:$0xf0] }
 0x5de   : > { %v6766_v40 = vmul.f32 %v6735_v61, %v19729_v1  ;;  %vm6957_vm14 = vweird.f32 %v20096_v62  ;;  %v20243_v14 = vmul.f32 0.5, %v6962_v48  ;;  %v6769_v7 = vmul.f32 %v6753_v43, %v19729_v1  ;;  %v14978_v61 = vld [vmem:[#allocation22 + $0x980] sm:$0xf]  ;;  %v16762_v57 = vld [vmem:[#allocation22 + $0x98c] sm:$0xf0] }
 0x5df   : > { %v15283_v55 = vor.u32 %v16838_v0, %v15282_v30  ;;  %v6601_v63 = vrot.slane %v20232_v16, 4  ;;  %vm6936_vm15 = vweird.f32 %v20055_v27  ;;  %vm6937_vm0 = vweird.f32 %v20118_v60  ;;  %10370 = vmatpush.bf16.msra.mxu2 %v15155_v59  ;;  %v15122_v43 = vld [vmem:[#allocation22 + $0xaa0] sm:$0xf]  ;;  %vm20282_vm5 = vmor %vm6956_vm13, %vm6957_vm14 }
 0x5e0   : > { %v6798_v47 = vsub.f32 %v6766_v40, %v6782_v37  ;;  %v20249_v9 = vpack.c.bf16 %v7129_v21, %v7129_v21  ;;  %v6655_v46 = vmul.f32 %v20232_v16, %v20232_v16  ;;  %v14867_v48 = vor.u32 %v16734_v49, %v14866_v5  ;;  %vm20292_vm6 = vmor %vm6936_vm15, %vm6937_vm0 }
 0x5e1   : > { %v20253_v30 = vmul.f32 0.5, %v6942_v11  ;;  %v20255_v0 = vadd.f32 1e-05, %v6816_v20  ;;  %v6801_v15 = vsub.f32 %v6769_v7, %v6785_v23  ;;  %v6602_v58 = vadd.f32 %v6601_v63, %v20232_v16  ;;  %v15250_v11 = vld [vmem:[#allocation22 + $0xba0] sm:$0xf] }
 0x5e2   : > { %v6814_v42 = vmax.f32 %v6798_v47, 0.0  ;;  %10287 = vmatmul.bf16.vlgmr.msra.gmra.mxu3 %v20249_v9  ;;  %v6736_v21 = vrot.slane %v6655_v46, 4  ;;  %10346 = vmatpush.bf16.msra.mxu0 %v14867_v48  ;;  %v14995_v59 = vor.u32 %v16766_v34, %v14994_v36  ;;  %v15139_v40 = vor.u32 %v16802_v24, %v15138_v39  ;;  %v16830_v47 = vld [vmem:[#allocation22 + $0xbac] sm:$0xf0]  ;;  %v14834_v34 = vld [vmem:[#allocation22 + $0x860] sm:$0xf] }
 0x5e3   : > { %v6817_v37 = vmax.f32 %v6801_v15, 0.0  ;;  %10383 = vmatpush.bf16.msra.mxu3 %v15283_v55  ;;  %v6603_v5 = vrot.slane %v6602_v58, 2  ;;  %v15267_v49 = vor.u32 %v16834_v18, %v15266_v35  ;;  %v14851_v8 = vor.u32 %v16730_v4, %v14850_v45  ;;  %v20265_v35 = vld [vmem:[#allocation19] sm:$0xff]  ;;  %v16726_v36 = vld [vmem:[#allocation22 + $0x86c] sm:$0xf0] }
 0x5e4   : > { %vm6966_vm1 = vweird.f32 %v20134_v52  ;;  %vm6967_vm2 = vweird.f32 %v20182_v13  ;;  %v20261_v20 = vadd.f32 1e-05, %v6814_v42  ;;  %v6737_v23 = vadd.f32 %v6736_v21, %v6655_v46  ;;  %10359 = vmatpush.bf16.msra.mxu1 %v14995_v59  ;;  %10371 = vmatpush.bf16.msra.mxu2 %v15139_v40  ;;  %v14962_v39 = vld [vmem:[#allocation22 + $0x960] sm:$0xf]  ;;  %v16794_v48 = vld [vmem:[#allocation22 + $0xa8c] sm:$0xf0] }
 0x5e5   : > { %v14979_v7 = vor.u32 %v16762_v57, %v14978_v61  ;;  %v15123_v63 = vor.u32 %v16798_v2, %v15122_v43  ;;  %v6964_v15 = vsub.f32 1.5, %v20243_v14  ;;  %vm6946_vm3 = vweird.f32 %v20163_v56  ;;  %v16758_v57 = vld [vmem:[#allocation22 + $0x96c] sm:$0xf0]  ;;  %v15106_v46 = vld [vmem:[#allocation22 + $0xa80] sm:$0xf]  ;;  %vm20341_vm8 = vmor %vm6966_vm1, %vm6967_vm2 }
 0x5e6   : > { %v6604_v18 = vadd.f32 %v6603_v5, %v6602_v58  ;;  %v7032_v45 = vperm.slane %v20265_v35, 4  ;;  %17258 = vrsqrt.f32 %v20255_v0  ;;  %v20269_v42 = vadd.f32 1e-05, %v6817_v37  ;;  %10347 = vmatpush.bf16.msra.mxu0 %v14851_v8  ;;  %v15234_v21 = vld [vmem:[#allocation22 + $0xb80] sm:$0xf] }
 0x5e7   : > { %v6738_v24 = vrot.slane %v6737_v23, 2  ;;  %v7082_v2 = vperm.slane %v20067_v29, 4  ;;  %vm6947_vm4 = vweird.f32 %v20193_v22  ;;  %10384 = vmatpush.bf16.msra.mxu3 %v15267_v49  ;;  %v15251_v58 = vor.u32 %v16830_v47, %v15250_v11  ;;  %v16826_v59 = vld [vmem:[#allocation22 + $0xb8c] sm:$0xf0]  ;;  %v14818_v11 = vld [vmem:[#allocation22 + $0x840] sm:$0xf] }
 0x5e8   : > { %v6605_v55 = vrot.slane %v6604_v18, 1  ;;  %v7064_v4 = vmul.f32 %v7032_v45, %v20089_v6  ;;  %v6944_v61 = vsub.f32 1.5, %v20253_v30  ;;  %17260 = vrsqrt.f32 %v20261_v20  ;;  %10360 = vmatpush.bf16.msra.mxu1 %v14979_v7  ;;  %10372 = vmatpush.bf16.msra.mxu2 %v15123_v63  ;;  %v16722_v6 = vld [vmem:[#allocation22 + $0x84c] sm:$0xf0]  ;;  %vm20318_vm7 = vmor %vm6946_vm3, %vm6947_vm4 }
 0x5e9   : > { %v6739_v43 = vadd.f32 %v6738_v24, %v6737_v23  ;;  %v7033_v8 = vperm.slane %v20265_v35, 5  ;;  %v7083_v5 = vperm.slane %v20067_v29, 5  ;;  %v14835_v49 = vor.u32 %v16726_v36, %v14834_v34  ;;  %v16750_v47 = vld [vmem:[#allocation22 + $0x92c] sm:$0xf0] }
 0x5ea   : > { %v6606_v40 = vadd.f32 %v6605_v55, %v6604_v18  ;;  %v7114_v37 = vadd.f32 %v7082_v2, %v7064_v4  ;;  %17262 = vrsqrt.f32 %v20269_v42  ;;  %v14963_v63 = vor.u32 %v16758_v57, %v14962_v39  ;;  %v14946_v2 = vld [vmem:[#allocation22 + $0x940] sm:$0xf]  ;;  %v16754_v57 = vld [vmem:[#allocation22 + $0x94c] sm:$0xf0] }
 0x5eb   : > { %v6740_v23 = vrot.slane %v6739_v43, 1  ;;  %v7065_v7 = vmul.f32 %v7033_v8, %v20101_v41  ;;  %10385 = vmatpush.bf16.msra.mxu3 %v15251_v58  ;;  %10348 = vmatpush.bf16.msra.mxu0 %v14835_v49  ;;  %v15107_v18 = vor.u32 %v16794_v48, %v15106_v46  ;;  %v15235_v45 = vor.u32 %v16826_v59, %v15234_v21  ;;  %v15218_v59 = vld [vmem:[#allocation22 + $0xb60] sm:$0xf] }
 0x5ec   : > { %v20297_v33 = vmul.f32 %v19729_v1, %v6606_v40  ;;  %v7130_v34 = vmax.f32 %v7114_v37, 0.0  ;;  %v20299_v36 = vpop.eup %17258  ;;  %v6945_v41 = vmul.f32 %v20193_v22, %v6944_v61  ;;  %10361 = vmatpush.bf16.msra.mxu1 %v14963_v63  ;;  %v14819_v27 = vor.u32 %v16722_v6, %v14818_v11  ;;  %v16822_v40 = vld [vmem:[#allocation22 + $0xb6c] sm:$0xf0]  ;;  %v14802_v49 = vld [vmem:[#allocation22 + $0x820] sm:$0xf] }
 0x5ed   : > { %v6741_v39 = vadd.f32 %v6740_v23, %v6739_v43  ;;  %v7115_v24 = vadd.f32 %v7083_v5, %v7065_v7  ;;  %v20800_v55 = vsub.f32 %v19803_v28, %v19906_v38  ;;  %v20801_v58 = vsel %vm20205_vm12, %v20045_v32, %v20185_v53  ;;  %10373 = vmatpush.bf16.msra.mxu2 %v15107_v18  ;;  %v16718_v11 = vld [vmem:[#allocation22 + $0x82c] sm:$0xf0]  ;;  %v14930_v63 = vld [vmem:[#allocation22 + $0x920] sm:$0xf] }
 0x5ee   : > { %v6959_v46 = vsel %vm20282_vm5, %v20096_v62, %v20227_v26  ;;  %v7037_v28 = vperm.slane %v20079_v54, 1  ;;  %v6783_v38 = vmul.f32 %v20297_v33, %v20297_v33  ;;  %v20325_v32 = vpop.eup %17260  ;;  %v6939_v62 = vsel %vm20292_vm6, %v20118_v60, %v20238_v3  ;;  %v16786_v18 = vld [vmem:[#allocation22 + $0xa4c] sm:$0xf0]  ;;  %v20809_v26 = vld [vmem:[#allocation41_spill] sm:$0xff] }
 0x5ef   : > { %v7017_v4 = vmul.f32 %v20801_v58, %v20800_v55  ;;  %v6965_v56 = vmul.f32 %v20182_v13, %v6964_v15  ;;  %v6827_v53 = vsub.f32 %v19987_v19, %v20063_v17  ;;  %v6767_v31 = vmul.f32 %v6741_v39, %v19729_v1  ;;  %10386 = vmatpush.bf16.msra.mxu3 %v15235_v45  ;;  %v15090_v19 = vld [vmem:[#allocation22 + $0xa60] sm:$0xf]  ;;  %v16790_v17 = vld [vmem:[#allocation22 + $0xa6c] sm:$0xf0] }
 0x5f0   : > { %v6991_v60 = vmul.f32 %v20299_v36, %v20255_v0  ;;  %v20347_v3 = vpack.c.bf16 %v7130_v34, %v7130_v34  ;;  %v7131_v14 = vmax.f32 %v7115_v24, 0.0  ;;  %10349 = vmatpush.bf16.msra.mxu0 %v14819_v27  ;;  %v14947_v15 = vor.u32 %v16754_v57, %v14946_v2  ;;  %v20349_v1 = vpop.eup %17262  ;;  %v15074_v34 = vld [vmem:[#allocation22 + $0xa40] sm:$0xf]  ;;  %v16818_v39 = vld [vmem:[#allocation22 + $0xb4c] sm:$0xf0] }
 0x5f1   : > { %v20806_v52 = vsub.f32 %v19867_v50, %v19963_v44  ;;  %v6949_v43 = vsel %vm20318_vm7, %v20193_v22, %v6945_v41  ;;  %v6799_v8 = vsub.f32 %v6767_v31, %v6783_v38  ;;  %v7034_v21 = vperm.slane %v20265_v35, 6  ;;  %v14786_v2 = vld [vmem:[#allocation22 + $0x800] sm:$0xf]  ;;  %v16714_v57 = vld [vmem:[#allocation22 + $0x80c] sm:$0xf0] }
 0x5f2   : > { %v6971_v37 = vmul.f32 %v20325_v32, %v20261_v20  ;;  %10300 = vmatmul.bf16.vlgmr.msrb.gmra.mxu0 %v20347_v3  ;;  %v20363_v5 = vpack.c.bf16 %v7131_v14, %v7131_v14  ;;  %10362 = vmatpush.bf16.msra.mxu1 %v14947_v15  ;;  %v7084_v50 = vperm.slane %v20067_v29, 6  ;;  %v7035_v44 = vperm.slane %v20265_v35, 7  ;;  %v20383_v55 = vld [vmem:[#allocation22 + $0x900] sm:$0xf]  ;;  %v20385_v58 = vld [vmem:[#allocation22 + $0x90c] sm:$0xf0] }
 0x5f3   : > { %v20354_v61 = vmul.f32 %v6959_v46, %v20806_v52  ;;  %v20807_v22 = vsub.f32 %v19876_v10, %v19980_v51  ;;  %v6969_v30 = vsel %vm20341_vm8, %v20182_v13, %v6965_v56  ;;  %v6815_v23 = vmax.f32 %v6799_v8, 0.0  ;;  %v20377_v51 = vld [vmem:[#allocation22 + $0xb40] sm:$0xf] }
 0x5f4   : > { %v7066_v7 = vmul.f32 %v7034_v21, %v20146_v12  ;;  %v7019_v45 = vmul.f32 %v6949_v43, %v6827_v53  ;;  %v6992_v35 = vmul.f32 %v20299_v36, %v6991_v60  ;;  %10313 = vmatmul.bf16.vlgmr.msrb.gmra.mxu1 %v20363_v5  ;;  %v7067_v41 = vmul.f32 %v7035_v44, %v7017_v4  ;;  %v15410_v38 = vld [vmem:[#allocation22 + $0xce0] sm:$0xf] }
 0x5f5   : > { %v7018_v6 = vmul.f32 %v6939_v62, %v20807_v22  ;;  %v7085_v10 = vperm.slane %v20067_v29, 7  ;;  %v7001_v13 = vmul.f32 %v20349_v1, %v20269_v42  ;;  %v20381_v24 = vadd.f32 1e-05, %v6815_v23  ;;  %v16870_v62 = vld [vmem:[#allocation22 + $0xcec] sm:$0xf0]  ;;  %v20414_v23 = vld [vmem:[#allocation21 + $0x8] sm:$0xff] }
 0x5f6   : > { %v7116_v12 = vadd.f32 %v7084_v50, %v7066_v7  ;;  %v15091_v27 = vor.u32 %v16790_v17, %v15090_v19  ;;  %v6972_v4 = vmul.f32 %v20325_v32, %v6971_v37  ;;  %v15219_v29 = vor.u32 %v16822_v40, %v15218_v59  ;;  %v20388_v56 = vld [vmem:[#allocation22 + $0xde0] sm:$0xf]  ;;  %v16902_v19 = vld [vmem:[#allocation22 + $0xdec] sm:$0xf0] }
 0x5f7   : > { %v7117_v46 = vadd.f32 %v7085_v10, %v7067_v41  ;;  %v14803_v48 = vor.u32 %v16718_v11, %v14802_v49  ;;  %v20808_v53 = vperm.slane %v20079_v54, 0  ;;  %v20810_v60 = vsub.f32 %v19911_v25, %v20809_v26  ;;  %v20396_v17 = vld [vmem:[#allocation22 + $0xa20] sm:$0xf]  ;;  %v16782_v59 = vld [vmem:[#allocation22 + $0xa2c] sm:$0xf0] }
 0x5f8   : > { %17264 = vrsqrt.f32 %v20381_v24  ;;  %v7132_v15 = vmax.f32 %v7116_v12, 0.0  ;;  %10374 = vmatpush.bf16.msra.mxu2 %v15091_v27  ;;  %v7069_v52 = vmul.f32 %v7037_v28, %v7019_v45  ;;  %10387 = vmatpush.bf16.msra.mxu3 %v15219_v29  ;;  %v14931_v8 = vor.u32 %v16750_v47, %v14930_v63  ;;  %v15186_v40 = vld [vmem:[#allocation22 + $0xb20] sm:$0xf]  ;;  %v16814_v49 = vld [vmem:[#allocation22 + $0xb2c] sm:$0xf0] }
 0x5f9   : > { %v7068_v31 = vmul.f32 %v20808_v53, %v7018_v6  ;;  %v7021_v14 = vmul.f32 %v6969_v30, %v20810_v60  ;;  %v7133_v43 = vmax.f32 %v7117_v46, 0.0  ;;  %10350 = vmatpush.bf16.msra.mxu0 %v14803_v48  ;;  %v15075_v21 = vor.u32 %v16786_v18, %v15074_v34  ;;  %v20406_v11 = vld [vmem:[#allocation22 + $0xcc0] sm:$0xf]  ;;  %v16866_v7 = vld [vmem:[#allocation22 + $0xccc] sm:$0xf0] }
 0x5fa   : > { %v20400_v37 = vmul.f32 0.5, %v6992_v35  ;;  %v7002_v25 = vmul.f32 %v20349_v1, %v7001_v13  ;;  %v20403_v50 = vpack.c.bf16 %v7132_v15, %v7132_v15  ;;  %v15203_v44 = vor.u32 %v16818_v39, %v20377_v51  ;;  %10363 = vmatpush.bf16.msra.mxu1 %v14931_v8  ;;  %v15522_v63 = vld [vmem:[#allocation22 + $0xdc0] sm:$0xf]  ;;  %v16898_v35 = vld [vmem:[#allocation22 + $0xdcc] sm:$0xf0] }
 0x5fb   : > { %v20408_v22 = vmul.f32 0.5, %v6972_v4  ;;  %v20410_v28 = vpack.c.bf16 %v7133_v43, %v7133_v43  ;;  %v14787_v6 = vor.u32 %v16714_v57, %v14786_v2  ;;  %v14915_v30 = vor.u32 %v20385_v58, %v20383_v55  ;;  %v20421_v41 = vld [vmem:[#allocation22 + $0xa00] sm:$0xf]  ;;  %v20423_v10 = vld [vmem:[#allocation22 + $0xa0c] sm:$0xf0] }
 0x5fc   : > { %v20811_v47 = vperm.slane %v20079_v54, 2  ;;  %10326 = vmatmul.bf16.vlgmr.msrb.gmra.mxu2 %v20403_v50  ;;  %v15411_v18 = vor.u32 %v16870_v62, %v15410_v38  ;;  %v15539_v45 = vor.u32 %v16902_v19, %v20388_v56  ;;  %v20812_v51 = vperm.slane %v20079_v54, 3  ;;  %v15170_v27 = vld [vmem:[#allocation22 + $0xb00] sm:$0xf]  ;;  %v16810_v2 = vld [vmem:[#allocation22 + $0xb0c] sm:$0xf0]  ;;  %10388 = vmatpush.bf16.msra.mxu3 %v15203_v44 }
 0x5fd   : > { %10339 = vmatmul.bf16.vlgmr.msrb.gmra.mxu3 %v20410_v28  ;;  %10375 = vmatpush.bf16.msra.mxu2 %v15075_v21  ;;  %v15059_v13 = vor.u32 %v16782_v59, %v20396_v17  ;;  %v7087_v12 = vperm.slane %v20414_v23, 1  ;;  %v20433_v55 = vmul.f32 0.5, %v7002_v25  ;;  %v15187_v58 = vor.u32 %v16814_v49, %v15186_v40  ;;  %v15666_v4 = vld [vmem:[#allocation22 + $0xee0] sm:$0xf]  ;;  %v16934_v46 = vld [vmem:[#allocation22 + $0xeec] sm:$0xf0] }
 0x5fe   : > { %v7070_v34 = vmul.f32 %v20811_v47, %v20354_v61  ;;  %v7071_v39 = vmul.f32 %v20812_v51, %v7021_v14  ;;  %v7086_v61 = vperm.slane %v20414_v23, 0  ;;  %v20431_v57 = vpop.eup %17264  ;;  %10351 = vmatpush.bf16.msra.mxu0 %v14787_v6  ;;  %v15395_v54 = vor.u32 %v16866_v7, %v20406_v11  ;;  %10364 = vmatpush.bf16.msra.mxu1 %v14915_v30  ;;  %v15794_v53 = vld [vmem:[#allocation22 + $0xfe0] sm:$0xf]  ;;  %v16966_v26 = vld [vmem:[#allocation22 + $0xfec] sm:$0xf0] }
 0x5ff   : > { %v7088_v29 = vperm.slane %v20414_v23, 2  ;;  %v6974_v48 = vsub.f32 1.5, %v20408_v22  ;;  %v6981_v38 = vmul.f32 %v20431_v57, %v20381_v24  ;;  %v7119_v56 = vadd.f32 %v7087_v12, %v7069_v52  ;;  %v15378_v19 = vld [vmem:[#allocation22 + $0xca0] sm:$0xf]  ;;  %v16862_v17 = vld [vmem:[#allocation22 + $0xcac] sm:$0xf0] }
 0x600   : > { %v7118_v62 = vadd.f32 %v7086_v61, %v7068_v31  ;;  %vm6986_vm9 = vweird.f32 %v20381_v24  ;;  %v15523_v60 = vor.u32 %v16898_v35, %v15522_v63  ;;  %v15043_v14 = vor.u32 %v20423_v10, %v20421_v41  ;;  %v15506_v43 = vld [vmem:[#allocation22 + $0xda0] sm:$0xf]  ;;  %v16894_v31 = vld [vmem:[#allocation22 + $0xdac] sm:$0xf0]  ;;  %10389 = vmatpush.bf16.msra.mxu3 %v15187_v58 }
 0x601   : > { %v15171_v15 = vor.u32 %v16810_v2, %v15170_v27  ;;  %v6982_v8 = vmul.f32 %v20431_v57, %v6981_v38  ;;  %10376 = vmatpush.bf16.msra.mxu2 %v15059_v13  ;;  %v7135_v59 = vmax.f32 %v7119_v56, 0.0  ;;  %v7089_v52 = vperm.slane %v20414_v23, 3  ;;  %v15650_v30 = vld [vmem:[#allocation22 + $0xec0] sm:$0xf]  ;;  %v16930_v47 = vld [vmem:[#allocation22 + $0xecc] sm:$0xf0] }
 0x602   : > { %10396 = vmatpush.bf16.msrb.mxu0 %v15411_v18  ;;  %10409 = vmatpush.bf16.msrb.mxu1 %v15539_v45  ;;  %v7134_v21 = vmax.f32 %v7118_v62, 0.0  ;;  %vm6987_vm10 = vweird.f32 %v20431_v57  ;;  %v15667_v40 = vor.u32 %v16934_v46, %v15666_v4  ;;  %v15795_v25 = vor.u32 %v16966_v26, %v15794_v53  ;;  %v15778_v18 = vld [vmem:[#allocation22 + $0xfc0] sm:$0xf]  ;;  %v16962_v45 = vld [vmem:[#allocation22 + $0xfcc] sm:$0xf0] }
 0x603   : > { %v7120_v44 = vadd.f32 %v7088_v29, %v7070_v34  ;;  %v6983_v49 = vmul.f32 0.5, %v6982_v8  ;;  %v20448_v22 = vpack.c.bf16 %v7135_v59, %v7135_v59  ;;  %v7121_v6 = vadd.f32 %v7089_v52, %v7071_v39  ;;  %v15362_v41 = vld [vmem:[#allocation22 + $0xc80] sm:$0xf]  ;;  %v16858_v10 = vld [vmem:[#allocation22 + $0xc8c] sm:$0xf0]  ;;  %vm20461_vm13 = vmor %vm6986_vm9, %vm6987_vm10 }
 0x604   : > { %v20446_v11 = vpack.c.bf16 %v7134_v21, %v7134_v21  ;;  %vm6976_vm11 = vweird.f32 %v20261_v20  ;;  %vm6977_vm12 = vweird.f32 %v20325_v32  ;;  %v15379_v7 = vor.u32 %v16862_v17, %v15378_v19  ;;  %10390 = vmatpush.bf16.msra.mxu3 %v15171_v15  ;;  %v15490_v61 = vld [vmem:[#allocation22 + $0xd80] sm:$0xf]  ;;  %v16890_v12 = vld [vmem:[#allocation22 + $0xd8c] sm:$0xf0] }
 0x605   : > { %v15507_v63 = vor.u32 %v16894_v31, %v15506_v43  ;;  %v6994_v34 = vsub.f32 1.5, %v20400_v37  ;;  %v6984_v35 = vsub.f32 1.5, %v6983_v49  ;;  %10365 = vmatmul.bf16.vlgmr.msra.gmra.mxu1 %v20448_v22  ;;  %v6975_v51 = vmul.f32 %v20325_v32, %v6974_v48  ;;  %10377 = vmatpush.bf16.msra.mxu2 %v15043_v14  ;;  %vm20469_vm14 = vmor %vm6976_vm11, %vm6977_vm12  ;;  %v20817_v4 = vld [vmem:[#allocation48_spill] sm:$0xff]  ;;  %v16926_v38 = vld [vmem:[#allocation22 + $0xeac] sm:$0xf0] }
 0x606   : > { %10397 = vmatpush.bf16.msrb.mxu0 %v15395_v54  ;;  %10410 = vmatpush.bf16.msrb.mxu1 %v15523_v60  ;;  %v7004_v39 = vsub.f32 1.5, %v20433_v55  ;;  %v7136_v37 = vmax.f32 %v7120_v44, 0.0  ;;  %v7137_v24 = vmax.f32 %v7121_v6, 0.0  ;;  %v15651_v55 = vor.u32 %v16930_v47, %v15650_v30  ;;  %v15634_v54 = vld [vmem:[#allocation22 + $0xea0] sm:$0xf]  ;;  %v20503_v49 = vld [vmem:[#allocation19 + $0x8] sm:$0xff] }
 0x607   : > { %10352 = vmatmul.bf16.vlgmr.msra.gmra.mxu0 %v20446_v11  ;;  %v6985_v2 = vmul.f32 %v20431_v57, %v6984_v35  ;;  %v15779_v58 = vor.u32 %v16962_v45, %v15778_v18  ;;  %vm6996_vm15 = vweird.f32 %v20255_v0  ;;  %v20818_v46 = vld [vmem:[#allocation44_spill] sm:$0xff]  ;;  %v6831_v20 = vsub.f32 %v20232_v16, %v20297_v33  ;;  %v16958_v56 = vld [vmem:[#allocation22 + $0xfac] sm:$0xf0]  ;;  %v20823_v47 = vld [vmem:[#allocation47_spill] sm:$0xff] }
 0x608   : > { %10435 = vmatpush.bf16.msrb.mxu3 %v15795_v25  ;;  %v6830_v29 = vsub.f32 %v20818_v46, %v20817_v4  ;;  %v15363_v48 = vor.u32 %v16858_v10, %v15362_v41  ;;  %v15762_v62 = vld [vmem:[#allocation22 + $0xfa0] sm:$0xf]  ;;  %vm6997_vm0 = vweird.f32 %v20299_v36  ;;  %vm7006_vm1 = vweird.f32 %v20269_v42  ;;  %v16854_v14 = vld [vmem:[#allocation22 + $0xc6c] sm:$0xf0] }
 0x609   : > { %10422 = vmatpush.bf16.msrb.mxu2 %v15667_v40  ;;  %v6989_v53 = vsel %vm20461_vm13, %v20431_v57, %v6985_v2  ;;  %v15491_v26 = vor.u32 %v16890_v12, %v15490_v61  ;;  %v15346_v60 = vld [vmem:[#allocation22 + $0xc60] sm:$0xf]  ;;  %v6995_v15 = vmul.f32 %v20299_v36, %v6994_v34  ;;  %v6979_v16 = vsel %vm20469_vm14, %v20325_v32, %v6975_v51  ;;  %v16886_v17 = vld [vmem:[#allocation22 + $0xd6c] sm:$0xf0]  ;;  %vm20497_vm3 = vmor %vm6996_vm15, %vm6997_vm0 }
 0x60a   : > { %10398 = vmatpush.bf16.msrb.mxu0 %v15379_v7  ;;  %10411 = vmatpush.bf16.msrb.mxu1 %v15507_v63  ;;  %vm7007_vm2 = vweird.f32 %v20349_v1  ;;  %v20489_v33 = vpack.c.bf16 %v7136_v37, %v7136_v37  ;;  %v15474_v19 = vld [vmem:[#allocation22 + $0xd60] sm:$0xf]  ;;  %v20491_v43 = vpack.c.bf16 %v7137_v24, %v7137_v24  ;;  %v15635_v57 = vor.u32 %v16926_v38, %v15634_v54  ;;  %v16922_v59 = vld [vmem:[#allocation22 + $0xe8c] sm:$0xf0] }
 0x60b   : > { %v15763_v8 = vor.u32 %v16958_v56, %v15762_v62  ;;  %v15618_v21 = vld [vmem:[#allocation22 + $0xe80] sm:$0xf]  ;;  %v7005_v31 = vmul.f32 %v20349_v1, %v7004_v39  ;;  %v7023_v52 = vmul.f32 %v6989_v53, %v6831_v20  ;;  %v15347_v40 = vor.u32 %v16854_v14, %v15346_v60  ;;  %v16954_v44 = vld [vmem:[#allocation22 + $0xf8c] sm:$0xf0]  ;;  %vm20510_vm4 = vmor %vm7006_vm1, %vm7007_vm2 }
 0x60c   : > { %10436 = vmatpush.bf16.msrb.mxu3 %v15779_v58  ;;  %10378 = vmatmul.bf16.vlgmr.msra.gmra.mxu2 %v20489_v33  ;;  %v15746_v25 = vld [vmem:[#allocation22 + $0xf80] sm:$0xf]  ;;  %v7041_v6 = vperm.slane %v20503_v49, 5  ;;  %v15475_v30 = vor.u32 %v16886_v17, %v15474_v19  ;;  %v16850_v63 = vld [vmem:[#allocation22 + $0xc4c] sm:$0xf0]  ;;  %v7022_v34 = vmul.f32 %v6979_v16, %v6830_v29  ;;  %v7040_v42 = vperm.slane %v20503_v49, 4 }
 0x60d   : > { %10423 = vmatpush.bf16.msrb.mxu2 %v15651_v55  ;;  %10391 = vmatmul.bf16.vlgmr.msra.gmra.mxu3 %v20491_v43  ;;  %v15330_v7 = vld [vmem:[#allocation22 + $0xc40] sm:$0xf]  ;;  %v20824_v18 = vld [vmem:[#allocation42_spill] sm:$0xff]  ;;  %v6999_v13 = vsel %vm20497_vm3, %v20299_v36, %v6995_v15  ;;  %v15619_v37 = vor.u32 %v16922_v59, %v15618_v21  ;;  %v15747_v61 = vor.u32 %v16954_v44, %v15746_v25  ;;  %v7091_v4 = vperm.slane %v20414_v23, 5  ;;  %v16516_v44 = vld [vmem:[#allocation22 + $0x1e4] sm:$0xf] }
 0x60e   : > { %10399 = vmatpush.bf16.msrb.mxu0 %v15363_v48  ;;  %10412 = vmatpush.bf16.msrb.mxu1 %v15491_v26  ;;  %v6832_v45 = vsub.f32 %v20824_v18, %v20823_v47  ;;  %v20825_v35 = vld [vmem:[#allocation50_spill] sm:$0xff]  ;;  %v15458_v51 = vld [vmem:[#allocation22 + $0xd40] sm:$0xf]  ;;  %v7009_v2 = vsel %vm20510_vm4, %v20349_v1, %v7005_v31  ;;  %v15331_v24 = vor.u32 %v16850_v63, %v15330_v7  ;;  %v7090_v53 = vperm.slane %v20414_v23, 4 }
 0x60f   : > { %v20826_v41 = vld [vmem:[#allocation46_spill] sm:$0xff]  ;;  %v15602_v12 = vld [vmem:[#allocation22 + $0xe60] sm:$0xf]  ;;  %v7073_v54 = vmul.f32 %v7041_v6, %v7023_v52  ;;  %v7072_v56 = vmul.f32 %v7040_v42, %v7022_v34  ;;  %v7042_v21 = vperm.slane %v20503_v49, 6  ;;  %v7043_v59 = vperm.slane %v20503_v49, 7 }
 0x610   : > { %v6833_v10 = vsub.f32 %v20826_v41, %v20825_v35  ;;  %v16882_v39 = vld [vmem:[#allocation22 + $0xd4c] sm:$0xf0]  ;;  %10437 = vmatpush.bf16.msrb.mxu3 %v15763_v8  ;;  %v15730_v55 = vld [vmem:[#allocation22 + $0xf60] sm:$0xf]  ;;  %v7024_v48 = vmul.f32 %v6999_v13, %v6832_v45  ;;  %v13876_v25 = vld [vmem:[#allocation22 + $0xf0] sm:$0xf0] }
 0x611   : > { %10424 = vmatpush.bf16.msrb.mxu2 %v15635_v57  ;;  %v16918_v27 = vld [vmem:[#allocation22 + $0xe6c] sm:$0xf0]  ;;  %v15459_v46 = vor.u32 %v16882_v39, %v15458_v51  ;;  %v15314_v36 = vld [vmem:[#allocation22 + $0xc20] sm:$0xf]  ;;  %v7123_v8 = vadd.f32 %v7091_v4, %v7073_v54  ;;  %v14004_v6 = vld [vmem:[#allocation22 + $0x1f0] sm:$0xf0]  ;;  %v7122_v0 = vadd.f32 %v7090_v53, %v7072_v56 }
 0x612   : > { %10400 = vmatpush.bf16.msrb.mxu0 %v15347_v40  ;;  %v16950_v58 = vld [vmem:[#allocation22 + $0xf6c] sm:$0xf0]  ;;  %10413 = vmatpush.bf16.msrb.mxu1 %v15475_v30  ;;  %v15442_v20 = vld [vmem:[#allocation22 + $0xd20] sm:$0xf]  ;;  %v7025_v26 = vmul.f32 %v7009_v2, %v6833_v10  ;;  %v15603_v1 = vor.u32 %v16918_v27, %v15602_v12  ;;  %v16484_v40 = vld [vmem:[#allocation22 + $0xe4] sm:$0xf]  ;;  %v7074_v41 = vmul.f32 %v7042_v21, %v7024_v48 }
 0x613   : > { %v16846_v29 = vld [vmem:[#allocation22 + $0xc2c] sm:$0xf0]  ;;  %v15586_v62 = vld [vmem:[#allocation22 + $0xe40] sm:$0xf]  ;;  %v15731_v60 = vor.u32 %v16950_v58, %v15730_v55  ;;  %v7092_v45 = vperm.slane %v20414_v23, 6  ;;  %v7139_v35 = vmax.f32 %v7123_v8, 0.0  ;;  %v13879_v42 = vor.u32 %v16484_v40, %v13876_v25 }
 0x614   : > { %v16878_v38 = vld [vmem:[#allocation22 + $0xd2c] sm:$0xf0]  ;;  %10438 = vmatpush.bf16.msrb.mxu3 %v15747_v61  ;;  %v15714_v15 = vld [vmem:[#allocation22 + $0xf40] sm:$0xf]  ;;  %v15315_v19 = vor.u32 %v16846_v29, %v15314_v36  ;;  %v7075_v10 = vmul.f32 %v7043_v59, %v7025_v26  ;;  %v7093_v51 = vperm.slane %v20414_v23, 7  ;;  %v7138_v61 = vmax.f32 %v7122_v0, 0.0 }
 0x615   : > { %10425 = vmatpush.bf16.msrb.mxu2 %v15619_v37  ;;  %v16914_v14 = vld [vmem:[#allocation22 + $0xe4c] sm:$0xf0]  ;;  %v15298_v17 = vld [vmem:[#allocation22 + $0xc00] sm:$0xf]  ;;  %v15443_v32 = vor.u32 %v16878_v38, %v15442_v20  ;;  %v16480_v13 = vld [vmem:[#allocation22 + $0xc4] sm:$0xf]  ;;  %v14007_v37 = vor.u32 %v16516_v44, %v14004_v6  ;;  %v20532_v4 = vpack.c.bf16 %v7139_v35, %v7139_v35  ;;  %v7124_v29 = vadd.f32 %v7092_v45, %v7074_v41 }
 0x616   : > { %v16946_v16 = vld [vmem:[#allocation22 + $0xf4c] sm:$0xf0]  ;;  %10401 = vmatpush.bf16.msrb.mxu0 %v15331_v24  ;;  %10414 = vmatpush.bf16.msrb.mxu1 %v15459_v46  ;;  %v15426_v31 = vld [vmem:[#allocation22 + $0xd00] sm:$0xf]  ;;  %v15587_v30 = vor.u32 %v16914_v14, %v15586_v62  ;;  %v13860_v12 = vld [vmem:[#allocation22 + $0xd0] sm:$0xf0]  ;;  %v7125_v20 = vadd.f32 %v7093_v51, %v7075_v10  ;;  %v20534_v53 = vpack.c.bf16 %v7138_v61, %v7138_v61 }
 0x617   : > { %v16842_v57 = vld [vmem:[#allocation22 + $0xc0c] sm:$0xf0]  ;;  %v15715_v7 = vor.u32 %v16946_v16, %v15714_v15  ;;  %v15570_v47 = vld [vmem:[#allocation22 + $0xe20] sm:$0xf]  ;;  %v16512_v27 = vld [vmem:[#allocation22 + $0x1c4] sm:$0xf]  ;;  %v13863_v48 = vor.u32 %v16480_v13, %v13860_v12 }
 0x618   : > { %v16874_v52 = vld [vmem:[#allocation22 + $0xd0c] sm:$0xf0]  ;;  %10439 = vmatpush.bf16.msrb.mxu3 %v15731_v60  ;;  %v15299_v63 = vor.u32 %v16842_v57, %v15298_v17  ;;  %v15698_v49 = vld [vmem:[#allocation22 + $0xf20] sm:$0xf]  ;;  %v13988_v55 = vld [vmem:[#allocation22 + $0x1d0] sm:$0xf0] }
 0x619   : > { %10426 = vmatpush.bf16.msrb.mxu2 %v15603_v1  ;;  %v16910_v18 = vld [vmem:[#allocation22 + $0xe2c] sm:$0xf0]  ;;  %v15427_v39 = vor.u32 %v16874_v52, %v15426_v31  ;;  %v15554_v58 = vld [vmem:[#allocation22 + $0xe00] sm:$0xf]  ;;  %v16548_v36 = vld [vmem:[#allocation22 + $0x2e4] sm:$0xf]  ;;  %v13991_v26 = vor.u32 %v16512_v27, %v13988_v55 }
 0x61a   : > { %10402 = vmatpush.bf16.msrb.mxu0 %v15315_v19  ;;  %v16942_v34 = vld [vmem:[#allocation22 + $0xf2c] sm:$0xf0]  ;;  %10415 = vmatpush.bf16.msrb.mxu1 %v15443_v32  ;;  %v15571_v2 = vor.u32 %v16910_v18, %v15570_v47  ;;  %v15682_v46 = vld [vmem:[#allocation22 + $0xf00] sm:$0xf]  ;;  %v14132_v38 = vld [vmem:[#allocation22 + $0x2f0] sm:$0xf0] }
 0x61b   : > { %v15699_v24 = vor.u32 %v16942_v34, %v15698_v49  ;;  %v16906_v54 = vld [vmem:[#allocation22 + $0xe0c] sm:$0xf0]  ;;  %v16580_v62 = vld [vmem:[#allocation22 + $0x3e4] sm:$0xf]  ;;  %v14260_v56 = vld [vmem:[#allocation22 + $0x3f0] sm:$0xf0]  ;;  %v14135_v17 = vor.u32 %v16548_v36, %v14132_v38 }
 0x61c   : > { %10440 = vmatpush.bf16.msrb.mxu3 %v15715_v7  ;;  %v16938_v23 = vld [vmem:[#allocation22 + $0xf0c] sm:$0xf0]  ;;  %v16476_v1 = vld [vmem:[#allocation22 + $0xa4] sm:$0xf]  ;;  %v13844_v60 = vld [vmem:[#allocation22 + $0xb0] sm:$0xf0]  ;;  %v15555_v14 = vor.u32 %v16906_v54, %v15554_v58  ;;  %v14263_v57 = vor.u32 %v16580_v62, %v14260_v56 }
 0x61d   : > { %10427 = vmatpush.bf16.msrb.mxu2 %v15587_v30  ;;  %v15683_v15 = vor.u32 %v16938_v23, %v15682_v46  ;;  %v16508_v16 = vld [vmem:[#allocation22 + $0x1a4] sm:$0xf]  ;;  %v13972_v19 = vld [vmem:[#allocation22 + $0x1b0] sm:$0xf0]  ;;  %v7140_v8 = vmax.f32 %v7124_v29, 0.0  ;;  %v7141_v21 = vmax.f32 %v7125_v20, 0.0  ;;  %v13847_v31 = vor.u32 %v16476_v1, %v13844_v60 }
 0x61e   : > { %10403 = vmatpush.bf16.msrb.mxu0 %v15299_v63  ;;  %10416 = vmatpush.bf16.msrb.mxu1 %v15427_v39  ;;  %v16544_v59 = vld [vmem:[#allocation22 + $0x2c4] sm:$0xf]  ;;  %v14116_v32 = vld [vmem:[#allocation22 + $0x2d0] sm:$0xf0]  ;;  %v13975_v6 = vor.u32 %v16508_v16, %v13972_v19 }
 0x61f   : > { %v16576_v52 = vld [vmem:[#allocation22 + $0x3c4] sm:$0xf]  ;;  %v14244_v40 = vld [vmem:[#allocation22 + $0x3d0] sm:$0xf0]  ;;  %v14119_v0 = vor.u32 %v16544_v59, %v14116_v32  ;;  %v20538_v30 = vpack.c.bf16 %v7140_v8, %v7140_v8  ;;  %v20540_v7 = vpack.c.bf16 %v7141_v21, %v7141_v21 }
 0x620   : > { %10441 = vmatpush.bf16.msrb.mxu3 %v15699_v24  ;;  %v16472_v25 = vld [vmem:[#allocation22 + $0x84] sm:$0xf]  ;;  %v13828_v44 = vld [vmem:[#allocation22 + $0x90] sm:$0xf0]  ;;  %v14247_v63 = vor.u32 %v16576_v52, %v14244_v40 }
 0x621   : > { %10428 = vmatpush.bf16.msrb.mxu2 %v15571_v2  ;;  %10404 = vmatmul.bf16.vlgmr.msrb.gmra.mxu0 %v20534_v53  ;;  %v16504_v47 = vld [vmem:[#allocation22 + $0x184] sm:$0xf]  ;;  %v13956_v18 = vld [vmem:[#allocation22 + $0x190] sm:$0xf0]  ;;  %v13831_v49 = vor.u32 %v16472_v25, %v13828_v44 }
 0x622   : > { %10448 = vmatpush.bf16.msra.mxu0 %v13879_v42  ;;  %10461 = vmatpush.bf16.msra.mxu1 %v14007_v37  ;;  %v16540_v45 = vld [vmem:[#allocation22 + $0x2a4] sm:$0xf]  ;;  %v14100_v34 = vld [vmem:[#allocation22 + $0x2b0] sm:$0xf0]  ;;  %v13959_v39 = vor.u32 %v16504_v47, %v13956_v18 }
 0x623   : > { %10417 = vmatmul.bf16.vlgmr.msrb.gmra.mxu1 %v20532_v4  ;;  %v16572_v35 = vld [vmem:[#allocation22 + $0x3a4] sm:$0xf]  ;;  %v14228_v41 = vld [vmem:[#allocation22 + $0x3b0] sm:$0xf0]  ;;  %v14103_v42 = vor.u32 %v16540_v45, %v14100_v34 }
 0x624   : > { %10442 = vmatpush.bf16.msrb.mxu3 %v15683_v15  ;;  %v16468_v10 = vld [vmem:[#allocation22 + $0x64] sm:$0xf]  ;;  %v13812_v51 = vld [vmem:[#allocation22 + $0x70] sm:$0xf0]  ;;  %v14231_v13 = vor.u32 %v16572_v35, %v14228_v41 }
 0x625   : > { %10429 = vmatpush.bf16.msrb.mxu2 %v15555_v14  ;;  %v16500_v37 = vld [vmem:[#allocation22 + $0x164] sm:$0xf]  ;;  %v13940_v61 = vld [vmem:[#allocation22 + $0x170] sm:$0xf0]  ;;  %v13815_v27 = vor.u32 %v16468_v10, %v13812_v51 }
 0x626   : > { %10449 = vmatpush.bf16.msra.mxu0 %v13863_v48  ;;  %10462 = vmatpush.bf16.msra.mxu1 %v13991_v26  ;;  %v16536_v12 = vld [vmem:[#allocation22 + $0x284] sm:$0xf]  ;;  %v14084_v2 = vld [vmem:[#allocation22 + $0x290] sm:$0xf0]  ;;  %v13943_v46 = vor.u32 %v16500_v37, %v13940_v61 }
 0x627   : > { %10443 = vmatmul.bf16.vlgmr.msrb.gmra.mxu3 %v20540_v7  ;;  %v16568_v24 = vld [vmem:[#allocation22 + $0x384] sm:$0xf]  ;;  %v14212_v55 = vld [vmem:[#allocation22 + $0x390] sm:$0xf0]  ;;  %v14087_v23 = vor.u32 %v16536_v12, %v14084_v2 }
 0x628   : > { %10487 = vmatpush.bf16.msra.mxu3 %v14263_v57  ;;  %10430 = vmatmul.bf16.vlgmr.msrb.gmra.mxu2 %v20538_v30  ;;  %v16464_v58 = vld [vmem:[#allocation22 + $0x44] sm:$0xf]  ;;  %v13796_v54 = vld [vmem:[#allocation22 + $0x50] sm:$0xf0]  ;;  %v14215_v36 = vor.u32 %v16568_v24, %v14212_v55 }
 0x629   : > { %10474 = vmatpush.bf16.msra.mxu2 %v14135_v17  ;;  %v16496_v29 = vld [vmem:[#allocation22 + $0x144] sm:$0xf]  ;;  %v13924_v20 = vld [vmem:[#allocation22 + $0x150] sm:$0xf0]  ;;  %v13799_v38 = vor.u32 %v16464_v58, %v13796_v54 }
 0x62a   : > { %10450 = vmatpush.bf16.msra.mxu0 %v13847_v31  ;;  %10463 = vmatpush.bf16.msra.mxu1 %v13975_v6  ;;  %v16532_v48 = vld [vmem:[#allocation22 + $0x264] sm:$0xf]  ;;  %v14068_v62 = vld [vmem:[#allocation22 + $0x270] sm:$0xf0]  ;;  %v13927_v14 = vor.u32 %v16496_v29, %v13924_v20 }
 0x62b   : > { %v16564_v56 = vld [vmem:[#allocation22 + $0x364] sm:$0xf]  ;;  %v14196_v26 = vld [vmem:[#allocation22 + $0x370] sm:$0xf0]  ;;  %v14071_v15 = vor.u32 %v16532_v48, %v14068_v62 }
 0x62c   : > { %10488 = vmatpush.bf16.msra.mxu3 %v14247_v63  ;;  %v16460_v1 = vld [vmem:[#allocation22 + $0x24] sm:$0xf]  ;;  %v13780_v60 = vld [vmem:[#allocation22 + $0x30] sm:$0xf0]  ;;  %v14199_v16 = vor.u32 %v16564_v56, %v14196_v26 }
 0x62d   : > { %10475 = vmatpush.bf16.msra.mxu2 %v14119_v0  ;;  %v16492_v19 = vld [vmem:[#allocation22 + $0x124] sm:$0xf]  ;;  %v13908_v17 = vld [vmem:[#allocation22 + $0x130] sm:$0xf0]  ;;  %v13783_v8 = vor.u32 %v16460_v1, %v13780_v60 }
 0x62e   : > { %10451 = vmatpush.bf16.msra.mxu0 %v13831_v49  ;;  %10464 = vmatpush.bf16.msra.mxu1 %v13959_v39  ;;  %v16528_v57 = vld [vmem:[#allocation22 + $0x244] sm:$0xf]  ;;  %v14052_v21 = vld [vmem:[#allocation22 + $0x250] sm:$0xf0]  ;;  %v13911_v40 = vor.u32 %v16492_v19, %v13908_v17 }
 0x62f   : > { %v16560_v59 = vld [vmem:[#allocation22 + $0x344] sm:$0xf]  ;;  %v14180_v32 = vld [vmem:[#allocation22 + $0x350] sm:$0xf0]  ;;  %v14055_v6 = vor.u32 %v16528_v57, %v14052_v21 }
 0x630   : > { %10489 = vmatpush.bf16.msra.mxu3 %v14231_v13  ;;  %v16456_v31 = vld [vmem:[#allocation22 + $0x4] sm:$0xf]  ;;  %v13764_v52 = vld [vmem:[#allocation22 + $0x10] sm:$0xf0]  ;;  %v14183_v0 = vor.u32 %v16560_v59, %v14180_v32 }
 0x631   : > { %10476 = vmatpush.bf16.msra.mxu2 %v14103_v42  ;;  %v16612_v25 = vld [vmem:[#allocation22 + $0x4e4] sm:$0xf]  ;;  %v14388_v44 = vld [vmem:[#allocation22 + $0x4f0] sm:$0xf0]  ;;  %v13767_v45 = vor.u32 %v16456_v31, %v13764_v52 }
 0x632   : > { %10452 = vmatpush.bf16.msra.mxu0 %v13815_v27  ;;  %10465 = vmatpush.bf16.msra.mxu1 %v13943_v46  ;;  %v16488_v63 = vld [vmem:[#allocation22 + $0x104] sm:$0xf]  ;;  %v13892_v47 = vld [vmem:[#allocation22 + $0x110] sm:$0xf0]  ;;  %v14391_v41 = vor.u32 %v16612_v25, %v14388_v44 }
 0x633   : > { %v16644_v18 = vld [vmem:[#allocation22 + $0x5e4] sm:$0xf]  ;;  %v14516_v49 = vld [vmem:[#allocation22 + $0x5f0] sm:$0xf0]  ;;  %v13895_v39 = vor.u32 %v16488_v63, %v13892_v47 }
 0x634   : > { %10490 = vmatpush.bf16.msra.mxu3 %v14215_v36  ;;  %v16524_v34 = vld [vmem:[#allocation22 + $0x224] sm:$0xf]  ;;  %v14036_v35 = vld [vmem:[#allocation22 + $0x230] sm:$0xf0]  ;;  %v14519_v37 = vor.u32 %v16644_v18, %v14516_v49 }
 0x635   : > { %10477 = vmatpush.bf16.msra.mxu2 %v14087_v23  ;;  %v16556_v10 = vld [vmem:[#allocation22 + $0x324] sm:$0xf]  ;;  %v14164_v51 = vld [vmem:[#allocation22 + $0x330] sm:$0xf0]  ;;  %v14039_v61 = vor.u32 %v16524_v34, %v14036_v35 }
 0x636   : > { %10453 = vmatpush.bf16.msra.mxu0 %v13799_v38  ;;  %10466 = vmatpush.bf16.msra.mxu1 %v13927_v14  ;;  %v16608_v42 = vld [vmem:[#allocation22 + $0x4c4] sm:$0xf]  ;;  %v14372_v13 = vld [vmem:[#allocation22 + $0x4d0] sm:$0xf0]  ;;  %v14167_v24 = vor.u32 %v16556_v10, %v14164_v51 }
 0x637   : > { %v16640_v12 = vld [vmem:[#allocation22 + $0x5c4] sm:$0xf]  ;;  %v14500_v27 = vld [vmem:[#allocation22 + $0x5d0] sm:$0xf0]  ;;  %v14375_v46 = vor.u32 %v16608_v42, %v14372_v13  ;;  %v7670_v42 = vld [vmem:[#allocation24] sm:$0xf] }
 0x638   : > { %10491 = vmatpush.bf16.msra.mxu3 %v14199_v16  ;;  %v16520_v2 = vld [vmem:[#allocation22 + $0x204] sm:$0xf]  ;;  %v14020_v55 = vld [vmem:[#allocation22 + $0x210] sm:$0xf0]  ;;  %v14503_v62 = vor.u32 %v16640_v12, %v14500_v27 }
 0x639   : > { %10478 = vmatpush.bf16.msra.mxu2 %v14071_v15  ;;  %v16552_v58 = vld [vmem:[#allocation22 + $0x304] sm:$0xf]  ;;  %v14148_v54 = vld [vmem:[#allocation22 + $0x310] sm:$0xf0]  ;;  %v14023_v56 = vor.u32 %v16520_v2, %v14020_v55 }
 0x63a   : > { %10454 = vmatpush.bf16.msra.mxu0 %v13783_v8  ;;  %10467 = vmatpush.bf16.msra.mxu1 %v13911_v40  ;;  %v16676_v23 = vld [vmem:[#allocation22 + $0x6e4] sm:$0xf]  ;;  %v14644_v36 = vld [vmem:[#allocation22 + $0x6f0] sm:$0xf0]  ;;  %v14151_v1 = vor.u32 %v16552_v58, %v14148_v54  ;;  %v7672_v54 = vperm.slane %v7670_v42, 0 }
 0x63b   : > { %v16708_v29 = vld [vmem:[#allocation22 + $0x7e4] sm:$0xf]  ;;  %v14772_v20 = vld [vmem:[#allocation22 + $0x7f0] sm:$0xf0]  ;;  %v14647_v60 = vor.u32 %v16676_v23, %v14644_v36 }
 0x63c   : > { %10492 = vmatpush.bf16.msra.mxu3 %v14183_v0  ;;  %v16604_v48 = vld [vmem:[#allocation22 + $0x4a4] sm:$0xf]  ;;  %v14356_v38 = vld [vmem:[#allocation22 + $0x4b0] sm:$0xf0]  ;;  %v14775_v19 = vor.u32 %v16708_v29, %v14772_v20 }
 0x63d   : > { %10479 = vmatpush.bf16.msra.mxu2 %v14055_v6  ;;  %v20827_v26 = vld [vmem:[#allocation43_spill] sm:$0xff]  ;;  %v16636_v14 = vld [vmem:[#allocation22 + $0x5a4] sm:$0xf]  ;;  %v14359_v17 = vor.u32 %v16604_v48, %v14356_v38 }
 0x63e   : > { %10455 = vmatpush.bf16.msra.mxu0 %v13767_v45  ;;  %10468 = vmatpush.bf16.msra.mxu1 %v13895_v39  ;;  %v14484_v15 = vld [vmem:[#allocation22 + $0x5b0] sm:$0xf0]  ;;  %v20828_v16 = vld [vmem:[#allocation45_spill] sm:$0xff] }
 0x63f   : > { %v16672_v57 = vld [vmem:[#allocation22 + $0x6c4] sm:$0xf]  ;;  %v14628_v8 = vld [vmem:[#allocation22 + $0x6d0] sm:$0xf0]  ;;  %v14487_v52 = vor.u32 %v16636_v14, %v14484_v15 }
 0x640   : > { %10493 = vmatpush.bf16.msra.mxu3 %v14167_v24  ;;  %v16704_v21 = vld [vmem:[#allocation22 + $0x7c4] sm:$0xf]  ;;  %v14756_v59 = vld [vmem:[#allocation22 + $0x7d0] sm:$0xf0]  ;;  %v14631_v40 = vor.u32 %v16672_v57, %v14628_v8 }
 0x641   : > { %10480 = vmatpush.bf16.msra.mxu2 %v14039_v61  ;;  %10456 = vmatmul.bf16.vlgmr.msra.gmra.mxu0 %v20827_v26  ;;  %v16600_v32 = vld [vmem:[#allocation22 + $0x484] sm:$0xf]  ;;  %v14340_v31 = vld [vmem:[#allocation22 + $0x490] sm:$0xf0]  ;;  %v14759_v6 = vor.u32 %v16704_v21, %v14756_v59 }
 0x642   : > { %10500 = vmatpush.bf16.msrb.mxu0 %v14391_v41  ;;  %10513 = vmatpush.bf16.msrb.mxu1 %v14519_v37  ;;  %v16632_v25 = vld [vmem:[#allocation22 + $0x584] sm:$0xf]  ;;  %v14468_v44 = vld [vmem:[#allocation22 + $0x590] sm:$0xf0]  ;;  %v14343_v0 = vor.u32 %v16600_v32, %v14340_v31 }
 0x643   : > { %10469 = vmatmul.bf16.vlgmr.msra.gmra.mxu1 %v20828_v16  ;;  %v16668_v63 = vld [vmem:[#allocation22 + $0x6a4] sm:$0xf]  ;;  %v14612_v47 = vld [vmem:[#allocation22 + $0x6b0] sm:$0xf0]  ;;  %v14471_v41 = vor.u32 %v16632_v25, %v14468_v44 }
 0x644   : > { %10494 = vmatpush.bf16.msra.mxu3 %v14151_v1  ;;  %v16700_v18 = vld [vmem:[#allocation22 + $0x7a4] sm:$0xf]  ;;  %v14740_v49 = vld [vmem:[#allocation22 + $0x7b0] sm:$0xf0]  ;;  %v14615_v10 = vor.u32 %v16668_v63, %v14612_v47 }
 0x645   : > { %10481 = vmatpush.bf16.msra.mxu2 %v14023_v56  ;;  %v20829_v45 = vld [vmem:[#allocation49_spill] sm:$0xff]  ;;  %v14324_v35 = vld [vmem:[#allocation22 + $0x470] sm:$0xf0]  ;;  %v14743_v13 = vor.u32 %v16700_v18, %v14740_v49 }
 0x646   : > { %10501 = vmatpush.bf16.msrb.mxu0 %v14375_v46  ;;  %10514 = vmatpush.bf16.msrb.mxu1 %v14503_v62  ;;  %v16596_v34 = vld [vmem:[#allocation22 + $0x464] sm:$0xf]  ;;  %v14452_v39 = vld [vmem:[#allocation22 + $0x570] sm:$0xf0] }
 0x647   : > { %10495 = vmatmul.bf16.vlgmr.msra.gmra.mxu3 %v20249_v9  ;;  %v16628_v51 = vld [vmem:[#allocation22 + $0x564] sm:$0xf]  ;;  %v14327_v37 = vor.u32 %v16596_v34, %v14324_v35  ;;  %v14596_v12 = vld [vmem:[#allocation22 + $0x690] sm:$0xf0] }
 0x648   : > { %10539 = vmatpush.bf16.msrb.mxu3 %v14775_v19  ;;  %10482 = vmatmul.bf16.vlgmr.msra.gmra.mxu2 %v20829_v45  ;;  %v16664_v61 = vld [vmem:[#allocation22 + $0x684] sm:$0xf]  ;;  %v14724_v2 = vld [vmem:[#allocation22 + $0x790] sm:$0xf0]  ;;  %v14455_v58 = vor.u32 %v16628_v51, %v14452_v39  ;;  %v10249_v14 = vpop.f32.mrf.mxu0 }
 0x649   : > { %10526 = vmatpush.bf16.msrb.mxu2 %v14647_v60  ;;  %v16696_v27 = vld [vmem:[#allocation22 + $0x784] sm:$0xf]  ;;  %v14308_v55 = vld [vmem:[#allocation22 + $0x450] sm:$0xf0]  ;;  %v14599_v46 = vor.u32 %v16664_v61, %v14596_v12  ;;  %v10250_v19 = vadd.f32 %v10249_v14, %v7672_v54 }
 0x64a   : > { %10502 = vmatpush.bf16.msrb.mxu0 %v14359_v17  ;;  %10515 = vmatpush.bf16.msrb.mxu1 %v14487_v52  ;;  %v16592_v24 = vld [vmem:[#allocation22 + $0x444] sm:$0xf]  ;;  %v14436_v36 = vld [vmem:[#allocation22 + $0x550] sm:$0xf0]  ;;  %v14727_v29 = vor.u32 %v16696_v27, %v14724_v2  ;;  %v10262_v17 = vpop.f32.mrf.mxu1 }
 0x64b   : > { %v16624_v23 = vld [vmem:[#allocation22 + $0x544] sm:$0xf]  ;;  %v14311_v20 = vor.u32 %v16592_v24, %v14308_v55  ;;  %v14580_v38 = vld [vmem:[#allocation22 + $0x670] sm:$0xf0]  ;;  %v20548_v25 = vadd.f32 %v10262_v17, %v10250_v19 }
 0x64c   : > { %10540 = vmatpush.bf16.msrb.mxu3 %v14759_v6  ;;  %v16660_v48 = vld [vmem:[#allocation22 + $0x664] sm:$0xf]  ;;  %v14708_v56 = vld [vmem:[#allocation22 + $0x770] sm:$0xf0]  ;;  %v14439_v15 = vor.u32 %v16624_v23, %v14436_v36 }
 0x64d   : > { %10527 = vmatpush.bf16.msrb.mxu2 %v14631_v40  ;;  %v16692_v62 = vld [vmem:[#allocation22 + $0x764] sm:$0xf]  ;;  %v14292_v60 = vld [vmem:[#allocation22 + $0x430] sm:$0xf0]  ;;  %v14583_v57 = vor.u32 %v16660_v48, %v14580_v38 }
 0x64e   : > { %10503 = vmatpush.bf16.msrb.mxu0 %v14343_v0  ;;  %10516 = vmatpush.bf16.msrb.mxu1 %v14471_v41  ;;  %v16588_v1 = vld [vmem:[#allocation22 + $0x424] sm:$0xf]  ;;  %v14420_v21 = vld [vmem:[#allocation22 + $0x530] sm:$0xf0]  ;;  %v14711_v59 = vor.u32 %v16692_v62, %v14708_v56 }
 0x64f   : > { %v16620_v8 = vld [vmem:[#allocation22 + $0x524] sm:$0xf]  ;;  %v14295_v32 = vor.u32 %v16588_v1, %v14292_v60  ;;  %v14564_v52 = vld [vmem:[#allocation22 + $0x650] sm:$0xf0] }
 0x650   : > { %10541 = vmatpush.bf16.msrb.mxu3 %v14743_v13  ;;  %v16656_v31 = vld [vmem:[#allocation22 + $0x644] sm:$0xf]  ;;  %v14692_v44 = vld [vmem:[#allocation22 + $0x750] sm:$0xf0]  ;;  %v14423_v63 = vor.u32 %v16620_v8, %v14420_v21  ;;  %v10251_v27 = vpop.f32.mrf.mxu0 }
 0x651   : > { %10528 = vmatpush.bf16.msrb.mxu2 %v14615_v10  ;;  %v16688_v40 = vld [vmem:[#allocation22 + $0x744] sm:$0xf]  ;;  %v14276_v0 = vld [vmem:[#allocation22 + $0x410] sm:$0xf0]  ;;  %v14567_v49 = vor.u32 %v16656_v31, %v14564_v52 }
 0x652   : > { %10504 = vmatpush.bf16.msrb.mxu0 %v14327_v37  ;;  %10517 = vmatpush.bf16.msrb.mxu1 %v14455_v58  ;;  %v16584_v6 = vld [vmem:[#allocation22 + $0x404] sm:$0xf]  ;;  %v14900_v18 = vld [vmem:[#allocation22 + $0x8f0] sm:$0xf0]  ;;  %v14695_v10 = vor.u32 %v16688_v40, %v14692_v44  ;;  %v10264_v58 = vpop.f32.mrf.mxu1 }
 0x653   : > { %v16740_v47 = vld [vmem:[#allocation22 + $0x8e4] sm:$0xf]  ;;  %v14404_v35 = vld [vmem:[#allocation22 + $0x510] sm:$0xf0]  ;;  %v14279_v51 = vor.u32 %v16584_v6, %v14276_v0 }
 0x654   : > { %10542 = vmatpush.bf16.msrb.mxu3 %v14727_v29  ;;  %v16616_v34 = vld [vmem:[#allocation22 + $0x504] sm:$0xf]  ;;  %v15028_v39 = vld [vmem:[#allocation22 + $0x9f0] sm:$0xf0]  ;;  %v14903_v37 = vor.u32 %v16740_v47, %v14900_v18 }
 0x655   : > { %10529 = vmatpush.bf16.msrb.mxu2 %v14599_v46  ;;  %v16772_v41 = vld [vmem:[#allocation22 + $0x9e4] sm:$0xf]  ;;  %v14548_v13 = vld [vmem:[#allocation22 + $0x630] sm:$0xf0]  ;;  %v14407_v2 = vor.u32 %v16616_v34, %v14404_v35 }
 0x656   : > { %10505 = vmatpush.bf16.msrb.mxu0 %v14311_v20  ;;  %10518 = vmatpush.bf16.msrb.mxu1 %v14439_v15  ;;  %v16652_v42 = vld [vmem:[#allocation22 + $0x624] sm:$0xf]  ;;  %v14676_v12 = vld [vmem:[#allocation22 + $0x730] sm:$0xf0]  ;;  %v15031_v54 = vor.u32 %v16772_v41, %v15028_v39 }
 0x657   : > { %v16684_v61 = vld [vmem:[#allocation22 + $0x724] sm:$0xf]  ;;  %v14884_v55 = vld [vmem:[#allocation22 + $0x8d0] sm:$0xf0]  ;;  %v14551_v46 = vor.u32 %v16652_v42, %v14548_v13 }
 0x658   : > { %10543 = vmatpush.bf16.msrb.mxu3 %v14711_v59  ;;  %v16736_v24 = vld [vmem:[#allocation22 + $0x8c4] sm:$0xf]  ;;  %v15012_v36 = vld [vmem:[#allocation22 + $0x9d0] sm:$0xf0]  ;;  %v14679_v20 = vor.u32 %v16684_v61, %v14676_v12 }
 0x659   : > { %10530 = vmatpush.bf16.msrb.mxu2 %v14583_v57  ;;  %v16768_v23 = vld [vmem:[#allocation22 + $0x9c4] sm:$0xf]  ;;  %v14532_v48 = vld [vmem:[#allocation22 + $0x610] sm:$0xf0]  ;;  %v14887_v56 = vor.u32 %v16736_v24, %v14884_v55 }
 0x65a   : > { %10506 = vmatpush.bf16.msrb.mxu0 %v14295_v32  ;;  %10519 = vmatpush.bf16.msrb.mxu1 %v14423_v63  ;;  %v16648_v29 = vld [vmem:[#allocation22 + $0x604] sm:$0xf]  ;;  %v14660_v62 = vld [vmem:[#allocation22 + $0x710] sm:$0xf0]  ;;  %v15015_v57 = vor.u32 %v16768_v23, %v15012_v36 }
 0x65b   : > { %v16680_v38 = vld [vmem:[#allocation22 + $0x704] sm:$0xf]  ;;  %v15156_v60 = vld [vmem:[#allocation22 + $0xaf0] sm:$0xf0]  ;;  %v14535_v8 = vor.u32 %v16648_v29, %v14532_v48 }
 0x65c   : > { %10544 = vmatpush.bf16.msrb.mxu3 %v14695_v10  ;;  %v16804_v1 = vld [vmem:[#allocation22 + $0xae4] sm:$0xf]  ;;  %v15284_v15 = vld [vmem:[#allocation22 + $0xbf0] sm:$0xf0]  ;;  %v14663_v21 = vor.u32 %v16680_v38, %v14660_v62 }
 0x65d   : > { %10531 = vmatpush.bf16.msrb.mxu2 %v14567_v49  ;;  %v16836_v14 = vld [vmem:[#allocation22 + $0xbe4] sm:$0xf]  ;;  %v14868_v17 = vld [vmem:[#allocation22 + $0x8b0] sm:$0xf0]  ;;  %v15159_v59 = vor.u32 %v16804_v1, %v15156_v60 }
 0x65e   : > { %10507 = vmatpush.bf16.msrb.mxu0 %v14279_v51  ;;  %10520 = vmatpush.bf16.msrb.mxu1 %v14407_v2  ;;  %v16732_v19 = vld [vmem:[#allocation22 + $0x8a4] sm:$0xf]  ;;  %v14996_v31 = vld [vmem:[#allocation22 + $0x9b0] sm:$0xf0]  ;;  %v15287_v52 = vor.u32 %v16836_v14, %v15284_v15  ;;  %v20554_v2 = vpop.f32.mrf.mxu2 }
 0x65f   : > { %v16764_v32 = vld [vmem:[#allocation22 + $0x9a4] sm:$0xf]  ;;  %v14871_v40 = vor.u32 %v16732_v19, %v14868_v17  ;;  %v15140_v6 = vld [vmem:[#allocation22 + $0xad0] sm:$0xf0] }
 0x660   : > { %10545 = vmatpush.bf16.msrb.mxu3 %v14679_v20  ;;  %v16800_v44 = vld [vmem:[#allocation22 + $0xac4] sm:$0xf]  ;;  %v15268_v63 = vld [vmem:[#allocation22 + $0xbd0] sm:$0xf0]  ;;  %v14999_v49 = vor.u32 %v16764_v32, %v14996_v31 }
 0x661   : > { %10532 = vmatpush.bf16.msrb.mxu2 %v14551_v46  ;;  %10508 = vmatmul.bf16.vlgmr.msrb.gmra.mxu0 %v20347_v3  ;;  %v16832_v0 = vld [vmem:[#allocation22 + $0xbc4] sm:$0xf]  ;;  %v14852_v18 = vld [vmem:[#allocation22 + $0x890] sm:$0xf0]  ;;  %v15143_v34 = vor.u32 %v16800_v44, %v15140_v6 }
 0x662   : > { %10552 = vmatpush.bf16.msra.mxu0 %v14903_v37  ;;  %10565 = vmatpush.bf16.msra.mxu1 %v15031_v54  ;;  %v16728_v47 = vld [vmem:[#allocation22 + $0x884] sm:$0xf]  ;;  %v14980_v41 = vld [vmem:[#allocation22 + $0x990] sm:$0xf0]  ;;  %v15271_v10 = vor.u32 %v16832_v0, %v15268_v63 }
 0x663   : > { %10521 = vmatmul.bf16.vlgmr.msrb.gmra.mxu1 %v20363_v5  ;;  %v16760_v35 = vld [vmem:[#allocation22 + $0x984] sm:$0xf]  ;;  %v14855_v51 = vor.u32 %v16728_v47, %v14852_v18  ;;  %v15124_v42 = vld [vmem:[#allocation22 + $0xab0] sm:$0xf0] }
 0x664   : > { %10546 = vmatpush.bf16.msrb.mxu3 %v14663_v21  ;;  %v16796_v39 = vld [vmem:[#allocation22 + $0xaa4] sm:$0xf]  ;;  %v15252_v37 = vld [vmem:[#allocation22 + $0xbb0] sm:$0xf0]  ;;  %v14983_v27 = vor.u32 %v16760_v35, %v14980_v41 }
 0x665   : > { %10533 = vmatpush.bf16.msrb.mxu2 %v14535_v8  ;;  %v16828_v13 = vld [vmem:[#allocation22 + $0xba4] sm:$0xf]  ;;  %v14836_v12 = vld [vmem:[#allocation22 + $0x870] sm:$0xf0]  ;;  %v15127_v24 = vor.u32 %v16796_v39, %v15124_v42  ;;  %v20556_v19 = vpop.f32.mrf.mxu3 }
 0x666   : > { %10553 = vmatpush.bf16.msra.mxu0 %v14887_v56  ;;  %10566 = vmatpush.bf16.msra.mxu1 %v15015_v57  ;;  %v16724_v61 = vld [vmem:[#allocation22 + $0x864] sm:$0xf]  ;;  %v14964_v58 = vld [vmem:[#allocation22 + $0x970] sm:$0xf0]  ;;  %v15255_v54 = vor.u32 %v16828_v13, %v15252_v37 }
 0x667   : > { %10547 = vmatmul.bf16.vlgmr.msrb.gmra.mxu3 %v20410_v28  ;;  %v16756_v55 = vld [vmem:[#allocation22 + $0x964] sm:$0xf]  ;;  %v14839_v46 = vor.u32 %v16724_v61, %v14836_v12  ;;  %v15108_v36 = vld [vmem:[#allocation22 + $0xa90] sm:$0xf0] }
 0x668   : > { %10591 = vmatpush.bf16.msra.mxu3 %v15287_v52  ;;  %10534 = vmatmul.bf16.vlgmr.msrb.gmra.mxu2 %v20403_v50  ;;  %v16792_v23 = vld [vmem:[#allocation22 + $0xa84] sm:$0xf]  ;;  %v15236_v20 = vld [vmem:[#allocation22 + $0xb90] sm:$0xf0]  ;;  %v14967_v62 = vor.u32 %v16756_v55, %v14964_v58  ;;  %v10277_v52 = vpop.f32.mrf.mxu2 }
 0x669   : > { %10578 = vmatpush.bf16.msra.mxu2 %v15159_v59  ;;  %v16824_v29 = vld [vmem:[#allocation22 + $0xb84] sm:$0xf]  ;;  %v14820_v38 = vld [vmem:[#allocation22 + $0x850] sm:$0xf0]  ;;  %v15111_v56 = vor.u32 %v16792_v23, %v15108_v36 }
 0x66a   : > { %10554 = vmatpush.bf16.msra.mxu0 %v14871_v40  ;;  %10567 = vmatpush.bf16.msra.mxu1 %v14999_v49  ;;  %v16720_v48 = vld [vmem:[#allocation22 + $0x844] sm:$0xf]  ;;  %v14948_v60 = vld [vmem:[#allocation22 + $0x950] sm:$0xf0]  ;;  %v15239_v14 = vor.u32 %v16824_v29, %v15236_v20 }
 0x66b   : > { %v16752_v1 = vld [vmem:[#allocation22 + $0x944] sm:$0xf]  ;;  %v14823_v15 = vor.u32 %v16720_v48, %v14820_v38  ;;  %v15092_v57 = vld [vmem:[#allocation22 + $0xa70] sm:$0xf0] }
 0x66c   : > { %10592 = vmatpush.bf16.msra.mxu3 %v15271_v10  ;;  %v16788_v17 = vld [vmem:[#allocation22 + $0xa64] sm:$0xf]  ;;  %v15220_v21 = vld [vmem:[#allocation22 + $0xb70] sm:$0xf0]  ;;  %v14951_v31 = vor.u32 %v16752_v1, %v14948_v60 }
 0x66d   : > { %10579 = vmatpush.bf16.msra.mxu2 %v15143_v34  ;;  %v16820_v8 = vld [vmem:[#allocation22 + $0xb64] sm:$0xf]  ;;  %v14804_v32 = vld [vmem:[#allocation22 + $0x830] sm:$0xf0]  ;;  %v15095_v40 = vor.u32 %v16788_v17, %v15092_v57 }
 0x66e   : > { %10555 = vmatpush.bf16.msra.mxu0 %v14855_v51  ;;  %10568 = vmatpush.bf16.msra.mxu1 %v14983_v27  ;;  %v16716_v59 = vld [vmem:[#allocation22 + $0x824] sm:$0xf]  ;;  %v14932_v6 = vld [vmem:[#allocation22 + $0x930] sm:$0xf0]  ;;  %v15223_v0 = vor.u32 %v16820_v8, %v15220_v21 }
 0x66f   : > { %v16748_v44 = vld [vmem:[#allocation22 + $0x924] sm:$0xf]  ;;  %v14807_v63 = vor.u32 %v16716_v59, %v14804_v32  ;;  %v15076_v18 = vld [vmem:[#allocation22 + $0xa50] sm:$0xf0] }
 0x670   : > { %10593 = vmatpush.bf16.msra.mxu3 %v15255_v54  ;;  %v16784_v47 = vld [vmem:[#allocation22 + $0xa44] sm:$0xf]  ;;  %v15204_v34 = vld [vmem:[#allocation22 + $0xb50] sm:$0xf0]  ;;  %v14935_v10 = vor.u32 %v16748_v44, %v14932_v6 }
 0x671   : > { %10580 = vmatpush.bf16.msra.mxu2 %v15127_v24  ;;  %v16816_v49 = vld [vmem:[#allocation22 + $0xb44] sm:$0xf]  ;;  %v14788_v41 = vld [vmem:[#allocation22 + $0x810] sm:$0xf0]  ;;  %v15079_v42 = vor.u32 %v16784_v47, %v15076_v18  ;;  %v10290_v24 = vpop.f32.mrf.mxu3 }
 0x672   : > { %10556 = vmatpush.bf16.msra.mxu0 %v14839_v46  ;;  %10569 = vmatpush.bf16.msra.mxu1 %v14967_v62  ;;  %v16712_v35 = vld [vmem:[#allocation22 + $0x804] sm:$0xf]  ;;  %v15412_v39 = vld [vmem:[#allocation22 + $0xcf0] sm:$0xf0]  ;;  %v15207_v12 = vor.u32 %v16816_v49, %v15204_v34  ;;  %v20558_v46 = vpop.f32.mrf.mxu0  ;;  %v20560_v62 = vpop.f32.mrf.mxu1 }
 0x673   : > { %v16868_v51 = vld [vmem:[#allocation22 + $0xce4] sm:$0xf]  ;;  %v14916_v37 = vld [vmem:[#allocation22 + $0x910] sm:$0xf0]  ;;  %v14791_v27 = vor.u32 %v16712_v35, %v14788_v41 }
 0x674   : > { %10594 = vmatpush.bf16.msra.mxu3 %v15239_v14  ;;  %v16744_v13 = vld [vmem:[#allocation22 + $0x904] sm:$0xf]  ;;  %v15540_v55 = vld [vmem:[#allocation22 + $0xdf0] sm:$0xf0]  ;;  %v15415_v23 = vor.u32 %v16868_v51, %v15412_v39 }
 0x675   : > { %10581 = vmatpush.bf16.msra.mxu2 %v15111_v56  ;;  %v16900_v61 = vld [vmem:[#allocation22 + $0xde4] sm:$0xf]  ;;  %v15060_v54 = vld [vmem:[#allocation22 + $0xa30] sm:$0xf0]  ;;  %v14919_v20 = vor.u32 %v16744_v13, %v14916_v37 }
 0x676   : > { %10557 = vmatpush.bf16.msra.mxu0 %v14823_v15  ;;  %10570 = vmatpush.bf16.msra.mxu1 %v14951_v31  ;;  %v16780_v58 = vld [vmem:[#allocation22 + $0xa24] sm:$0xf]  ;;  %v15188_v29 = vld [vmem:[#allocation22 + $0xb30] sm:$0xf0]  ;;  %v15543_v56 = vor.u32 %v16900_v61, %v15540_v55 }
 0x677   : > { %v16812_v36 = vld [vmem:[#allocation22 + $0xb24] sm:$0xf]  ;;  %v15396_v38 = vld [vmem:[#allocation22 + $0xcd0] sm:$0xf0]  ;;  %v15063_v1 = vor.u32 %v16780_v58, %v15060_v54 }
 0x678   : > { %10595 = vmatpush.bf16.msra.mxu3 %v15223_v0  ;;  %v16864_v48 = vld [vmem:[#allocation22 + $0xcc4] sm:$0xf]  ;;  %v15524_v14 = vld [vmem:[#allocation22 + $0xdd0] sm:$0xf0]  ;;  %v15191_v17 = vor.u32 %v16812_v36, %v15188_v29 }
 0x679   : > { %10582 = vmatpush.bf16.msra.mxu2 %v15095_v40  ;;  %v16896_v60 = vld [vmem:[#allocation22 + $0xdc4] sm:$0xf]  ;;  %v15044_v57 = vld [vmem:[#allocation22 + $0xa10] sm:$0xf0]  ;;  %v15399_v59 = vor.u32 %v16864_v48, %v15396_v38 }
 0x67a   : > { %10558 = vmatpush.bf16.msra.mxu0 %v14807_v63  ;;  %10571 = vmatpush.bf16.msra.mxu1 %v14935_v10  ;;  %v16776_v15 = vld [vmem:[#allocation22 + $0xa04] sm:$0xf]  ;;  %v15172_v21 = vld [vmem:[#allocation22 + $0xb10] sm:$0xf0]  ;;  %v15527_v0 = vor.u32 %v16896_v60, %v15524_v14  ;;  %v10303_v35 = vpop.f32.mrf.mxu0 }
 0x67b   : > { %v16808_v8 = vld [vmem:[#allocation22 + $0xb04] sm:$0xf]  ;;  %v15668_v31 = vld [vmem:[#allocation22 + $0xef0] sm:$0xf0]  ;;  %v15047_v63 = vor.u32 %v16776_v15, %v15044_v57 }
 0x67c   : > { %10596 = vmatpush.bf16.msra.mxu3 %v15207_v12  ;;  %v16932_v32 = vld [vmem:[#allocation22 + $0xee4] sm:$0xf]  ;;  %v15796_v40 = vld [vmem:[#allocation22 + $0xff0] sm:$0xf0]  ;;  %v15175_v47 = vor.u32 %v16808_v8, %v15172_v21  ;;  %v10316_v12 = vpop.f32.mrf.mxu1 }
 0x67d   : > { %10583 = vmatpush.bf16.msra.mxu2 %v15079_v42  ;;  %v16964_v52 = vld [vmem:[#allocation22 + $0xfe4] sm:$0xf]  ;;  %v15380_v6 = vld [vmem:[#allocation22 + $0xcb0] sm:$0xf0]  ;;  %v15671_v18 = vor.u32 %v16932_v32, %v15668_v31 }
 0x67e   : > { %10559 = vmatpush.bf16.msra.mxu0 %v14791_v27  ;;  %10572 = vmatpush.bf16.msra.mxu1 %v14919_v20  ;;  %v16860_v44 = vld [vmem:[#allocation22 + $0xca4] sm:$0xf]  ;;  %v15508_v34 = vld [vmem:[#allocation22 + $0xdb0] sm:$0xf0]  ;;  %v15799_v41 = vor.u32 %v16964_v52, %v15796_v40 }
 0x67f   : > { %v16892_v49 = vld [vmem:[#allocation22 + $0xda4] sm:$0xf]  ;;  %v15383_v10 = vor.u32 %v16860_v44, %v15380_v6  ;;  %v15652_v39 = vld [vmem:[#allocation22 + $0xed0] sm:$0xf0]  ;;  %v20566_v60 = vpop.f32.mrf.mxu2  ;;  %v10276_v6 = vadd.f32 %v20554_v2, %v20548_v25 }
 0x680   : > { %10597 = vmatpush.bf16.msra.mxu3 %v15191_v17  ;;  %v16928_v51 = vld [vmem:[#allocation22 + $0xec4] sm:$0xf]  ;;  %v15780_v13 = vld [vmem:[#allocation22 + $0xfd0] sm:$0xf0]  ;;  %v15511_v27 = vor.u32 %v16892_v49, %v15508_v34  ;;  %v20568_v57 = vpop.f32.mrf.mxu3 }
 0x681   : > { %10584 = vmatpush.bf16.msra.mxu2 %v15063_v1  ;;  %10560 = vmatmul.bf16.vlgmr.msra.gmra.mxu0 %v20446_v11  ;;  %v16960_v42 = vld [vmem:[#allocation22 + $0xfc4] sm:$0xf]  ;;  %v15364_v61 = vld [vmem:[#allocation22 + $0xc90] sm:$0xf0]  ;;  %v15655_v24 = vor.u32 %v16928_v51, %v15652_v39  ;;  %v10289_v2 = vadd.f32 %v20556_v19, %v10276_v6 }
 0x682   : > { %10604 = vmatpush.bf16.msrb.mxu0 %v15415_v23  ;;  %10617 = vmatpush.bf16.msrb.mxu1 %v15543_v56  ;;  %v16856_v37 = vld [vmem:[#allocation22 + $0xc84] sm:$0xf]  ;;  %v15492_v58 = vld [vmem:[#allocation22 + $0xd90] sm:$0xf0]  ;;  %v15783_v54 = vor.u32 %v16960_v42, %v15780_v13 }
 0x683   : > { %10573 = vmatmul.bf16.vlgmr.msra.gmra.mxu1 %v20448_v22  ;;  %v16888_v55 = vld [vmem:[#allocation22 + $0xd84] sm:$0xf]  ;;  %v15367_v23 = vor.u32 %v16856_v37, %v15364_v61  ;;  %v15636_v29 = vld [vmem:[#allocation22 + $0xeb0] sm:$0xf0]  ;;  %v10302_v19 = vadd.f32 %v20558_v46, %v10289_v2 }
 0x684   : > { %10598 = vmatpush.bf16.msra.mxu3 %v15175_v47  ;;  %v16924_v36 = vld [vmem:[#allocation22 + $0xea4] sm:$0xf]  ;;  %v15764_v48 = vld [vmem:[#allocation22 + $0xfb0] sm:$0xf0]  ;;  %v15495_v1 = vor.u32 %v16888_v55, %v15492_v58 }
 0x685   : > { %10585 = vmatpush.bf16.msra.mxu2 %v15047_v63  ;;  %v16956_v20 = vld [vmem:[#allocation22 + $0xfa4] sm:$0xf]  ;;  %v15348_v56 = vld [vmem:[#allocation22 + $0xc70] sm:$0xf0]  ;;  %v15639_v14 = vor.u32 %v16924_v36, %v15636_v29  ;;  %v20574_v63 = vpop.f32.mrf.mxu1 }
 0x686   : > { %10605 = vmatpush.bf16.msrb.mxu0 %v15399_v59  ;;  %10618 = vmatpush.bf16.msrb.mxu1 %v15527_v0  ;;  %v16852_v38 = vld [vmem:[#allocation22 + $0xc64] sm:$0xf]  ;;  %v15476_v17 = vld [vmem:[#allocation22 + $0xd70] sm:$0xf0]  ;;  %v15767_v8 = vor.u32 %v16956_v20, %v15764_v48  ;;  %v20572_v0 = vpop.f32.mrf.mxu0 }
 0x687   : > { %10599 = vmatmul.bf16.vlgmr.msra.gmra.mxu3 %v20491_v43  ;;  %v16884_v15 = vld [vmem:[#allocation22 + $0xd64] sm:$0xf]  ;;  %v15351_v21 = vor.u32 %v16852_v38, %v15348_v56  ;;  %v15620_v32 = vld [vmem:[#allocation22 + $0xe90] sm:$0xf0]  ;;  %v10329_v61 = vpop.f32.mrf.mxu2 }
 0x688   : > { %10643 = vmatpush.bf16.msrb.mxu3 %v15799_v41  ;;  %10586 = vmatmul.bf16.vlgmr.msra.gmra.mxu2 %v20489_v33  ;;  %v16920_v59 = vld [vmem:[#allocation22 + $0xe84] sm:$0xf]  ;;  %v15748_v52 = vld [vmem:[#allocation22 + $0xf90] sm:$0xf0]  ;;  %v15479_v47 = vor.u32 %v16884_v15, %v15476_v17  ;;  %v10342_v55 = vpop.f32.mrf.mxu3  ;;  %v13882_v15 = vld [vmem:[#allocation22 + $0xe8] sm:$0xf] }
 0x689   : > { %10630 = vmatpush.bf16.msrb.mxu2 %v15671_v18  ;;  %v16952_v31 = vld [vmem:[#allocation22 + $0xf84] sm:$0xf]  ;;  %v15332_v44 = vld [vmem:[#allocation22 + $0xc50] sm:$0xf0]  ;;  %v15623_v18 = vor.u32 %v16920_v59, %v15620_v32  ;;  %v16487_v17 = vld [vmem:[#allocation22 + $0xf4] sm:$0xf0] }
 0x68a   : > { %10606 = vmatpush.bf16.msrb.mxu0 %v15383_v10  ;;  %10619 = vmatpush.bf16.msrb.mxu1 %v15511_v27  ;;  %v16848_v40 = vld [vmem:[#allocation22 + $0xc44] sm:$0xf]  ;;  %v15460_v34 = vld [vmem:[#allocation22 + $0xd50] sm:$0xf0]  ;;  %v15751_v35 = vor.u32 %v16952_v31, %v15748_v52  ;;  %v14010_v32 = vld [vmem:[#allocation22 + $0x1e8] sm:$0xf] }
 0x68b   : > { %v16880_v49 = vld [vmem:[#allocation22 + $0xd44] sm:$0xf]  ;;  %v15335_v41 = vor.u32 %v16848_v40, %v15332_v44  ;;  %v15604_v51 = vld [vmem:[#allocation22 + $0xe70] sm:$0xf0]  ;;  %v16519_v40 = vld [vmem:[#allocation22 + $0x1f4] sm:$0xf0] }
 0x68c   : > { %10644 = vmatpush.bf16.msrb.mxu3 %v15783_v54  ;;  %v16916_v10 = vld [vmem:[#allocation22 + $0xe64] sm:$0xf]  ;;  %v15732_v42 = vld [vmem:[#allocation22 + $0xf70] sm:$0xf0]  ;;  %v15463_v37 = vor.u32 %v16880_v49, %v15460_v34  ;;  %v10315_v49 = vadd.f32 %v20560_v62, %v10302_v19  ;;  %v14138_v55 = vld [vmem:[#allocation22 + $0x2e8] sm:$0xf] }
 0x68d   : > { %10631 = vmatpush.bf16.msrb.mxu2 %v15655_v24  ;;  %v16948_v39 = vld [vmem:[#allocation22 + $0xf64] sm:$0xf]  ;;  %v15316_v25 = vld [vmem:[#allocation22 + $0xc30] sm:$0xf0]  ;;  %v15607_v12 = vor.u32 %v16916_v10, %v15604_v51  ;;  %v14011_v51 = vor.u32 %v16519_v40, %v14010_v32  ;;  %v13834_v32 = vld [vmem:[#allocation22 + $0x88] sm:$0xf] }
 0x68e   : > { %10607 = vmatpush.bf16.msrb.mxu0 %v15367_v23  ;;  %10620 = vmatpush.bf16.msrb.mxu1 %v15495_v1  ;;  %v16844_v13 = vld [vmem:[#allocation22 + $0xc24] sm:$0xf]  ;;  %v15444_v24 = vld [vmem:[#allocation22 + $0xd30] sm:$0xf0]  ;;  %v15735_v58 = vor.u32 %v16948_v39, %v15732_v42  ;;  %v10355_v56 = vpop.f32.mrf.mxu0  ;;  %v10368_v1 = vpop.f32.mrf.mxu1  ;;  %v13994_v42 = vld [vmem:[#allocation22 + $0x1c8] sm:$0xf]  ;;  %v10328_v2 = vadd.f32 %v20566_v60, %v10315_v49 }
 0x68f   : > { %v16876_v27 = vld [vmem:[#allocation22 + $0xd24] sm:$0xf]  ;;  %v15319_v54 = vor.u32 %v16844_v13, %v15316_v25  ;;  %v15588_v36 = vld [vmem:[#allocation22 + $0xe50] sm:$0xf0]  ;;  %v20579_v10 = vpop.f32.mrf.mxu2  ;;  %v16515_v13 = vld [vmem:[#allocation22 + $0x1d4] sm:$0xf0] }
 0x690   : > { %10645 = vmatpush.bf16.msrb.mxu3 %v15767_v8  ;;  %v16912_v23 = vld [vmem:[#allocation22 + $0xe44] sm:$0xf]  ;;  %v15716_v20 = vld [vmem:[#allocation22 + $0xf50] sm:$0xf0]  ;;  %v13995_v60 = vor.u32 %v16515_v13, %v13994_v42  ;;  %v13978_v56 = vld [vmem:[#allocation22 + $0x1a8] sm:$0xf] }
 0x691   : > { %10632 = vmatpush.bf16.msrb.mxu2 %v15639_v14  ;;  %v16944_v29 = vld [vmem:[#allocation22 + $0xf44] sm:$0xf]  ;;  %v15300_v38 = vld [vmem:[#allocation22 + $0xc10] sm:$0xf0]  ;;  %v15447_v14 = vor.u32 %v16876_v27, %v15444_v24  ;;  %v15591_v8 = vor.u32 %v16912_v23, %v15588_v36  ;;  %v16583_v23 = vld [vmem:[#allocation22 + $0x3f4] sm:$0xf0] }
 0x692   : > { %10608 = vmatpush.bf16.msrb.mxu0 %v15351_v21  ;;  %10621 = vmatpush.bf16.msrb.mxu1 %v15479_v47  ;;  %v16840_v48 = vld [vmem:[#allocation22 + $0xc04] sm:$0xf]  ;;  %v15428_v59 = vld [vmem:[#allocation22 + $0xd10] sm:$0xf0]  ;;  %v15719_v31 = vor.u32 %v16944_v29, %v15716_v20  ;;  %v13883_v47 = vor.u32 %v16487_v17, %v13882_v15  ;;  %v13850_v36 = vld [vmem:[#allocation22 + $0xa8] sm:$0xf] }
 0x693   : > { %v16872_v21 = vld [vmem:[#allocation22 + $0xd04] sm:$0xf]  ;;  %v15303_v52 = vor.u32 %v16840_v48, %v15300_v38  ;;  %v15572_v6 = vld [vmem:[#allocation22 + $0xe30] sm:$0xf0]  ;;  %v16479_v29 = vld [vmem:[#allocation22 + $0xb4] sm:$0xf0]  ;;  %v10341_v48 = vadd.f32 %v20568_v57, %v10328_v2 }
 0x694   : > { %10646 = vmatpush.bf16.msrb.mxu3 %v15751_v35  ;;  %v16908_v44 = vld [vmem:[#allocation22 + $0xe24] sm:$0xf]  ;;  %v15431_v34 = vor.u32 %v16872_v21, %v15428_v59  ;;  %v13866_v35 = vld [vmem:[#allocation22 + $0xc8] sm:$0xf]  ;;  %v15556_v62 = vld [vmem:[#allocation22 + $0xe10] sm:$0xf0]  ;;  %v13851_v15 = vor.u32 %v16479_v29, %v13850_v36 }
 0x695   : > { %10633 = vmatpush.bf16.msrb.mxu2 %v15623_v18  ;;  %v16940_v46 = vld [vmem:[#allocation22 + $0xf24] sm:$0xf]  ;;  %v15700_v18 = vld [vmem:[#allocation22 + $0xf30] sm:$0xf0]  ;;  %v15575_v39 = vor.u32 %v16908_v44, %v15572_v6  ;;  %v16511_v1 = vld [vmem:[#allocation22 + $0x1b4] sm:$0xf0]  ;;  %v10354_v40 = vadd.f32 %v20572_v0, %v10341_v48 }
 0x696   : > { %10609 = vmatpush.bf16.msrb.mxu0 %v15335_v41  ;;  %10622 = vmatpush.bf16.msrb.mxu1 %v15463_v37  ;;  %v16483_v41 = vld [vmem:[#allocation22 + $0xd4] sm:$0xf0]  ;;  %v16904_v25 = vld [vmem:[#allocation22 + $0xe04] sm:$0xf]  ;;  %v20582_v37 = vpop.f32.mrf.mxu3  ;;  %v15703_v61 = vor.u32 %v16940_v46, %v15700_v18  ;;  %v15684_v27 = vld [vmem:[#allocation22 + $0xf10] sm:$0xf0]  ;;  %v13979_v57 = vor.u32 %v16511_v1, %v13978_v56 }
 0x697   : > { %v13867_v24 = vor.u32 %v16483_v41, %v13866_v35  ;;  %v15559_v20 = vor.u32 %v16904_v25, %v15556_v62  ;;  %v14122_v17 = vld [vmem:[#allocation22 + $0x2c8] sm:$0xf]  ;;  %v16579_v59 = vld [vmem:[#allocation22 + $0x3d4] sm:$0xf0]  ;;  %v10367_v13 = vadd.f32 %v20574_v63, %v10354_v40 }
 0x698   : > { %10647 = vmatpush.bf16.msrb.mxu3 %v15735_v58  ;;  %v16551_v58 = vld [vmem:[#allocation22 + $0x2f4] sm:$0xf0]  ;;  %v14250_v21 = vld [vmem:[#allocation22 + $0x3c8] sm:$0xf] }
 0x699   : > { %10634 = vmatpush.bf16.msrb.mxu2 %v15607_v12  ;;  %v16936_v12 = vld [vmem:[#allocation22 + $0xf04] sm:$0xf]  ;;  %v14139_v19 = vor.u32 %v16551_v58, %v14138_v55  ;;  %v16507_v46 = vld [vmem:[#allocation22 + $0x194] sm:$0xf0]  ;;  %v14251_v18 = vor.u32 %v16579_v59, %v14250_v21  ;;  %v14234_v41 = vld [vmem:[#allocation22 + $0x3a8] sm:$0xf] }
 0x69a   : > { %10610 = vmatpush.bf16.msrb.mxu0 %v15319_v54  ;;  %10623 = vmatpush.bf16.msrb.mxu1 %v15447_v14  ;;  %v14266_v54 = vld [vmem:[#allocation22 + $0x3e8] sm:$0xf]  ;;  %v15687_v38 = vor.u32 %v16936_v12, %v15684_v27  ;;  %v16543_v35 = vld [vmem:[#allocation22 + $0x2b4] sm:$0xf0] }
 0x69b   : > { %v14267_v14 = vor.u32 %v16583_v23, %v14266_v54  ;;  %v16471_v42 = vld [vmem:[#allocation22 + $0x74] sm:$0xf0]  ;;  %v13946_v2 = vld [vmem:[#allocation22 + $0x168] sm:$0xf]  ;;  %v10380_v23 = vadd.f32 %v20579_v10, %v10367_v13 }
 0x69c   : > { %10648 = vmatpush.bf16.msrb.mxu3 %v15719_v31  ;;  %v16475_v31 = vld [vmem:[#allocation22 + $0x94] sm:$0xf0]  ;;  %v14090_v55 = vld [vmem:[#allocation22 + $0x288] sm:$0xf] }
 0x69d   : > { %10635 = vmatpush.bf16.msrb.mxu2 %v15591_v8  ;;  %v16547_v8 = vld [vmem:[#allocation22 + $0x2d4] sm:$0xf0]  ;;  %v13835_v49 = vor.u32 %v16475_v31, %v13834_v32  ;;  %v14218_v54 = vld [vmem:[#allocation22 + $0x388] sm:$0xf] }
 0x69e   : > { %10611 = vmatpush.bf16.msrb.mxu0 %v15303_v52  ;;  %10624 = vmatpush.bf16.msrb.mxu1 %v15431_v34  ;;  %v10381_v52 = vpop.f32.mrf.mxu2  ;;  %v10394_v44 = vpop.f32.mrf.mxu3  ;;  %v14123_v6 = vor.u32 %v16547_v8, %v14122_v17  ;;  %v14106_v34 = vld [vmem:[#allocation22 + $0x2a8] sm:$0xf]  ;;  %v16539_v58 = vld [vmem:[#allocation22 + $0x294] sm:$0xf0]  ;;  %v10393_v17 = vadd.f32 %v20582_v37, %v10380_v23 }
 0x69f   : > { %v14107_v25 = vor.u32 %v16543_v35, %v14106_v34  ;;  %v10405_v62 = vpop.f32.mrf.mxu0  ;;  %v16571_v36 = vld [vmem:[#allocation22 + $0x394] sm:$0xf0]  ;;  %v13802_v29 = vld [vmem:[#allocation22 + $0x48] sm:$0xf] }
 0x6a0   : > { %10649 = vmatpush.bf16.msrb.mxu3 %v15703_v61  ;;  %v16503_v61 = vld [vmem:[#allocation22 + $0x174] sm:$0xf0]  ;;  %v10418_v12 = vpop.f32.mrf.mxu1  ;;  %v13930_v48 = vld [vmem:[#allocation22 + $0x148] sm:$0xf]  ;;  %v10406_v32 = vadd.f32 %v10405_v62, %v10393_v17 }
 0x6a1   : > { %10636 = vmatpush.bf16.msrb.mxu2 %v15575_v39  ;;  %10612 = vmatmul.bf16.vlgmr.msrb.gmra.mxu0 %v20534_v53  ;;  %v13818_v39 = vld [vmem:[#allocation22 + $0x68] sm:$0xf]  ;;  %v13947_v63 = vor.u32 %v16503_v61, %v13946_v2  ;;  %v16567_v8 = vld [vmem:[#allocation22 + $0x374] sm:$0xf0] }
 0x6a2   : > { %10656 = vmatpush.bf16.msra.mxu0 %v13883_v47  ;;  %10669 = vmatpush.bf16.msra.mxu1 %v14011_v51  ;;  %v13962_v47 = vld [vmem:[#allocation22 + $0x188] sm:$0xf]  ;;  %v16575_v51 = vld [vmem:[#allocation22 + $0x3b4] sm:$0xf0] }
 0x6a3   : > { %10625 = vmatmul.bf16.vlgmr.msrb.gmra.mxu1 %v20532_v4  ;;  %v13963_v0 = vor.u32 %v16507_v46, %v13962_v47  ;;  %v14235_v27 = vor.u32 %v16575_v51, %v14234_v41  ;;  %v14074_v1 = vld [vmem:[#allocation22 + $0x268] sm:$0xf]  ;;  %v16463_v21 = vld [vmem:[#allocation22 + $0x34] sm:$0xf0] }
 0x6a4   : > { %10650 = vmatpush.bf16.msrb.mxu3 %v15687_v38  ;;  %v16499_v38 = vld [vmem:[#allocation22 + $0x154] sm:$0xf0]  ;;  %v13786_v10 = vld [vmem:[#allocation22 + $0x28] sm:$0xf] }
 0x6a5   : > { %10637 = vmatpush.bf16.msrb.mxu2 %v15559_v20  ;;  %v14091_v20 = vor.u32 %v16539_v58, %v14090_v55  ;;  %v13931_v59 = vor.u32 %v16499_v38, %v13930_v48  ;;  %v13914_v52 = vld [vmem:[#allocation22 + $0x128] sm:$0xf]  ;;  %v13787_v47 = vor.u32 %v16463_v21, %v13786_v10  ;;  %v16563_v37 = vld [vmem:[#allocation22 + $0x354] sm:$0xf0] }
 0x6a6   : > { %10657 = vmatpush.bf16.msra.mxu0 %v13867_v24  ;;  %10670 = vmatpush.bf16.msra.mxu1 %v13995_v60  ;;  %v13819_v24 = vor.u32 %v16471_v42, %v13818_v39  ;;  %v16467_v60 = vld [vmem:[#allocation22 + $0x54] sm:$0xf0]  ;;  %v14058_v46 = vld [vmem:[#allocation22 + $0x248] sm:$0xf]  ;;  %v10419_v42 = vadd.f32 %v10418_v12, %v10406_v32 }
 0x6a7   : > { %10651 = vmatmul.bf16.vlgmr.msrb.gmra.mxu3 %v20540_v7  ;;  %v13803_v56 = vor.u32 %v16467_v60, %v13802_v29  ;;  %v10407_v40 = vpop.f32.mrf.mxu0  ;;  %v13770_v34 = vld [vmem:[#allocation22 + $0x8] sm:$0xf]  ;;  %v16459_v35 = vld [vmem:[#allocation22 + $0x14] sm:$0xf0] }
 0x6a8   : > { %10695 = vmatpush.bf16.msra.mxu3 %v14267_v14  ;;  %10638 = vmatmul.bf16.vlgmr.msrb.gmra.mxu2 %v20538_v30  ;;  %v16535_v14 = vld [vmem:[#allocation22 + $0x274] sm:$0xf0]  ;;  %v10420_v44 = vpop.f32.mrf.mxu1  ;;  %v14394_v51 = vld [vmem:[#allocation22 + $0x4e8] sm:$0xf] }
 0x6a9   : > { %10682 = vmatpush.bf16.msra.mxu2 %v14139_v19  ;;  %v14219_v19 = vor.u32 %v16571_v36, %v14218_v54  ;;  %v14075_v31 = vor.u32 %v16535_v14, %v14074_v1  ;;  %v16615_v39 = vld [vmem:[#allocation22 + $0x4f4] sm:$0xf0]  ;;  %v13898_v13 = vld [vmem:[#allocation22 + $0x108] sm:$0xf] }
 0x6aa   : > { %10658 = vmatpush.bf16.msra.mxu0 %v13851_v15  ;;  %10671 = vmatpush.bf16.msra.mxu1 %v13979_v57  ;;  %v14202_v15 = vld [vmem:[#allocation22 + $0x368] sm:$0xf]  ;;  %v16495_v57 = vld [vmem:[#allocation22 + $0x134] sm:$0xf0]  ;;  %v10444_v62 = vpop.f32.mrf.mxu3  ;;  %v14395_v36 = vor.u32 %v16615_v39, %v14394_v51 }
 0x6ab   : > { %v13915_v41 = vor.u32 %v16495_v57, %v13914_v52  ;;  %v14522_v2 = vld [vmem:[#allocation22 + $0x5e8] sm:$0xf]  ;;  %v10431_v61 = vpop.f32.mrf.mxu2  ;;  %v16647_v55 = vld [vmem:[#allocation22 + $0x5f4] sm:$0xf0] }
 0x6ac   : > { %10696 = vmatpush.bf16.msra.mxu3 %v14251_v18  ;;  %v16531_v18 = vld [vmem:[#allocation22 + $0x254] sm:$0xf0]  ;;  %v14042_v58 = vld [vmem:[#allocation22 + $0x228] sm:$0xf]  ;;  %v10432_v23 = vadd.f32 %v10431_v61, %v10419_v42  ;;  %v14523_v38 = vor.u32 %v16647_v55, %v14522_v2 }
 0x6ad   : > { %10683 = vmatpush.bf16.msra.mxu2 %v14123_v6  ;;  %v14203_v6 = vor.u32 %v16567_v8, %v14202_v15  ;;  %v16527_v54 = vld [vmem:[#allocation22 + $0x234] sm:$0xf0]  ;;  %v14170_v29 = vld [vmem:[#allocation22 + $0x328] sm:$0xf] }
 0x6ae   : > { %10659 = vmatpush.bf16.msra.mxu0 %v13835_v49  ;;  %10672 = vmatpush.bf16.msra.mxu1 %v13963_v0  ;;  %v14186_v49 = vld [vmem:[#allocation22 + $0x348] sm:$0xf]  ;;  %v14059_v0 = vor.u32 %v16531_v18, %v14058_v46  ;;  %v16559_v60 = vld [vmem:[#allocation22 + $0x334] sm:$0xf0]  ;;  %v10445_v48 = vadd.f32 %v10444_v62, %v10432_v23 }
 0x6af   : > { %v16643_v1 = vld [vmem:[#allocation22 + $0x5d4] sm:$0xf0]  ;;  %v14026_v14 = vld [vmem:[#allocation22 + $0x208] sm:$0xf]  ;;  %v14171_v15 = vor.u32 %v16559_v60, %v14170_v29 }
 0x6b0   : > { %10697 = vmatpush.bf16.msra.mxu3 %v14235_v27  ;;  %v14187_v27 = vor.u32 %v16563_v37, %v14186_v49  ;;  %v16523_v17 = vld [vmem:[#allocation22 + $0x214] sm:$0xf0]  ;;  %v14154_v8 = vld [vmem:[#allocation22 + $0x308] sm:$0xf]  ;;  %17266 = vtanh.f32 %v10445_v48 }
 0x6b1   : > { %10684 = vmatpush.bf16.msra.mxu2 %v14107_v25  ;;  %v16491_v25 = vld [vmem:[#allocation22 + $0x114] sm:$0xf0]  ;;  %v14362_v57 = vld [vmem:[#allocation22 + $0x4a8] sm:$0xf] }
 0x6b2   : > { %10660 = vmatpush.bf16.msra.mxu0 %v13819_v24  ;;  %10673 = vmatpush.bf16.msra.mxu1 %v13947_v63  ;;  %v13771_v24 = vor.u32 %v16459_v35, %v13770_v34  ;;  %v13899_v12 = vor.u32 %v16491_v25, %v13898_v13  ;;  %v14378_v63 = vld [vmem:[#allocation22 + $0x4c8] sm:$0xf]  ;;  %v16555_v10 = vld [vmem:[#allocation22 + $0x314] sm:$0xf0]  ;;  %v10446_v46 = vpop.f32.mrf.mxu3 }
 0x6b3   : > { %v16679_v32 = vld [vmem:[#allocation22 + $0x6f4] sm:$0xf0]  ;;  %v14155_v18 = vor.u32 %v16555_v10, %v14154_v8  ;;  %v14490_v37 = vld [vmem:[#allocation22 + $0x5a8] sm:$0xf] }
 0x6b4   : > { %10698 = vmatpush.bf16.msra.mxu3 %v14219_v19  ;;  %v14043_v19 = vor.u32 %v16527_v54, %v14042_v58  ;;  %v16711_v52 = vld [vmem:[#allocation22 + $0x7f4] sm:$0xf0]  ;;  %v14634_v51 = vld [vmem:[#allocation22 + $0x6c8] sm:$0xf] }
 0x6b5   : > { %10685 = vmatpush.bf16.msra.mxu2 %v14091_v20  ;;  %v16611_v20 = vld [vmem:[#allocation22 + $0x4d4] sm:$0xf0]  ;;  %v14762_v42 = vld [vmem:[#allocation22 + $0x7c8] sm:$0xf] }
 0x6b6   : > { %10661 = vmatpush.bf16.msra.mxu0 %v13803_v56  ;;  %10674 = vmatpush.bf16.msra.mxu1 %v13931_v59  ;;  %v14506_v56 = vld [vmem:[#allocation22 + $0x5c8] sm:$0xf]  ;;  %v14379_v21 = vor.u32 %v16611_v20, %v14378_v63  ;;  %v16607_v40 = vld [vmem:[#allocation22 + $0x4b4] sm:$0xf0]  ;;  %v17267_v2 = vpop.eup %17266 }
 0x6b7   : > { %v14650_v59 = vld [vmem:[#allocation22 + $0x6e8] sm:$0xf]  ;;  %v14507_v44 = vor.u32 %v16643_v1, %v14506_v56  ;;  %v16639_v34 = vld [vmem:[#allocation22 + $0x5b4] sm:$0xf0]  ;;  %11076 = vst [vmem:[#allocation28] sm:$0xff] %v17267_v2 }
 0x6b8   : > { %10699 = vmatpush.bf16.msra.mxu3 %v14203_v6  ;;  %v14027_v6 = vor.u32 %v16523_v17, %v14026_v14  ;;  %v14651_v49 = vor.u32 %v16679_v32, %v14650_v59  ;;  %v16675_v39 = vld [vmem:[#allocation22 + $0x6d4] sm:$0xf0]  ;;  %v14346_v13 = vld [vmem:[#allocation22 + $0x488] sm:$0xf]  ;;  %v14491_v61 = vor.u32 %v16639_v34, %v14490_v37 }
 0x6b9   : > { %10686 = vmatpush.bf16.msra.mxu2 %v14075_v31  ;;  %v14778_v31 = vld [vmem:[#allocation22 + $0x7e8] sm:$0xf]  ;;  %v16603_v25 = vld [vmem:[#allocation22 + $0x494] sm:$0xf0]  ;;  %v14635_v62 = vor.u32 %v16675_v39, %v14634_v51 }
 0x6ba   : > { %10662 = vmatpush.bf16.msra.mxu0 %v13787_v47  ;;  %10675 = vmatpush.bf16.msra.mxu1 %v13915_v41  ;;  %v10433_v47 = vpop.f32.mrf.mxu2  ;;  %v14779_v35 = vor.u32 %v16711_v52, %v14778_v31  ;;  %v14363_v41 = vor.u32 %v16607_v40, %v14362_v57  ;;  %v14474_v55 = vld [vmem:[#allocation22 + $0x588] sm:$0xf]  ;;  %v16635_v58 = vld [vmem:[#allocation22 + $0x594] sm:$0xf0]  ;;  %v14347_v23 = vor.u32 %v16603_v25, %v14346_v13 }
 0x6bb   : > { %v16671_v29 = vld [vmem:[#allocation22 + $0x6b4] sm:$0xf0]  ;;  %v14746_v60 = vld [vmem:[#allocation22 + $0x7a8] sm:$0xf]  ;;  %v14475_v48 = vor.u32 %v16635_v58, %v14474_v55 }
 0x6bc   : > { %10700 = vmatpush.bf16.msra.mxu3 %v14187_v27  ;;  %v17282_v27 = vld [vmem:[#allocation24] sm:$0xf]  ;;  %v14330_v63 = vld [vmem:[#allocation22 + $0x468] sm:$0xf]  ;;  %v16599_v20 = vld [vmem:[#allocation22 + $0x474] sm:$0xf0] }
 0x6bd   : > { %10687 = vmatpush.bf16.msra.mxu2 %v14059_v0  ;;  %v16707_v0 = vld [vmem:[#allocation22 + $0x7d4] sm:$0xf0]  ;;  %v14602_v17 = vld [vmem:[#allocation22 + $0x688] sm:$0xf] }
 0x6be   : > { %10663 = vmatpush.bf16.msra.mxu0 %v13771_v24  ;;  %10676 = vmatpush.bf16.msra.mxu1 %v13899_v12  ;;  %v7673_v24 = vperm.slane %v17282_v27, 1  ;;  %v14763_v54 = vor.u32 %v16707_v0, %v14762_v42  ;;  %v16703_v12 = vld [vmem:[#allocation22 + $0x7b4] sm:$0xf0]  ;;  %v10457_v1 = vpop.f32.mrf.mxu0  ;;  %v14730_v10 = vld [vmem:[#allocation22 + $0x788] sm:$0xf] }
 0x6bf   : > { %v16631_v56 = vld [vmem:[#allocation22 + $0x574] sm:$0xf0]  ;;  %v14747_v14 = vor.u32 %v16703_v12, %v14746_v60  ;;  %v14314_v31 = vld [vmem:[#allocation22 + $0x448] sm:$0xf] }
 0x6c0   : > { %10701 = vmatpush.bf16.msra.mxu3 %v14171_v15  ;;  %v14331_v15 = vor.u32 %v16599_v20, %v14330_v63  ;;  %v16667_v8 = vld [vmem:[#allocation22 + $0x694] sm:$0xf0]  ;;  %v10470_v59 = vpop.f32.mrf.mxu1  ;;  %v14714_v34 = vld [vmem:[#allocation22 + $0x768] sm:$0xf] }
 0x6c1   : > { %10688 = vmatpush.bf16.msra.mxu2 %v14043_v19  ;;  %10664 = vmatmul.bf16.vlgmr.msra.gmra.mxu0 %v20827_v26  ;;  %v14458_v19 = vld [vmem:[#allocation22 + $0x568] sm:$0xf]  ;;  %v16699_v32 = vld [vmem:[#allocation22 + $0x794] sm:$0xf0] }
 0x6c2   : > { %10708 = vmatpush.bf16.msrb.mxu0 %v14395_v36  ;;  %10721 = vmatpush.bf16.msrb.mxu1 %v14523_v38  ;;  %v14618_v36 = vld [vmem:[#allocation22 + $0x6a8] sm:$0xf]  ;;  %v16595_v52 = vld [vmem:[#allocation22 + $0x454] sm:$0xf0]  ;;  %v14459_v57 = vor.u32 %v16631_v56, %v14458_v19  ;;  %v14731_v46 = vor.u32 %v16699_v32, %v14730_v10 }
 0x6c3   : > { %10677 = vmatmul.bf16.vlgmr.msra.gmra.mxu1 %v20828_v16  ;;  %v14619_v38 = vor.u32 %v16671_v29, %v14618_v36  ;;  %v16627_v47 = vld [vmem:[#allocation22 + $0x554] sm:$0xf0]  ;;  %v14426_v0 = vld [vmem:[#allocation22 + $0x528] sm:$0xf] }
 0x6c4   : > { %10702 = vmatpush.bf16.msra.mxu3 %v14155_v18  ;;  %v14315_v18 = vor.u32 %v16595_v52, %v14314_v31  ;;  %v16663_v37 = vld [vmem:[#allocation22 + $0x674] sm:$0xf0]  ;;  %v14906_v29 = vld [vmem:[#allocation22 + $0x8e8] sm:$0xf] }
 0x6c5   : > { %10689 = vmatpush.bf16.msra.mxu2 %v14027_v6  ;;  %v14442_v6 = vld [vmem:[#allocation22 + $0x548] sm:$0xf]  ;;  %v16591_v51 = vld [vmem:[#allocation22 + $0x434] sm:$0xf0] }
 0x6c6   : > { %10709 = vmatpush.bf16.msrb.mxu0 %v14379_v21  ;;  %10722 = vmatpush.bf16.msrb.mxu1 %v14507_v44  ;;  %v10458_v21 = vadd.f32 %v10457_v1, %v7673_v24  ;;  %v14603_v44 = vor.u32 %v16667_v8, %v14602_v17  ;;  %v14443_v39 = vor.u32 %v16627_v47, %v14442_v6  ;;  %v16623_v13 = vld [vmem:[#allocation22 + $0x534] sm:$0xf0]  ;;  %v10459_v25 = vpop.f32.mrf.mxu0  ;;  %v14698_v24 = vld [vmem:[#allocation22 + $0x748] sm:$0xf] }
 0x6c7   : > { %10703 = vmatmul.bf16.vlgmr.msra.gmra.mxu3 %v20249_v9  ;;  %v16659_v27 = vld [vmem:[#allocation22 + $0x654] sm:$0xf0]  ;;  %v14427_v36 = vor.u32 %v16623_v13, %v14426_v0  ;;  %v14410_v63 = vld [vmem:[#allocation22 + $0x508] sm:$0xf] }
 0x6c8   : > { %10747 = vmatpush.bf16.msrb.mxu3 %v14779_v35  ;;  %10690 = vmatmul.bf16.vlgmr.msra.gmra.mxu2 %v20829_v45  ;;  %v10471_v40 = vadd.f32 %v10470_v59, %v10458_v21  ;;  %v16695_v35 = vld [vmem:[#allocation22 + $0x774] sm:$0xf0]  ;;  %v10472_v55 = vpop.f32.mrf.mxu1  ;;  %v14682_v21 = vld [vmem:[#allocation22 + $0x728] sm:$0xf] }
 0x6c9   : > { %10734 = vmatpush.bf16.msrb.mxu2 %v14651_v49  ;;  %v14586_v49 = vld [vmem:[#allocation22 + $0x668] sm:$0xf]  ;;  %v14715_v2 = vor.u32 %v16695_v35, %v14714_v34  ;;  %v16691_v58 = vld [vmem:[#allocation22 + $0x754] sm:$0xf0] }
 0x6ca   : > { %10710 = vmatpush.bf16.msrb.mxu0 %v14363_v41  ;;  %10723 = vmatpush.bf16.msrb.mxu1 %v14491_v61  ;;  %v14298_v41 = vld [vmem:[#allocation22 + $0x428] sm:$0xf]  ;;  %v14587_v42 = vor.u32 %v16663_v37, %v14586_v49  ;;  %v16743_v60 = vld [vmem:[#allocation22 + $0x8f4] sm:$0xf0]  ;;  %v14699_v19 = vor.u32 %v16691_v58, %v14698_v24  ;;  %v10496_v8 = vpop.f32.mrf.mxu3 }
 0x6cb   : > { %v14299_v61 = vor.u32 %v16591_v51, %v14298_v41  ;;  %v16619_v20 = vld [vmem:[#allocation22 + $0x514] sm:$0xf0]  ;;  %v14907_v10 = vor.u32 %v16743_v60, %v14906_v29  ;;  %v14890_v31 = vld [vmem:[#allocation22 + $0x8c8] sm:$0xf] }
 0x6cc   : > { %10748 = vmatpush.bf16.msrb.mxu3 %v14763_v54  ;;  %v14282_v54 = vld [vmem:[#allocation22 + $0x408] sm:$0xf]  ;;  %v16775_v1 = vld [vmem:[#allocation22 + $0x9f4] sm:$0xf0]  ;;  %v14411_v32 = vor.u32 %v16619_v20, %v14410_v63 }
 0x6cd   : > { %10735 = vmatpush.bf16.msrb.mxu2 %v14635_v62  ;;  %v14570_v62 = vld [vmem:[#allocation22 + $0x648] sm:$0xf]  ;;  %v16687_v59 = vld [vmem:[#allocation22 + $0x734] sm:$0xf0] }
 0x6ce   : > { %10711 = vmatpush.bf16.msrb.mxu0 %v14347_v23  ;;  %10724 = vmatpush.bf16.msrb.mxu1 %v14475_v48  ;;  %v16587_v23 = vld [vmem:[#allocation22 + $0x414] sm:$0xf0]  ;;  %v14571_v12 = vor.u32 %v16659_v27, %v14570_v62  ;;  %v15034_v48 = vld [vmem:[#allocation22 + $0x9e8] sm:$0xf]  ;;  %v14683_v49 = vor.u32 %v16687_v59, %v14682_v21 }
 0x6cf   : > { %v14283_v56 = vor.u32 %v16587_v23, %v14282_v54  ;;  %v16739_v52 = vld [vmem:[#allocation22 + $0x8d4] sm:$0xf0]  ;;  %v15018_v47 = vld [vmem:[#allocation22 + $0x9c8] sm:$0xf] }
 0x6d0   : > { %10749 = vmatpush.bf16.msrb.mxu3 %v14747_v14  ;;  %v14554_v14 = vld [vmem:[#allocation22 + $0x628] sm:$0xf]  ;;  %v16683_v34 = vld [vmem:[#allocation22 + $0x714] sm:$0xf0]  ;;  %v14891_v35 = vor.u32 %v16739_v52, %v14890_v31 }
 0x6d1   : > { %10736 = vmatpush.bf16.msrb.mxu2 %v14619_v38  ;;  %v10483_v38 = vpop.f32.mrf.mxu2  ;;  %v14666_v37 = vld [vmem:[#allocation22 + $0x708] sm:$0xf]  ;;  %v16807_v51 = vld [vmem:[#allocation22 + $0xaf4] sm:$0xf0] }
 0x6d2   : > { %10712 = vmatpush.bf16.msrb.mxu0 %v14331_v15  ;;  %10725 = vmatpush.bf16.msrb.mxu1 %v14459_v57  ;;  %v16655_v15 = vld [vmem:[#allocation22 + $0x634] sm:$0xf0]  ;;  %v10484_v17 = vadd.f32 %v10483_v38, %v10471_v40  ;;  %v15162_v41 = vld [vmem:[#allocation22 + $0xae8] sm:$0xf]  ;;  %v14667_v62 = vor.u32 %v16683_v34, %v14666_v37  ;;  %v10498_v58 = vpop.f32.mrf.mxu3 }
 0x6d3   : > { %v14555_v6 = vor.u32 %v16655_v15, %v14554_v14  ;;  %v16651_v40 = vld [vmem:[#allocation22 + $0x614] sm:$0xf0]  ;;  %v14874_v0 = vld [vmem:[#allocation22 + $0x8a8] sm:$0xf]  ;;  %v15163_v27 = vor.u32 %v16807_v51, %v15162_v41 }
 0x6d4   : > { %10750 = vmatpush.bf16.msrb.mxu3 %v14731_v46  ;;  %v20597_v57 = vadd.f32 %v10496_v8, %v10484_v17  ;;  %v16771_v46 = vld [vmem:[#allocation22 + $0x9d4] sm:$0xf0]  ;;  %v15002_v24 = vld [vmem:[#allocation22 + $0x9a8] sm:$0xf] }
 0x6d5   : > { %10737 = vmatpush.bf16.msrb.mxu2 %v14603_v44  ;;  %v15035_v44 = vor.u32 %v16775_v1, %v15034_v48  ;;  %v16735_v13 = vld [vmem:[#allocation22 + $0x8b4] sm:$0xf0]  ;;  %v15019_v25 = vor.u32 %v16771_v46, %v15018_v47  ;;  %v15274_v60 = vld [vmem:[#allocation22 + $0xbc8] sm:$0xf] }
 0x6d6   : > { %10713 = vmatpush.bf16.msrb.mxu0 %v14315_v18  ;;  %10726 = vmatpush.bf16.msrb.mxu1 %v14443_v39  ;;  %v14538_v18 = vld [vmem:[#allocation22 + $0x608] sm:$0xf]  ;;  %v16767_v55 = vld [vmem:[#allocation22 + $0x9b4] sm:$0xf0]  ;;  %v14875_v23 = vor.u32 %v16735_v13, %v14874_v0 }
 0x6d7   : > { %v15290_v39 = vld [vmem:[#allocation22 + $0xbe8] sm:$0xf]  ;;  %v16803_v29 = vld [vmem:[#allocation22 + $0xad4] sm:$0xf0]  ;;  %v15003_v48 = vor.u32 %v16767_v55, %v15002_v24 }
 0x6d8   : > { %10751 = vmatpush.bf16.msrb.mxu3 %v14715_v2  ;;  %v14539_v2 = vor.u32 %v16651_v40, %v14538_v18  ;;  %v14858_v63 = vld [vmem:[#allocation22 + $0x888] sm:$0xf]  ;;  %v16731_v20 = vld [vmem:[#allocation22 + $0x894] sm:$0xf0] }
 0x6d9   : > { %10738 = vmatpush.bf16.msrb.mxu2 %v14587_v42  ;;  %v16839_v42 = vld [vmem:[#allocation22 + $0xbf4] sm:$0xf0]  ;;  %v14859_v14 = vor.u32 %v16731_v20, %v14858_v63  ;;  %v15130_v15 = vld [vmem:[#allocation22 + $0xaa8] sm:$0xf] }
 0x6da   : > { %10714 = vmatpush.bf16.msrb.mxu0 %v14299_v61  ;;  %10727 = vmatpush.bf16.msrb.mxu1 %v14427_v36  ;;  %v10485_v61 = vpop.f32.mrf.mxu2  ;;  %v15291_v54 = vor.u32 %v16839_v42, %v15290_v39  ;;  %v15146_v36 = vld [vmem:[#allocation22 + $0xac8] sm:$0xf]  ;;  %v16799_v17 = vld [vmem:[#allocation22 + $0xab4] sm:$0xf0] }
 0x6db   : > { %v15147_v38 = vor.u32 %v16803_v29, %v15146_v36  ;;  %v15258_v8 = vld [vmem:[#allocation22 + $0xba8] sm:$0xf]  ;;  %v16727_v59 = vld [vmem:[#allocation22 + $0x874] sm:$0xf0]  ;;  %v15131_v31 = vor.u32 %v16799_v17, %v15130_v15 }
 0x6dc   : > { %10752 = vmatpush.bf16.msrb.mxu3 %v14699_v19  ;;  %v14986_v19 = vld [vmem:[#allocation22 + $0x988] sm:$0xf]  ;;  %v16827_v34 = vld [vmem:[#allocation22 + $0xb94] sm:$0xf0] }
 0x6dd   : > { %10739 = vmatpush.bf16.msrb.mxu2 %v14571_v12  ;;  %v16835_v12 = vld [vmem:[#allocation22 + $0xbd4] sm:$0xf0]  ;;  %v14842_v21 = vld [vmem:[#allocation22 + $0x868] sm:$0xf] }
 0x6de   : > { %10715 = vmatpush.bf16.msrb.mxu0 %v14283_v56  ;;  %10728 = vmatpush.bf16.msrb.mxu1 %v14411_v32  ;;  %v16763_v56 = vld [vmem:[#allocation22 + $0x994] sm:$0xf0]  ;;  %v15275_v1 = vor.u32 %v16835_v12, %v15274_v60  ;;  %v14970_v52 = vld [vmem:[#allocation22 + $0x968] sm:$0xf]  ;;  %v14843_v46 = vor.u32 %v16727_v59, %v14842_v21 }
 0x6df   : > { %v14987_v32 = vor.u32 %v16763_v56, %v14986_v19  ;;  %v15114_v18 = vld [vmem:[#allocation22 + $0xa88] sm:$0xf]  ;;  %v16723_v41 = vld [vmem:[#allocation22 + $0x854] sm:$0xf0] }
 0x6e0   : > { %10753 = vmatpush.bf16.msrb.mxu3 %v14683_v49  ;;  %v16795_v49 = vld [vmem:[#allocation22 + $0xa94] sm:$0xf0]  ;;  %v15242_v40 = vld [vmem:[#allocation22 + $0xb88] sm:$0xf]  ;;  %v20605_v37 = vpop.f32.mrf.mxu1 }
 0x6e1   : > { %10740 = vmatpush.bf16.msrb.mxu2 %v14555_v6  ;;  %10716 = vmatmul.bf16.vlgmr.msrb.gmra.mxu0 %v20347_v3  ;;  %v20603_v6 = vpop.f32.mrf.mxu0  ;;  %v15115_v39 = vor.u32 %v16795_v49, %v15114_v18  ;;  %v14954_v42 = vld [vmem:[#allocation22 + $0x948] sm:$0xf]  ;;  %v16755_v0 = vld [vmem:[#allocation22 + $0x954] sm:$0xf0]  ;;  %v15243_v13 = vor.u32 %v16827_v34, %v15242_v40 }
 0x6e2   : > { %10760 = vmatpush.bf16.msra.mxu0 %v14907_v10  ;;  %10773 = vmatpush.bf16.msra.mxu1 %v15035_v44  ;;  %v16831_v10 = vld [vmem:[#allocation22 + $0xbb4] sm:$0xf0]  ;;  %v14810_v24 = vld [vmem:[#allocation22 + $0x828] sm:$0xf]  ;;  %v14955_v58 = vor.u32 %v16755_v0, %v14954_v42 }
 0x6e3   : > { %10729 = vmatmul.bf16.vlgmr.msrb.gmra.mxu1 %v20363_v5  ;;  %v16759_v44 = vld [vmem:[#allocation22 + $0x974] sm:$0xf0]  ;;  %v15259_v47 = vor.u32 %v16831_v10, %v15258_v8  ;;  %v15082_v63 = vld [vmem:[#allocation22 + $0xa48] sm:$0xf] }
 0x6e4   : > { %10754 = vmatpush.bf16.msrb.mxu3 %v14667_v62  ;;  %v14971_v51 = vor.u32 %v16759_v44, %v14970_v52  ;;  %v16791_v61 = vld [vmem:[#allocation22 + $0xa74] sm:$0xf0]  ;;  %v15226_v62 = vld [vmem:[#allocation22 + $0xb68] sm:$0xf] }
 0x6e5   : > { %10741 = vmatpush.bf16.msrb.mxu2 %v14539_v2  ;;  %v15098_v2 = vld [vmem:[#allocation22 + $0xa68] sm:$0xf]  ;;  %v16719_v55 = vld [vmem:[#allocation22 + $0x834] sm:$0xf0] }
 0x6e6   : > { %10761 = vmatpush.bf16.msra.mxu0 %v14891_v35  ;;  %10774 = vmatpush.bf16.msra.mxu1 %v15019_v25  ;;  %v14826_v35 = vld [vmem:[#allocation22 + $0x848] sm:$0xf]  ;;  %v16751_v36 = vld [vmem:[#allocation22 + $0x934] sm:$0xf0]  ;;  %v14811_v12 = vor.u32 %v16719_v55, %v14810_v24 }
 0x6e7   : > { %10755 = vmatmul.bf16.vlgmr.msrb.gmra.mxu3 %v20410_v28  ;;  %v14827_v25 = vor.u32 %v16723_v41, %v14826_v35  ;;  %v16787_v20 = vld [vmem:[#allocation22 + $0xa54] sm:$0xf0]  ;;  %v14794_v56 = vld [vmem:[#allocation22 + $0x808] sm:$0xf] }
 0x6e8   : > { %10799 = vmatpush.bf16.msra.mxu3 %v15291_v54  ;;  %10742 = vmatmul.bf16.vlgmr.msrb.gmra.mxu2 %v20403_v50  ;;  %v15099_v54 = vor.u32 %v16791_v61, %v15098_v2  ;;  %v16819_v19 = vld [vmem:[#allocation22 + $0xb54] sm:$0xf0]  ;;  %v15418_v15 = vld [vmem:[#allocation22 + $0xce8] sm:$0xf]  ;;  %v15083_v8 = vor.u32 %v16787_v20, %v15082_v63 }
 0x6e9   : > { %10786 = vmatpush.bf16.msra.mxu2 %v15163_v27  ;;  %v16823_v27 = vld [vmem:[#allocation22 + $0xb74] sm:$0xf0]  ;;  %v10511_v29 = vpop.f32.mrf.mxu0  ;;  %v14922_v10 = vld [vmem:[#allocation22 + $0x908] sm:$0xf] }
 0x6ea   : > { %10762 = vmatpush.bf16.msra.mxu0 %v14875_v23  ;;  %10775 = vmatpush.bf16.msra.mxu1 %v15003_v48  ;;  %v14938_v23 = vld [vmem:[#allocation22 + $0x928] sm:$0xf]  ;;  %v15227_v60 = vor.u32 %v16823_v27, %v15226_v62  ;;  %v16871_v17 = vld [vmem:[#allocation22 + $0xcf4] sm:$0xf0]  ;;  %v20609_v18 = vpop.f32.mrf.mxu3 }
 0x6eb   : > { %v15210_v48 = vld [vmem:[#allocation22 + $0xb48] sm:$0xf]  ;;  %v16747_v21 = vld [vmem:[#allocation22 + $0x914] sm:$0xf0]  ;;  %v15419_v49 = vor.u32 %v16871_v17, %v15418_v15 }
 0x6ec   : > { %10800 = vmatpush.bf16.msra.mxu3 %v15275_v1  ;;  %v16715_v1 = vld [vmem:[#allocation22 + $0x814] sm:$0xf0]  ;;  %v15546_v59 = vld [vmem:[#allocation22 + $0xde8] sm:$0xf]  ;;  %v14923_v35 = vor.u32 %v16747_v21, %v14922_v10 }
 0x6ed   : > { %10787 = vmatpush.bf16.msra.mxu2 %v15147_v38  ;;  %v10524_v38 = vpop.f32.mrf.mxu1  ;;  %v14795_v52 = vor.u32 %v16715_v1, %v14794_v56  ;;  %v16903_v44 = vld [vmem:[#allocation22 + $0xdf4] sm:$0xf0]  ;;  %v15194_v40 = vld [vmem:[#allocation22 + $0xb28] sm:$0xf] }
 0x6ee   : > { %10763 = vmatpush.bf16.msra.mxu0 %v14859_v14  ;;  %10776 = vmatpush.bf16.msra.mxu1 %v14987_v32  ;;  %v14939_v14 = vor.u32 %v16751_v36, %v14938_v23  ;;  %v20607_v32 = vpop.f32.mrf.mxu2  ;;  %v16815_v34 = vld [vmem:[#allocation22 + $0xb34] sm:$0xf0]  ;;  %v15402_v41 = vld [vmem:[#allocation22 + $0xcc8] sm:$0xf] }
 0x6ef   : > { %v15530_v0 = vld [vmem:[#allocation22 + $0xdc8] sm:$0xf]  ;;  %v15195_v2 = vor.u32 %v16815_v34, %v15194_v40  ;;  %v16779_v61 = vld [vmem:[#allocation22 + $0xa14] sm:$0xf0] }
 0x6f0   : > { %10801 = vmatpush.bf16.msra.mxu3 %v15259_v47  ;;  %v15066_v47 = vld [vmem:[#allocation22 + $0xa28] sm:$0xf]  ;;  %v16811_v27 = vld [vmem:[#allocation22 + $0xb14] sm:$0xf0] }
 0x6f1   : > { %10788 = vmatpush.bf16.msra.mxu2 %v15131_v31  ;;  %v15211_v31 = vor.u32 %v16819_v19, %v15210_v48  ;;  %v15178_v62 = vld [vmem:[#allocation22 + $0xb08] sm:$0xf]  ;;  %v16967_v23 = vld [vmem:[#allocation22 + $0xff4] sm:$0xf0] }
 0x6f2   : > { %10764 = vmatpush.bf16.msra.mxu0 %v14843_v46  ;;  %10777 = vmatpush.bf16.msra.mxu1 %v14971_v51  ;;  %v16783_v46 = vld [vmem:[#allocation22 + $0xa34] sm:$0xf0]  ;;  %v15674_v55 = vld [vmem:[#allocation22 + $0xee8] sm:$0xf]  ;;  %v15179_v20 = vor.u32 %v16811_v27, %v15178_v62  ;;  %v10550_v56 = vpop.f32.mrf.mxu3 }
 0x6f3   : > { %v16867_v51 = vld [vmem:[#allocation22 + $0xcd4] sm:$0xf0]  ;;  %v15067_v42 = vor.u32 %v16783_v46, %v15066_v47  ;;  %v15386_v36 = vld [vmem:[#allocation22 + $0xca8] sm:$0xf] }
 0x6f4   : > { %10802 = vmatpush.bf16.msra.mxu3 %v15243_v13  ;;  %v16899_v13 = vld [vmem:[#allocation22 + $0xdd4] sm:$0xf0]  ;;  %v15403_v24 = vor.u32 %v16867_v51, %v15402_v41  ;;  %v15514_v38 = vld [vmem:[#allocation22 + $0xda8] sm:$0xf] }
 0x6f5   : > { %10789 = vmatpush.bf16.msra.mxu2 %v15115_v39  ;;  %v15547_v39 = vor.u32 %v16903_v44, %v15546_v59  ;;  %v16863_v29 = vld [vmem:[#allocation22 + $0xcb4] sm:$0xf0]  ;;  %v15658_v15 = vld [vmem:[#allocation22 + $0xec8] sm:$0xf] }
 0x6f6   : > { %10765 = vmatpush.bf16.msra.mxu0 %v14827_v25  ;;  %10778 = vmatpush.bf16.msra.mxu1 %v14955_v58  ;;  %v15050_v25 = vld [vmem:[#allocation22 + $0xa08] sm:$0xf]  ;;  %v16935_v58 = vld [vmem:[#allocation22 + $0xef4] sm:$0xf0]  ;;  %v10537_v63 = vpop.f32.mrf.mxu2 }
 0x6f7   : > { %v15675_v48 = vor.u32 %v16935_v58, %v15674_v55  ;;  %v16895_v19 = vld [vmem:[#allocation22 + $0xdb4] sm:$0xf0]  ;;  %v15370_v21 = vld [vmem:[#allocation22 + $0xc88] sm:$0xf] }
 0x6f8   : > { %10803 = vmatpush.bf16.msra.mxu3 %v15227_v60  ;;  %v15531_v60 = vor.u32 %v16899_v13, %v15530_v0  ;;  %v16931_v17 = vld [vmem:[#allocation22 + $0xed4] sm:$0xf0]  ;;  %v15498_v44 = vld [vmem:[#allocation22 + $0xd88] sm:$0xf] }
 0x6f9   : > { %10790 = vmatpush.bf16.msra.mxu2 %v15099_v54  ;;  %v15802_v54 = vld [vmem:[#allocation22 + $0xfe8] sm:$0xf]  ;;  %v16963_v10 = vld [vmem:[#allocation22 + $0xfd4] sm:$0xf0] }
 0x6fa   : > { %10766 = vmatpush.bf16.msra.mxu0 %v14811_v12  ;;  %10779 = vmatpush.bf16.msra.mxu1 %v14939_v14  ;;  %v15051_v12 = vor.u32 %v16779_v61, %v15050_v25  ;;  %v15803_v1 = vor.u32 %v16967_v23, %v15802_v54  ;;  %v15387_v14 = vor.u32 %v16863_v29, %v15386_v36  ;;  %v16859_v59 = vld [vmem:[#allocation22 + $0xc94] sm:$0xf0]  ;;  %v15642_v40 = vld [vmem:[#allocation22 + $0xea8] sm:$0xf] }
 0x6fb   : > { %v16891_v47 = vld [vmem:[#allocation22 + $0xd94] sm:$0xf0]  ;;  %v15354_v51 = vld [vmem:[#allocation22 + $0xc68] sm:$0xf] }
 0x6fc   : > { %10804 = vmatpush.bf16.msra.mxu3 %v15211_v31  ;;  %v15515_v31 = vor.u32 %v16895_v19, %v15514_v38  ;;  %v16927_v34 = vld [vmem:[#allocation22 + $0xeb4] sm:$0xf0]  ;;  %v15482_v13 = vld [vmem:[#allocation22 + $0xd68] sm:$0xf] }
 0x6fd   : > { %10791 = vmatpush.bf16.msra.mxu2 %v15083_v8  ;;  %v15786_v8 = vld [vmem:[#allocation22 + $0xfc8] sm:$0xf]  ;;  %v16959_v41 = vld [vmem:[#allocation22 + $0xfb4] sm:$0xf0]  ;;  %v15643_v0 = vor.u32 %v16927_v34, %v15642_v40 }
 0x6fe   : > { %10767 = vmatpush.bf16.msra.mxu0 %v14795_v52  ;;  %10780 = vmatpush.bf16.msra.mxu1 %v14923_v35  ;;  %v15659_v52 = vor.u32 %v16931_v17, %v15658_v15  ;;  %v15787_v46 = vor.u32 %v16963_v10, %v15786_v8  ;;  %v15770_v35 = vld [vmem:[#allocation22 + $0xfa8] sm:$0xf]  ;;  %v16887_v25 = vld [vmem:[#allocation22 + $0xd74] sm:$0xf0] }
 0x6ff   : > { %v15771_v61 = vor.u32 %v16959_v41, %v15770_v35  ;;  %v15626_v27 = vld [vmem:[#allocation22 + $0xe88] sm:$0xf]  ;;  %v16955_v54 = vld [vmem:[#allocation22 + $0xf94] sm:$0xf0]  ;;  %v15483_v29 = vor.u32 %v16887_v25, %v15482_v13  ;;  %v16517_v25 = vld [vmem:[#allocation22 + $0x1ec] sm:$0xf] }
 0x700   : > { %10805 = vmatpush.bf16.msra.mxu3 %v15195_v2  ;;  %v20615_v2 = vpop.f32.mrf.mxu0  ;;  %v15754_v55 = vld [vmem:[#allocation22 + $0xf88] sm:$0xf]  ;;  %v20617_v58 = vpop.f32.mrf.mxu1  ;;  %v16851_v36 = vld [vmem:[#allocation22 + $0xc54] sm:$0xf0] }
 0x701   : > { %10792 = vmatpush.bf16.msra.mxu2 %v15067_v42  ;;  %10768 = vmatmul.bf16.vlgmr.msra.gmra.mxu0 %v20446_v11  ;;  %v15499_v42 = vor.u32 %v16891_v47, %v15498_v44  ;;  %v15338_v23 = vld [vmem:[#allocation22 + $0xc48] sm:$0xf]  ;;  %v16883_v63 = vld [vmem:[#allocation22 + $0xd54] sm:$0xf0] }
 0x702   : > { %10812 = vmatpush.bf16.msrb.mxu0 %v15419_v49  ;;  %10825 = vmatpush.bf16.msrb.mxu1 %v15547_v39  ;;  %v15371_v49 = vor.u32 %v16859_v59, %v15370_v21  ;;  %v16855_v39 = vld [vmem:[#allocation22 + $0xc74] sm:$0xf0]  ;;  %v15610_v38 = vld [vmem:[#allocation22 + $0xe68] sm:$0xf] }
 0x703   : > { %10781 = vmatmul.bf16.vlgmr.msra.gmra.mxu1 %v20448_v22  ;;  %v15355_v62 = vor.u32 %v16855_v39, %v15354_v51  ;;  %v16919_v19 = vld [vmem:[#allocation22 + $0xe74] sm:$0xf0]  ;;  %v15738_v56 = vld [vmem:[#allocation22 + $0xf68] sm:$0xf]  ;;  %v16485_v51 = vld [vmem:[#allocation22 + $0xec] sm:$0xf] }
 0x704   : > { %10806 = vmatpush.bf16.msra.mxu3 %v15179_v20  ;;  %v15755_v20 = vor.u32 %v16955_v54, %v15754_v55  ;;  %v16847_v15 = vld [vmem:[#allocation22 + $0xc34] sm:$0xf0]  ;;  %v15611_v8 = vor.u32 %v16919_v19, %v15610_v38  ;;  %v15450_v10 = vld [vmem:[#allocation22 + $0xd28] sm:$0xf]  ;;  %v13884_v39 = vld [vmem:[#allocation22 + $0xf8] sm:$0xf0] }
 0x705   : > { %10793 = vmatpush.bf16.msra.mxu2 %v15051_v12  ;;  %v15466_v12 = vld [vmem:[#allocation22 + $0xd48] sm:$0xf]  ;;  %v16879_v21 = vld [vmem:[#allocation22 + $0xd34] sm:$0xf0]  ;;  %v14012_v55 = vld [vmem:[#allocation22 + $0x1f8] sm:$0xf0] }
 0x706   : > { %10813 = vmatpush.bf16.msrb.mxu0 %v15403_v24  ;;  %10826 = vmatpush.bf16.msrb.mxu1 %v15531_v60  ;;  %v16923_v24 = vld [vmem:[#allocation22 + $0xe94] sm:$0xf0]  ;;  %v15467_v17 = vor.u32 %v16883_v63, %v15466_v12  ;;  %v15594_v44 = vld [vmem:[#allocation22 + $0xe48] sm:$0xf]  ;;  %v15451_v41 = vor.u32 %v16879_v21, %v15450_v10  ;;  %v16513_v38 = vld [vmem:[#allocation22 + $0x1cc] sm:$0xf] }
 0x707   : > { %10807 = vmatmul.bf16.vlgmr.msra.gmra.mxu3 %v20491_v43  ;;  %v15627_v60 = vor.u32 %v16923_v24, %v15626_v27  ;;  %v16915_v47 = vld [vmem:[#allocation22 + $0xe54] sm:$0xf0]  ;;  %v15306_v34 = vld [vmem:[#allocation22 + $0xc08] sm:$0xf]  ;;  %v13996_v19 = vld [vmem:[#allocation22 + $0x1d8] sm:$0xf0] }
 0x708   : > { %10851 = vmatpush.bf16.msrb.mxu3 %v15803_v1  ;;  %10794 = vmatmul.bf16.vlgmr.msra.gmra.mxu2 %v20489_v33  ;;  %v16951_v1 = vld [vmem:[#allocation22 + $0xf74] sm:$0xf0]  ;;  %v10563_v59 = vpop.f32.mrf.mxu0  ;;  %v15578_v54 = vld [vmem:[#allocation22 + $0xe28] sm:$0xf]  ;;  %v16549_v21 = vld [vmem:[#allocation22 + $0x2ec] sm:$0xf] }
 0x709   : > { %10838 = vmatpush.bf16.msrb.mxu2 %v15675_v48  ;;  %v15339_v48 = vor.u32 %v16851_v36, %v15338_v23  ;;  %v16947_v40 = vld [vmem:[#allocation22 + $0xf54] sm:$0xf0]  ;;  %v14140_v59 = vld [vmem:[#allocation22 + $0x2f8] sm:$0xf0] }
 0x70a   : > { %10814 = vmatpush.bf16.msrb.mxu0 %v15387_v14  ;;  %10827 = vmatpush.bf16.msrb.mxu1 %v15515_v31  ;;  %v15322_v14 = vld [vmem:[#allocation22 + $0xc28] sm:$0xf]  ;;  %v15739_v31 = vor.u32 %v16951_v1, %v15738_v56  ;;  %v16843_v35 = vld [vmem:[#allocation22 + $0xc14] sm:$0xf0]  ;;  %v20623_v36 = vpop.f32.mrf.mxu3 }
 0x70b   : > { %v16875_v13 = vld [vmem:[#allocation22 + $0xd14] sm:$0xf0]  ;;  %v15307_v24 = vor.u32 %v16843_v35, %v15306_v34  ;;  %v15562_v56 = vld [vmem:[#allocation22 + $0xe08] sm:$0xf]  ;;  %v14143_v35 = vor.u32 %v16549_v21, %v14140_v59  ;;  %v16537_v21 = vld [vmem:[#allocation22 + $0x28c] sm:$0xf] }
 0x70c   : > { %10852 = vmatpush.bf16.msrb.mxu3 %v15787_v46  ;;  %v15722_v46 = vld [vmem:[#allocation22 + $0xf48] sm:$0xf]  ;;  %v16911_v23 = vld [vmem:[#allocation22 + $0xe34] sm:$0xf0]  ;;  %v14092_v59 = vld [vmem:[#allocation22 + $0x298] sm:$0xf0] }
 0x70d   : > { %10839 = vmatpush.bf16.msrb.mxu2 %v15659_v52  ;;  %v15323_v52 = vor.u32 %v16847_v15, %v15322_v14  ;;  %v15723_v27 = vor.u32 %v16947_v40, %v15722_v46  ;;  %v16943_v12 = vld [vmem:[#allocation22 + $0xf34] sm:$0xf0]  ;;  %v13852_v46 = vld [vmem:[#allocation22 + $0xb8] sm:$0xf0] }
 0x70e   : > { %10815 = vmatpush.bf16.msrb.mxu0 %v15371_v49  ;;  %10828 = vmatpush.bf16.msrb.mxu1 %v15499_v42  ;;  %v10576_v49 = vpop.f32.mrf.mxu1  ;;  %v15595_v42 = vor.u32 %v16915_v47, %v15594_v44  ;;  %v16907_v15 = vld [vmem:[#allocation22 + $0xe14] sm:$0xf0]  ;;  %v14268_v44 = vld [vmem:[#allocation22 + $0x3f8] sm:$0xf0]  ;;  %v16477_v47 = vld [vmem:[#allocation22 + $0xac] sm:$0xf] }
 0x70f   : > { %v15563_v49 = vor.u32 %v16907_v15, %v15562_v56  ;;  %v13948_v15 = vld [vmem:[#allocation22 + $0x178] sm:$0xf0] }
 0x710   : > { %10853 = vmatpush.bf16.msrb.mxu3 %v15771_v61  ;;  %v10510_v61 = vadd.f32 %v20603_v6, %v20597_v57  ;;  %v14015_v57 = vor.u32 %v16517_v25, %v14012_v55  ;;  %v15579_v6 = vor.u32 %v16911_v23, %v15578_v54  ;;  %v16577_v25 = vld [vmem:[#allocation22 + $0x3cc] sm:$0xf]  ;;  %v13836_v55 = vld [vmem:[#allocation22 + $0x98] sm:$0xf0] }
 0x711   : > { %10840 = vmatpush.bf16.msrb.mxu2 %v15643_v0  ;;  %v15434_v0 = vld [vmem:[#allocation22 + $0xd08] sm:$0xf] }
 0x712   : > { %10816 = vmatpush.bf16.msrb.mxu0 %v15355_v62  ;;  %10829 = vmatpush.bf16.msrb.mxu1 %v15483_v29  ;;  %v20621_v62 = vpop.f32.mrf.mxu2  ;;  %v13887_v29 = vor.u32 %v16485_v51, %v13884_v39  ;;  %v15435_v63 = vor.u32 %v16875_v13, %v15434_v0  ;;  %v10523_v1 = vadd.f32 %v20605_v37, %v10510_v61  ;;  %v13980_v51 = vld [vmem:[#allocation22 + $0x1b8] sm:$0xf0]  ;;  %v10602_v39 = vpop.f32.mrf.mxu3  ;;  %v16545_v0 = vld [vmem:[#allocation22 + $0x2cc] sm:$0xf] }
 0x713   : > { %v13999_v37 = vor.u32 %v16513_v38, %v13996_v19  ;;  %v14124_v13 = vld [vmem:[#allocation22 + $0x2d8] sm:$0xf0]  ;;  %v16469_v38 = vld [vmem:[#allocation22 + $0x6c] sm:$0xf] }
 0x714   : > { %10854 = vmatpush.bf16.msrb.mxu3 %v15755_v20  ;;  %v16481_v20 = vld [vmem:[#allocation22 + $0xcc] sm:$0xf]  ;;  %v13820_v19 = vld [vmem:[#allocation22 + $0x78] sm:$0xf0] }
 0x715   : > { %10841 = vmatpush.bf16.msrb.mxu2 %v15627_v60  ;;  %v15706_v60 = vld [vmem:[#allocation22 + $0xf28] sm:$0xf]  ;;  %v14076_v39 = vld [vmem:[#allocation22 + $0x278] sm:$0xf0] }
 0x716   : > { %10817 = vmatpush.bf16.msrb.mxu0 %v15339_v48  ;;  %10830 = vmatpush.bf16.msrb.mxu1 %v15467_v17  ;;  %v13868_v48 = vld [vmem:[#allocation22 + $0xd8] sm:$0xf0]  ;;  %v15707_v14 = vor.u32 %v16943_v12, %v15706_v60  ;;  %v15690_v17 = vld [vmem:[#allocation22 + $0xf08] sm:$0xf]  ;;  %v16505_v60 = vld [vmem:[#allocation22 + $0x18c] sm:$0xf] }
 0x717   : > { %v13871_v10 = vor.u32 %v16481_v20, %v13868_v48  ;;  %v13964_v12 = vld [vmem:[#allocation22 + $0x198] sm:$0xf0]  ;;  %v16541_v48 = vld [vmem:[#allocation22 + $0x2ac] sm:$0xf] }
 0x718   : > { %10855 = vmatpush.bf16.msrb.mxu3 %v15739_v31  ;;  %v16581_v31 = vld [vmem:[#allocation22 + $0x3ec] sm:$0xf] }
 0x719   : > { %10842 = vmatpush.bf16.msrb.mxu2 %v15611_v8  ;;  %v16939_v8 = vld [vmem:[#allocation22 + $0xf14] sm:$0xf0] }
 0x71a   : > { %10818 = vmatpush.bf16.msrb.mxu0 %v15323_v52  ;;  %10831 = vmatpush.bf16.msrb.mxu1 %v15451_v41  ;;  %v10536_v52 = vadd.f32 %v20607_v32, %v10523_v1  ;;  %v10589_v40 = vpop.f32.mrf.mxu2  ;;  %v15691_v34 = vor.u32 %v16939_v8, %v15690_v17  ;;  %v16509_v41 = vld [vmem:[#allocation22 + $0x1ac] sm:$0xf]  ;;  %v14271_v32 = vor.u32 %v16581_v31, %v14268_v44 }
 0x71b   : > { %v13983_v54 = vor.u32 %v16509_v41, %v13980_v51  ;;  %v16569_v31 = vld [vmem:[#allocation22 + $0x38c] sm:$0xf] }
 0x71c   : > { %10856 = vmatpush.bf16.msrb.mxu3 %v15723_v27  ;;  %v10549_v61 = vadd.f32 %v20609_v18, %v10536_v52  ;;  %v14252_v27 = vld [vmem:[#allocation22 + $0x3d8] sm:$0xf0]  ;;  %v16573_v18 = vld [vmem:[#allocation22 + $0x3ac] sm:$0xf] }
 0x71d   : > { %10843 = vmatpush.bf16.msrb.mxu2 %v15595_v42  ;;  %v13855_v42 = vor.u32 %v16477_v47, %v13852_v46  ;;  %v14220_v47 = vld [vmem:[#allocation22 + $0x398] sm:$0xf0]  ;;  %v16465_v46 = vld [vmem:[#allocation22 + $0x4c] sm:$0xf] }
 0x71e   : > { %10819 = vmatpush.bf16.msrb.mxu0 %v15307_v24  ;;  %10832 = vmatpush.bf16.msrb.mxu1 %v15435_v63  ;;  %v16473_v24 = vld [vmem:[#allocation22 + $0x8c] sm:$0xf]  ;;  %v10562_v23 = vadd.f32 %v20615_v2, %v10549_v61  ;;  %v14255_v63 = vor.u32 %v16577_v25, %v14252_v27  ;;  %v13967_v2 = vor.u32 %v16505_v60, %v13964_v12  ;;  %v10613_v17 = vpop.f32.mrf.mxu0  ;;  %v14060_v12 = vld [vmem:[#allocation22 + $0x258] sm:$0xf0] }
 0x71f   : > { %v13839_v20 = vor.u32 %v16473_v24, %v13836_v55  ;;  %v16497_v40 = vld [vmem:[#allocation22 + $0x14c] sm:$0xf]  ;;  %v13916_v55 = vld [vmem:[#allocation22 + $0x138] sm:$0xf0] }
 0x720   : > { %10857 = vmatpush.bf16.msrb.mxu3 %v15707_v14  ;;  %v10575_v56 = vadd.f32 %v20617_v58, %v10562_v23  ;;  %v16501_v14 = vld [vmem:[#allocation22 + $0x16c] sm:$0xf]  ;;  %v10626_v44 = vpop.f32.mrf.mxu1 }
 0x721   : > { %10844 = vmatpush.bf16.msrb.mxu2 %v15579_v6  ;;  %10820 = vmatmul.bf16.vlgmr.msrb.gmra.mxu0 %v20534_v53  ;;  %v14236_v6 = vld [vmem:[#allocation22 + $0x3b8] sm:$0xf0]  ;;  %v13951_v58 = vor.u32 %v16501_v14, %v13948_v15  ;;  %v16533_v51 = vld [vmem:[#allocation22 + $0x26c] sm:$0xf] }
 0x722   : > { %10864 = vmatpush.bf16.msra.mxu0 %v13887_v29  ;;  %10877 = vmatpush.bf16.msra.mxu1 %v14015_v57  ;;  %v14127_v29 = vor.u32 %v16545_v0, %v14124_v13  ;;  %v14108_v57 = vld [vmem:[#allocation22 + $0x2b8] sm:$0xf0]  ;;  %v14239_v8 = vor.u32 %v16573_v18, %v14236_v6  ;;  %v10588_v52 = vadd.f32 %v20621_v62, %v10575_v56  ;;  %v16461_v0 = vld [vmem:[#allocation22 + $0x2c] sm:$0xf] }
 0x723   : > { %10833 = vmatmul.bf16.vlgmr.msrb.gmra.mxu1 %v20532_v4  ;;  %v14111_v1 = vor.u32 %v16541_v48, %v14108_v57  ;;  %v14204_v62 = vld [vmem:[#allocation22 + $0x378] sm:$0xf0]  ;;  %v14079_v27 = vor.u32 %v16533_v51, %v14076_v39  ;;  %v16493_v24 = vld [vmem:[#allocation22 + $0x12c] sm:$0xf] }
 0x724   : > { %10858 = vmatpush.bf16.msrb.mxu3 %v15691_v34  ;;  %v13932_v34 = vld [vmem:[#allocation22 + $0x158] sm:$0xf0]  ;;  %v16529_v60 = vld [vmem:[#allocation22 + $0x24c] sm:$0xf]  ;;  %v13919_v18 = vor.u32 %v16493_v24, %v13916_v55 }
 0x725   : > { %10845 = vmatpush.bf16.msrb.mxu2 %v15563_v49  ;;  %v14095_v49 = vor.u32 %v16537_v21, %v14092_v59  ;;  %v13788_v13 = vld [vmem:[#allocation22 + $0x38] sm:$0xf0]  ;;  %v13935_v25 = vor.u32 %v16497_v40, %v13932_v34  ;;  %v16457_v48 = vld [vmem:[#allocation22 + $0xc] sm:$0xf] }
 0x726   : > { %10865 = vmatpush.bf16.msra.mxu0 %v13871_v10  ;;  %10878 = vmatpush.bf16.msra.mxu1 %v13999_v37  ;;  %v13823_v10 = vor.u32 %v16469_v38, %v13820_v19  ;;  %v13804_v37 = vld [vmem:[#allocation22 + $0x58] sm:$0xf0]  ;;  %v16613_v6 = vld [vmem:[#allocation22 + $0x4ec] sm:$0xf] }
 0x727   : > { %10859 = vmatmul.bf16.vlgmr.msrb.gmra.mxu3 %v20540_v7  ;;  %v13807_v41 = vor.u32 %v16465_v46, %v13804_v37  ;;  %v13772_v57 = vld [vmem:[#allocation22 + $0x18] sm:$0xf0]  ;;  %v16489_v56 = vld [vmem:[#allocation22 + $0x10c] sm:$0xf] }
 0x728   : > { %10903 = vmatpush.bf16.msra.mxu3 %v14271_v32  ;;  %10846 = vmatmul.bf16.vlgmr.msrb.gmra.mxu2 %v20538_v30  ;;  %v16565_v32 = vld [vmem:[#allocation22 + $0x36c] sm:$0xf]  ;;  %v14396_v38 = vld [vmem:[#allocation22 + $0x4f8] sm:$0xf0] }
 0x729   : > { %10890 = vmatpush.bf16.msra.mxu2 %v14143_v35  ;;  %v14223_v35 = vor.u32 %v16569_v31, %v14220_v47  ;;  %v14207_v23 = vor.u32 %v16565_v32, %v14204_v62  ;;  %v16645_v14 = vld [vmem:[#allocation22 + $0x5ec] sm:$0xf]  ;;  %v14044_v59 = vld [vmem:[#allocation22 + $0x238] sm:$0xf0]  ;;  %v14399_v47 = vor.u32 %v16613_v6, %v14396_v38 }
 0x72a   : > { %10866 = vmatpush.bf16.msra.mxu0 %v13855_v42  ;;  %10879 = vmatpush.bf16.msra.mxu1 %v13983_v54  ;;  %v10601_v42 = vadd.f32 %v20623_v36, %v10588_v52  ;;  %v10615_v54 = vpop.f32.mrf.mxu0  ;;  %v14188_v36 = vld [vmem:[#allocation22 + $0x358] sm:$0xf0]  ;;  %v16525_v21 = vld [vmem:[#allocation22 + $0x22c] sm:$0xf]  ;;  %v10652_v52 = vpop.f32.mrf.mxu3 }
 0x72b   : > { %v10639_v15 = vpop.f32.mrf.mxu2  ;;  %v16557_v46 = vld [vmem:[#allocation22 + $0x32c] sm:$0xf]  ;;  %v14172_v37 = vld [vmem:[#allocation22 + $0x338] sm:$0xf0] }
 0x72c   : > { %10904 = vmatpush.bf16.msra.mxu3 %v14255_v63  ;;  %v10614_v61 = vadd.f32 %v10613_v17, %v10601_v42  ;;  %v16561_v63 = vld [vmem:[#allocation22 + $0x34c] sm:$0xf]  ;;  %v14508_v51 = vld [vmem:[#allocation22 + $0x5d8] sm:$0xf0]  ;;  %v14175_v32 = vor.u32 %v16557_v46, %v14172_v37 }
 0x72d   : > { %10891 = vmatpush.bf16.msra.mxu2 %v14127_v29  ;;  %v13791_v29 = vor.u32 %v16461_v0, %v13788_v13  ;;  %v14191_v17 = vor.u32 %v16561_v63, %v14188_v36  ;;  %v16521_v39 = vld [vmem:[#allocation22 + $0x20c] sm:$0xf]  ;;  %v14028_v42 = vld [vmem:[#allocation22 + $0x218] sm:$0xf0] }
 0x72e   : > { %10867 = vmatpush.bf16.msra.mxu0 %v13839_v20  ;;  %10880 = vmatpush.bf16.msra.mxu1 %v13967_v2  ;;  %v10628_v20 = vpop.f32.mrf.mxu1  ;;  %v10627_v19 = vadd.f32 %v10626_v44, %v10614_v61  ;;  %v14063_v2 = vor.u32 %v16529_v60, %v14060_v12  ;;  %v16553_v62 = vld [vmem:[#allocation22 + $0x30c] sm:$0xf]  ;;  %v14156_v0 = vld [vmem:[#allocation22 + $0x318] sm:$0xf0] }
 0x72f   : > { %v14652_v61 = vld [vmem:[#allocation22 + $0x6f8] sm:$0xf0]  ;;  %v16605_v55 = vld [vmem:[#allocation22 + $0x4ac] sm:$0xf]  ;;  %v14159_v12 = vor.u32 %v16553_v62, %v14156_v0 }
 0x730   : > { %10905 = vmatpush.bf16.msra.mxu3 %v14239_v8  ;;  %v13775_v8 = vor.u32 %v16457_v48, %v13772_v57  ;;  %v10640_v31 = vadd.f32 %v10639_v15, %v10627_v19  ;;  %v14780_v24 = vld [vmem:[#allocation22 + $0x7f8] sm:$0xf0]  ;;  %v16637_v20 = vld [vmem:[#allocation22 + $0x5ac] sm:$0xf] }
 0x731   : > { %10892 = vmatpush.bf16.msra.mxu2 %v14111_v1  ;;  %v13900_v1 = vld [vmem:[#allocation22 + $0x118] sm:$0xf0]  ;;  %v16673_v6 = vld [vmem:[#allocation22 + $0x6cc] sm:$0xf] }
 0x732   : > { %10868 = vmatpush.bf16.msra.mxu0 %v13823_v10  ;;  %10881 = vmatpush.bf16.msra.mxu1 %v13951_v58  ;;  %v14524_v10 = vld [vmem:[#allocation22 + $0x5f8] sm:$0xf0]  ;;  %v13903_v44 = vor.u32 %v16489_v56, %v13900_v1  ;;  %v16609_v58 = vld [vmem:[#allocation22 + $0x4cc] sm:$0xf]  ;;  %v10653_v40 = vadd.f32 %v10652_v52, %v10640_v31  ;;  %v10654_v48 = vpop.f32.mrf.mxu3 }
 0x733   : > { %v14527_v34 = vor.u32 %v16645_v14, %v14524_v10  ;;  %v14364_v54 = vld [vmem:[#allocation22 + $0x4b8] sm:$0xf0]  ;;  %v10641_v60 = vpop.f32.mrf.mxu2  ;;  %v16705_v19 = vld [vmem:[#allocation22 + $0x7cc] sm:$0xf] }
 0x734   : > { %10906 = vmatpush.bf16.msra.mxu3 %v14223_v35  ;;  %v14047_v35 = vor.u32 %v16525_v21, %v14044_v59  ;;  %17268 = vtanh.f32 %v10653_v40  ;;  %v14492_v36 = vld [vmem:[#allocation22 + $0x5b8] sm:$0xf0]  ;;  %v16601_v56 = vld [vmem:[#allocation22 + $0x48c] sm:$0xf] }
 0x735   : > { %10893 = vmatpush.bf16.msra.mxu2 %v14095_v49  ;;  %v14380_v49 = vld [vmem:[#allocation22 + $0x4d8] sm:$0xf0]  ;;  %v16669_v31 = vld [vmem:[#allocation22 + $0x6ac] sm:$0xf] }
 0x736   : > { %10869 = vmatpush.bf16.msra.mxu0 %v13807_v41  ;;  %10882 = vmatpush.bf16.msra.mxu1 %v13935_v25  ;;  %v16641_v41 = vld [vmem:[#allocation22 + $0x5cc] sm:$0xf]  ;;  %v14383_v13 = vor.u32 %v16609_v58, %v14380_v49  ;;  %v14636_v38 = vld [vmem:[#allocation22 + $0x6d8] sm:$0xf0] }
 0x737   : > { %v16677_v25 = vld [vmem:[#allocation22 + $0x6ec] sm:$0xf]  ;;  %v14348_v1 = vld [vmem:[#allocation22 + $0x498] sm:$0xf0]  ;;  %v14639_v15 = vor.u32 %v16673_v6, %v14636_v38 }
 0x738   : > { %10907 = vmatpush.bf16.msra.mxu3 %v14207_v23  ;;  %v14511_v23 = vor.u32 %v16641_v41, %v14508_v51  ;;  %v14655_v63 = vor.u32 %v16677_v25, %v14652_v61  ;;  %v14476_v10 = vld [vmem:[#allocation22 + $0x598] sm:$0xf0]  ;;  %v14351_v59 = vor.u32 %v16601_v56, %v14348_v1  ;;  %v16597_v37 = vld [vmem:[#allocation22 + $0x46c] sm:$0xf] }
 0x739   : > { %10894 = vmatpush.bf16.msra.mxu2 %v14079_v27  ;;  %v16709_v27 = vld [vmem:[#allocation22 + $0x7ec] sm:$0xf]  ;;  %v14620_v52 = vld [vmem:[#allocation22 + $0x6b8] sm:$0xf0] }
 0x73a   : > { %10870 = vmatpush.bf16.msra.mxu0 %v13791_v29  ;;  %10883 = vmatpush.bf16.msra.mxu1 %v13919_v18  ;;  %v14031_v29 = vor.u32 %v16521_v39, %v14028_v42  ;;  %v14783_v57 = vor.u32 %v16709_v27, %v14780_v24  ;;  %v14367_v18 = vor.u32 %v16605_v55, %v14364_v54  ;;  %v20638_v14 = vpop.eup %17268  ;;  %v14748_v46 = vld [vmem:[#allocation22 + $0x7b8] sm:$0xf0]  ;;  %v16629_v40 = vld [vmem:[#allocation22 + $0x56c] sm:$0xf] }
 0x73b   : > { %11077 = vst [vmem:[#allocation28 + $0x8] sm:$0xff] %v20638_v14  ;;  %v14623_v49 = vor.u32 %v16669_v31, %v14620_v52  ;;  %v16665_v39 = vld [vmem:[#allocation22 + $0x68c] sm:$0xf]  ;;  %v14732_v0 = vld [vmem:[#allocation22 + $0x798] sm:$0xf0] }
 0x73c   : > { %10908 = vmatpush.bf16.msra.mxu3 %v14191_v17  ;;  %v16697_v42 = vld [vmem:[#allocation22 + $0x78c] sm:$0xf]  ;;  %v14316_v25 = vld [vmem:[#allocation22 + $0x458] sm:$0xf0] }
 0x73d   : > { %10895 = vmatpush.bf16.msra.mxu2 %v14063_v2  ;;  %v14764_v2 = vld [vmem:[#allocation22 + $0x7d8] sm:$0xf0]  ;;  %v16625_v24 = vld [vmem:[#allocation22 + $0x54c] sm:$0xf]  ;;  %v14735_v54 = vor.u32 %v16697_v42, %v14732_v0 }
 0x73e   : > { %10871 = vmatpush.bf16.msra.mxu0 %v13775_v8  ;;  %10884 = vmatpush.bf16.msra.mxu1 %v13903_v44  ;;  %v16633_v8 = vld [vmem:[#allocation22 + $0x58c] sm:$0xf]  ;;  %v14767_v21 = vor.u32 %v16705_v19, %v14764_v2  ;;  %v14332_v44 = vld [vmem:[#allocation22 + $0x478] sm:$0xf0] }
 0x73f   : > { %v14479_v58 = vor.u32 %v16633_v8, %v14476_v10  ;;  %v14335_v51 = vor.u32 %v16597_v37, %v14332_v44  ;;  %v14444_v55 = vld [vmem:[#allocation22 + $0x558] sm:$0xf0]  ;;  %v16657_v56 = vld [vmem:[#allocation22 + $0x64c] sm:$0xf] }
 0x740   : > { %10909 = vmatpush.bf16.msra.mxu3 %v14175_v32  ;;  %v14604_v32 = vld [vmem:[#allocation22 + $0x698] sm:$0xf0]  ;;  %v10678_v62 = vpop.f32.mrf.mxu1  ;;  %v14447_v48 = vor.u32 %v16625_v24, %v14444_v55  ;;  %v16585_v8 = vld [vmem:[#allocation22 + $0x40c] sm:$0xf] }
 0x741   : > { %10896 = vmatpush.bf16.msra.mxu2 %v14047_v35  ;;  %10872 = vmatmul.bf16.vlgmr.msra.gmra.mxu0 %v20827_v26  ;;  %v14495_v26 = vor.u32 %v16637_v20, %v14492_v36  ;;  %v10665_v35 = vpop.f32.mrf.mxu0  ;;  %v14607_v27 = vor.u32 %v16665_v39, %v14604_v32  ;;  %v14588_v60 = vld [vmem:[#allocation22 + $0x678] sm:$0xf0]  ;;  %v16589_v20 = vld [vmem:[#allocation22 + $0x42c] sm:$0xf] }
 0x742   : > { %10916 = vmatpush.bf16.msrb.mxu0 %v14399_v47  ;;  %10929 = vmatpush.bf16.msrb.mxu1 %v14527_v34  ;;  %v16701_v47 = vld [vmem:[#allocation22 + $0x7ac] sm:$0xf]  ;;  %v14460_v34 = vld [vmem:[#allocation22 + $0x578] sm:$0xf0] }
 0x743   : > { %10885 = vmatmul.bf16.vlgmr.msra.gmra.mxu1 %v20828_v16  ;;  %v20641_v16 = vld [vmem:[#allocation24] sm:$0xf]  ;;  %v14751_v41 = vor.u32 %v16701_v47, %v14748_v46  ;;  %v14300_v36 = vld [vmem:[#allocation22 + $0x438] sm:$0xf0]  ;;  %v16617_v47 = vld [vmem:[#allocation22 + $0x50c] sm:$0xf] }
 0x744   : > { %10910 = vmatpush.bf16.msra.mxu3 %v14159_v12  ;;  %v7674_v17 = vperm.slane %v20641_v16, 2  ;;  %v16693_v12 = vld [vmem:[#allocation22 + $0x76c] sm:$0xf]  ;;  %v14428_v6 = vld [vmem:[#allocation22 + $0x538] sm:$0xf0]  ;;  %v14303_v2 = vor.u32 %v16589_v20, %v14300_v36 }
 0x745   : > { %10897 = vmatpush.bf16.msra.mxu2 %v14031_v29  ;;  %v16661_v29 = vld [vmem:[#allocation22 + $0x66c] sm:$0xf]  ;;  %v14572_v1 = vld [vmem:[#allocation22 + $0x658] sm:$0xf0] }
 0x746   : > { %10917 = vmatpush.bf16.msrb.mxu0 %v14383_v13  ;;  %10930 = vmatpush.bf16.msrb.mxu1 %v14511_v23  ;;  %v16593_v13 = vld [vmem:[#allocation22 + $0x44c] sm:$0xf]  ;;  %v14284_v10 = vld [vmem:[#allocation22 + $0x418] sm:$0xf0]  ;;  %v14575_v52 = vor.u32 %v16657_v56, %v14572_v1 }
 0x747   : > { %10911 = vmatmul.bf16.vlgmr.msra.gmra.mxu3 %v20249_v9  ;;  %v14463_v9 = vor.u32 %v16629_v40, %v14460_v34  ;;  %v14319_v23 = vor.u32 %v16593_v13, %v14316_v25  ;;  %v14908_v31 = vld [vmem:[#allocation22 + $0x8f8] sm:$0xf0]  ;;  %v16773_v37 = vld [vmem:[#allocation22 + $0x9ec] sm:$0xf] }
 0x748   : > { %10955 = vmatpush.bf16.msrb.mxu3 %v14783_v57  ;;  %10898 = vmatmul.bf16.vlgmr.msra.gmra.mxu2 %v20829_v45  ;;  %v10666_v45 = vadd.f32 %v10665_v35, %v7674_v17  ;;  %v14591_v57 = vor.u32 %v16661_v29, %v14588_v60  ;;  %v14700_v17 = vld [vmem:[#allocation22 + $0x758] sm:$0xf0]  ;;  %v16653_v34 = vld [vmem:[#allocation22 + $0x62c] sm:$0xf] }
 0x749   : > { %10942 = vmatpush.bf16.msrb.mxu2 %v14655_v63  ;;  %v14716_v63 = vld [vmem:[#allocation22 + $0x778] sm:$0xf0]  ;;  %v10667_v38 = vpop.f32.mrf.mxu0  ;;  %v16685_v32 = vld [vmem:[#allocation22 + $0x72c] sm:$0xf] }
 0x74a   : > { %10918 = vmatpush.bf16.msrb.mxu0 %v14367_v18  ;;  %10931 = vmatpush.bf16.msrb.mxu1 %v14495_v26  ;;  %v10679_v61 = vadd.f32 %v10678_v62, %v10666_v45  ;;  %v16621_v18 = vld [vmem:[#allocation22 + $0x52c] sm:$0xf]  ;;  %v14719_v19 = vor.u32 %v16693_v12, %v14716_v63  ;;  %v14412_v46 = vld [vmem:[#allocation22 + $0x518] sm:$0xf0] }
 0x74b   : > { %v16689_v26 = vld [vmem:[#allocation22 + $0x74c] sm:$0xf]  ;;  %v10691_v44 = vpop.f32.mrf.mxu2  ;;  %v15036_v40 = vld [vmem:[#allocation22 + $0x9f8] sm:$0xf0]  ;;  %v14415_v45 = vor.u32 %v16617_v47, %v14412_v46 }
 0x74c   : > { %10956 = vmatpush.bf16.msrb.mxu3 %v14767_v21  ;;  %v14431_v21 = vor.u32 %v16621_v18, %v14428_v6  ;;  %v14556_v35 = vld [vmem:[#allocation22 + $0x638] sm:$0xf0]  ;;  %v16737_v62 = vld [vmem:[#allocation22 + $0x8cc] sm:$0xf]  ;;  %v15039_v25 = vor.u32 %v16773_v37, %v15036_v40 }
 0x74d   : > { %10943 = vmatpush.bf16.msrb.mxu2 %v14639_v15  ;;  %v10680_v15 = vpop.f32.mrf.mxu1  ;;  %v14684_v42 = vld [vmem:[#allocation22 + $0x738] sm:$0xf0]  ;;  %v16649_v55 = vld [vmem:[#allocation22 + $0x60c] sm:$0xf] }
 0x74e   : > { %10919 = vmatpush.bf16.msrb.mxu0 %v14351_v59  ;;  %10932 = vmatpush.bf16.msrb.mxu1 %v14479_v58  ;;  %v16741_v59 = vld [vmem:[#allocation22 + $0x8ec] sm:$0xf]  ;;  %v14703_v58 = vor.u32 %v16689_v26, %v14700_v17  ;;  %v14892_v0 = vld [vmem:[#allocation22 + $0x8d8] sm:$0xf0] }
 0x74f   : > { %v14911_v39 = vor.u32 %v16741_v59, %v14908_v31  ;;  %v15020_v24 = vld [vmem:[#allocation22 + $0x9d8] sm:$0xf0]  ;;  %v14895_v60 = vor.u32 %v16737_v62, %v14892_v0  ;;  %v16805_v12 = vld [vmem:[#allocation22 + $0xaec] sm:$0xf] }
 0x750   : > { %10957 = vmatpush.bf16.msrb.mxu3 %v14751_v41  ;;  %v10692_v41 = vadd.f32 %v10691_v44, %v10679_v61  ;;  %v14540_v61 = vld [vmem:[#allocation22 + $0x618] sm:$0xf0]  ;;  %v16837_v20 = vld [vmem:[#allocation22 + $0xbec] sm:$0xf] }
 0x751   : > { %10944 = vmatpush.bf16.msrb.mxu2 %v14623_v49  ;;  %v14287_v49 = vor.u32 %v16585_v8, %v14284_v10  ;;  %v14668_v29 = vld [vmem:[#allocation22 + $0x718] sm:$0xf0]  ;;  %v14543_v6 = vor.u32 %v16649_v55, %v14540_v61  ;;  %v16765_v56 = vld [vmem:[#allocation22 + $0x9ac] sm:$0xf] }
 0x752   : > { %10920 = vmatpush.bf16.msrb.mxu0 %v14335_v51  ;;  %10933 = vmatpush.bf16.msrb.mxu1 %v14463_v9  ;;  %v10704_v51 = vpop.f32.mrf.mxu3  ;;  %v14559_v9 = vor.u32 %v16653_v34, %v14556_v35  ;;  %v15164_v63 = vld [vmem:[#allocation22 + $0xaf8] sm:$0xf0]  ;;  %v16801_v8 = vld [vmem:[#allocation22 + $0xacc] sm:$0xf] }
 0x753   : > { %v20646_v13 = vadd.f32 %v10704_v51, %v10692_v41  ;;  %v15292_v36 = vld [vmem:[#allocation22 + $0xbf8] sm:$0xf0]  ;;  %v10693_v38 = vpop.f32.mrf.mxu2  ;;  %v16729_v31 = vld [vmem:[#allocation22 + $0x88c] sm:$0xf] }
 0x754   : > { %10958 = vmatpush.bf16.msrb.mxu3 %v14735_v54  ;;  %v14687_v54 = vor.u32 %v16685_v32, %v14684_v42  ;;  %v15004_v1 = vld [vmem:[#allocation22 + $0x9b8] sm:$0xf0]  ;;  %v15295_v15 = vor.u32 %v16837_v20, %v15292_v36  ;;  %v16761_v46 = vld [vmem:[#allocation22 + $0x98c] sm:$0xf] }
 0x755   : > { %10945 = vmatpush.bf16.msrb.mxu2 %v14607_v27  ;;  %v16769_v27 = vld [vmem:[#allocation22 + $0x9cc] sm:$0xf]  ;;  %v15148_v10 = vld [vmem:[#allocation22 + $0xad8] sm:$0xf0]  ;;  %v15007_v47 = vor.u32 %v16765_v56, %v15004_v1 }
 0x756   : > { %10921 = vmatpush.bf16.msrb.mxu0 %v14319_v23  ;;  %10934 = vmatpush.bf16.msrb.mxu1 %v14447_v48  ;;  %v16681_v23 = vld [vmem:[#allocation22 + $0x70c] sm:$0xf]  ;;  %v15023_v18 = vor.u32 %v16769_v27, %v15020_v24  ;;  %v15276_v59 = vld [vmem:[#allocation22 + $0xbd8] sm:$0xf0] }
 0x757   : > { %v16733_v48 = vld [vmem:[#allocation22 + $0x8ac] sm:$0xf]  ;;  %v14988_v37 = vld [vmem:[#allocation22 + $0x998] sm:$0xf0] }
 0x758   : > { %10959 = vmatpush.bf16.msrb.mxu3 %v14719_v19  ;;  %v14671_v19 = vor.u32 %v16681_v23, %v14668_v29  ;;  %v16829_v40 = vld [vmem:[#allocation22 + $0xbac] sm:$0xf]  ;;  %v15260_v34 = vld [vmem:[#allocation22 + $0xbb8] sm:$0xf0]  ;;  %v14991_v51 = vor.u32 %v16761_v46, %v14988_v37 }
 0x759   : > { %10946 = vmatpush.bf16.msrb.mxu2 %v14591_v57  ;;  %v14876_v57 = vld [vmem:[#allocation22 + $0x8b8] sm:$0xf0]  ;;  %v16725_v35 = vld [vmem:[#allocation22 + $0x86c] sm:$0xf]  ;;  %v15263_v62 = vor.u32 %v16829_v40, %v15260_v34 }
 0x75a   : > { %10922 = vmatpush.bf16.msrb.mxu0 %v14303_v2  ;;  %10935 = vmatpush.bf16.msrb.mxu1 %v14431_v21  ;;  %v15167_v2 = vor.u32 %v16805_v12, %v15164_v63  ;;  %v10706_v26 = vpop.f32.mrf.mxu3  ;;  %v14879_v17 = vor.u32 %v16733_v48, %v14876_v57  ;;  %v16833_v21 = vld [vmem:[#allocation22 + $0xbcc] sm:$0xf]  ;;  %v14844_v41 = vld [vmem:[#allocation22 + $0x878] sm:$0xf0] }
 0x75b   : > { %v16757_v32 = vld [vmem:[#allocation22 + $0x96c] sm:$0xf]  ;;  %v14972_v42 = vld [vmem:[#allocation22 + $0x978] sm:$0xf0]  ;;  %v14847_v0 = vor.u32 %v16725_v35, %v14844_v41 }
 0x75c   : > { %10960 = vmatpush.bf16.msrb.mxu3 %v14703_v58  ;;  %v16797_v58 = vld [vmem:[#allocation22 + $0xaac] sm:$0xf]  ;;  %v15244_v24 = vld [vmem:[#allocation22 + $0xb98] sm:$0xf0] }
 0x75d   : > { %10947 = vmatpush.bf16.msrb.mxu2 %v14575_v52  ;;  %v14860_v52 = vld [vmem:[#allocation22 + $0x898] sm:$0xf0]  ;;  %v16721_v55 = vld [vmem:[#allocation22 + $0x84c] sm:$0xf] }
 0x75e   : > { %10923 = vmatpush.bf16.msrb.mxu0 %v14287_v49  ;;  %10936 = vmatpush.bf16.msrb.mxu1 %v14415_v45  ;;  %v14863_v44 = vor.u32 %v16729_v31, %v14860_v52  ;;  %v15132_v49 = vld [vmem:[#allocation22 + $0xab8] sm:$0xf0]  ;;  %v20652_v45 = vpop.f32.mrf.mxu0  ;;  %v16753_v23 = vld [vmem:[#allocation22 + $0x94c] sm:$0xf] }
 0x75f   : > { %v14956_v29 = vld [vmem:[#allocation22 + $0x958] sm:$0xf0]  ;;  %v16789_v63 = vld [vmem:[#allocation22 + $0xa6c] sm:$0xf] }
 0x760   : > { %10961 = vmatpush.bf16.msrb.mxu3 %v14687_v54  ;;  %v20654_v27 = vpop.f32.mrf.mxu1  ;;  %v14975_v54 = vor.u32 %v16757_v32, %v14972_v42  ;;  %v15100_v20 = vld [vmem:[#allocation22 + $0xa78] sm:$0xf0]  ;;  %v16821_v36 = vld [vmem:[#allocation22 + $0xb6c] sm:$0xf] }
 0x761   : > { %10948 = vmatpush.bf16.msrb.mxu2 %v14559_v9  ;;  %10924 = vmatmul.bf16.vlgmr.msrb.gmra.mxu0 %v20347_v3  ;;  %v15151_v3 = vor.u32 %v16801_v8, %v15148_v10  ;;  %v15116_v9 = vld [vmem:[#allocation22 + $0xa98] sm:$0xf0]  ;;  %v16717_v57 = vld [vmem:[#allocation22 + $0x82c] sm:$0xf]  ;;  %v15103_v38 = vor.u32 %v16789_v63, %v15100_v20 }
 0x762   : > { %10968 = vmatpush.bf16.msra.mxu0 %v14911_v39  ;;  %10981 = vmatpush.bf16.msra.mxu1 %v15039_v25  ;;  %v15135_v39 = vor.u32 %v16797_v58, %v15132_v49  ;;  %v16793_v25 = vld [vmem:[#allocation22 + $0xa8c] sm:$0xf]  ;;  %v15228_v48 = vld [vmem:[#allocation22 + $0xb78] sm:$0xf0] }
 0x763   : > { %10937 = vmatmul.bf16.vlgmr.msrb.gmra.mxu1 %v20363_v5  ;;  %v15279_v5 = vor.u32 %v16833_v21, %v15276_v59  ;;  %v15119_v61 = vor.u32 %v16793_v25, %v15116_v9  ;;  %v15231_v1 = vor.u32 %v16821_v36, %v15228_v48  ;;  %v16817_v8 = vld [vmem:[#allocation22 + $0xb4c] sm:$0xf]  ;;  %v15212_v21 = vld [vmem:[#allocation22 + $0xb58] sm:$0xf0] }
 0x764   : > { %10962 = vmatpush.bf16.msrb.mxu3 %v14671_v19  ;;  %v16749_v19 = vld [vmem:[#allocation22 + $0x92c] sm:$0xf]  ;;  %v14796_v31 = vld [vmem:[#allocation22 + $0x818] sm:$0xf0]  ;;  %v15215_v49 = vor.u32 %v16817_v8, %v15212_v21 }
 0x765   : > { %10949 = vmatpush.bf16.msrb.mxu2 %v14543_v6  ;;  %v14959_v6 = vor.u32 %v16753_v23, %v14956_v29  ;;  %v16713_v59 = vld [vmem:[#allocation22 + $0x80c] sm:$0xf]  ;;  %v15548_v34 = vld [vmem:[#allocation22 + $0xdf8] sm:$0xf0] }
 0x766   : > { %10969 = vmatpush.bf16.msra.mxu0 %v14895_v60  ;;  %10982 = vmatpush.bf16.msra.mxu1 %v15023_v18  ;;  %v14812_v18 = vld [vmem:[#allocation22 + $0x838] sm:$0xf0]  ;;  %v10719_v56 = vpop.f32.mrf.mxu0  ;;  %v16745_v37 = vld [vmem:[#allocation22 + $0x90c] sm:$0xf]  ;;  %v14799_v40 = vor.u32 %v16713_v59, %v14796_v31 }
 0x767   : > { %10963 = vmatmul.bf16.vlgmr.msrb.gmra.mxu3 %v20410_v28  ;;  %v14828_v28 = vld [vmem:[#allocation22 + $0x858] sm:$0xf0]  ;;  %v14815_v26 = vor.u32 %v16717_v57, %v14812_v18  ;;  %v16781_v35 = vld [vmem:[#allocation22 + $0xa2c] sm:$0xf] }
 0x768   : > { %11007 = vmatpush.bf16.msra.mxu3 %v15295_v15  ;;  %10950 = vmatmul.bf16.vlgmr.msrb.gmra.mxu2 %v20403_v50  ;;  %v16825_v50 = vld [vmem:[#allocation22 + $0xb8c] sm:$0xf]  ;;  %v14831_v12 = vor.u32 %v16721_v55, %v14828_v28  ;;  %v10732_v10 = vpop.f32.mrf.mxu1  ;;  %v15068_v41 = vld [vmem:[#allocation22 + $0xa38] sm:$0xf0] }
 0x769   : > { %10994 = vmatpush.bf16.msra.mxu2 %v15167_v2  ;;  %v15247_v60 = vor.u32 %v16825_v50, %v15244_v24  ;;  %v14940_v2 = vld [vmem:[#allocation22 + $0x938] sm:$0xf0]  ;;  %v16785_v15 = vld [vmem:[#allocation22 + $0xa4c] sm:$0xf]  ;;  %v15071_v50 = vor.u32 %v16781_v35, %v15068_v41 }
 0x76a   : > { %10970 = vmatpush.bf16.msra.mxu0 %v14879_v17  ;;  %10983 = vmatpush.bf16.msra.mxu1 %v15007_v47  ;;  %v15084_v17 = vld [vmem:[#allocation22 + $0xa58] sm:$0xf0]  ;;  %v14943_v52 = vor.u32 %v16749_v19, %v14940_v2  ;;  %v16869_v47 = vld [vmem:[#allocation22 + $0xcec] sm:$0xf] }
 0x76b   : > { %v15087_v46 = vor.u32 %v16785_v15, %v15084_v17  ;;  %v20656_v58 = vpop.f32.mrf.mxu2  ;;  %v16813_v32 = vld [vmem:[#allocation22 + $0xb2c] sm:$0xf]  ;;  %v15196_v42 = vld [vmem:[#allocation22 + $0xb38] sm:$0xf0] }
 0x76c   : > { %11008 = vmatpush.bf16.msra.mxu3 %v15279_v5  ;;  %v14924_v5 = vld [vmem:[#allocation22 + $0x918] sm:$0xf0]  ;;  %v16897_v24 = vld [vmem:[#allocation22 + $0xdcc] sm:$0xf] }
 0x76d   : > { %10995 = vmatpush.bf16.msra.mxu2 %v15151_v3  ;;  %v15420_v3 = vld [vmem:[#allocation22 + $0xcf8] sm:$0xf0]  ;;  %v16777_v28 = vld [vmem:[#allocation22 + $0xa0c] sm:$0xf] }
 0x76e   : > { %10971 = vmatpush.bf16.msra.mxu0 %v14863_v44  ;;  %10984 = vmatpush.bf16.msra.mxu1 %v14991_v51  ;;  %v16901_v44 = vld [vmem:[#allocation22 + $0xdec] sm:$0xf]  ;;  %v20658_v51 = vpop.f32.mrf.mxu3  ;;  %v15404_v25 = vld [vmem:[#allocation22 + $0xcd8] sm:$0xf0] }
 0x76f   : > { %v15551_v9 = vor.u32 %v16901_v44, %v15548_v34  ;;  %v15532_v55 = vld [vmem:[#allocation22 + $0xdd8] sm:$0xf0]  ;;  %v16809_v23 = vld [vmem:[#allocation22 + $0xb0c] sm:$0xf] }
 0x770   : > { %11009 = vmatpush.bf16.msra.mxu3 %v15263_v62  ;;  %v14927_v62 = vor.u32 %v16745_v37, %v14924_v5  ;;  %v15180_v29 = vld [vmem:[#allocation22 + $0xb18] sm:$0xf0]  ;;  %v16965_v20 = vld [vmem:[#allocation22 + $0xfec] sm:$0xf]  ;;  %v15535_v18 = vor.u32 %v16897_v24, %v15532_v55 }
 0x771   : > { %10996 = vmatpush.bf16.msra.mxu2 %v15135_v39  ;;  %v15423_v39 = vor.u32 %v16869_v47, %v15420_v3  ;;  %v15676_v63 = vld [vmem:[#allocation22 + $0xef8] sm:$0xf0]  ;;  %v16861_v48 = vld [vmem:[#allocation22 + $0xcac] sm:$0xf]  ;;  %v15183_v19 = vor.u32 %v16809_v23, %v15180_v29 }
 0x772   : > { %10972 = vmatpush.bf16.msra.mxu0 %v14847_v0  ;;  %10985 = vmatpush.bf16.msra.mxu1 %v14975_v54  ;;  %v16865_v0 = vld [vmem:[#allocation22 + $0xccc] sm:$0xf]  ;;  %v15199_v54 = vor.u32 %v16813_v32, %v15196_v42  ;;  %v15804_v36 = vld [vmem:[#allocation22 + $0xff8] sm:$0xf0] }
 0x773   : > { %v15388_v57 = vld [vmem:[#allocation22 + $0xcb8] sm:$0xf0]  ;;  %v16893_v56 = vld [vmem:[#allocation22 + $0xdac] sm:$0xf]  ;;  %v15807_v15 = vor.u32 %v16965_v20, %v15804_v36 }
 0x774   : > { %11010 = vmatpush.bf16.msra.mxu3 %v15247_v60  ;;  %v15407_v60 = vor.u32 %v16865_v0, %v15404_v25  ;;  %v15391_v17 = vor.u32 %v16861_v48, %v15388_v57  ;;  %v16929_v8 = vld [vmem:[#allocation22 + $0xecc] sm:$0xf]  ;;  %v15660_v10 = vld [vmem:[#allocation22 + $0xed8] sm:$0xf0] }
 0x775   : > { %10997 = vmatpush.bf16.msra.mxu2 %v15119_v61  ;;  %v15052_v61 = vld [vmem:[#allocation22 + $0xa18] sm:$0xf0]  ;;  %v16961_v21 = vld [vmem:[#allocation22 + $0xfcc] sm:$0xf] }
 0x776   : > { %10973 = vmatpush.bf16.msra.mxu0 %v14831_v12  ;;  %10986 = vmatpush.bf16.msra.mxu1 %v14959_v6  ;;  %v16933_v12 = vld [vmem:[#allocation22 + $0xeec] sm:$0xf]  ;;  %v15055_v6 = vor.u32 %v16777_v28, %v15052_v61  ;;  %v15788_v59 = vld [vmem:[#allocation22 + $0xfd8] sm:$0xf0] }
 0x777   : > { %v15679_v2 = vor.u32 %v16933_v12, %v15676_v63  ;;  %v16857_v31 = vld [vmem:[#allocation22 + $0xc8c] sm:$0xf]  ;;  %v15644_v44 = vld [vmem:[#allocation22 + $0xeb8] sm:$0xf0] }
 0x778   : > { %11011 = vmatpush.bf16.msra.mxu3 %v15231_v1  ;;  %v15516_v1 = vld [vmem:[#allocation22 + $0xdb8] sm:$0xf0]  ;;  %v16889_v3 = vld [vmem:[#allocation22 + $0xd8c] sm:$0xf] }
 0x779   : > { %10998 = vmatpush.bf16.msra.mxu2 %v15103_v38  ;;  %v10745_v38 = vpop.f32.mrf.mxu2  ;;  %v15519_v47 = vor.u32 %v16893_v56, %v15516_v1  ;;  %v16925_v5 = vld [vmem:[#allocation22 + $0xeac] sm:$0xf]  ;;  %v15356_v35 = vld [vmem:[#allocation22 + $0xc78] sm:$0xf0] }
 0x77a   : > { %10974 = vmatpush.bf16.msra.mxu0 %v14815_v26  ;;  %10987 = vmatpush.bf16.msra.mxu1 %v14943_v52  ;;  %v10758_v26 = vpop.f32.mrf.mxu3  ;;  %v15372_v52 = vld [vmem:[#allocation22 + $0xc98] sm:$0xf0]  ;;  %v16853_v34 = vld [vmem:[#allocation22 + $0xc6c] sm:$0xf] }
 0x77b   : > { %v15375_v37 = vor.u32 %v16857_v31, %v15372_v52  ;;  %v16885_v32 = vld [vmem:[#allocation22 + $0xd6c] sm:$0xf]  ;;  %v15484_v42 = vld [vmem:[#allocation22 + $0xd78] sm:$0xf0]  ;;  %v15359_v25 = vor.u32 %v16853_v34, %v15356_v35 }
 0x77c   : > { %11012 = vmatpush.bf16.msra.mxu3 %v15215_v49  ;;  %v16957_v49 = vld [vmem:[#allocation22 + $0xfac] sm:$0xf]  ;;  %v15756_v55 = vld [vmem:[#allocation22 + $0xf98] sm:$0xf0] }
 0x77d   : > { %10999 = vmatpush.bf16.msra.mxu2 %v15087_v46  ;;  %v15500_v46 = vld [vmem:[#allocation22 + $0xd98] sm:$0xf0]  ;;  %v16849_v28 = vld [vmem:[#allocation22 + $0xc4c] sm:$0xf] }
 0x77e   : > { %10975 = vmatpush.bf16.msra.mxu0 %v14799_v40  ;;  %10988 = vmatpush.bf16.msra.mxu1 %v14927_v62  ;;  %v15772_v40 = vld [vmem:[#allocation22 + $0xfb8] sm:$0xf0]  ;;  %v15503_v41 = vor.u32 %v16889_v3, %v15500_v46  ;;  %v20664_v62 = vpop.f32.mrf.mxu0  ;;  %v16881_v23 = vld [vmem:[#allocation22 + $0xd4c] sm:$0xf]  ;;  %v10718_v46 = vadd.f32 %v20652_v45, %v20646_v13 }
 0x77f   : > { %v15775_v0 = vor.u32 %v16957_v49, %v15772_v40  ;;  %v15468_v29 = vld [vmem:[#allocation22 + $0xd58] sm:$0xf0]  ;;  %v16917_v63 = vld [vmem:[#allocation22 + $0xe6c] sm:$0xf] }
 0x780   : > { %11013 = vmatpush.bf16.msra.mxu3 %v15199_v54  ;;  %v20666_v24 = vpop.f32.mrf.mxu1  ;;  %v15487_v54 = vor.u32 %v16885_v32, %v15484_v42  ;;  %v15612_v20 = vld [vmem:[#allocation22 + $0xe78] sm:$0xf0]  ;;  %v16949_v36 = vld [vmem:[#allocation22 + $0xf6c] sm:$0xf] }
 0x781   : > { %11000 = vmatpush.bf16.msra.mxu2 %v15071_v50  ;;  %10976 = vmatmul.bf16.vlgmr.msra.gmra.mxu0 %v20446_v11  ;;  %v15663_v11 = vor.u32 %v16929_v8, %v15660_v10  ;;  %v15628_v50 = vld [vmem:[#allocation22 + $0xe98] sm:$0xf0]  ;;  %v16845_v57 = vld [vmem:[#allocation22 + $0xc2c] sm:$0xf]  ;;  %v15615_v38 = vor.u32 %v16917_v63, %v15612_v20  ;;  %v16990_v63 = vld [vmem:[#allocation25 + $0xb0] sm:$0xff] }
 0x782   : > { %11020 = vmatpush.bf16.msrb.mxu0 %v15423_v39  ;;  %11033 = vmatpush.bf16.msrb.mxu1 %v15551_v9  ;;  %v15647_v39 = vor.u32 %v16925_v5, %v15644_v44  ;;  %v16921_v9 = vld [vmem:[#allocation22 + $0xe8c] sm:$0xf]  ;;  %v15740_v48 = vld [vmem:[#allocation22 + $0xf78] sm:$0xf0]  ;;  %v16972_v20 = vld [vmem:[#allocation25 + $0x20] sm:$0xff] }
 0x783   : > { %10989 = vmatmul.bf16.vlgmr.msra.gmra.mxu1 %v20448_v22  ;;  %v15791_v22 = vor.u32 %v16961_v21, %v15788_v59  ;;  %v15631_v61 = vor.u32 %v16921_v9, %v15628_v50  ;;  %v15743_v1 = vor.u32 %v16949_v36, %v15740_v48  ;;  %v16945_v8 = vld [vmem:[#allocation22 + $0xf4c] sm:$0xf]  ;;  %v15724_v21 = vld [vmem:[#allocation22 + $0xf58] sm:$0xf0]  ;;  %v16974_v9 = vld [vmem:[#allocation25 + $0x30] sm:$0xff] }
 0x784   : > { %11014 = vmatpush.bf16.msra.mxu3 %v15183_v19  ;;  %v16877_v19 = vld [vmem:[#allocation22 + $0xd2c] sm:$0xf]  ;;  %v15308_v31 = vld [vmem:[#allocation22 + $0xc18] sm:$0xf0] }
 0x785   : > { %11001 = vmatpush.bf16.msra.mxu2 %v15055_v6  ;;  %v15471_v6 = vor.u32 %v16881_v23, %v15468_v29  ;;  %v16841_v59 = vld [vmem:[#allocation22 + $0xc0c] sm:$0xf]  ;;  %v15436_v3 = vld [vmem:[#allocation22 + $0xd18] sm:$0xf0] }
 0x786   : > { %11021 = vmatpush.bf16.msrb.mxu0 %v15407_v60  ;;  %11034 = vmatpush.bf16.msrb.mxu1 %v15535_v18  ;;  %v15324_v18 = vld [vmem:[#allocation22 + $0xc38] sm:$0xf0]  ;;  %v10771_v56 = vpop.f32.mrf.mxu0  ;;  %v15311_v5 = vor.u32 %v16841_v59, %v15308_v31  ;;  %v16909_v44 = vld [vmem:[#allocation22 + $0xe2c] sm:$0xf]  ;;  %v16976_v31 = vld [vmem:[#allocation25 + $0x40] sm:$0xff] }
 0x787   : > { %11015 = vmatmul.bf16.vlgmr.msra.gmra.mxu3 %v20491_v43  ;;  %v15340_v43 = vld [vmem:[#allocation22 + $0xc58] sm:$0xf0]  ;;  %v15327_v26 = vor.u32 %v16845_v57, %v15324_v18  ;;  %v16941_v35 = vld [vmem:[#allocation22 + $0xf2c] sm:$0xf] }
 0x788   : > { %11059 = vmatpush.bf16.msrb.mxu3 %v15807_v15  ;;  %11002 = vmatmul.bf16.vlgmr.msra.gmra.mxu2 %v20489_v33  ;;  %v16953_v33 = vld [vmem:[#allocation22 + $0xf8c] sm:$0xf]  ;;  %v15343_v12 = vor.u32 %v16849_v28, %v15340_v43  ;;  %v10784_v10 = vpop.f32.mrf.mxu1  ;;  %v15580_v49 = vld [vmem:[#allocation22 + $0xe38] sm:$0xf0]  ;;  %v16982_v28 = vld [vmem:[#allocation25 + $0x70] sm:$0xff] }
 0x789   : > { %11046 = vmatpush.bf16.msrb.mxu2 %v15679_v2  ;;  %v15759_v60 = vor.u32 %v16953_v33, %v15756_v55  ;;  %v15452_v2 = vld [vmem:[#allocation22 + $0xd38] sm:$0xf0]  ;;  %v16913_v15 = vld [vmem:[#allocation22 + $0xe4c] sm:$0xf]  ;;  %v15583_v42 = vor.u32 %v16909_v44, %v15580_v49  ;;  %v16968_v10 = vld [vmem:[#allocation25] sm:$0xff] }
 0x78a   : > { %11022 = vmatpush.bf16.msrb.mxu0 %v15391_v17  ;;  %11035 = vmatpush.bf16.msrb.mxu1 %v15519_v47  ;;  %v15596_v17 = vld [vmem:[#allocation22 + $0xe58] sm:$0xf0]  ;;  %v15455_v52 = vor.u32 %v16877_v19, %v15452_v2  ;;  %v10808_v40 = vpop.f32.mrf.mxu3  ;;  %v16905_v45 = vld [vmem:[#allocation22 + $0xe0c] sm:$0xf] }
 0x78b   : > { %v15599_v47 = vor.u32 %v16913_v15, %v15596_v17  ;;  %v16975_v34 = vld [vmem:[#allocation25 + $0x38] sm:$0xff]  ;;  %v16937_v50 = vld [vmem:[#allocation22 + $0xf0c] sm:$0xf]  ;;  %v16986_v17 = vld [vmem:[#allocation25 + $0x90] sm:$0xff] }
 0x78c   : > { %11060 = vmatpush.bf16.msrb.mxu3 %v15791_v22  ;;  %v10795_v22 = vpop.f32.mrf.mxu2  ;;  %v16983_v32 = vld [vmem:[#allocation25 + $0x78] sm:$0xff]  ;;  %v16973_v29 = vld [vmem:[#allocation25 + $0x28] sm:$0xff] }
 0x78d   : > { %11047 = vmatpush.bf16.msrb.mxu2 %v15663_v11  ;;  %v16873_v11 = vld [vmem:[#allocation22 + $0xd0c] sm:$0xf]  ;;  %v15692_v33 = vld [vmem:[#allocation22 + $0xf18] sm:$0xf0] }
 0x78e   : > { %11023 = vmatpush.bf16.msrb.mxu0 %v15375_v37  ;;  %11036 = vmatpush.bf16.msrb.mxu1 %v15503_v41  ;;  %v15727_v37 = vor.u32 %v16945_v8, %v15724_v21  ;;  %v15708_v41 = vld [vmem:[#allocation22 + $0xf38] sm:$0xf0]  ;;  %v16969_v56 = vld [vmem:[#allocation25 + $0x8] sm:$0xff] }
 0x78f   : > { %v15711_v13 = vor.u32 %v16941_v35, %v15708_v41  ;;  %v16971_v48 = vld [vmem:[#allocation25 + $0x18] sm:$0xff] }
 0x790   : > { %11061 = vmatpush.bf16.msrb.mxu3 %v15775_v0  ;;  %v10731_v0 = vadd.f32 %v20654_v27, %v10718_v46  ;;  %v15695_v27 = vor.u32 %v16937_v50, %v15692_v33  ;;  %v16979_v18 = vld [vmem:[#allocation25 + $0x58] sm:$0xff]  ;;  %v11081_v46 = vpack.c.bf16 %v20638_v14, %v20638_v14 }
 0x791   : > { %11048 = vmatpush.bf16.msrb.mxu2 %v15647_v39  ;;  %v15439_v39 = vor.u32 %v16873_v11, %v15436_v3  ;;  %v16987_v2 = vld [vmem:[#allocation25 + $0x98] sm:$0xff]  ;;  %v17284_v11 = vld [vmem:[#allocation28] sm:$0xff] }
 0x792   : > { %11024 = vmatpush.bf16.msrb.mxu0 %v15359_v25  ;;  %11037 = vmatpush.bf16.msrb.mxu1 %v15487_v54  ;;  %v15564_v25 = vld [vmem:[#allocation22 + $0xe18] sm:$0xf0]  ;;  %v10744_v55 = vadd.f32 %v20656_v58, %v10731_v0  ;;  %v10810_v23 = vpop.f32.mrf.mxu3  ;;  %v16981_v58 = vld [vmem:[#allocation25 + $0x68] sm:$0xff]  ;;  %v11080_v3 = vpack.c.bf16 %v17284_v11, %v17284_v11 }
 0x793   : > { %v15567_v43 = vor.u32 %v16905_v45, %v15564_v25 }
 0x794   : > { %11062 = vmatpush.bf16.msrb.mxu3 %v15759_v60  ;;  %v10797_v54 = vpop.f32.mrf.mxu2  ;;  %v10757_v60 = vadd.f32 %v20658_v51, %v10744_v55  ;;  %v16989_v51 = vld [vmem:[#allocation25 + $0xa8] sm:$0xff] }
 0x795   : > { %11049 = vmatpush.bf16.msrb.mxu2 %v15631_v61  ;;  %v16991_v61 = vld [vmem:[#allocation25 + $0xb8] sm:$0xff] }
 0x796   : > { %11025 = vmatpush.bf16.msrb.mxu0 %v15343_v12  ;;  %11038 = vmatpush.bf16.msrb.mxu1 %v15471_v6  ;;  %v10770_v12 = vadd.f32 %v20664_v62, %v10757_v60  ;;  %v16988_v6 = vld [vmem:[#allocation25 + $0xa0] sm:$0xff]  ;;  %v16997_v60 = vld [vmem:[#allocation25 + $0xe8] sm:$0xff] }
 0x798   : > { %11063 = vmatpush.bf16.msrb.mxu3 %v15743_v1 }
 0x799   : > { %11050 = vmatpush.bf16.msrb.mxu2 %v15615_v38  ;;  %v16970_v38 = vld [vmem:[#allocation25 + $0x10] sm:$0xff] }
 0x79a   : > { %11026 = vmatpush.bf16.msrb.mxu0 %v15327_v26  ;;  %11039 = vmatpush.bf16.msrb.mxu1 %v15455_v52  ;;  %v16977_v26 = vld [vmem:[#allocation25 + $0x48] sm:$0xff] }
 0x79c   : > { %11064 = vmatpush.bf16.msrb.mxu3 %v15727_v37 }
 0x79d   : > { %11051 = vmatpush.bf16.msrb.mxu2 %v15599_v47  ;;  %v16985_v47 = vld [vmem:[#allocation25 + $0x88] sm:$0xff] }
 0x79e   : > { %11027 = vmatpush.bf16.msrb.mxu0 %v15311_v5  ;;  %11040 = vmatpush.bf16.msrb.mxu1 %v15439_v39  ;;  %v10821_v36 = vpop.f32.mrf.mxu0 }
 0x7a0   : > { %11065 = vmatpush.bf16.msrb.mxu3 %v15711_v13  ;;  %v10834_v62 = vpop.f32.mrf.mxu1 }
 0x7a1   : > { %11052 = vmatpush.bf16.msrb.mxu2 %v15583_v42  ;;  %11028 = vmatmul.bf16.vlgmr.msrb.gmra.mxu0 %v20534_v53  ;;  %v10783_v53 = vadd.f32 %v20666_v24, %v10770_v12  ;;  %v16996_v12 = vld [vmem:[#allocation25 + $0xe0] sm:$0xff] }
 0x7a2   : > { %11344 = vmatpush.bf16.msra.mxu0 %v16975_v34  ;;  %11357 = vmatpush.bf16.msra.mxu1 %v16983_v32 }
 0x7a3   : > { %11041 = vmatmul.bf16.vlgmr.msrb.gmra.mxu1 %v20532_v4  ;;  %v16980_v4 = vld [vmem:[#allocation25 + $0x60] sm:$0xff]  ;;  %v10796_v57 = vadd.f32 %v10795_v22, %v10783_v53 }
 0x7a4   : > { %11066 = vmatpush.bf16.msrb.mxu3 %v15695_v27  ;;  %v16984_v22 = vld [vmem:[#allocation25 + $0x80] sm:$0xff]  ;;  %v16999_v27 = vld [vmem:[#allocation25 + $0xf8] sm:$0xff] }
 0x7a5   : > { %11053 = vmatpush.bf16.msrb.mxu2 %v15567_v43 }
 0x7a6   : > { %11345 = vmatpush.bf16.msra.mxu0 %v16974_v9  ;;  %11358 = vmatpush.bf16.msra.mxu1 %v16982_v28  ;;  %v10823_v24 = vpop.f32.mrf.mxu0 }
 0x7a7   : > { %11067 = vmatmul.bf16.vlgmr.msrb.gmra.mxu3 %v20540_v7  ;;  %v16978_v7 = vld [vmem:[#allocation25 + $0x50] sm:$0xff] }
 0x7a8   : > { %11054 = vmatmul.bf16.vlgmr.msrb.gmra.mxu2 %v20538_v30  ;;  %v10809_v30 = vadd.f32 %v10808_v40, %v10796_v57  ;;  %v10836_v1 = vpop.f32.mrf.mxu1  ;;  %v7675_v40 = vperm.slane %v20641_v16, 3  ;;  %11383 = vmatpush.bf16.msra.mxu3 %v16999_v27 }
 0x7a9   : > { %11370 = vmatpush.bf16.msra.mxu2 %v16991_v61  ;;  %v16998_v61 = vld [vmem:[#allocation25 + $0xf0] sm:$0xff] }
 0x7aa   : > { %11346 = vmatpush.bf16.msra.mxu0 %v16973_v29  ;;  %11359 = vmatpush.bf16.msra.mxu1 %v16981_v58  ;;  %v10822_v19 = vadd.f32 %v10821_v36, %v10809_v30  ;;  %v10860_v59 = vpop.f32.mrf.mxu3  ;;  %v16993_v30 = vld [vmem:[#allocation25 + $0xc8] sm:$0xff] }
 0x7ab   : > { %v10847_v8 = vpop.f32.mrf.mxu2 }
 0x7ac   : > { %v10835_v15 = vadd.f32 %v10834_v62, %v10822_v19  ;;  %11384 = vmatpush.bf16.msra.mxu3 %v16998_v61  ;;  %v16992_v19 = vld [vmem:[#allocation25 + $0xc0] sm:$0xff] }
 0x7ad   : > { %11371 = vmatpush.bf16.msra.mxu2 %v16990_v63  ;;  %v16995_v63 = vld [vmem:[#allocation25 + $0xd8] sm:$0xff] }
 0x7ae   : > { %11347 = vmatpush.bf16.msra.mxu0 %v16972_v20  ;;  %11360 = vmatpush.bf16.msra.mxu1 %v16980_v4  ;;  %v10848_v21 = vadd.f32 %v10847_v8, %v10835_v15 }
 0x7b0   : > { %v10861_v52 = vadd.f32 %v10860_v59, %v10848_v21  ;;  %11385 = vmatpush.bf16.msra.mxu3 %v16997_v60 }
 0x7b1   : > { %11372 = vmatpush.bf16.msra.mxu2 %v16989_v51 }
 0x7b2   : > { %11348 = vmatpush.bf16.msra.mxu0 %v16971_v48  ;;  %11361 = vmatpush.bf16.msra.mxu1 %v16979_v18  ;;  %17270 = vtanh.f32 %v10861_v52  ;;  %v10862_v5 = vpop.f32.mrf.mxu3 }
 0x7b3   : > { %v10849_v37 = vpop.f32.mrf.mxu2 }
 0x7b4   : > { %11386 = vmatpush.bf16.msra.mxu3 %v16996_v12 }
 0x7b5   : > { %11373 = vmatpush.bf16.msra.mxu2 %v16988_v6  ;;  %v16994_v6 = vld [vmem:[#allocation25 + $0xd0] sm:$0xff] }
 0x7b6   : > { %11349 = vmatpush.bf16.msra.mxu0 %v16970_v38  ;;  %11362 = vmatpush.bf16.msra.mxu1 %v16978_v7 }
 0x7b8   : > { %v17271_v44 = vpop.eup %17270  ;;  %11387 = vmatpush.bf16.msra.mxu3 %v16995_v63 }
 0x7b9   : > { %11374 = vmatpush.bf16.msra.mxu2 %v16987_v2  ;;  %11078 = vst [vmem:[#allocation28 + $0x10] sm:$0xff] %v17271_v44  ;;  %v11082_v49 = vpack.c.bf16 %v17271_v44, %v17271_v44 }
 0x7ba   : > { %11350 = vmatpush.bf16.msra.mxu0 %v16969_v56  ;;  %11363 = vmatpush.bf16.msra.mxu1 %v16977_v26 }
 0x7bc   : > { %11388 = vmatpush.bf16.msra.mxu3 %v16994_v6 }
 0x7bd   : > { %11375 = vmatpush.bf16.msra.mxu2 %v16986_v17 }
 0x7be   : > { %11351 = vmatpush.bf16.msra.mxu0 %v16968_v10  ;;  %11364 = vmatpush.bf16.msra.mxu1 %v16976_v31  ;;  %v10873_v34 = vpop.f32.mrf.mxu0 }
 0x7bf   : > { %v10874_v35 = vadd.f32 %v10873_v34, %v7675_v40 }
 0x7c0   : > { %v10886_v41 = vpop.f32.mrf.mxu1  ;;  %11389 = vmatpush.bf16.msra.mxu3 %v16993_v30 }
 0x7c1   : > { %11376 = vmatpush.bf16.msra.mxu2 %v16985_v47  ;;  %11352 = vmatmul.bf16.vlgmr.msra.gmra.mxu0 %v11080_v3  ;;  %v10887_v39 = vadd.f32 %v10886_v41, %v10874_v35 }
 0x7c2   : > { %11365 = vmatmul.bf16.vlgmr.msra.gmra.mxu1 %v11081_v46 }
 0x7c4   : > { %11390 = vmatpush.bf16.msra.mxu3 %v16992_v19 }
 0x7c5   : > { %11377 = vmatpush.bf16.msra.mxu2 %v16984_v22  ;;  %v17231_v22 = vld [vmem:[#allocation27] ss:$0 sm:$0xff] }
 0x7c6   : > { %v10875_v32 = vpop.f32.mrf.mxu0 }
 0x7c8   : > { %11378 = vmatmul.bf16.vlgmr.msra.gmra.mxu2 %v11082_v49  ;;  %v10888_v42 = vpop.f32.mrf.mxu1 }
 0x7ca   : > { %v10912_v13 = vpop.f32.mrf.mxu3 }
 0x7cb   : > { %v10899_v14 = vpop.f32.mrf.mxu2 }
 0x7cc   : > { %v10900_v0 = vadd.f32 %v10899_v14, %v10887_v39 }
 0x7ce   : > { %v10913_v45 = vadd.f32 %v10912_v13, %v10900_v0 }
 0x7d2   : > { %v10914_v9 = vpop.f32.mrf.mxu3 }
 0x7d3   : > { %v10901_v25 = vpop.f32.mrf.mxu2  ;;  %v11396_v9 = vlaneseq }
 0x7de   : > { %v10925_v50 = vpop.f32.mrf.mxu0 }
 0x7df   : > { %v10926_v53 = vadd.f32 %v10925_v50, %v10913_v45 }
 0x7e0   : > { %v10938_v33 = vpop.f32.mrf.mxu1 }
 0x7e1   : > { %v10939_v48 = vadd.f32 %v10938_v33, %v10926_v53 }
 0x7e6   : > { %v10927_v55 = vpop.f32.mrf.mxu0 }
 0x7e7   : > { %v11397_v55 = vand.u32 127, %v11396_v9 }
 0x7e8   : > { %v10940_v28 = vpop.f32.mrf.mxu1 }
 0x7e9   : > { %vm11398_vm7 = vcmp.lt.s32.totalorder %v11397_v55, 32 }
 0x7ea   : > { %v10964_v54 = vpop.f32.mrf.mxu3 }
 0x7eb   : > { %v10951_v43 = vpop.f32.mrf.mxu2 }
 0x7ec   : > { %v10952_v57 = vadd.f32 %v10951_v43, %v10939_v48 }
 0x7ee   : > { %v10965_v38 = vadd.f32 %v10964_v54, %v10952_v57 }
 0x7f2   : > { %v10966_v23 = vpop.f32.mrf.mxu3 }
 0x7f3   : > { %v10953_v16 = vpop.f32.mrf.mxu2 }
 0x7fe   : > { %v10977_v29 = vpop.f32.mrf.mxu0 }
 0x7ff   : > { %v10978_v7 = vadd.f32 %v10977_v29, %v10965_v38 }
 0x800   : > { %v10990_v58 = vpop.f32.mrf.mxu1 }
 0x801   : > { %v10991_v2 = vadd.f32 %v10990_v58, %v10978_v7 }
 0x806   : > { %v10979_v20 = vpop.f32.mrf.mxu0 }
 0x808   : > { %v10992_v4 = vpop.f32.mrf.mxu1 }
 0x80a   : > { %v11016_v36 = vpop.f32.mrf.mxu3 }
 0x80b   : > { %v11003_v51 = vpop.f32.mrf.mxu2 }
 0x80c   : > { %v11004_v56 = vadd.f32 %v11003_v51, %v10991_v2 }
 0x80e   : > { %v11017_v26 = vadd.f32 %v11016_v36, %v11004_v56 }
 0x812   : > { %v11018_v18 = vpop.f32.mrf.mxu3 }
 0x813   : > { %v11005_v62 = vpop.f32.mrf.mxu2 }
 0x81e   : > { %v11029_v24 = vpop.f32.mrf.mxu0 }
 0x81f   : > { %v11030_v15 = vadd.f32 %v11029_v24, %v11017_v26 }
 0x820   : > { %v11042_v1 = vpop.f32.mrf.mxu1 }
 0x821   : > { %v11043_v10 = vadd.f32 %v11042_v1, %v11030_v15 }
 0x826   : > { %v11031_v17 = vpop.f32.mrf.mxu0 }
 0x828   : > { %v11044_v8 = vpop.f32.mrf.mxu1 }
 0x82a   : > { %v11068_v31 = vpop.f32.mrf.mxu3 }
 0x82b   : > { %v11055_v21 = vpop.f32.mrf.mxu2 }
 0x82c   : > { %v11056_v59 = vadd.f32 %v11055_v21, %v11043_v10 }
 0x82e   : > { %v11069_v52 = vadd.f32 %v11068_v31, %v11056_v59 }
 0x830   : > { %17272 = vtanh.f32 %v11069_v52 }
 0x832   : > { %v11070_v11 = vpop.f32.mrf.mxu3 }
 0x833   : > { %v11057_v47 = vpop.f32.mrf.mxu2 }
 0x836   : > { %v17273_v3 = vpop.eup %17272 }
 0x837   : > { %11079 = vst [vmem:[#allocation28 + $0x18] sm:$0xff] %v17273_v3  ;;  %v11083_v46 = vpack.c.bf16 %v17273_v3, %v17273_v3 }
 0x839   : > { %11391 = vmatmul.bf16.vlgmr.msra.gmra.mxu3 %v11083_v46 }
 0x83e   : > { %v11353_v37 = vpop.f32.mrf.mxu0 }
 0x83f   : > { %v11354_v5 = vadd.f32 %v17231_v22, %v11353_v37  ;;  %v11366_v44 = vpop.f32.mrf.mxu1 }
 0x841   : > { %v11367_v49 = vadd.f32 %v11366_v44, %v11354_v5 }
 0x846   : > { %v11355_v40 = vpop.f32.mrf.mxu0 }
 0x847   : > { %v11368_v34 = vpop.f32.mrf.mxu1 }
 0x84b   : > { %v11379_v35 = vpop.f32.mrf.mxu2 }
 0x84c   : > { %v11380_v41 = vadd.f32 %v11379_v35, %v11367_v49 }
 0x853   : > { %v11381_v39 = vpop.f32.mrf.mxu2 }
 0x8bc   : > { %v11392_v32 = vpop.f32.mrf.mxu3 }
 0x8bd   : > { %v11393_v42 = vadd.f32 %v11392_v32, %v11380_v41 }
 0x8bf   : > { %v15936_v14 = vmul.f32 -1.442695, %v11393_v42 }
 0x8c1   : > { %17274 = vpow2.f32 %v15936_v14 }
 0x8c4   : > { %v11394_v0 = vpop.f32.mrf.mxu3 }
 0x8c7   : > { %v17275_v13 = vpop.eup %17274 }
 0x8c8   : > { %v11403_v45 = vadd.f32 1.0, %v17275_v13 }
 0x8ca   : > { %17276 = vrcp.f32 %v11403_v45  ;;  %v11415_v28 = vand.u32 2147483648, %v11403_v45  ;;  %v11413_v54 = vand.u32 2147483647, %v11403_v45  ;;  %vm11409_vm6 = vweird.f32 %v11403_v45 }
 0x8cb   : > { %17278 = vtanh.f32 %v11393_v42 }
 0x8cc   : > { %v11416_v16 = vor.u32 1.1754944e-38, %v11415_v28  ;;  %vm11414_vm9 = vcmp.eq.f32.partialorder %v11413_v54, 8.507059e+37 }
 0x8d0   : > { %v17277_v25 = vpop.eup %17276 }
 0x8d1   : > { %v11405_v50 = vmul.f32 %v17277_v25, %v11403_v45  ;;  %vm11410_vm5 = vweird.f32 %v17277_v25  ;;  %v17279_v23 = vpop.eup %17278 }
 0x8d2   : > { %vm11411_vm8 = vmor %vm11409_vm6, %vm11410_vm5 }
 0x8d3   : > { %v11406_v33 = vsub.f32 1.0, %v11405_v50 }
 0x8d5   : > { %v11407_v43 = vmul.f32 %v17277_v25, %v11406_v33 }
 0x8d7   : > { %v11408_v27 = vadd.f32 %v17277_v25, %v11407_v43 }
 0x8d9   : > { %v11412_v61 = vsel %vm11411_vm8, %v17277_v25, %v11408_v27 }
 0x8da   : > { %v11417_v29 = vsel %vm11414_vm9, %v11416_v16, %v11412_v61 }
 0x8db   : > { %v11419_v60 = vsel %vm11398_vm7, %v17279_v23, %v11417_v29 }
 0x8dc   : > { %11420 = vst [vmem:[%s20830_s30] sm:$0xff] %v11419_v60 }
 0x8dd PF: > { %s20831_s28 = sld [smem:[#allocation39_spill]]  ;;  %s17859_s24 = smov [#allocation28]  }
 0x8de   : > { %s11427_s20 = sshll.u32 %s17859_s24, 4  ;;  %s20832_s29 = sld [smem:[#allocation56_spill]]  ;;  %s11428_s20 = int_to_ptr.vmem [resolvable:$true] %s11427_s20 }
 0x8e3   : > { %p17138_p3 = scmp.eq.s32.totalorder %s20831_s28, 3 }
 0x8e4   : > { %s11429_s26 = sshll.u32 %s20832_s29, 4  ;;  %s11430_s26 = int_to_ptr.hbm [resolvable:$true] %s11429_s26 }
 0x8e5   : > { %17059 = dma.vmem_to_hbm [thread:$0]  (%p17138_p3), %s11428_s20, 512, %s11430_s26, [#allocation6]  }
 0x8e6   : > { %17816 = dma.done.wait (%p17138_p3), [#allocation6], 512  }
 0x8e7   : > { %17818 = vsyncadd (%p17138_p3), [#allocation6], 4294966784 }
 0x8e8 PF: > { %p35_p4 = scmp.ge.s32.totalorder %s18057_s0, 6   ;;  %s20833_s21 = smov %s17825_s22 }
 0x8e9   : > { %s20834_s22 = smov %s17829_s23  ;;  %s20835_s23 = smov %s18069_s7 }
 0x8ea   : > { %s20836_s24 = smov %s18057_s0  ;;  %37 = sbr.rel (!%p35_p4) target bundleno = 19 (0x13), region = 194 }
 0x8ef   :  { %11449 = vsyncpa [#allocation5], 1 }
 0x8f0   :  { %11451 = vsyncpa [#allocation5 + $0x1], 1 }
 0x8f1   :  { %11452 = vsyncpa [#allocation8], 1 }
 0x8f2   :  { %11453 = vsyncpa [#allocation11], 1 }
 0x8f3   :  { %11454 = vsyncpa [#allocation14], 1 }
 0x8f4   :  { %11455 = vsyncpa [#allocation17], 1 }
 0x8f5   :  { %11457 = vsyncpa [#allocation17 + $0x1], 1 }
 0x8f6   :  { %11458 = vsyncpa [#allocation20], 1 }
 0x8f7   :  { %11459 = vsyncpa [#allocation23], 1 }
 0x8f8   :  { %11460 = vsyncpa [#allocation26], 1 }
 0x8f9   :  { %11461 = vsyncpa [#allocation6], 1 }
 0x8fa   :  { %11463 = vsyncpa [#allocation6 + $0x1], 1 }

</bundles_post_ra>
